<compile_context>
chip_gen: v7x
topology: tpu7x:2x2x1
jax: 0.10.0
libtpu: 0.0.40
codegen_flags: <defaults>
</compile_context>

<pallas_src>
import functools

import jax
import jax.numpy as jnp
from jax.experimental import pallas as pl
from jax.experimental.pallas import tpu as pltpu


_LANE = 128
_VMEM_LIMIT = 48 * 1024 * 1024   # safe on v7x (64 MiB/TC); working sets are <~8 MiB

# bf16 MXU inputs on all TPU generations (f32 accumulation).  Flip to False for
# f32-everywhere numerics.
USE_BF16_MATMUL = True
COMPUTE_DTYPE = jnp.bfloat16 if USE_BF16_MATMUL else jnp.float32


def _round_up(x, m):
    return (x + m - 1) // m * m


def _num_images_per_step(batch):
    # >= 2 grid steps whenever batch >= 2 (so both v7x TensorCores get work),
    # up to 8 images per step at larger batch to amortize per-step overhead.
    return max(1, min(8, batch // 2))


# --------------------------------------------------------------------------
# Pallas kernels
# --------------------------------------------------------------------------

def _conv_taps_kernel(x_ref, w_ref, b_ref, o_ref, *, nb, offsets, m_out):
    """Stride-1 conv as a sum of shifted matmuls over a flattened image.

    x_ref: (nb, P_in, C_in)   per-image rows ordered (h*W_store + w), zero tail
    w_ref: (T,  C_in, C_out)  one (C_in, C_out) weight slab per tap
    b_ref: (1,  C_out)        f32 bias row
    o_ref: (nb, m_out, C_out) output rows ordered (oh*W_store + ow)
    """
    bias = b_ref[...]
    for img in range(nb):
        acc = None
        for t, off in enumerate(offsets):
            lhs = x_ref[img, pl.ds(off, m_out), :]
            part = jnp.dot(lhs, w_ref[t], preferred_element_type=jnp.float32)
            acc = part if acc is None else acc + part
        o_ref[img] = jnp.maximum(acc + bias, 0.0).astype(o_ref.dtype)


def _fc1_dueling_kernel(x_ref, w1_ref, b1_ref, wh_ref, bh_ref, o_ref, *, num_actions):
    """Fused fc1 (single K tile) + dueling head.

    Head weight layout: cols [0, A) = advantage, col A = value, cols > A unused.
    The advantage mean is computed with an explicit lane mask (not by trusting
    zero padding), so stale values in the padded columns cannot corrupt it.
    """
    h = jnp.dot(x_ref[...], w1_ref[...], preferred_element_type=jnp.float32)
    h = jnp.maximum(h + b1_ref[...], 0.0)
    out = jnp.dot(h.astype(wh_ref.dtype), wh_ref[...],
                  preferred_element_type=jnp.float32) + bh_ref[...]
    value = out[:, num_actions:num_actions + 1]                       # (tm, 1)
    lane = jax.lax.broadcasted_iota(jnp.int32, out.shape, 1)
    adv_sum = jnp.sum(jnp.where(lane < num_actions, out, 0.0),
                      axis=1, keepdims=True)
    # q[:, j] = value + adv_j - mean(adv) for j < A; columns >= A are garbage
    # and are sliced off in the wrapper.  Full 128-lane dense store.
    o_ref[...] = out + value - adv_sum * (1.0 / num_actions)


# --------------------------------------------------------------------------
# pallas_call wrappers
# --------------------------------------------------------------------------

def pallas_conv_taps(x, w, b, *, offsets, m_out):
    """x: (B, P_in, C_in); w: (T, C_in, C_out); b: (1, C_out) -> (B, m_out, C_out)."""
    B, P_in, C_in = x.shape
    T, _, C_out = w.shape
    nb = _num_images_per_step(B)
    kernel = functools.partial(_conv_taps_kernel, nb=nb,
                               offsets=tuple(offsets), m_out=m_out)
    act_bytes = x.dtype.itemsize
    return pl.pallas_call(
        kernel,
        out_shape=jax.ShapeDtypeStruct((B, m_out, C_out), x.dtype),
        grid=(pl.cdiv(B, nb),),
        in_specs=[pl.BlockSpec((nb, P_in, C_in), lambda i: (i, 0, 0)),
                  pl.BlockSpec((T, C_in, C_out), lambda i: (0, 0, 0)),
                  pl.BlockSpec((1, C_out), lambda i: (0, 0))],
        out_specs=pl.BlockSpec((nb, m_out, C_out), lambda i: (i, 0, 0)),
        compiler_params=pltpu.CompilerParams(
            dimension_semantics=("parallel",),
            vmem_limit_bytes=_VMEM_LIMIT),
        cost_estimate=pl.CostEstimate(
            flops=2 * B * m_out * T * C_in * C_out,
            transcendentals=0,
            bytes_accessed=int(B * (P_in * C_in + m_out * C_out) * act_bytes
                               + (T * C_in * C_out + C_out) * w.dtype.itemsize)),
    )(x, w, b)


def pallas_fc1_dueling(x, w1, b1, wh, bh, num_actions):
    """Fused fc1 (single K tile, bias+ReLU) + dueling head; returns (B, A) f32."""
    M, K = x.shape
    H = w1.shape[1]
    NH = wh.shape[1]
    if M < 8:
        tile_m = M                                  # full-dim block (legal)
    else:
        tile_m = min(512, max(8, _round_up(pl.cdiv(M, 2), 8)))
    kernel = functools.partial(_fc1_dueling_kernel, num_actions=num_actions)
    out = pl.pallas_call(
        kernel,
        out_shape=jax.ShapeDtypeStruct((M, NH), jnp.float32),
        grid=(pl.cdiv(M, tile_m),),
        in_specs=[pl.BlockSpec((tile_m, K), lambda i: (i, 0)),
                  pl.BlockSpec((K, H), lambda i: (0, 0)),
                  pl.BlockSpec((1, H), lambda i: (0, 0)),
                  pl.BlockSpec((H, NH), lambda i: (0, 0)),
                  pl.BlockSpec((1, NH), lambda i: (0, 0))],
        out_specs=pl.BlockSpec((tile_m, NH), lambda i: (i, 0)),
        compiler_params=pltpu.CompilerParams(
            dimension_semantics=("parallel",),
            vmem_limit_bytes=_VMEM_LIMIT),
        cost_estimate=pl.CostEstimate(
            flops=2 * M * K * H + 2 * M * H * NH,
            transcendentals=0,
            bytes_accessed=int(M * K * x.dtype.itemsize
                               + (K * H + H * NH + H + NH) * w1.dtype.itemsize
                               + M * NH * 4)),
    )(x, w1, b1, wh, bh)
    return out[:, :num_actions]


# --------------------------------------------------------------------------
# Parameters (PyTorch layout) and one-time kernel-friendly re-layout
# --------------------------------------------------------------------------

def init_params(key, action_space):
    """PyTorch-layout parameters (Linear weights stored transposed as (in, out))."""
    def u(k, shape, fan_in):
        bound = 1.0 / jnp.sqrt(jnp.float32(fan_in))
        return jax.random.uniform(k, shape, jnp.float32, -bound, bound)

    ks = jax.random.split(key, 12)
    return {
        "conv1_w": u(ks[0], (32, 4, 8, 8), 4 * 8 * 8),
        "conv1_b": u(ks[1], (32,), 4 * 8 * 8),
        "conv2_w": u(ks[2], (64, 32, 4, 4), 32 * 4 * 4),
        "conv2_b": u(ks[3], (64,), 32 * 4 * 4),
        "conv3_w": u(ks[4], (64, 64, 3, 3), 64 * 3 * 3),
        "conv3_b": u(ks[5], (64,), 64 * 3 * 3),
        "fc1_w": u(ks[6], (3136, 512), 3136),      # (in, out) = torch W.T
        "fc1_b": u(ks[7], (512,), 3136),
        "value_w": u(ks[8], (512, 1), 512),        # (in, out) = torch W.T
        "value_b": u(ks[9], (1,), 512),
        "adv_w": u(ks[10], (512, action_space), 512),
        "adv_b": u(ks[11], (action_space,), 512),
    }


def prepare_params(params, action_space, dtype=COMPUTE_DTYPE):
    """One-time re-layout into kernel form (space-to-depth taps, channels-last).

    (If importing real PyTorch weights: conv weights are (O, I, KH, KW) as-is;
    Linear weights must be transposed to (in, out) first, as init_params does.)
    """
    # conv1: 8x8 stride-4 -> 2x2 stride-1 on the 4x4 space-to-depth input.
    # Tap order t = i*2 + j, channel order dh*16 + dw*4 + c.
    w1c = params["conv1_w"].reshape(32, 4, 2, 4, 2, 4)       # (o, c, i, dh, j, dw)
    w1c = jnp.transpose(w1c, (2, 4, 3, 5, 1, 0)).reshape(4, 64, 32)
    b1c = params["conv1_b"].reshape(1, 32)

    # conv2: 4x4 stride-2 -> 2x2 stride-1 on the 2x2 space-to-depth activation.
    # Tap order t = i*2 + j, channel order dh*64 + dw*32 + c.
    w2c = params["conv2_w"].reshape(64, 32, 2, 2, 2, 2)      # (o, c, i, dh, j, dw)
    w2c = jnp.transpose(w2c, (2, 4, 3, 5, 1, 0)).reshape(4, 128, 64)
    b2c = params["conv2_b"].reshape(1, 64)

    # conv3: already stride 1; taps ordered t = kh*3 + kw, channels as-is.
    w3c = jnp.transpose(params["conv3_w"], (2, 3, 1, 0)).reshape(9, 64, 64)
    b3c = params["conv3_b"].reshape(1, 64)

    # fc1: rows re-ordered from torch's (c, h, w) flatten to our (h, w, c) flatten.
    w1 = params["fc1_w"].reshape(64, 7, 7, 512)
    w1 = jnp.transpose(w1, (1, 2, 0, 3)).reshape(3136, 512)
    b1 = params["fc1_b"].reshape(1, 512)

    # Fused dueling head: cols [0, A) = advantage, col A = value, rest unused
    # (kernel masks by lane index, so the padded columns' contents don't matter).
    a = action_space
    wh = jnp.concatenate([params["adv_w"], params["value_w"]], axis=1)   # (512, A+1)
    wh = jnp.pad(wh, ((0, 0), (0, _LANE - (a + 1))))
    bh = jnp.concatenate([params["adv_b"], params["value_b"]])
    bh = jnp.pad(bh, (0, _LANE - (a + 1))).reshape(1, _LANE)

    f32 = jnp.float32
    return {
        "conv1_w": w1c.astype(dtype), "conv1_b": b1c.astype(f32),
        "conv2_w": w2c.astype(dtype), "conv2_b": b2c.astype(f32),
        "conv3_w": w3c.astype(dtype), "conv3_b": b3c.astype(f32),
        "fc1_w": w1.astype(dtype), "fc1_b": b1.astype(f32),
        "head_w": wh.astype(dtype), "head_b": bh.astype(f32),
    }


# --------------------------------------------------------------------------
# Forward pass
# --------------------------------------------------------------------------

@functools.partial(jax.jit, static_argnums=(2,))
def dqnetwork_forward(prep, x, num_actions):
    """x: (B, 4, 84, 84) float32 NCHW (PyTorch layout). Returns (B, A) f32."""
    B = x.shape[0]
    cdtype = prep["conv1_w"].dtype

    # conv1 input: 4x4 space-to-depth + NCHW->(rows, channels), zero tail pad.
    # (B, 4, 84, 84) -> rows h1*21+w1, channels dh*16+dw*4+c  -> (B, 449, 64)
    xin = x.astype(cdtype).reshape(B, 4, 21, 4, 21, 4)
    xin = jnp.transpose(xin, (0, 2, 4, 3, 5, 1)).reshape(B, 441, 64)
    xin = jnp.pad(xin, ((0, 0), (0, 8), (0, 0)))

    # conv1: 2x2 stride-1 taps on the 21x21x64 view -> stored (B, 420, 32)
    # (rows oh*21+ow; column ow=20 is unused and dropped below).
    a1 = pallas_conv_taps(xin, prep["conv1_w"], prep["conv1_b"],
                          offsets=(0, 1, 21, 22), m_out=420)

    # conv2 input: 2x2 space-to-depth of conv1's valid (20, 20, 32) activation.
    a1 = a1.reshape(B, 20, 21, 32)[:, :, :20, :]
    a1 = a1.reshape(B, 10, 2, 10, 2, 32)
    a1 = jnp.transpose(a1, (0, 1, 3, 2, 4, 5)).reshape(B, 100, 128)
    a1 = jnp.pad(a1, ((0, 0), (0, 16), (0, 0)))                # (B, 116, 128)

    # conv2: 2x2 stride-1 taps on the 10x10x128 view -> stored (B, 98, 64)
    # (rows oh*10+ow; rows >= 90 and column ow=9 are unused by valid outputs).
    a2 = pallas_conv_taps(a1, prep["conv2_w"], prep["conv2_b"],
                          offsets=(0, 1, 10, 11), m_out=98)

    # conv3: 3x3 stride-1 taps on the 9x(10-stored)x64 activation -> (B, 70, 64).
    a3 = pallas_conv_taps(a2, prep["conv3_w"], prep["conv3_b"],
                          offsets=(0, 1, 2, 10, 11, 12, 20, 21, 22), m_out=70)

    # Keep the valid 7x7 window and flatten in (h, w, c) order -> fc1 K = 3136.
    flat = a3.reshape(B, 7, 10, 64)[:, :, :7, :].reshape(B, 3136)
    return pallas_fc1_dueling(flat, prep["fc1_w"], prep["fc1_b"],
                              prep["head_w"], prep["head_b"], num_actions)


# --------------------------------------------------------------------------
# Pure-JAX reference (matches the PyTorch module) for a correctness check
# --------------------------------------------------------------------------

def _reference_forward(params, x, num_actions):
    hp = jax.lax.Precision.HIGHEST

    def conv(x, w, b, stride):
        y = jax.lax.conv_general_dilated(
            x, w, (stride, stride), "VALID",
            dimension_numbers=("NCHW", "OIHW", "NCHW"), precision=hp)
        return jax.nn.relu(y + b[None, :, None, None])

    x = conv(x, params["conv1_w"], params["conv1_b"], 4)
    x = conv(x, params["conv2_w"], params["conv2_b"], 2)
    x = conv(x, params["conv3_w"], params["conv3_b"], 1)
    x = x.reshape(x.shape[0], -1)
    h = jax.nn.relu(jnp.dot(x, params["fc1_w"], precision=hp) + params["fc1_b"])
    value = jnp.dot(h, params["value_w"], precision=hp) + params["value_b"]
    adv = jnp.dot(h, params["adv_w"], precision=hp) + params["adv_b"]
    return value + adv - jnp.mean(adv, axis=1, keepdims=True)


if __name__ == "__main__":
    key = jax.random.PRNGKey(0)
    k_param, k_x = jax.random.split(key)

    action_space = 17   # crafter action space size
    batch = 2           # DQNetwork's fc1 (64*7*7) fixes the input at 4x84x84
    params = init_params(k_param, action_space)
    prep = prepare_params(params, action_space, dtype=COMPUTE_DTYPE)
    x = jax.random.uniform(k_x, (batch, 4, 84, 84), jnp.float32)

    q_values = dqnetwork_forward(prep, x, action_space)
    jax.block_until_ready(q_values)

    assert q_values.shape == (batch, action_space)
    assert q_values.dtype == jnp.float32

    # correctness check against the plain-JAX reference of the PyTorch module
    q_ref = _reference_forward(params, x, action_space)
    err = float(jnp.max(jnp.abs(q_values - q_ref)))
    tol = 5e-2 if USE_BF16_MATMUL else 2e-2
    assert err < tol, f"max abs error {err} exceeds tolerance {tol}"

    print("KERNEL_OK")
</pallas_src>

<mosaic_0001>
module attributes {stable_mosaic.version = 11 : i64} {
  func.func @_conv_taps_kernel(%arg0: i32, %arg1: memref<1x449x64xbf16, #tpu.memory_space<vmem>>, %arg2: memref<4x64x32xbf16, #tpu.memory_space<vmem>>, %arg3: memref<1x32xf32, #tpu.memory_space<vmem>>, %arg4: memref<1x420x32xbf16, #tpu.memory_space<vmem>>) attributes {dimension_semantics = [#tpu.dimension_semantics<parallel>], iteration_bounds = array<i64: 2>, scalar_prefetch = 0 : i64, scratch_operands = 0 : i64, tpu.core_type = #tpu.core_type<tc>, window_params = [{transform_indices = @transform_0, window_bounds = array<i64: 1, 449, 64>}, {pipeline_mode = #tpu.pipeline_mode<synchronous>, transform_indices = @transform_1, window_bounds = array<i64: 4, 64, 32>}, {pipeline_mode = #tpu.pipeline_mode<synchronous>, transform_indices = @transform_2, window_bounds = array<i64: 1, 32>}, {transform_indices = @transform_3, window_bounds = array<i64: 1, 420, 32>}]} {
    %c0 = arith.constant 0 : index
    %c0_0 = arith.constant 0 : index
    %0 = vector.load %arg3[%c0, %c0_0] : memref<1x32xf32, #tpu.memory_space<vmem>>, vector<1x32xf32>
    %c0_1 = arith.constant 0 : index
    %c0_2 = arith.constant 0 : index
    %c0_3 = arith.constant 0 : index
    %1 = vector.load %arg1[%c0_1, %c0_2, %c0_3] : memref<1x449x64xbf16, #tpu.memory_space<vmem>>, vector<1x420x64xbf16>
    %2 = vector.shape_cast %1 : vector<1x420x64xbf16> to vector<420x64xbf16>
    %c0_4 = arith.constant 0 : index
    %c0_5 = arith.constant 0 : index
    %c0_6 = arith.constant 0 : index
    %3 = vector.load %arg2[%c0_4, %c0_5, %c0_6] : memref<4x64x32xbf16, #tpu.memory_space<vmem>>, vector<1x64x32xbf16>
    %4 = vector.shape_cast %3 : vector<1x64x32xbf16> to vector<64x32xbf16>
    %cst = arith.constant dense<0.000000e+00> : vector<420x32xf32>
    %5 = tpu.matmul %2, %4, %cst {dimension_numbers = #tpu.dot_dimension_numbers<[1], [0], [0], [1], [0, 0, 1, 1], [], []>} : vector<420x64xbf16>, vector<64x32xbf16>, vector<420x32xf32> -> vector<420x32xf32>
    %c0_7 = arith.constant 0 : index
    %c1 = arith.constant 1 : index
    %c0_8 = arith.constant 0 : index
    %6 = vector.load %arg1[%c0_7, %c1, %c0_8] : memref<1x449x64xbf16, #tpu.memory_space<vmem>>, vector<1x420x64xbf16>
    %7 = vector.shape_cast %6 : vector<1x420x64xbf16> to vector<420x64xbf16>
    %c1_9 = arith.constant 1 : index
    %c0_10 = arith.constant 0 : index
    %c0_11 = arith.constant 0 : index
    %8 = vector.load %arg2[%c1_9, %c0_10, %c0_11] : memref<4x64x32xbf16, #tpu.memory_space<vmem>>, vector<1x64x32xbf16>
    %9 = vector.shape_cast %8 : vector<1x64x32xbf16> to vector<64x32xbf16>
    %cst_12 = arith.constant dense<0.000000e+00> : vector<420x32xf32>
    %10 = tpu.matmul %7, %9, %cst_12 {dimension_numbers = #tpu.dot_dimension_numbers<[1], [0], [0], [1], [0, 0, 1, 1], [], []>} : vector<420x64xbf16>, vector<64x32xbf16>, vector<420x32xf32> -> vector<420x32xf32>
    %11 = arith.addf %5, %10 : vector<420x32xf32>
    %c0_13 = arith.constant 0 : index
    %c21 = arith.constant 21 : index
    %c0_14 = arith.constant 0 : index
    %12 = vector.load %arg1[%c0_13, %c21, %c0_14] : memref<1x449x64xbf16, #tpu.memory_space<vmem>>, vector<1x420x64xbf16>
    %13 = vector.shape_cast %12 : vector<1x420x64xbf16> to vector<420x64xbf16>
    %c2 = arith.constant 2 : index
    %c0_15 = arith.constant 0 : index
    %c0_16 = arith.constant 0 : index
    %14 = vector.load %arg2[%c2, %c0_15, %c0_16] : memref<4x64x32xbf16, #tpu.memory_space<vmem>>, vector<1x64x32xbf16>
    %15 = vector.shape_cast %14 : vector<1x64x32xbf16> to vector<64x32xbf16>
    %cst_17 = arith.constant dense<0.000000e+00> : vector<420x32xf32>
    %16 = tpu.matmul %13, %15, %cst_17 {dimension_numbers = #tpu.dot_dimension_numbers<[1], [0], [0], [1], [0, 0, 1, 1], [], []>} : vector<420x64xbf16>, vector<64x32xbf16>, vector<420x32xf32> -> vector<420x32xf32>
    %17 = arith.addf %11, %16 : vector<420x32xf32>
    %c0_18 = arith.constant 0 : index
    %c22 = arith.constant 22 : index
    %c0_19 = arith.constant 0 : index
    %18 = vector.load %arg1[%c0_18, %c22, %c0_19] : memref<1x449x64xbf16, #tpu.memory_space<vmem>>, vector<1x420x64xbf16>
    %19 = vector.shape_cast %18 : vector<1x420x64xbf16> to vector<420x64xbf16>
    %c3 = arith.constant 3 : index
    %c0_20 = arith.constant 0 : index
    %c0_21 = arith.constant 0 : index
    %20 = vector.load %arg2[%c3, %c0_20, %c0_21] : memref<4x64x32xbf16, #tpu.memory_space<vmem>>, vector<1x64x32xbf16>
    %21 = vector.shape_cast %20 : vector<1x64x32xbf16> to vector<64x32xbf16>
    %cst_22 = arith.constant dense<0.000000e+00> : vector<420x32xf32>
    %22 = tpu.matmul %19, %21, %cst_22 {dimension_numbers = #tpu.dot_dimension_numbers<[1], [0], [0], [1], [0, 0, 1, 1], [], []>} : vector<420x64xbf16>, vector<64x32xbf16>, vector<420x32xf32> -> vector<420x32xf32>
    %23 = arith.addf %17, %22 : vector<420x32xf32>
    %24 = vector.broadcast %0 : vector<1x32xf32> to vector<420x32xf32>
    %25 = arith.addf %23, %24 : vector<420x32xf32>
    %cst_23 = arith.constant 0.000000e+00 : f32
    %26 = vector.broadcast %cst_23 : f32 to vector<420x32xf32>
    %27 = arith.maximumf %25, %26 : vector<420x32xf32>
    %28 = arith.truncf %27 : vector<420x32xf32> to vector<420x32xbf16>
    %c0_24 = arith.constant 0 : index
    %c0_25 = arith.constant 0 : index
    %c0_26 = arith.constant 0 : index
    %29 = vector.load %arg4[%c0_24, %c0_25, %c0_26] : memref<1x420x32xbf16, #tpu.memory_space<vmem>>, vector<1x420x32xbf16>
    %30 = vector.shape_cast %29 : vector<1x420x32xbf16> to vector<420x32xbf16>
    %31 = vector.shape_cast %28 : vector<420x32xbf16> to vector<1x420x32xbf16>
    tpu.vector_store %arg4[%c0_24, %c0_25, %c0_26], %31 {strides = array<i32>} : memref<1x420x32xbf16, #tpu.memory_space<vmem>>, vector<1x420x32xbf16>,
    return
  }
  func.func @transform_0(%arg0: i32) -> (i32, i32, i32) {
    %c0_i32 = arith.constant 0 : i32
    %c0_i32_0 = arith.constant 0 : i32
    %c0_i32_1 = arith.constant 0 : i32
    return %arg0, %c0_i32, %c0_i32_0 : i32, i32, i32
  }
  func.func @transform_1(%arg0: i32) -> (i32, i32, i32) {
    %c0_i32 = arith.constant 0 : i32
    %c0_i32_0 = arith.constant 0 : i32
    %c0_i32_1 = arith.constant 0 : i32
    %c0_i32_2 = arith.constant 0 : i32
    return %c0_i32, %c0_i32_0, %c0_i32_1 : i32, i32, i32
  }
  func.func @transform_2(%arg0: i32) -> (i32, i32) {
    %c0_i32 = arith.constant 0 : i32
    %c0_i32_0 = arith.constant 0 : i32
    %c0_i32_1 = arith.constant 0 : i32
    return %c0_i32, %c0_i32_0 : i32, i32
  }
  func.func @transform_3(%arg0: i32) -> (i32, i32, i32) {
    %c0_i32 = arith.constant 0 : i32
    %c0_i32_0 = arith.constant 0 : i32
    %c0_i32_1 = arith.constant 0 : i32
    return %arg0, %c0_i32, %c0_i32_0 : i32, i32, i32
  }
}

module attributes {stable_mosaic.version = 11 : i64} {
  func.func @_conv_taps_kernel(%arg0: i32, %arg1: memref<1x116x128xbf16, #tpu.memory_space<vmem>>, %arg2: memref<4x128x64xbf16, #tpu.memory_space<vmem>>, %arg3: memref<1x64xf32, #tpu.memory_space<vmem>>, %arg4: memref<1x98x64xbf16, #tpu.memory_space<vmem>>) attributes {dimension_semantics = [#tpu.dimension_semantics<parallel>], iteration_bounds = array<i64: 2>, scalar_prefetch = 0 : i64, scratch_operands = 0 : i64, tpu.core_type = #tpu.core_type<tc>, window_params = [{transform_indices = @transform_0, window_bounds = array<i64: 1, 116, 128>}, {pipeline_mode = #tpu.pipeline_mode<synchronous>, transform_indices = @transform_1, window_bounds = array<i64: 4, 128, 64>}, {pipeline_mode = #tpu.pipeline_mode<synchronous>, transform_indices = @transform_2, window_bounds = array<i64: 1, 64>}, {transform_indices = @transform_3, window_bounds = array<i64: 1, 98, 64>}]} {
    %c0 = arith.constant 0 : index
    %c0_0 = arith.constant 0 : index
    %0 = vector.load %arg3[%c0, %c0_0] : memref<1x64xf32, #tpu.memory_space<vmem>>, vector<1x64xf32>
    %c0_1 = arith.constant 0 : index
    %c0_2 = arith.constant 0 : index
    %c0_3 = arith.constant 0 : index
    %1 = vector.load %arg1[%c0_1, %c0_2, %c0_3] : memref<1x116x128xbf16, #tpu.memory_space<vmem>>, vector<1x98x128xbf16>
    %2 = vector.shape_cast %1 : vector<1x98x128xbf16> to vector<98x128xbf16>
    %c0_4 = arith.constant 0 : index
    %c0_5 = arith.constant 0 : index
    %c0_6 = arith.constant 0 : index
    %3 = vector.load %arg2[%c0_4, %c0_5, %c0_6] : memref<4x128x64xbf16, #tpu.memory_space<vmem>>, vector<1x128x64xbf16>
    %4 = vector.shape_cast %3 : vector<1x128x64xbf16> to vector<128x64xbf16>
    %cst = arith.constant dense<0.000000e+00> : vector<98x64xf32>
    %5 = tpu.matmul %2, %4, %cst {dimension_numbers = #tpu.dot_dimension_numbers<[1], [0], [0], [1], [0, 0, 1, 1], [], []>} : vector<98x128xbf16>, vector<128x64xbf16>, vector<98x64xf32> -> vector<98x64xf32>
    %c0_7 = arith.constant 0 : index
    %c1 = arith.constant 1 : index
    %c0_8 = arith.constant 0 : index
    %6 = vector.load %arg1[%c0_7, %c1, %c0_8] : memref<1x116x128xbf16, #tpu.memory_space<vmem>>, vector<1x98x128xbf16>
    %7 = vector.shape_cast %6 : vector<1x98x128xbf16> to vector<98x128xbf16>
    %c1_9 = arith.constant 1 : index
    %c0_10 = arith.constant 0 : index
    %c0_11 = arith.constant 0 : index
    %8 = vector.load %arg2[%c1_9, %c0_10, %c0_11] : memref<4x128x64xbf16, #tpu.memory_space<vmem>>, vector<1x128x64xbf16>
    %9 = vector.shape_cast %8 : vector<1x128x64xbf16> to vector<128x64xbf16>
    %cst_12 = arith.constant dense<0.000000e+00> : vector<98x64xf32>
    %10 = tpu.matmul %7, %9, %cst_12 {dimension_numbers = #tpu.dot_dimension_numbers<[1], [0], [0], [1], [0, 0, 1, 1], [], []>} : vector<98x128xbf16>, vector<128x64xbf16>, vector<98x64xf32> -> vector<98x64xf32>
    %11 = arith.addf %5, %10 : vector<98x64xf32>
    %c0_13 = arith.constant 0 : index
    %c10 = arith.constant 10 : index
    %c0_14 = arith.constant 0 : index
    %12 = vector.load %arg1[%c0_13, %c10, %c0_14] : memref<1x116x128xbf16, #tpu.memory_space<vmem>>, vector<1x98x128xbf16>
    %13 = vector.shape_cast %12 : vector<1x98x128xbf16> to vector<98x128xbf16>
    %c2 = arith.constant 2 : index
    %c0_15 = arith.constant 0 : index
    %c0_16 = arith.constant 0 : index
    %14 = vector.load %arg2[%c2, %c0_15, %c0_16] : memref<4x128x64xbf16, #tpu.memory_space<vmem>>, vector<1x128x64xbf16>
    %15 = vector.shape_cast %14 : vector<1x128x64xbf16> to vector<128x64xbf16>
    %cst_17 = arith.constant dense<0.000000e+00> : vector<98x64xf32>
    %16 = tpu.matmul %13, %15, %cst_17 {dimension_numbers = #tpu.dot_dimension_numbers<[1], [0], [0], [1], [0, 0, 1, 1], [], []>} : vector<98x128xbf16>, vector<128x64xbf16>, vector<98x64xf32> -> vector<98x64xf32>
    %17 = arith.addf %11, %16 : vector<98x64xf32>
    %c0_18 = arith.constant 0 : index
    %c11 = arith.constant 11 : index
    %c0_19 = arith.constant 0 : index
    %18 = vector.load %arg1[%c0_18, %c11, %c0_19] : memref<1x116x128xbf16, #tpu.memory_space<vmem>>, vector<1x98x128xbf16>
    %19 = vector.shape_cast %18 : vector<1x98x128xbf16> to vector<98x128xbf16>
    %c3 = arith.constant 3 : index
    %c0_20 = arith.constant 0 : index
    %c0_21 = arith.constant 0 : index
    %20 = vector.load %arg2[%c3, %c0_20, %c0_21] : memref<4x128x64xbf16, #tpu.memory_space<vmem>>, vector<1x128x64xbf16>
    %21 = vector.shape_cast %20 : vector<1x128x64xbf16> to vector<128x64xbf16>
    %cst_22 = arith.constant dense<0.000000e+00> : vector<98x64xf32>
    %22 = tpu.matmul %19, %21, %cst_22 {dimension_numbers = #tpu.dot_dimension_numbers<[1], [0], [0], [1], [0, 0, 1, 1], [], []>} : vector<98x128xbf16>, vector<128x64xbf16>, vector<98x64xf32> -> vector<98x64xf32>
    %23 = arith.addf %17, %22 : vector<98x64xf32>
    %24 = vector.broadcast %0 : vector<1x64xf32> to vector<98x64xf32>
    %25 = arith.addf %23, %24 : vector<98x64xf32>
    %cst_23 = arith.constant 0.000000e+00 : f32
    %26 = vector.broadcast %cst_23 : f32 to vector<98x64xf32>
    %27 = arith.maximumf %25, %26 : vector<98x64xf32>
    %28 = arith.truncf %27 : vector<98x64xf32> to vector<98x64xbf16>
    %c0_24 = arith.constant 0 : index
    %c0_25 = arith.constant 0 : index
    %c0_26 = arith.constant 0 : index
    %29 = vector.load %arg4[%c0_24, %c0_25, %c0_26] : memref<1x98x64xbf16, #tpu.memory_space<vmem>>, vector<1x98x64xbf16>
    %30 = vector.shape_cast %29 : vector<1x98x64xbf16> to vector<98x64xbf16>
    %31 = vector.shape_cast %28 : vector<98x64xbf16> to vector<1x98x64xbf16>
    tpu.vector_store %arg4[%c0_24, %c0_25, %c0_26], %31 {strides = array<i32>} : memref<1x98x64xbf16, #tpu.memory_space<vmem>>, vector<1x98x64xbf16>,
    return
  }
  func.func @transform_0(%arg0: i32) -> (i32, i32, i32) {
    %c0_i32 = arith.constant 0 : i32
    %c0_i32_0 = arith.constant 0 : i32
    %c0_i32_1 = arith.constant 0 : i32
    return %arg0, %c0_i32, %c0_i32_0 : i32, i32, i32
  }
  func.func @transform_1(%arg0: i32) -> (i32, i32, i32) {
    %c0_i32 = arith.constant 0 : i32
    %c0_i32_0 = arith.constant 0 : i32
    %c0_i32_1 = arith.constant 0 : i32
    %c0_i32_2 = arith.constant 0 : i32
    return %c0_i32, %c0_i32_0, %c0_i32_1 : i32, i32, i32
  }
  func.func @transform_2(%arg0: i32) -> (i32, i32) {
    %c0_i32 = arith.constant 0 : i32
    %c0_i32_0 = arith.constant 0 : i32
    %c0_i32_1 = arith.constant 0 : i32
    return %c0_i32, %c0_i32_0 : i32, i32
  }
  func.func @transform_3(%arg0: i32) -> (i32, i32, i32) {
    %c0_i32 = arith.constant 0 : i32
    %c0_i32_0 = arith.constant 0 : i32
    %c0_i32_1 = arith.constant 0 : i32
    return %arg0, %c0_i32, %c0_i32_0 : i32, i32, i32
  }
}

module attributes {stable_mosaic.version = 11 : i64} {
  func.func @_conv_taps_kernel(%arg0: i32, %arg1: memref<1x98x64xbf16, #tpu.memory_space<vmem>>, %arg2: memref<9x64x64xbf16, #tpu.memory_space<vmem>>, %arg3: memref<1x64xf32, #tpu.memory_space<vmem>>, %arg4: memref<1x70x64xbf16, #tpu.memory_space<vmem>>) attributes {dimension_semantics = [#tpu.dimension_semantics<parallel>], iteration_bounds = array<i64: 2>, scalar_prefetch = 0 : i64, scratch_operands = 0 : i64, tpu.core_type = #tpu.core_type<tc>, window_params = [{transform_indices = @transform_0, window_bounds = array<i64: 1, 98, 64>}, {pipeline_mode = #tpu.pipeline_mode<synchronous>, transform_indices = @transform_1, window_bounds = array<i64: 9, 64, 64>}, {pipeline_mode = #tpu.pipeline_mode<synchronous>, transform_indices = @transform_2, window_bounds = array<i64: 1, 64>}, {transform_indices = @transform_3, window_bounds = array<i64: 1, 70, 64>}]} {
    %c0 = arith.constant 0 : index
    %c0_0 = arith.constant 0 : index
    %0 = vector.load %arg3[%c0, %c0_0] : memref<1x64xf32, #tpu.memory_space<vmem>>, vector<1x64xf32>
    %c0_1 = arith.constant 0 : index
    %c0_2 = arith.constant 0 : index
    %c0_3 = arith.constant 0 : index
    %1 = vector.load %arg1[%c0_1, %c0_2, %c0_3] : memref<1x98x64xbf16, #tpu.memory_space<vmem>>, vector<1x70x64xbf16>
    %2 = vector.shape_cast %1 : vector<1x70x64xbf16> to vector<70x64xbf16>
    %c0_4 = arith.constant 0 : index
    %c0_5 = arith.constant 0 : index
    %c0_6 = arith.constant 0 : index
    %3 = vector.load %arg2[%c0_4, %c0_5, %c0_6] : memref<9x64x64xbf16, #tpu.memory_space<vmem>>, vector<1x64x64xbf16>
    %4 = vector.shape_cast %3 : vector<1x64x64xbf16> to vector<64x64xbf16>
    %cst = arith.constant dense<0.000000e+00> : vector<70x64xf32>
    %5 = tpu.matmul %2, %4, %cst {dimension_numbers = #tpu.dot_dimension_numbers<[1], [0], [0], [1], [0, 0, 1, 1], [], []>} : vector<70x64xbf16>, vector<64x64xbf16>, vector<70x64xf32> -> vector<70x64xf32>
    %c0_7 = arith.constant 0 : index
    %c1 = arith.constant 1 : index
    %c0_8 = arith.constant 0 : index
    %6 = vector.load %arg1[%c0_7, %c1, %c0_8] : memref<1x98x64xbf16, #tpu.memory_space<vmem>>, vector<1x70x64xbf16>
    %7 = vector.shape_cast %6 : vector<1x70x64xbf16> to vector<70x64xbf16>
    %c1_9 = arith.constant 1 : index
    %c0_10 = arith.constant 0 : index
    %c0_11 = arith.constant 0 : index
    %8 = vector.load %arg2[%c1_9, %c0_10, %c0_11] : memref<9x64x64xbf16, #tpu.memory_space<vmem>>, vector<1x64x64xbf16>
    %9 = vector.shape_cast %8 : vector<1x64x64xbf16> to vector<64x64xbf16>
    %cst_12 = arith.constant dense<0.000000e+00> : vector<70x64xf32>
    %10 = tpu.matmul %7, %9, %cst_12 {dimension_numbers = #tpu.dot_dimension_numbers<[1], [0], [0], [1], [0, 0, 1, 1], [], []>} : vector<70x64xbf16>, vector<64x64xbf16>, vector<70x64xf32> -> vector<70x64xf32>
    %11 = arith.addf %5, %10 : vector<70x64xf32>
    %c0_13 = arith.constant 0 : index
    %c2 = arith.constant 2 : index
    %c0_14 = arith.constant 0 : index
    %12 = vector.load %arg1[%c0_13, %c2, %c0_14] : memref<1x98x64xbf16, #tpu.memory_space<vmem>>, vector<1x70x64xbf16>
    %13 = vector.shape_cast %12 : vector<1x70x64xbf16> to vector<70x64xbf16>
    %c2_15 = arith.constant 2 : index
    %c0_16 = arith.constant 0 : index
    %c0_17 = arith.constant 0 : index
    %14 = vector.load %arg2[%c2_15, %c0_16, %c0_17] : memref<9x64x64xbf16, #tpu.memory_space<vmem>>, vector<1x64x64xbf16>
    %15 = vector.shape_cast %14 : vector<1x64x64xbf16> to vector<64x64xbf16>
    %cst_18 = arith.constant dense<0.000000e+00> : vector<70x64xf32>
    %16 = tpu.matmul %13, %15, %cst_18 {dimension_numbers = #tpu.dot_dimension_numbers<[1], [0], [0], [1], [0, 0, 1, 1], [], []>} : vector<70x64xbf16>, vector<64x64xbf16>, vector<70x64xf32> -> vector<70x64xf32>
    %17 = arith.addf %11, %16 : vector<70x64xf32>
    %c0_19 = arith.constant 0 : index
    %c10 = arith.constant 10 : index
    %c0_20 = arith.constant 0 : index
    %18 = vector.load %arg1[%c0_19, %c10, %c0_20] : memref<1x98x64xbf16, #tpu.memory_space<vmem>>, vector<1x70x64xbf16>
    %19 = vector.shape_cast %18 : vector<1x70x64xbf16> to vector<70x64xbf16>
    %c3 = arith.constant 3 : index
    %c0_21 = arith.constant 0 : index
    %c0_22 = arith.constant 0 : index
    %20 = vector.load %arg2[%c3, %c0_21, %c0_22] : memref<9x64x64xbf16, #tpu.memory_space<vmem>>, vector<1x64x64xbf16>
    %21 = vector.shape_cast %20 : vector<1x64x64xbf16> to vector<64x64xbf16>
    %cst_23 = arith.constant dense<0.000000e+00> : vector<70x64xf32>
    %22 = tpu.matmul %19, %21, %cst_23 {dimension_numbers = #tpu.dot_dimension_numbers<[1], [0], [0], [1], [0, 0, 1, 1], [], []>} : vector<70x64xbf16>, vector<64x64xbf16>, vector<70x64xf32> -> vector<70x64xf32>
    %23 = arith.addf %17, %22 : vector<70x64xf32>
    %c0_24 = arith.constant 0 : index
    %c11 = arith.constant 11 : index
    %c0_25 = arith.constant 0 : index
    %24 = vector.load %arg1[%c0_24, %c11, %c0_25] : memref<1x98x64xbf16, #tpu.memory_space<vmem>>, vector<1x70x64xbf16>
    %25 = vector.shape_cast %24 : vector<1x70x64xbf16> to vector<70x64xbf16>
    %c4 = arith.constant 4 : index
    %c0_26 = arith.constant 0 : index
    %c0_27 = arith.constant 0 : index
    %26 = vector.load %arg2[%c4, %c0_26, %c0_27] : memref<9x64x64xbf16, #tpu.memory_space<vmem>>, vector<1x64x64xbf16>
    %27 = vector.shape_cast %26 : vector<1x64x64xbf16> to vector<64x64xbf16>
    %cst_28 = arith.constant dense<0.000000e+00> : vector<70x64xf32>
    %28 = tpu.matmul %25, %27, %cst_28 {dimension_numbers = #tpu.dot_dimension_numbers<[1], [0], [0], [1], [0, 0, 1, 1], [], []>} : vector<70x64xbf16>, vector<64x64xbf16>, vector<70x64xf32> -> vector<70x64xf32>
    %29 = arith.addf %23, %28 : vector<70x64xf32>
    %c0_29 = arith.constant 0 : index
    %c12 = arith.constant 12 : index
    %c0_30 = arith.constant 0 : index
    %30 = vector.load %arg1[%c0_29, %c12, %c0_30] : memref<1x98x64xbf16, #tpu.memory_space<vmem>>, vector<1x70x64xbf16>
    %31 = vector.shape_cast %30 : vector<1x70x64xbf16> to vector<70x64xbf16>
    %c5 = arith.constant 5 : index
    %c0_31 = arith.constant 0 : index
    %c0_32 = arith.constant 0 : index
    %32 = vector.load %arg2[%c5, %c0_31, %c0_32] : memref<9x64x64xbf16, #tpu.memory_space<vmem>>, vector<1x64x64xbf16>
    %33 = vector.shape_cast %32 : vector<1x64x64xbf16> to vector<64x64xbf16>
    %cst_33 = arith.constant dense<0.000000e+00> : vector<70x64xf32>
    %34 = tpu.matmul %31, %33, %cst_33 {dimension_numbers = #tpu.dot_dimension_numbers<[1], [0], [0], [1], [0, 0, 1, 1], [], []>} : vector<70x64xbf16>, vector<64x64xbf16>, vector<70x64xf32> -> vector<70x64xf32>
    %35 = arith.addf %29, %34 : vector<70x64xf32>
    %c0_34 = arith.constant 0 : index
    %c20 = arith.constant 20 : index
    %c0_35 = arith.constant 0 : index
    %36 = vector.load %arg1[%c0_34, %c20, %c0_35] : memref<1x98x64xbf16, #tpu.memory_space<vmem>>, vector<1x70x64xbf16>
    %37 = vector.shape_cast %36 : vector<1x70x64xbf16> to vector<70x64xbf16>
    %c6 = arith.constant 6 : index
    %c0_36 = arith.constant 0 : index
    %c0_37 = arith.constant 0 : index
    %38 = vector.load %arg2[%c6, %c0_36, %c0_37] : memref<9x64x64xbf16, #tpu.memory_space<vmem>>, vector<1x64x64xbf16>
    %39 = vector.shape_cast %38 : vector<1x64x64xbf16> to vector<64x64xbf16>
    %cst_38 = arith.constant dense<0.000000e+00> : vector<70x64xf32>
    %40 = tpu.matmul %37, %39, %cst_38 {dimension_numbers = #tpu.dot_dimension_numbers<[1], [0], [0], [1], [0, 0, 1, 1], [], []>} : vector<70x64xbf16>, vector<64x64xbf16>, vector<70x64xf32> -> vector<70x64xf32>
    %41 = arith.addf %35, %40 : vector<70x64xf32>
    %c0_39 = arith.constant 0 : index
    %c21 = arith.constant 21 : index
    %c0_40 = arith.constant 0 : index
    %42 = vector.load %arg1[%c0_39, %c21, %c0_40] : memref<1x98x64xbf16, #tpu.memory_space<vmem>>, vector<1x70x64xbf16>
    %43 = vector.shape_cast %42 : vector<1x70x64xbf16> to vector<70x64xbf16>
    %c7 = arith.constant 7 : index
    %c0_41 = arith.constant 0 : index
    %c0_42 = arith.constant 0 : index
    %44 = vector.load %arg2[%c7, %c0_41, %c0_42] : memref<9x64x64xbf16, #tpu.memory_space<vmem>>, vector<1x64x64xbf16>
    %45 = vector.shape_cast %44 : vector<1x64x64xbf16> to vector<64x64xbf16>
    %cst_43 = arith.constant dense<0.000000e+00> : vector<70x64xf32>
    %46 = tpu.matmul %43, %45, %cst_43 {dimension_numbers = #tpu.dot_dimension_numbers<[1], [0], [0], [1], [0, 0, 1, 1], [], []>} : vector<70x64xbf16>, vector<64x64xbf16>, vector<70x64xf32> -> vector<70x64xf32>
    %47 = arith.addf %41, %46 : vector<70x64xf32>
    %c0_44 = arith.constant 0 : index
    %c22 = arith.constant 22 : index
    %c0_45 = arith.constant 0 : index
    %48 = vector.load %arg1[%c0_44, %c22, %c0_45] : memref<1x98x64xbf16, #tpu.memory_space<vmem>>, vector<1x70x64xbf16>
    %49 = vector.shape_cast %48 : vector<1x70x64xbf16> to vector<70x64xbf16>
    %c8 = arith.constant 8 : index
    %c0_46 = arith.constant 0 : index
    %c0_47 = arith.constant 0 : index
    %50 = vector.load %arg2[%c8, %c0_46, %c0_47] : memref<9x64x64xbf16, #tpu.memory_space<vmem>>, vector<1x64x64xbf16>
    %51 = vector.shape_cast %50 : vector<1x64x64xbf16> to vector<64x64xbf16>
    %cst_48 = arith.constant dense<0.000000e+00> : vector<70x64xf32>
    %52 = tpu.matmul %49, %51, %cst_48 {dimension_numbers = #tpu.dot_dimension_numbers<[1], [0], [0], [1], [0, 0, 1, 1], [], []>} : vector<70x64xbf16>, vector<64x64xbf16>, vector<70x64xf32> -> vector<70x64xf32>
    %53 = arith.addf %47, %52 : vector<70x64xf32>
    %54 = vector.broadcast %0 : vector<1x64xf32> to vector<70x64xf32>
    %55 = arith.addf %53, %54 : vector<70x64xf32>
    %cst_49 = arith.constant 0.000000e+00 : f32
    %56 = vector.broadcast %cst_49 : f32 to vector<70x64xf32>
    %57 = arith.maximumf %55, %56 : vector<70x64xf32>
    %58 = arith.truncf %57 : vector<70x64xf32> to vector<70x64xbf16>
    %c0_50 = arith.constant 0 : index
    %c0_51 = arith.constant 0 : index
    %c0_52 = arith.constant 0 : index
    %59 = vector.load %arg4[%c0_50, %c0_51, %c0_52] : memref<1x70x64xbf16, #tpu.memory_space<vmem>>, vector<1x70x64xbf16>
    %60 = vector.shape_cast %59 : vector<1x70x64xbf16> to vector<70x64xbf16>
    %61 = vector.shape_cast %58 : vector<70x64xbf16> to vector<1x70x64xbf16>
    tpu.vector_store %arg4[%c0_50, %c0_51, %c0_52], %61 {strides = array<i32>} : memref<1x70x64xbf16, #tpu.memory_space<vmem>>, vector<1x70x64xbf16>,
    return
  }
  func.func @transform_0(%arg0: i32) -> (i32, i32, i32) {
    %c0_i32 = arith.constant 0 : i32
    %c0_i32_0 = arith.constant 0 : i32
    %c0_i32_1 = arith.constant 0 : i32
    return %arg0, %c0_i32, %c0_i32_0 : i32, i32, i32
  }
  func.func @transform_1(%arg0: i32) -> (i32, i32, i32) {
    %c0_i32 = arith.constant 0 : i32
    %c0_i32_0 = arith.constant 0 : i32
    %c0_i32_1 = arith.constant 0 : i32
    %c0_i32_2 = arith.constant 0 : i32
    return %c0_i32, %c0_i32_0, %c0_i32_1 : i32, i32, i32
  }
  func.func @transform_2(%arg0: i32) -> (i32, i32) {
    %c0_i32 = arith.constant 0 : i32
    %c0_i32_0 = arith.constant 0 : i32
    %c0_i32_1 = arith.constant 0 : i32
    return %c0_i32, %c0_i32_0 : i32, i32
  }
  func.func @transform_3(%arg0: i32) -> (i32, i32, i32) {
    %c0_i32 = arith.constant 0 : i32
    %c0_i32_0 = arith.constant 0 : i32
    %c0_i32_1 = arith.constant 0 : i32
    return %arg0, %c0_i32, %c0_i32_0 : i32, i32, i32
  }
}

module attributes {stable_mosaic.version = 11 : i64} {
  func.func @_fc1_dueling_kernel(%arg0: i32, %arg1: memref<2x3136xbf16, #tpu.memory_space<vmem>>, %arg2: memref<3136x512xbf16, #tpu.memory_space<vmem>>, %arg3: memref<1x512xf32, #tpu.memory_space<vmem>>, %arg4: memref<512x128xbf16, #tpu.memory_space<vmem>>, %arg5: memref<1x128xf32, #tpu.memory_space<vmem>>, %arg6: memref<2x128xf32, #tpu.memory_space<vmem>>) attributes {dimension_semantics = [#tpu.dimension_semantics<parallel>], iteration_bounds = array<i64: 1>, scalar_prefetch = 0 : i64, scratch_operands = 0 : i64, tpu.core_type = #tpu.core_type<tc>, window_params = [{transform_indices = @transform_0, window_bounds = array<i64: 2, 3136>}, {pipeline_mode = #tpu.pipeline_mode<synchronous>, transform_indices = @transform_1, window_bounds = array<i64: 3136, 512>}, {pipeline_mode = #tpu.pipeline_mode<synchronous>, transform_indices = @transform_2, window_bounds = array<i64: 1, 512>}, {pipeline_mode = #tpu.pipeline_mode<synchronous>, transform_indices = @transform_3, window_bounds = array<i64: 512, 128>}, {pipeline_mode = #tpu.pipeline_mode<synchronous>, transform_indices = @transform_4, window_bounds = array<i64: 1, 128>}, {transform_indices = @transform_5, window_bounds = array<i64: 2, 128>}]} {
    %c0 = arith.constant 0 : index
    %c0_0 = arith.constant 0 : index
    %0 = vector.load %arg1[%c0, %c0_0] : memref<2x3136xbf16, #tpu.memory_space<vmem>>, vector<2x3136xbf16>
    %c0_1 = arith.constant 0 : index
    %c0_2 = arith.constant 0 : index
    %1 = vector.load %arg2[%c0_1, %c0_2] : memref<3136x512xbf16, #tpu.memory_space<vmem>>, vector<3136x512xbf16>
    %cst = arith.constant dense<0.000000e+00> : vector<2x512xf32>
    %2 = tpu.matmul %0, %1, %cst {dimension_numbers = #tpu.dot_dimension_numbers<[1], [0], [0], [1], [0, 0, 1, 1], [], []>} : vector<2x3136xbf16>, vector<3136x512xbf16>, vector<2x512xf32> -> vector<2x512xf32>
    %c0_3 = arith.constant 0 : index
    %c0_4 = arith.constant 0 : index
    %3 = vector.load %arg3[%c0_3, %c0_4] : memref<1x512xf32, #tpu.memory_space<vmem>>, vector<1x512xf32>
    %4 = vector.broadcast %3 : vector<1x512xf32> to vector<2x512xf32>
    %5 = arith.addf %2, %4 : vector<2x512xf32>
    %cst_5 = arith.constant 0.000000e+00 : f32
    %6 = vector.broadcast %cst_5 : f32 to vector<2x512xf32>
    %7 = arith.maximumf %5, %6 : vector<2x512xf32>
    %8 = arith.truncf %7 : vector<2x512xf32> to vector<2x512xbf16>
    %c0_6 = arith.constant 0 : index
    %c0_7 = arith.constant 0 : index
    %9 = vector.load %arg4[%c0_6, %c0_7] : memref<512x128xbf16, #tpu.memory_space<vmem>>, vector<512x128xbf16>
    %cst_8 = arith.constant dense<0.000000e+00> : vector<2x128xf32>
    %10 = tpu.matmul %8, %9, %cst_8 {dimension_numbers = #tpu.dot_dimension_numbers<[1], [0], [0], [1], [0, 0, 1, 1], [], []>} : vector<2x512xbf16>, vector<512x128xbf16>, vector<2x128xf32> -> vector<2x128xf32>
    %c0_9 = arith.constant 0 : index
    %c0_10 = arith.constant 0 : index
    %11 = vector.load %arg5[%c0_9, %c0_10] : memref<1x128xf32, #tpu.memory_space<vmem>>, vector<1x128xf32>
    %12 = vector.broadcast %11 : vector<1x128xf32> to vector<2x128xf32>
    %13 = arith.addf %10, %12 : vector<2x128xf32>
    %14 = vector.extract_strided_slice %13 {offsets = [0, 17], sizes = [2, 1], strides = [1, 1]} : vector<2x128xf32> to vector<2x1xf32>
    %15 = tpu.iota {dimensions = array<i32: 1>} : vector<2x128xi32>
    %c17_i32 = arith.constant 17 : i32
    %16 = vector.broadcast %c17_i32 : i32 to vector<2x128xi32>
    %17 = arith.cmpi slt, %15, %16 : vector<2x128xi32>
    %cst_11 = arith.constant 0.000000e+00 : f32
    %18 = vector.broadcast %cst_11 : f32 to vector<2x128xf32>
    %19 = arith.select %17, %13, %18 : vector<2x128xi1>, vector<2x128xf32>
    %cst_12 = arith.constant dense<0.000000e+00> : vector<2xf32>
    %20 = vector.multi_reduction <add>, %19, %cst_12 [1] : vector<2x128xf32> to vector<2xf32>
    %21 = vector.shape_cast %20 : vector<2xf32> to vector<2x1xf32>
    %22 = vector.broadcast %14 : vector<2x1xf32> to vector<2x128xf32>
    %23 = arith.addf %13, %22 : vector<2x128xf32>
    %cst_13 = arith.constant 0.0588235296 : f32
    %24 = vector.broadcast %cst_13 : f32 to vector<2x1xf32>
    %25 = arith.mulf %21, %24 : vector<2x1xf32>
    %26 = vector.broadcast %25 : vector<2x1xf32> to vector<2x128xf32>
    %27 = arith.subf %23, %26 : vector<2x128xf32>
    %c0_14 = arith.constant 0 : index
    %c0_15 = arith.constant 0 : index
    %28 = vector.load %arg6[%c0_14, %c0_15] : memref<2x128xf32, #tpu.memory_space<vmem>>, vector<2x128xf32>
    tpu.vector_store %arg6[%c0_14, %c0_15], %27 {strides = array<i32>} : memref<2x128xf32, #tpu.memory_space<vmem>>, vector<2x128xf32>,
    return
  }
  func.func @transform_0(%arg0: i32) -> (i32, i32) {
    %c0_i32 = arith.constant 0 : i32
    %c0_i32_0 = arith.constant 0 : i32
    return %arg0, %c0_i32 : i32, i32
  }
  func.func @transform_1(%arg0: i32) -> (i32, i32) {
    %c0_i32 = arith.constant 0 : i32
    %c0_i32_0 = arith.constant 0 : i32
    %c0_i32_1 = arith.constant 0 : i32
    return %c0_i32, %c0_i32_0 : i32, i32
  }
  func.func @transform_2(%arg0: i32) -> (i32, i32) {
    %c0_i32 = arith.constant 0 : i32
    %c0_i32_0 = arith.constant 0 : i32
    %c0_i32_1 = arith.constant 0 : i32
    return %c0_i32, %c0_i32_0 : i32, i32
  }
  func.func @transform_3(%arg0: i32) -> (i32, i32) {
    %c0_i32 = arith.constant 0 : i32
    %c0_i32_0 = arith.constant 0 : i32
    %c0_i32_1 = arith.constant 0 : i32
    return %c0_i32, %c0_i32_0 : i32, i32
  }
  func.func @transform_4(%arg0: i32) -> (i32, i32) {
    %c0_i32 = arith.constant 0 : i32
    %c0_i32_0 = arith.constant 0 : i32
    %c0_i32_1 = arith.constant 0 : i32
    return %c0_i32, %c0_i32_0 : i32, i32
  }
  func.func @transform_5(%arg0: i32) -> (i32, i32) {
    %c0_i32 = arith.constant 0 : i32
    %c0_i32_0 = arith.constant 0 : i32
    return %arg0, %c0_i32 : i32, i32
  }
}

</mosaic_0001>

<bundles_post_ra>
// kernel: dqnetwork_forward.4
= control target key start
LH: loop header
LB: loop body
LE: loop exit
PB: predicated region body
PF: predicated region fallthrough
CT: control target
= control target key end

     0   :  { %s4055_s12 = smov 0   ;;  %s5046_s0 = inlined_call_operand.vmem [shape: bf16[2,449,64], index: 0, kind: input, shape index: {}]   ;;  %s5047_s1 = inlined_call_operand.vmem [shape: bf16[4,64,32], index: 1, kind: input, shape index: {}]   ;;  %s5048_s2 = inlined_call_operand.vmem [shape: f32[1,32], index: 2, kind: input, shape index: {}]   ;;  %s5049_s3 = inlined_call_operand.vmem [shape: bf16[2,420,32], index: 3, kind: output, shape index: {}]  }
   0x1 LB: > { %s3032_s13 = sadd.s32 4294967295, %s4031_s12   ;;  %p3036_p0 = scmp.ge.s32.totalorder %s4031_s12, 1  ;;  %s4031_s12 = sphi %s4055_s12, %s13_s12  }
   0x2   : > { %p137_p1 = scmp.lt.s32.totalorder %s4031_s12, 3 }
   0x4   : > { %p138_p2 = pnand %p3036_p0, %p137_p1 }
   0x6   : > { %141 = sbr.rel (%p138_p2) target bundleno = 677 (0x2a5), region = 32 }
   0xd   : > { %v3952_v0 = vld [vmem:[%s5047_s1 + $0x20] sm:$0xff]   ;;  %v5050_v1 = vmov 0.0   ;;  %v3954_v3 = vld [vmem:[%s5047_s1 + $0x28] sm:$0xff]   ;;  %vm4034_vm0 = vmmov 0   ;;  %p161_p3 = scmp.lt.s32.totalorder %s3032_s13, 1  ;;  %v3956_v5 = vld [vmem:[%s5047_s1 + $0x30] sm:$0xff]  }
   0xe   : > { %3476 = vmatprep.subr.bf16.mxu0 %v5050_v1  ;;  %3592 = vmatprep.subr.bf16.mxu1 %v5050_v1  ;;  %v3953_v2 = vld [vmem:[%s5047_s1] sm:$0xff]   ;;  %v3955_v4 = vld [vmem:[%s5047_s1 + $0x8] sm:$0xff]   ;;  %v3957_v6 = vld [vmem:[%s5047_s1 + $0x10] sm:$0xff]   ;;  %vm377_vm1 = vsmask.f32 7424  ;;  %vm617_vm2 = vcmask 523264  }
   0xf   : > { %3477 = vmatpush3.bf16.msra.mxu0 %v3952_v0  ;;  %3484 = vmatprep.mubr.msk.bf16.mxu0 %vm4034_vm0, %v5050_v1  ;;  %s5068_s13 = smov (!%p161_p3, %s3032_s13), 1  ;;  %v3958_v7 = vld [vmem:[%s5047_s1 + $0x38] sm:$0xff]   ;;  %v3962_v17 = vld [vmem:[%s5047_s1 + $0x40] sm:$0xff]   ;;  %v3970_v26 = vld [vmem:[%s5047_s1 + $0x48] sm:$0xff]   ;;  %vm2137_vm3 = vcmask 1044480   ;;  %vm2922_vm5 = vcmask 257024  }
  0x10   : > { %3593 = vmatpush3.bf16.msra.mxu1 %v3953_v2  ;;  %3478 = vmatprep.subr.bf16.mxu0 %v5050_v1  ;;  %s3940_s24 = smul.u32 228, %s5068_s13  ;;  %v3959_v8 = vld [vmem:[%s5047_s1 + $0x18] sm:$0xff]   ;;  %v3963_v18 = vld [vmem:[%s5047_s1 + $0x60] sm:$0xff]   ;;  %v3972_v27 = vld [vmem:[%s5047_s1 + $0x68] sm:$0xff]   ;;  %vm1475_vm4 = vsmask.f32 5376 }
  0x11   : > { %3594 = vmatprep.subr.bf16.mxu1 %v5050_v1  ;;  %3600 = vmatprep.mubr.msk.bf16.mxu1 %vm4034_vm0, %v5050_v1  ;;  %v3979_v37 = vld [vmem:[%s5047_s1 + $0x50] sm:$0xff]   ;;  %v3988_v51 = vld [vmem:[%s5047_s1 + $0x58] sm:$0xff]   ;;  %s3941_s27 = smul.u32 212, %s5068_s13  ;;  %vm2975_vm6 = vcmask 254976  }
  0x12   : > { %s4100_s4 = scalar_lea.vmem %s5046_s0, %s3940_s24  ;;  %v3980_v38 = vld [vmem:[%s5047_s1 + $0x70] sm:$0xff]   ;;  %v3989_v52 = vld [vmem:[%s5047_s1 + $0x78] sm:$0xff]  }
  0x13   : > { %3479 = vmatpush3.bf16.msra.mxu0 %v3954_v3  ;;  %v3960_v9 = vld [vmem:[%s4100_s4] sm:$0xff]   ;;  %v3961_v10 = vld [vmem:[%s4100_s4 + $0x8] sm:$0xff]   ;;  %v3964_v14 = vld [vmem:[%s4100_s4 + $0x10] sm:$0xff]   ;;  %s4833_s30 = scalar_lea.vmem %s5049_s3, %s3941_s27 }
  0x14   : > { %3595 = vmatpush3.bf16.msra.mxu1 %v3955_v4  ;;  %3480 = vmatprep.subr.bf16.mxu0 %v5050_v1  ;;  %v379_v11 = vshrl.u32 %v3960_v9, 16  ;;  %v381_v12 = vshll.u32 %v3960_v9, 16  ;;  %v386_v13 = vshll.u32 %v3961_v10, 16  ;;  %v390_v20 = vshrl.u32 %v3961_v10, 16  ;;  %v3965_v25 = vld [vmem:[%s4100_s4 + $0x18] sm:$0xff]   ;;  %v3966_v31 = vld [vmem:[%s4100_s4 + $0x20] sm:$0xff]  }
  0x15   : > { %3596 = vmatprep.subr.bf16.mxu1 %v5050_v1  ;;  %v394_v21 = vshll.u32 %v3964_v14, 16  ;;  %v398_v29 = vshrl.u32 %v3964_v14, 16  ;;  %v402_v30 = vshll.u32 %v3965_v25, 16  ;;  %v410_v34 = vshll.u32 %v3966_v31, 16  ;;  %v3967_v40 = vld [vmem:[%s4100_s4 + $0x28] sm:$0xff]   ;;  %v3968_v47 = vld [vmem:[%s4100_s4 + $0x30] sm:$0xff]  }
  0x16   : > { %v383_v15 = vrot.slane %v381_v12, 1  ;;  %v388_v16 = vrot.slane %v386_v13, 1  ;;  %v406_v36 = vshrl.u32 %v3965_v25, 16  ;;  %v414_v43 = vshrl.u32 %v3966_v31, 16  ;;  %v3969_v55 = vld [vmem:[%s4100_s4 + $0x38] sm:$0xff]   ;;  %v3971_v61 = vld [vmem:[%s4100_s4 + $0x40] sm:$0xff]  }
  0x17   : > { %3481 = vmatpush3.bf16.msra.mxu0 %v3956_v5  ;;  %v396_v24 = vrot.slane %v394_v21, 1  ;;  %v404_v33 = vrot.slane %v402_v30, 1  ;;  %v412_v39 = vrot.slane %v410_v34, 1  ;;  %v418_v44 = vshll.u32 %v3967_v40, 16  ;;  %v3973_v4 = vld [vmem:[%s4100_s4 + $0x48] sm:$0xff]   ;;  %v3978_v34 = vld [vmem:[%s4100_s4 + $0x70] sm:$0xff]  }
  0x18   : > { %3597 = vmatpush3.bf16.msra.mxu1 %v3957_v6  ;;  %3482 = vmatprep.subr.bf16.mxu0 %v5050_v1  ;;  %v384_v19 = vor.u32 %v383_v15, %v379_v11  ;;  %v392_v23 = vor.u32 %v390_v20, %v388_v16  ;;  %v422_v49 = vshrl.u32 %v3967_v40, 16  ;;  %v426_v50 = vshll.u32 %v3968_v47, 16 }
  0x19   : > { %3598 = vmatprep.subr.bf16.mxu1 %v5050_v1  ;;  %v400_v32 = vor.u32 %v398_v29, %v396_v24  ;;  %v408_v41 = vor.u32 %v406_v36, %v404_v33  ;;  %v416_v45 = vor.u32 %v414_v43, %v412_v39  ;;  %v420_v46 = vrot.slane %v418_v44, 1 }
  0x1a   : > { %v389_v22 = vsel %vm377_vm1, %v384_v19, %v388_v16  ;;  %v397_v28 = vsel %vm377_vm1, %v392_v23, %v396_v24  ;;  %v428_v54 = vrot.slane %v426_v50, 1  ;;  %v430_v57 = vshrl.u32 %v3968_v47, 16  ;;  %v3975_v16 = vld [vmem:[%s4100_s4 + $0x58] sm:$0xff]  }
  0x1b   : > { %3483 = vmatpush3.bf16.msra.mxu0 %v3958_v7  ;;  %v405_v35 = vsel %vm377_vm1, %v400_v32, %v404_v33  ;;  %v413_v42 = vsel %vm377_vm1, %v408_v41, %v412_v39  ;;  %v421_v48 = vsel %vm377_vm1, %v416_v45, %v420_v46  ;;  %v424_v53 = vor.u32 %v422_v49, %v420_v46  ;;  %v3982_v46 = vld [vmem:[%s4100_s4 + $0x80] sm:$0xff]  }
  0x1c   : > { %3599 = vmatpush3.bf16.msra.mxu1 %v3959_v8  ;;  %3708 = vmatprep.subr.bf16.mxu0 %v5050_v1  ;;  %v434_v58 = vshll.u32 %v3969_v55, 16  ;;  %v432_v59 = vor.u32 %v430_v57, %v428_v54  ;;  %v438_v63 = vshrl.u32 %v3969_v55, 16  ;;  %v442_v0 = vshll.u32 %v3971_v61, 16 }
  0x1d   : > { %3824 = vmatprep.subr.bf16.mxu1 %v5050_v1  ;;  %v429_v56 = vsel %vm377_vm1, %v424_v53, %v428_v54  ;;  %v446_v6 = vshrl.u32 %v3971_v61, 16  ;;  %v450_v7 = vshll.u32 %v3973_v4, 16  ;;  %v454_v12 = vshrl.u32 %v3973_v4, 16 }
  0x1e   : > { %3485 = vmatmul.mubr.msk.bf16.vlgmr.msra.gmra.mrb[0].mxu0 %vm617_vm2, %v389_v22  ;;  %v436_v60 = vrot.slane %v434_v58, 1  ;;  %v444_v3 = vrot.slane %v442_v0, 1  ;;  %v466_v19 = vshll.u32 %v3975_v16, 16  ;;  %v3976_v22 = vld [vmem:[%s4100_s4 + $0x60] sm:$0xff]   ;;  %v470_v24 = vshrl.u32 %v3975_v16, 16  ;;  %v3984_v58 = vld [vmem:[%s4100_s4 + $0x90] sm:$0xff]  }
  0x1f   : > { %3601 = vmatmul.mubr.msk.bf16.vlgmr.msra.gmra.mrb[0].mxu1 %vm617_vm2, %v3960_v9  ;;  %3709 = vmatpush3.bf16.msra.mxu0 %v3962_v17  ;;  %v452_v9 = vrot.slane %v450_v7, 1  ;;  %v478_v30 = vshrl.u32 %v3976_v22, 16  ;;  %v506_v49 = vshll.u32 %v3982_v46, 16  ;;  %v510_v54 = vshrl.u32 %v3982_v46, 16  ;;  %v3985_v0 = vld [vmem:[%s4100_s4 + $0x98] sm:$0xff]   ;;  %v3986_v7 = vld [vmem:[%s4100_s4 + $0xa0] sm:$0xff]  }
  0x20   : > { %3825 = vmatpush3.bf16.msra.mxu1 %v3963_v18  ;;  %3488 = vmatprep.mubr.msk.bf16.mxu0 %vm4034_vm0, %v5050_v1  ;;  %v437_v62 = vsel %vm377_vm1, %v432_v59, %v436_v60  ;;  %v440_v2 = vor.u32 %v438_v63, %v436_v60  ;;  %v448_v8 = vor.u32 %v446_v6, %v444_v3  ;;  %v468_v21 = vrot.slane %v466_v19, 1  ;;  %v3990_v19 = vld [vmem:[%s4100_s4 + $0xb0] sm:$0xff]  }
  0x21   : > { %3604 = vmatprep.mubr.msk.bf16.mxu1 %vm4034_vm0, %v5050_v1  ;;  %3710 = vmatprep.subr.bf16.mxu0 %v5050_v1 }
  0x22   : > { %3826 = vmatprep.subr.bf16.mxu1 %v5050_v1  ;;  %v445_v5 = vsel %vm377_vm1, %v440_v2, %v444_v3  ;;  %v453_v11 = vsel %vm377_vm1, %v448_v8, %v452_v9  ;;  %v526_v3 = vshrl.u32 %v3984_v58, 16 }
  0x23   : > { %3711 = vmatpush3.bf16.msra.mxu0 %v3970_v26  ;;  %v472_v26 = vor.u32 %v470_v24, %v468_v21 }
  0x24   : > { %3827 = vmatpush3.bf16.msra.mxu1 %v3972_v27  ;;  %3712 = vmatprep.subr.bf16.mxu0 %v5050_v1 }
  0x25   : > { %3828 = vmatprep.subr.bf16.mxu1 %v5050_v1 }
  0x26   : > { %3489 = vmatmul.mubr.msk.bf16.gmra.mrb[4].mxu0 %vm617_vm2, %v397_v28  ;;  %v3977_v28 = vld [vmem:[%s4100_s4 + $0x68] sm:$0xff]  }
  0x27   : > { %3605 = vmatmul.mubr.msk.bf16.gmra.mrb[4].mxu1 %vm617_vm2, %v3961_v10  ;;  %3492 = vmatprep.mubr.msk.bf16.mxu0 %vm4034_vm0, %v5050_v1  ;;  %v3974_v10 = vld [vmem:[%s4100_s4 + $0x50] sm:$0xff]   ;;  %v486_v36 = vshrl.u32 %v3977_v28, 16 }
  0x28   : > { %3608 = vmatprep.mubr.msk.bf16.mxu1 %vm4034_vm0, %v5050_v1  ;;  %3713 = vmatpush3.bf16.msra.mxu0 %v3979_v37  ;;  %v458_v13 = vshll.u32 %v3974_v10, 16  ;;  %v462_v18 = vshrl.u32 %v3974_v10, 16  ;;  %v490_v37 = vshll.u32 %v3978_v34, 16 }
  0x29   : > { %3829 = vmatpush3.bf16.msra.mxu1 %v3980_v38  ;;  %3714 = vmatprep.subr.bf16.mxu0 %v5050_v1 }
  0x2a   : > { %3830 = vmatprep.subr.bf16.mxu1 %v5050_v1  ;;  %v460_v15 = vrot.slane %v458_v13, 1  ;;  %v492_v39 = vrot.slane %v490_v37, 1  ;;  %v3987_v13 = vld [vmem:[%s4100_s4 + $0xa8] sm:$0xff]  }
  0x2b   : > { %v3993_v37 = vld [vmem:[%s4100_s4 + $0xc8] sm:$0xff]  }
  0x2c   : > { %3715 = vmatpush3.bf16.msra.mxu0 %v3988_v51  ;;  %v464_v20 = vor.u32 %v462_v18, %v460_v15  ;;  %v508_v51 = vrot.slane %v506_v49, 1  ;;  %v1277_v49 = vld [vmem:[%s4100_s4 + $0x8] sm:$0xc] }
  0x2d   : > { %3831 = vmatpush3.bf16.msra.mxu1 %v3989_v52  ;;  %v3983_v52 = vld [vmem:[%s4100_s4 + $0x88] sm:$0xff]  }
  0x2e   : > { %3493 = vmatmul.mubr.msk.bf16.gmra.mrb[8].mxu0 %vm617_vm2, %v405_v35  ;;  %v469_v23 = vsel %vm377_vm1, %v464_v20, %v468_v21  ;;  %v518_v60 = vshrl.u32 %v3983_v52, 16  ;;  %v550_v21 = vshrl.u32 %v3987_v13, 16 }
  0x2f   : > { %3609 = vmatmul.mubr.msk.bf16.gmra.mrb[8].mxu1 %vm617_vm2, %v3964_v14  ;;  %3496 = vmatprep.mubr.msk.bf16.mxu0 %vm4034_vm0, %v5050_v1  ;;  %v456_v14 = vor.u32 %v454_v12, %v452_v9  ;;  %v534_v9 = vshrl.u32 %v3985_v0, 16 }
  0x30   : > { %3612 = vmatprep.mubr.msk.bf16.mxu1 %vm4034_vm0, %v5050_v1 }
  0x31   : > { %v461_v17 = vsel %vm377_vm1, %v456_v14, %v460_v15  ;;  %v542_v15 = vshrl.u32 %v3986_v7, 16 }
  0x36   : > { %3497 = vmatmul.mubr.msk.bf16.gmra.mrb[12].mxu0 %vm617_vm2, %v413_v42  ;;  %v494_v42 = vshrl.u32 %v3978_v34, 16 }
  0x37   : > { %3613 = vmatmul.mubr.msk.bf16.gmra.mrb[12].mxu1 %vm617_vm2, %v3965_v25  ;;  %3500 = vmatprep.mubr.msk.bf16.mxu0 %vm4034_vm0, %v5050_v1  ;;  %v474_v25 = vshll.u32 %v3976_v22, 16 }
  0x38   : > { %3616 = vmatprep.mubr.msk.bf16.mxu1 %vm4034_vm0, %v5050_v1  ;;  %v496_v44 = vor.u32 %v494_v42, %v492_v39 }
  0x39   : > { %v476_v27 = vrot.slane %v474_v25, 1  ;;  %v3991_v25 = vld [vmem:[%s4100_s4 + $0xb8] sm:$0xff]  }
  0x3b   : > { %v477_v29 = vsel %vm377_vm1, %v472_v26, %v476_v27  ;;  %v480_v32 = vor.u32 %v478_v30, %v476_v27  ;;  %v558_v27 = vshrl.u32 %v3990_v19, 16 }
  0x3e   : > { %3501 = vmatmul.mubr.msk.bf16.gmra.mrb[16].mxu0 %vm617_vm2, %v421_v48 }
  0x3f   : > { %3617 = vmatmul.mubr.msk.bf16.gmra.mrb[16].mxu1 %vm617_vm2, %v3966_v31  ;;  %3504 = vmatprep.mubr.msk.bf16.mxu0 %vm4034_vm0, %v5050_v1  ;;  %v482_v31 = vshll.u32 %v3977_v28, 16 }
  0x40   : > { %3620 = vmatprep.mubr.msk.bf16.mxu1 %vm4034_vm0, %v5050_v1 }
  0x41   : > { %v484_v33 = vrot.slane %v482_v31, 1  ;;  %v3992_v31 = vld [vmem:[%s4100_s4 + $0xc0] sm:$0xff]  }
  0x43   : > { %v485_v35 = vsel %vm377_vm1, %v480_v32, %v484_v33  ;;  %v488_v38 = vor.u32 %v486_v36, %v484_v33  ;;  %v566_v33 = vshrl.u32 %v3991_v25, 16 }
  0x45   : > { %v493_v41 = vsel %vm377_vm1, %v488_v38, %v492_v39  ;;  %v574_v39 = vshrl.u32 %v3992_v31, 16 }
  0x46   : > { %3505 = vmatmul.mubr.msk.bf16.gmra.mrb[20].mxu0 %vm617_vm2, %v429_v56  ;;  %v512_v56 = vor.u32 %v510_v54, %v508_v51 }
  0x47   : > { %3621 = vmatmul.mubr.msk.bf16.gmra.mrb[20].mxu1 %vm617_vm2, %v3967_v40  ;;  %3508 = vmatprep.mubr.msk.bf16.mxu0 %vm4034_vm0, %v5050_v1  ;;  %v3981_v40 = vld [vmem:[%s4100_s4 + $0x78] sm:$0xff]  }
  0x48   : > { %3624 = vmatprep.mubr.msk.bf16.mxu1 %vm4034_vm0, %v5050_v1  ;;  %v498_v43 = vshll.u32 %v3981_v40, 16  ;;  %v502_v48 = vshrl.u32 %v3981_v40, 16 }
  0x4a   : > { %v500_v45 = vrot.slane %v498_v43, 1  ;;  %v3994_v43 = vld [vmem:[%s4100_s4 + $0xd0] ss:$0 sps:$4 sm:$0x77]  }
  0x4b   : > { %v590_v54 = vshrl.u32 %v3994_v43, 16 }
  0x4c   : > { %v504_v50 = vor.u32 %v502_v48, %v500_v45 }
  0x4e   : > { %3509 = vmatmul.mubr.msk.bf16.gmra.mrb[24].mxu0 %vm617_vm2, %v437_v62  ;;  %v509_v53 = vsel %vm377_vm1, %v504_v50, %v508_v51  ;;  %v1278_v50 = vld [vmem:[%s4100_s4 + $0xc] sm:$0xf]  ;;  %v4344_v51 = vld [vmem:[%s4100_s4 + $0x10] sm:$0xff]  }
  0x4f   : > { %3625 = vmatmul.mubr.msk.bf16.gmra.mrb[24].mxu1 %vm617_vm2, %v3968_v47  ;;  %3512 = vmatprep.mubr.msk.bf16.mxu0 %vm4034_vm0, %v5050_v1  ;;  %v501_v47 = vsel %vm377_vm1, %v496_v44, %v500_v45  ;;  %v582_v45 = vshrl.u32 %v3993_v37, 16 }
  0x50   : > { %3628 = vmatprep.mubr.msk.bf16.mxu1 %vm4034_vm0, %v5050_v1 }
  0x56   : > { %3513 = vmatmul.mubr.msk.bf16.gmra.mrb[28].mxu0 %vm617_vm2, %v445_v5 }
  0x57   : > { %3629 = vmatmul.mubr.msk.bf16.gmra.mrb[28].mxu1 %vm617_vm2, %v3969_v55  ;;  %3516 = vmatprep.mubr.msk.bf16.mxu0 %vm4034_vm0, %v5050_v1  ;;  %v514_v55 = vshll.u32 %v3983_v52, 16 }
  0x58   : > { %3632 = vmatprep.mubr.msk.bf16.mxu1 %vm4034_vm0, %v5050_v1 }
  0x59   : > { %v516_v57 = vrot.slane %v514_v55, 1  ;;  %v1485_v55 = vshrl.u32 %v4344_v51, 16 }
  0x5b   : > { %v517_v59 = vsel %vm377_vm1, %v512_v56, %v516_v57  ;;  %v520_v62 = vor.u32 %v518_v60, %v516_v57  ;;  %v1488_v56 = vshll.u32 %v4344_v51, 16  ;;  %v3995_v60 = vld [vmem:[%s4100_s4 + $0xd0] ss:$0 sps:$4 sm:$0x33]  }
  0x5e   : > { %3517 = vmatmul.mubr.msk.bf16.gmra.mrb[32].mxu0 %vm617_vm2, %v453_v11 }
  0x5f   : > { %3633 = vmatmul.mubr.msk.bf16.gmra.mrb[32].mxu1 %vm617_vm2, %v3971_v61  ;;  %3520 = vmatprep.mubr.msk.bf16.mxu0 %vm4034_vm0, %v5050_v1  ;;  %v522_v61 = vshll.u32 %v3984_v58, 16 }
  0x60   : > { %3636 = vmatprep.mubr.msk.bf16.mxu1 %vm4034_vm0, %v5050_v1 }
  0x61   : > { %v524_v63 = vrot.slane %v522_v61, 1 }
  0x63   : > { %v525_v2 = vsel %vm377_vm1, %v520_v62, %v524_v63  ;;  %v528_v5 = vor.u32 %v526_v3, %v524_v63  ;;  %v1487_v62 = vrot.slane %v1485_v55, 2  ;;  %v1490_v63 = vrot.slane %v1488_v56, 3 }
  0x66   : > { %3521 = vmatmul.mubr.msk.bf16.gmra.mrb[36].mxu0 %vm617_vm2, %v461_v17 }
  0x67   : > { %3637 = vmatmul.mubr.msk.bf16.gmra.mrb[36].mxu1 %vm617_vm2, %v3973_v4  ;;  %3524 = vmatprep.mubr.msk.bf16.mxu0 %vm4034_vm0, %v5050_v1  ;;  %v530_v4 = vshll.u32 %v3985_v0, 16 }
  0x68   : > { %3640 = vmatprep.mubr.msk.bf16.mxu1 %vm4034_vm0, %v5050_v1 }
  0x69   : > { %v532_v6 = vrot.slane %v530_v4, 1  ;;  %v4358_v4 = vld [vmem:[%s4100_s4 + $0x18] sm:$0xff]  }
  0x6b   : > { %v533_v8 = vsel %vm377_vm1, %v528_v5, %v532_v6  ;;  %v536_v11 = vor.u32 %v534_v9, %v532_v6  ;;  %v1491_v5 = vor.u32 %v1490_v63, %v1487_v62  ;;  %v1494_v9 = vshrl.u32 %v4358_v4, 16 }
  0x6e   : > { %3525 = vmatmul.mubr.msk.bf16.gmra.mrb[40].mxu0 %vm617_vm2, %v469_v23 }
  0x6f   : > { %3641 = vmatmul.mubr.msk.bf16.gmra.mrb[40].mxu1 %vm617_vm2, %v3974_v10  ;;  %3528 = vmatprep.mubr.msk.bf16.mxu0 %vm4034_vm0, %v5050_v1  ;;  %v538_v10 = vshll.u32 %v3986_v7, 16 }
  0x70   : > { %3644 = vmatprep.mubr.msk.bf16.mxu1 %vm4034_vm0, %v5050_v1 }
  0x71   : > { %v540_v12 = vrot.slane %v538_v10, 1  ;;  %v1497_v10 = vshll.u32 %v4358_v4, 16 }
  0x73   : > { %v541_v14 = vsel %vm377_vm1, %v536_v11, %v540_v12  ;;  %v544_v17 = vor.u32 %v542_v15, %v540_v12 }
  0x76   : > { %3529 = vmatmul.mubr.msk.bf16.gmra.mrb[44].mxu0 %vm617_vm2, %v477_v29 }
  0x77   : > { %3645 = vmatmul.mubr.msk.bf16.gmra.mrb[44].mxu1 %vm617_vm2, %v3975_v16  ;;  %3532 = vmatprep.mubr.msk.bf16.mxu0 %vm4034_vm0, %v5050_v1  ;;  %v546_v16 = vshll.u32 %v3987_v13, 16 }
  0x78   : > { %3648 = vmatprep.mubr.msk.bf16.mxu1 %vm4034_vm0, %v5050_v1 }
  0x79   : > { %v548_v18 = vrot.slane %v546_v16, 1 }
  0x7b   : > { %v549_v20 = vsel %vm377_vm1, %v544_v17, %v548_v18  ;;  %v552_v23 = vor.u32 %v550_v21, %v548_v18  ;;  %v1496_v21 = vrot.slane %v1494_v9, 2 }
  0x7e   : > { %3533 = vmatmul.mubr.msk.bf16.gmra.mrb[48].mxu0 %vm617_vm2, %v485_v35 }
  0x7f   : > { %3649 = vmatmul.mubr.msk.bf16.gmra.mrb[48].mxu1 %vm617_vm2, %v3976_v22  ;;  %3536 = vmatprep.mubr.msk.bf16.mxu0 %vm4034_vm0, %v5050_v1  ;;  %v554_v22 = vshll.u32 %v3990_v19, 16 }
  0x80   : > { %3652 = vmatprep.mubr.msk.bf16.mxu1 %vm4034_vm0, %v5050_v1 }
  0x81   : > { %v556_v24 = vrot.slane %v554_v22, 1  ;;  %v1499_v22 = vrot.slane %v1497_v10, 3 }
  0x83   : > { %v557_v26 = vsel %vm377_vm1, %v552_v23, %v556_v24  ;;  %v560_v29 = vor.u32 %v558_v27, %v556_v24  ;;  %v4374_v23 = vld [vmem:[%s4100_s4 + $0x20] sm:$0xff]   ;;  %v1500_v27 = vor.u32 %v1499_v22, %v1496_v21 }
  0x86   : > { %3537 = vmatmul.mubr.msk.bf16.gmra.mrb[52].mxu0 %vm617_vm2, %v493_v41 }
  0x87   : > { %3653 = vmatmul.mubr.msk.bf16.gmra.mrb[52].mxu1 %vm617_vm2, %v3977_v28  ;;  %3540 = vmatprep.mubr.msk.bf16.mxu0 %vm4034_vm0, %v5050_v1  ;;  %v562_v28 = vshll.u32 %v3991_v25, 16 }
  0x88   : > { %3656 = vmatprep.mubr.msk.bf16.mxu1 %vm4034_vm0, %v5050_v1 }
  0x89   : > { %v564_v30 = vrot.slane %v562_v28, 1  ;;  %v1503_v28 = vshrl.u32 %v4374_v23, 16 }
  0x8b   : > { %v565_v32 = vsel %vm377_vm1, %v560_v29, %v564_v30  ;;  %v568_v35 = vor.u32 %v566_v33, %v564_v30  ;;  %v1506_v29 = vshll.u32 %v4374_v23, 16 }
  0x8e   : > { %3541 = vmatmul.mubr.msk.bf16.gmra.mrb[56].mxu0 %vm617_vm2, %v501_v47 }
  0x8f   : > { %3657 = vmatmul.mubr.msk.bf16.gmra.mrb[56].mxu1 %vm617_vm2, %v3978_v34  ;;  %3544 = vmatprep.mubr.msk.bf16.mxu0 %vm4034_vm0, %v5050_v1  ;;  %v570_v34 = vshll.u32 %v3992_v31, 16 }
  0x90   : > { %3660 = vmatprep.mubr.msk.bf16.mxu1 %vm4034_vm0, %v5050_v1 }
  0x91   : > { %v572_v36 = vrot.slane %v570_v34, 1 }
  0x93   : > { %v573_v38 = vsel %vm377_vm1, %v568_v35, %v572_v36  ;;  %v576_v41 = vor.u32 %v574_v39, %v572_v36  ;;  %v1501_v39 = vsel %vm1475_vm4, %v1491_v5, %v1500_v27 }
  0x96   : > { %3545 = vmatmul.mubr.msk.bf16.gmra.mrb[60].mxu0 %vm617_vm2, %v509_v53  ;;  %v3145_v53 = vcombine.low %v1277_v49, %v1278_v50 }
  0x97   : > { %3661 = vmatmul.mubr.msk.bf16.gmra.mrb[60].mxu1 %vm617_vm2, %v3981_v40  ;;  %3548 = vmatprep.mubr.msk.bf16.mxu0 %vm4034_vm0, %v5050_v1  ;;  %v578_v40 = vshll.u32 %v3993_v37, 16 }
  0x98   : > { %3664 = vmatprep.mubr.msk.bf16.mxu1 %vm4034_vm0, %v5050_v1  ;;  %v1477_v57 = vshrl.u32 %v3145_v53, 16 }
  0x99   : > { %v580_v42 = vrot.slane %v578_v40, 1  ;;  %v1505_v40 = vrot.slane %v1503_v28, 2 }
  0x9b   : > { %v581_v44 = vsel %vm377_vm1, %v576_v41, %v580_v42  ;;  %v584_v47 = vor.u32 %v582_v45, %v580_v42  ;;  %v1508_v41 = vrot.slane %v1506_v29, 3  ;;  %v4392_v42 = vld [vmem:[%s4100_s4 + $0x28] sm:$0xff]   ;;  %v2143_v45 = vrot.slane %v4374_v23, 3 }
  0x9e   : > { %3549 = vmatmul.mubr.msk.bf16.gmra.mrb[64].mxu0 %vm617_vm2, %v517_v59  ;;  %v2124_v59 = vld [vmem:[%s4100_s4 + $0x8] sm:$0x8] }
  0x9f   : > { %3665 = vmatmul.mubr.msk.bf16.gmra.mrb[64].mxu1 %vm617_vm2, %v3982_v46  ;;  %3552 = vmatprep.mubr.msk.bf16.mxu0 %vm4034_vm0, %v5050_v1  ;;  %v586_v46 = vshll.u32 %v3994_v43, 16 }
  0xa0   : > { %3668 = vmatprep.mubr.msk.bf16.mxu1 %vm4034_vm0, %v5050_v1 }
  0xa1   : > { %v588_v48 = vrot.slane %v586_v46, 1  ;;  %v1509_v46 = vor.u32 %v1508_v41, %v1505_v40 }
  0xa3   : > { %v592_v61 = vor.u32 %v590_v54, %v588_v48 }
  0xa6   : > { %3553 = vmatmul.mubr.msk.bf16.gmra.mrb[68].mxu0 %vm617_vm2, %v525_v2  ;;  %v1479_v2 = vrot.slane %v1477_v57, 2 }
  0xa7   : > { %3669 = vmatmul.mubr.msk.bf16.gmra.mrb[68].mxu1 %vm617_vm2, %v3983_v52  ;;  %3556 = vmatprep.mubr.msk.bf16.mxu0 %vm4034_vm0, %v5050_v1  ;;  %v589_v52 = vsel %vm377_vm1, %v584_v47, %v588_v48  ;;  %v1512_v47 = vshrl.u32 %v4392_v42, 16  ;;  %v1515_v48 = vshll.u32 %v4392_v42, 16 }
  0xa8   : > { %3672 = vmatprep.mubr.msk.bf16.mxu1 %vm4034_vm0, %v5050_v1 }
  0xae   : > { %3557 = vmatmul.mubr.msk.bf16.gmra.mrb[72].mxu0 %vm617_vm2, %v533_v8 }
  0xaf   : > { %3673 = vmatmul.mubr.msk.bf16.gmra.mrb[72].mxu1 %vm617_vm2, %v3984_v58  ;;  %3560 = vmatprep.mubr.msk.bf16.mxu0 %vm4034_vm0, %v5050_v1  ;;  %v1480_v58 = vshll.u32 %v3145_v53, 16 }
  0xb0   : > { %3676 = vmatprep.mubr.msk.bf16.mxu1 %vm4034_vm0, %v5050_v1 }
  0xb1   : > { %v1482_v3 = vrot.slane %v1480_v58, 3  ;;  %v1510_v58 = vsel %vm1475_vm4, %v1500_v27, %v1509_v46 }
  0xb3   : > { %v1483_v8 = vor.u32 %v1482_v3, %v1479_v2 }
  0xb6   : > { %3561 = vmatmul.mubr.msk.bf16.gmra.mrb[76].mxu0 %vm617_vm2, %v541_v14 }
  0xb7   : > { %3677 = vmatmul.mubr.msk.bf16.gmra.mrb[76].mxu1 %vm617_vm2, %v3985_v0  ;;  %3564 = vmatprep.mubr.msk.bf16.mxu0 %vm4034_vm0, %v5050_v1  ;;  %v3211_v0 = vcombine.low %v2124_v59, %v1278_v50  ;;  %v1514_v59 = vrot.slane %v1512_v47, 2 }
  0xb8   : > { %3680 = vmatprep.mubr.msk.bf16.mxu1 %vm4034_vm0, %v5050_v1 }
  0xb9   : > { %v2138_v6 = vrot.slane %v3211_v0, 3  ;;  %v2145_v0 = vrot.slane %v4392_v42, 3 }
  0xbe   : > { %3565 = vmatmul.mubr.msk.bf16.gmra.mrb[80].mxu0 %vm617_vm2, %v549_v20  ;;  %v1492_v20 = vsel %vm1475_vm4, %v1483_v8, %v1491_v5 }
  0xbf   : > { %3681 = vmatmul.mubr.msk.bf16.gmra.mrb[80].mxu1 %vm617_vm2, %v3986_v7  ;;  %3568 = vmatprep.mubr.msk.bf16.mxu0 %vm4034_vm0, %v5050_v1  ;;  %v2139_v7 = vrot.slane %v4344_v51, 3 }
  0xc0   : > { %3684 = vmatprep.mubr.msk.bf16.mxu1 %vm4034_vm0, %v5050_v1 }
  0xc1   : > { %v2140_v17 = vsel %vm2137_vm3, %v2138_v6, %v2139_v7 }
  0xc6   : > { %3569 = vmatmul.mubr.msk.bf16.gmra.mrb[84].mxu0 %vm617_vm2, %v557_v26  ;;  %v2141_v26 = vrot.slane %v4358_v4, 3 }
  0xc7   : > { %3685 = vmatmul.mubr.msk.bf16.gmra.mrb[84].mxu1 %vm617_vm2, %v3987_v13  ;;  %3572 = vmatprep.mubr.msk.bf16.mxu0 %vm4034_vm0, %v5050_v1 }
  0xc8   : > { %3688 = vmatprep.mubr.msk.bf16.mxu1 %vm4034_vm0, %v5050_v1  ;;  %v2142_v36 = vsel %vm2137_vm3, %v2139_v7, %v2141_v26  ;;  %v2144_v55 = vsel %vm2137_vm3, %v2141_v26, %v2143_v45 }
  0xce   : > { %3573 = vmatmul.mubr.msk.bf16.gmra.mrb[88].mxu0 %vm617_vm2, %v565_v32 }
  0xcf   : > { %3689 = vmatmul.mubr.msk.bf16.gmra.mrb[88].mxu1 %vm617_vm2, %v3990_v19  ;;  %3576 = vmatprep.mubr.msk.bf16.mxu0 %vm4034_vm0, %v5050_v1 }
  0xd0   : > { %3692 = vmatprep.mubr.msk.bf16.mxu1 %vm4034_vm0, %v5050_v1 }
  0xd6   : > { %3577 = vmatmul.mubr.msk.bf16.gmra.mrb[92].mxu0 %vm617_vm2, %v573_v38 }
  0xd7   : > { %3693 = vmatmul.mubr.msk.bf16.gmra.mrb[92].mxu1 %vm617_vm2, %v3991_v25  ;;  %3580 = vmatprep.mubr.msk.bf16.mxu0 %vm4034_vm0, %v5050_v1 }
  0xd8   : > { %3696 = vmatprep.mubr.msk.bf16.mxu1 %vm4034_vm0, %v5050_v1 }
  0xde   : > { %3581 = vmatmul.mubr.msk.bf16.gmra.mrb[96].mxu0 %vm617_vm2, %v581_v44 }
  0xdf   : > { %3697 = vmatmul.mubr.msk.bf16.gmra.mrb[96].mxu1 %vm617_vm2, %v3992_v31  ;;  %3584 = vmatprep.mubr.msk.bf16.mxu0 %vm4034_vm0, %v5050_v1 }
  0xe0   : > { %3700 = vmatprep.mubr.msk.bf16.mxu1 %vm4034_vm0, %v5050_v1 }
  0xe6   : > { %3585 = vmatmul.mubr.msk.bf16.gmra.mrb[100].mxu0 %vm617_vm2, %v589_v52 }
  0xe7   : > { %3701 = vmatmul.mubr.msk.bf16.gmra.mrb[100].mxu1 %vm617_vm2, %v3993_v37  ;;  %3588 = vmatprep.mubr.msk.bf16.mxu0 %vm4034_vm0, %v5050_v1 }
  0xe8   : > { %3704 = vmatprep.mubr.msk.bf16.mxu1 %vm4034_vm0, %v5050_v1 }
  0xee   : > { %3589 = vmatmul.mubr.msk.bf16.gmra.mrb[104].mxu0 %vm617_vm2, %v592_v61  ;;  %v4410_v61 = vld [vmem:[%s4100_s4 + $0x30] sm:$0xff]  }
  0xef   : > { %3705 = vmatmul.mubr.msk.bf16.gmra.mrb[104].mxu1 %vm617_vm2, %v3995_v60  ;;  %3716 = vmatprep.mubr.msk.bf16.mxu0 %vm4034_vm0, %v5050_v1  ;;  %v1517_v60 = vrot.slane %v1515_v48, 3  ;;  %v1521_v3 = vshrl.u32 %v4410_v61, 16  ;;  %v1524_v4 = vshll.u32 %v4410_v61, 16  ;;  %v2147_v21 = vrot.slane %v4410_v61, 3 }
  0xf0   : > { %3832 = vmatprep.mubr.msk.bf16.mxu1 %vm4034_vm0, %v5050_v1 }
  0xf1   : > { %v733_v12 = vpop.f32.mrb[0].mxu0  ;;  %v1518_v2 = vor.u32 %v1517_v60, %v1514_v59  ;;  %v4464_v60 = vld [vmem:[%s4100_s4 + $0x48] sm:$0xff]  }
  0xf2   : > { %v1063_v11 = vpop.f32.mrb[0].mxu1  ;;  %v3486_v15 = vpop.f32.mrb[1].mxu0 }
  0xf3   : > { %v3602_v13 = vpop.f32.mrb[1].mxu1  ;;  %v4369_v14 = vadd.f32 %v1063_v11, %v733_v12  ;;  %v736_v18 = vpop.f32.mrb[2].mxu0  ;;  %v2146_v11 = vsel %vm2137_vm3, %v2143_v45, %v2145_v0  ;;  %v1519_v15 = vsel %vm1475_vm4, %v1509_v46, %v1518_v2 }
  0xf4   : > { %v1066_v16 = vpop.f32.mrb[2].mxu1  ;;  %v3487_v25 = vpop.f32.mrb[3].mxu0 }
  0xf5   : > { %v3603_v19 = vpop.f32.mrb[3].mxu1  ;;  %v4376_v24 = vadd.f32 %v1066_v16, %v736_v18  ;;  %v1523_v16 = vrot.slane %v1521_v3, 2  ;;  %v4428_v18 = vld [vmem:[%s4100_s4 + $0x38] sm:$0xff]   ;;  %v1548_v3 = vshrl.u32 %v4464_v60, 16 }
  0xf6   : > { %3717 = vmatmul.mubr.msk.bf16.vlgmr.msra.gmra.mrb[108].mxu0 %vm617_vm2, %v1492_v20  ;;  %v1530_v23 = vshrl.u32 %v4428_v18, 16  ;;  %v1533_v25 = vshll.u32 %v4428_v18, 16  ;;  %v2149_v42 = vrot.slane %v4428_v18, 3 }
  0xf7   : > { %3833 = vmatmul.mubr.msk.bf16.vlgmr.msra.gmra.mrb[108].mxu1 %vm617_vm2, %v2140_v17  ;;  %3720 = vmatprep.mubr.msk.bf16.mxu0 %vm4034_vm0, %v5050_v1  ;;  %v1526_v17 = vrot.slane %v1524_v4, 3  ;;  %v1551_v4 = vshll.u32 %v4464_v60, 16 }
  0xf8   : > { %3836 = vmatprep.mubr.msk.bf16.mxu1 %vm4034_vm0, %v5050_v1 }
  0xf9   : > { %v741_v31 = vpop.f32.mrb[4].mxu0  ;;  %v1527_v22 = vor.u32 %v1526_v17, %v1523_v16  ;;  %v1550_v17 = vrot.slane %v1548_v3, 2  ;;  %v1553_v18 = vrot.slane %v1551_v4, 3  ;;  %v4518_v4 = vld [vmem:[%s4100_s4 + $0x60] sm:$0xff]  }
  0xfa   : > { %v1071_v30 = vpop.f32.mrb[4].mxu1  ;;  %v3490_v34 = vpop.f32.mrb[5].mxu0 }
  0xfb   : > { %v3606_v32 = vpop.f32.mrb[5].mxu1  ;;  %v4387_v33 = vadd.f32 %v1071_v30, %v741_v31  ;;  %v744_v37 = vpop.f32.mrb[6].mxu0 }
  0xfc   : > { %v1074_v35 = vpop.f32.mrb[6].mxu1  ;;  %v3491_v44 = vpop.f32.mrb[7].mxu0  ;;  %v2148_v32 = vsel %vm2137_vm3, %v2145_v0, %v2147_v21 }
  0xfd   : > { %v3607_v38 = vpop.f32.mrb[7].mxu1  ;;  %v4394_v43 = vadd.f32 %v1074_v35, %v744_v37  ;;  %v1532_v37 = vrot.slane %v1530_v23, 2  ;;  %v2153_v23 = vrot.slane %v4464_v60, 3 }
  0xfe   : > { %3721 = vmatmul.mubr.msk.bf16.gmra.mrb[112].mxu0 %vm617_vm2, %v1501_v39  ;;  %v1535_v38 = vrot.slane %v1533_v25, 3  ;;  %v4446_v39 = vld [vmem:[%s4100_s4 + $0x40] sm:$0xff]   ;;  %v1554_v25 = vor.u32 %v1553_v18, %v1550_v17 }
  0xff   : > { %3837 = vmatmul.mubr.msk.bf16.gmra.mrb[112].mxu1 %vm617_vm2, %v2142_v36  ;;  %3724 = vmatprep.mubr.msk.bf16.mxu0 %vm4034_vm0, %v5050_v1  ;;  %v1528_v36 = vsel %vm1475_vm4, %v1518_v2, %v1527_v22  ;;  %v1539_v45 = vshrl.u32 %v4446_v39, 16  ;;  %v1542_v46 = vshll.u32 %v4446_v39, 16  ;;  %v2151_v0 = vrot.slane %v4446_v39, 3 }
 0x100   : > { %3840 = vmatprep.mubr.msk.bf16.mxu1 %vm4034_vm0, %v5050_v1  ;;  %v1536_v44 = vor.u32 %v1535_v38, %v1532_v37 }
 0x101   : > { %v749_v50 = vpop.f32.mrb[8].mxu0  ;;  %v1544_v59 = vrot.slane %v1542_v46, 3 }
 0x102   : > { %v1079_v49 = vpop.f32.mrb[8].mxu1  ;;  %v3494_v53 = vpop.f32.mrb[9].mxu0 }
 0x103   : > { %v3610_v51 = vpop.f32.mrb[9].mxu1  ;;  %v4405_v52 = vadd.f32 %v1079_v49, %v749_v50  ;;  %v752_v56 = vpop.f32.mrb[10].mxu0 }
 0x104   : > { %v1082_v54 = vpop.f32.mrb[10].mxu1  ;;  %v3495_v63 = vpop.f32.mrb[11].mxu0 }
 0x105   : > { %v3611_v57 = vpop.f32.mrb[11].mxu1  ;;  %v4412_v62 = vadd.f32 %v1082_v54, %v752_v56  ;;  %v2150_v54 = vsel %vm2137_vm3, %v2147_v21, %v2149_v42 }
 0x106   : > { %3725 = vmatmul.mubr.msk.bf16.gmra.mrb[116].mxu0 %vm617_vm2, %v1510_v58  ;;  %v1537_v57 = vsel %vm1475_vm4, %v1527_v22, %v1536_v44  ;;  %v1541_v58 = vrot.slane %v1539_v45, 2 }
 0x107   : > { %3841 = vmatmul.mubr.msk.bf16.gmra.mrb[116].mxu1 %vm617_vm2, %v2144_v55  ;;  %3728 = vmatprep.mubr.msk.bf16.mxu0 %vm4034_vm0, %v5050_v1 }
 0x108   : > { %3844 = vmatprep.mubr.msk.bf16.mxu1 %vm4034_vm0, %v5050_v1  ;;  %v1545_v2 = vor.u32 %v1544_v59, %v1541_v58 }
 0x109   : > { %v757_v6 = vpop.f32.mrb[12].mxu0 }
 0x10a   : > { %v1087_v5 = vpop.f32.mrb[12].mxu1  ;;  %v3498_v9 = vpop.f32.mrb[13].mxu0  ;;  %v1546_v16 = vsel %vm1475_vm4, %v1536_v44, %v1545_v2  ;;  %v1555_v39 = vsel %vm1475_vm4, %v1545_v2, %v1554_v25  ;;  %v4500_v44 = vld [vmem:[%s4100_s4 + $0x58] sm:$0xff]  }
 0x10b   : > { %v3614_v7 = vpop.f32.mrb[13].mxu1  ;;  %v4423_v8 = vadd.f32 %v1087_v5, %v757_v6  ;;  %v760_v12 = vpop.f32.mrb[14].mxu0 }
 0x10c   : > { %v1090_v10 = vpop.f32.mrb[14].mxu1  ;;  %v3499_v20 = vpop.f32.mrb[15].mxu0 }
 0x10d   : > { %v3615_v13 = vpop.f32.mrb[15].mxu1  ;;  %v4430_v19 = vadd.f32 %v1090_v10, %v760_v12  ;;  %v2152_v12 = vsel %vm2137_vm3, %v2149_v42, %v2151_v0  ;;  %v4482_v20 = vld [vmem:[%s4100_s4 + $0x50] sm:$0xff]  }
 0x10e   : > { %3729 = vmatmul.mubr.msk.bf16.gmra.mrb[120].mxu0 %vm617_vm2, %v1519_v15 }
 0x10f   : > { %3845 = vmatmul.mubr.msk.bf16.gmra.mrb[120].mxu1 %vm617_vm2, %v2146_v11  ;;  %3732 = vmatprep.mubr.msk.bf16.mxu0 %vm4034_vm0, %v5050_v1 }
 0x110   : > { %3848 = vmatprep.mubr.msk.bf16.mxu1 %vm4034_vm0, %v5050_v1 }
 0x111   : > { %v765_v27 = vpop.f32.mrb[16].mxu0 }
 0x112   : > { %v1095_v26 = vpop.f32.mrb[16].mxu1  ;;  %v3502_v30 = vpop.f32.mrb[17].mxu0 }
 0x113   : > { %v3618_v28 = vpop.f32.mrb[17].mxu1  ;;  %v4441_v29 = vadd.f32 %v1095_v26, %v765_v27  ;;  %v768_v34 = vpop.f32.mrb[18].mxu0  ;;  %v1557_v26 = vshrl.u32 %v4482_v20, 16  ;;  %v1560_v27 = vshll.u32 %v4482_v20, 16 }
 0x114   : > { %v1098_v31 = vpop.f32.mrb[18].mxu1  ;;  %v3503_v41 = vpop.f32.mrb[19].mxu0 }
 0x115   : > { %v3619_v35 = vpop.f32.mrb[19].mxu1  ;;  %v4448_v40 = vadd.f32 %v1098_v31, %v768_v34  ;;  %v1559_v41 = vrot.slane %v1557_v26, 2  ;;  %v1562_v42 = vrot.slane %v1560_v27, 3 }
 0x116   : > { %3733 = vmatmul.mubr.msk.bf16.gmra.mrb[124].mxu0 %vm617_vm2, %v1528_v36  ;;  %v2154_v36 = vsel %vm2137_vm3, %v2151_v0, %v2153_v23 }
 0x117   : > { %3849 = vmatmul.mubr.msk.bf16.gmra.mrb[124].mxu1 %vm617_vm2, %v2148_v32  ;;  %3736 = vmatprep.mubr.msk.bf16.mxu0 %vm4034_vm0, %v5050_v1 }
 0x118   : > { %3852 = vmatprep.mubr.msk.bf16.mxu1 %vm4034_vm0, %v5050_v1 }
 0x119   : > { %v773_v48 = vpop.f32.mrb[20].mxu0 }
 0x11a   : > { %v1103_v47 = vpop.f32.mrb[20].mxu1  ;;  %v3506_v51 = vpop.f32.mrb[21].mxu0 }
 0x11b   : > { %v3622_v49 = vpop.f32.mrb[21].mxu1  ;;  %v4459_v50 = vadd.f32 %v1103_v47, %v773_v48  ;;  %v776_v55 = vpop.f32.mrb[22].mxu0  ;;  %v2155_v47 = vrot.slane %v4482_v20, 3  ;;  %v1563_v48 = vor.u32 %v1562_v42, %v1559_v41  ;;  %v1569_v51 = vshll.u32 %v4500_v44, 16 }
 0x11c   : > { %v1106_v53 = vpop.f32.mrb[22].mxu1  ;;  %v3507_v63 = vpop.f32.mrb[23].mxu0  ;;  %v1566_v49 = vshrl.u32 %v4500_v44, 16 }
 0x11d   : > { %v3623_v56 = vpop.f32.mrb[23].mxu1  ;;  %v4466_v61 = vadd.f32 %v1106_v53, %v776_v55  ;;  %v2156_v59 = vsel %vm2137_vm3, %v2153_v23, %v2155_v47  ;;  %v1564_v0 = vsel %vm1475_vm4, %v1554_v25, %v1563_v48  ;;  %v1571_v3 = vrot.slane %v1569_v51, 3 }
 0x11e   : > { %3737 = vmatmul.mubr.msk.bf16.gmra.mrb[128].mxu0 %vm617_vm2, %v1537_v57  ;;  %v1568_v2 = vrot.slane %v1566_v49, 2 }
 0x11f   : > { %3853 = vmatmul.mubr.msk.bf16.gmra.mrb[128].mxu1 %vm617_vm2, %v2150_v54  ;;  %3740 = vmatprep.mubr.msk.bf16.mxu0 %vm4034_vm0, %v5050_v1 }
 0x120   : > { %3856 = vmatprep.mubr.msk.bf16.mxu1 %vm4034_vm0, %v5050_v1 }
 0x121   : > { %v781_v6 = vpop.f32.mrb[24].mxu0 }
 0x122   : > { %v1111_v5 = vpop.f32.mrb[24].mxu1  ;;  %v3510_v10 = vpop.f32.mrb[25].mxu0 }
 0x123   : > { %v3626_v7 = vpop.f32.mrb[25].mxu1  ;;  %v4477_v9 = vadd.f32 %v1111_v5, %v781_v6  ;;  %v784_v13 = vpop.f32.mrb[26].mxu0  ;;  %v1572_v10 = vor.u32 %v1571_v3, %v1568_v2 }
 0x124   : > { %v1114_v11 = vpop.f32.mrb[26].mxu1  ;;  %v3511_v22 = vpop.f32.mrb[27].mxu0  ;;  %v2157_v7 = vrot.slane %v4500_v44, 3 }
 0x125   : > { %v3627_v15 = vpop.f32.mrb[27].mxu1  ;;  %v4484_v21 = vadd.f32 %v1114_v11, %v784_v13  ;;  %v1575_v11 = vshrl.u32 %v4518_v4, 16  ;;  %v1573_v26 = vsel %vm1475_vm4, %v1563_v48, %v1572_v10 }
 0x126   : > { %3741 = vmatmul.mubr.msk.bf16.gmra.mrb[132].mxu0 %vm617_vm2, %v1546_v16  ;;  %v2158_v22 = vsel %vm2137_vm3, %v2155_v47, %v2157_v7 }
 0x127   : > { %3857 = vmatmul.mubr.msk.bf16.gmra.mrb[132].mxu1 %vm617_vm2, %v2152_v12  ;;  %3744 = vmatprep.mubr.msk.bf16.mxu0 %vm4034_vm0, %v5050_v1  ;;  %v1578_v12 = vshll.u32 %v4518_v4, 16  ;;  %v1577_v27 = vrot.slane %v1575_v11, 2 }
 0x128   : > { %3860 = vmatprep.mubr.msk.bf16.mxu1 %vm4034_vm0, %v5050_v1 }
 0x129   : > { %v789_v30 = vpop.f32.mrb[28].mxu0 }
 0x12a   : > { %v1119_v28 = vpop.f32.mrb[28].mxu1  ;;  %v3514_v34 = vpop.f32.mrb[29].mxu0 }
 0x12b   : > { %v3630_v31 = vpop.f32.mrb[29].mxu1  ;;  %v4495_v32 = vadd.f32 %v1119_v28, %v789_v30  ;;  %v792_v37 = vpop.f32.mrb[30].mxu0  ;;  %v1580_v28 = vrot.slane %v1578_v12, 3  ;;  %v4536_v30 = vld [vmem:[%s4100_s4 + $0x68] sm:$0xff]  }
 0x12c   : > { %v1122_v35 = vpop.f32.mrb[30].mxu1  ;;  %v3515_v46 = vpop.f32.mrb[31].mxu0 }
 0x12d   : > { %v3631_v38 = vpop.f32.mrb[31].mxu1  ;;  %v4502_v45 = vadd.f32 %v1122_v35, %v792_v37  ;;  %v2159_v35 = vrot.slane %v4518_v4, 3  ;;  %v1584_v37 = vshrl.u32 %v4536_v30, 16 }
 0x12e   : > { %3745 = vmatmul.mubr.msk.bf16.gmra.mrb[136].mxu0 %vm617_vm2, %v1555_v39  ;;  %v1587_v38 = vshll.u32 %v4536_v30, 16 }
 0x12f   : > { %3861 = vmatmul.mubr.msk.bf16.gmra.mrb[136].mxu1 %vm617_vm2, %v2154_v36  ;;  %3748 = vmatprep.mubr.msk.bf16.mxu0 %vm4034_vm0, %v5050_v1  ;;  %v1581_v36 = vor.u32 %v1580_v28, %v1577_v27  ;;  %v2160_v48 = vsel %vm2137_vm3, %v2157_v7, %v2159_v35 }
 0x130   : > { %3864 = vmatprep.mubr.msk.bf16.mxu1 %vm4034_vm0, %v5050_v1 }
 0x131   : > { %v797_v54 = vpop.f32.mrb[32].mxu0 }
 0x132   : > { %v1127_v53 = vpop.f32.mrb[32].mxu1  ;;  %v3518_v57 = vpop.f32.mrb[33].mxu0 }
 0x133   : > { %v3634_v55 = vpop.f32.mrb[33].mxu1  ;;  %v4513_v56 = vadd.f32 %v1127_v53, %v797_v54  ;;  %v800_v60 = vpop.f32.mrb[34].mxu0  ;;  %v1582_v53 = vsel %vm1475_vm4, %v1572_v10, %v1581_v36  ;;  %v1586_v54 = vrot.slane %v1584_v37, 2  ;;  %v4554_v57 = vld [vmem:[%s4100_s4 + $0x70] sm:$0xff]  }
 0x134   : > { %v1130_v58 = vpop.f32.mrb[34].mxu1  ;;  %v3519_v6 = vpop.f32.mrb[35].mxu0  ;;  %v1589_v55 = vrot.slane %v1587_v38, 3  ;;  %v1596_v2 = vshll.u32 %v4554_v57, 16 }
 0x135   : > { %v3635_v63 = vpop.f32.mrb[35].mxu1  ;;  %v4520_v5 = vadd.f32 %v1130_v58, %v800_v60  ;;  %v2161_v60 = vrot.slane %v4536_v30, 3 }
 0x136   : > { %3749 = vmatmul.mubr.msk.bf16.gmra.mrb[140].mxu0 %vm617_vm2, %v1564_v0  ;;  %v1590_v63 = vor.u32 %v1589_v55, %v1586_v54  ;;  %v1593_v0 = vshrl.u32 %v4554_v57, 16 }
 0x137   : > { %3865 = vmatmul.mubr.msk.bf16.gmra.mrb[140].mxu1 %vm617_vm2, %v2156_v59  ;;  %3752 = vmatprep.mubr.msk.bf16.mxu0 %vm4034_vm0, %v5050_v1  ;;  %v2162_v12 = vsel %vm2137_vm3, %v2159_v35, %v2161_v60 }
 0x138   : > { %3868 = vmatprep.mubr.msk.bf16.mxu1 %vm4034_vm0, %v5050_v1 }
 0x139   : > { %v805_v15 = vpop.f32.mrb[36].mxu0 }
 0x13a   : > { %v1135_v13 = vpop.f32.mrb[36].mxu1  ;;  %v3522_v18 = vpop.f32.mrb[37].mxu0 }
 0x13b   : > { %v3638_v16 = vpop.f32.mrb[37].mxu1  ;;  %v4531_v17 = vadd.f32 %v1135_v13, %v805_v15  ;;  %v808_v23 = vpop.f32.mrb[38].mxu0  ;;  %v1595_v18 = vrot.slane %v1593_v0, 2 }
 0x13c   : > { %v1138_v20 = vpop.f32.mrb[38].mxu1  ;;  %v3523_v34 = vpop.f32.mrb[39].mxu0  ;;  %v1591_v16 = vsel %vm1475_vm4, %v1581_v36, %v1590_v63 }
 0x13d   : > { %v3639_v25 = vpop.f32.mrb[39].mxu1  ;;  %v4538_v31 = vadd.f32 %v1138_v20, %v808_v23  ;;  %v1598_v20 = vrot.slane %v1596_v2, 3 }
 0x13e   : > { %3753 = vmatmul.mubr.msk.bf16.gmra.mrb[144].mxu0 %vm617_vm2, %v1573_v26  ;;  %v2163_v26 = vrot.slane %v4554_v57, 3 }
 0x13f   : > { %3869 = vmatmul.mubr.msk.bf16.gmra.mrb[144].mxu1 %vm617_vm2, %v2158_v22  ;;  %3756 = vmatprep.mubr.msk.bf16.mxu0 %vm4034_vm0, %v5050_v1  ;;  %v4572_v22 = vld [vmem:[%s4100_s4 + $0x78] sm:$0xff]   ;;  %v1599_v27 = vor.u32 %v1598_v20, %v1595_v18  ;;  %v4608_v18 = vld [vmem:[%s4100_s4 + $0x88] sm:$0xff]  }
 0x140   : > { %3872 = vmatprep.mubr.msk.bf16.mxu1 %vm4034_vm0, %v5050_v1  ;;  %v1602_v28 = vshrl.u32 %v4572_v22, 16  ;;  %v1605_v30 = vshll.u32 %v4572_v22, 16  ;;  %v2165_v55 = vrot.slane %v4572_v22, 3 }
 0x141   : > { %v813_v41 = vpop.f32.mrb[40].mxu0 }
 0x142   : > { %v1143_v39 = vpop.f32.mrb[40].mxu1  ;;  %v3526_v46 = vpop.f32.mrb[41].mxu0 }
 0x143   : > { %v3642_v42 = vpop.f32.mrb[41].mxu1  ;;  %v4549_v44 = vadd.f32 %v1143_v39, %v813_v41  ;;  %v816_v49 = vpop.f32.mrb[42].mxu0  ;;  %v2164_v41 = vsel %vm2137_vm3, %v2161_v60, %v2163_v26 }
 0x144   : > { %v1146_v47 = vpop.f32.mrb[42].mxu1  ;;  %v3527_v59 = vpop.f32.mrb[43].mxu0 }
 0x145   : > { %v3643_v51 = vpop.f32.mrb[43].mxu1  ;;  %v4556_v58 = vadd.f32 %v1146_v47, %v816_v49  ;;  %v1600_v47 = vsel %vm1475_vm4, %v1590_v63, %v1599_v27  ;;  %v1607_v49 = vrot.slane %v1605_v30, 3 }
 0x146   : > { %3757 = vmatmul.mubr.msk.bf16.gmra.mrb[148].mxu0 %vm617_vm2, %v1582_v53  ;;  %v4590_v51 = vld [vmem:[%s4100_s4 + $0x80] sm:$0xff]  }
 0x147   : > { %3873 = vmatmul.mubr.msk.bf16.gmra.mrb[148].mxu1 %vm617_vm2, %v2160_v48  ;;  %3760 = vmatprep.mubr.msk.bf16.mxu0 %vm4034_vm0, %v5050_v1  ;;  %v1604_v48 = vrot.slane %v1602_v28, 2  ;;  %v1611_v59 = vshrl.u32 %v4590_v51, 16  ;;  %v1614_v60 = vshll.u32 %v4590_v51, 16  ;;  %v1623_v28 = vshll.u32 %v4608_v18, 16 }
 0x148   : > { %3876 = vmatprep.mubr.msk.bf16.mxu1 %vm4034_vm0, %v5050_v1 }
 0x149   : > { %v821_v4 = vpop.f32.mrb[44].mxu0  ;;  %v1608_v57 = vor.u32 %v1607_v49, %v1604_v48  ;;  %v1625_v49 = vrot.slane %v1623_v28, 3 }
 0x14a   : > { %v1151_v3 = vpop.f32.mrb[44].mxu1  ;;  %v3530_v10 = vpop.f32.mrb[45].mxu0 }
 0x14b   : > { %v3646_v6 = vpop.f32.mrb[45].mxu1  ;;  %v4567_v7 = vadd.f32 %v1151_v3, %v821_v4  ;;  %v824_v13 = vpop.f32.mrb[46].mxu0  ;;  %v2166_v10 = vsel %vm2137_vm3, %v2163_v26, %v2165_v55 }
 0x14c   : > { %v1154_v11 = vpop.f32.mrb[46].mxu1  ;;  %v3531_v25 = vpop.f32.mrb[47].mxu0 }
 0x14d   : > { %v3647_v15 = vpop.f32.mrb[47].mxu1  ;;  %v4574_v23 = vadd.f32 %v1154_v11, %v824_v13  ;;  %v1609_v13 = vsel %vm1475_vm4, %v1599_v27, %v1608_v57  ;;  %v2167_v25 = vrot.slane %v4590_v51, 3  ;;  %v1620_v27 = vshrl.u32 %v4608_v18, 16  ;;  %v4626_v51 = vld [vmem:[%s4100_s4 + $0x90] sm:$0xff]  }
 0x14e   : > { %3761 = vmatmul.mubr.msk.bf16.gmra.mrb[152].mxu0 %vm617_vm2, %v1591_v16  ;;  %v1613_v15 = vrot.slane %v1611_v59, 2  ;;  %v1616_v16 = vrot.slane %v1614_v60, 3  ;;  %v1629_v60 = vshrl.u32 %v4626_v51, 16 }
 0x14f   : > { %3877 = vmatmul.mubr.msk.bf16.gmra.mrb[152].mxu1 %vm617_vm2, %v2162_v12  ;;  %3764 = vmatprep.mubr.msk.bf16.mxu0 %vm4034_vm0, %v5050_v1  ;;  %v1622_v48 = vrot.slane %v1620_v27, 2  ;;  %v4644_v27 = vld [vmem:[%s4100_s4 + $0x98] sm:$0xff]  }
 0x150   : > { %3880 = vmatprep.mubr.msk.bf16.mxu1 %vm4034_vm0, %v5050_v1  ;;  %v1617_v26 = vor.u32 %v1616_v16, %v1613_v15 }
 0x151   : > { %v829_v35 = vpop.f32.mrb[48].mxu0 }
 0x152   : > { %v1159_v34 = vpop.f32.mrb[48].mxu1  ;;  %v3534_v38 = vpop.f32.mrb[49].mxu0 }
 0x153   : > { %v3650_v36 = vpop.f32.mrb[49].mxu1  ;;  %v4585_v37 = vadd.f32 %v1159_v34, %v829_v35  ;;  %v832_v42 = vpop.f32.mrb[50].mxu0 }
 0x154   : > { %v1162_v39 = vpop.f32.mrb[50].mxu1  ;;  %v3535_v54 = vpop.f32.mrb[51].mxu0 }
 0x155   : > { %v3651_v46 = vpop.f32.mrb[51].mxu1  ;;  %v4592_v53 = vadd.f32 %v1162_v39, %v832_v42 }
 0x156   : > { %3765 = vmatmul.mubr.msk.bf16.gmra.mrb[156].mxu0 %vm617_vm2, %v1600_v47  ;;  %v1618_v47 = vsel %vm1475_vm4, %v1608_v57, %v1617_v26  ;;  %v1626_v57 = vor.u32 %v1625_v49, %v1622_v48 }
 0x157   : > { %3881 = vmatmul.mubr.msk.bf16.gmra.mrb[156].mxu1 %vm617_vm2, %v2164_v41  ;;  %3768 = vmatprep.mubr.msk.bf16.mxu0 %vm4034_vm0, %v5050_v1  ;;  %v2168_v41 = vsel %vm2137_vm3, %v2165_v55, %v2167_v25  ;;  %v2169_v55 = vrot.slane %v4608_v18, 3  ;;  %v1631_v18 = vrot.slane %v1629_v60, 2 }
 0x158   : > { %3884 = vmatprep.mubr.msk.bf16.mxu1 %vm4034_vm0, %v5050_v1  ;;  %v1627_v16 = vsel %vm1475_vm4, %v1617_v26, %v1626_v57 }
 0x159   : > { %v837_v0 = vpop.f32.mrb[52].mxu0 }
 0x15a   : > { %v1167_v63 = vpop.f32.mrb[52].mxu1  ;;  %v3538_v4 = vpop.f32.mrb[53].mxu0 }
 0x15b   : > { %v3654_v2 = vpop.f32.mrb[53].mxu1  ;;  %v4603_v3 = vadd.f32 %v1167_v63, %v837_v0  ;;  %v840_v11 = vpop.f32.mrb[54].mxu0  ;;  %v1632_v63 = vshll.u32 %v4626_v51, 16 }
 0x15c   : > { %v1170_v6 = vpop.f32.mrb[54].mxu1  ;;  %v3539_v22 = vpop.f32.mrb[55].mxu0 }
 0x15d   : > { %v3655_v12 = vpop.f32.mrb[55].mxu1  ;;  %v4610_v20 = vadd.f32 %v1170_v6, %v840_v11  ;;  %v1634_v22 = vrot.slane %v1632_v63, 3 }
 0x15e   : > { %3769 = vmatmul.mubr.msk.bf16.gmra.mrb[160].mxu0 %vm617_vm2, %v1609_v13  ;;  %v2170_v12 = vsel %vm2137_vm3, %v2167_v25, %v2169_v55  ;;  %v2171_v25 = vrot.slane %v4626_v51, 3 }
 0x15f   : > { %3885 = vmatmul.mubr.msk.bf16.gmra.mrb[160].mxu1 %vm617_vm2, %v2166_v10  ;;  %3772 = vmatprep.mubr.msk.bf16.mxu0 %vm4034_vm0, %v5050_v1  ;;  %v1635_v26 = vor.u32 %v1634_v22, %v1631_v18 }
 0x160   : > { %3888 = vmatprep.mubr.msk.bf16.mxu1 %vm4034_vm0, %v5050_v1  ;;  %v2172_v48 = vsel %vm2137_vm3, %v2169_v55, %v2171_v25  ;;  %v2173_v55 = vrot.slane %v4644_v27, 3 }
 0x161   : > { %v845_v34 = vpop.f32.mrb[56].mxu0 }
 0x162   : > { %v1175_v30 = vpop.f32.mrb[56].mxu1  ;;  %v3542_v38 = vpop.f32.mrb[57].mxu0 }
 0x163   : > { %v3658_v35 = vpop.f32.mrb[57].mxu1  ;;  %v4621_v36 = vadd.f32 %v1175_v30, %v845_v34  ;;  %v848_v42 = vpop.f32.mrb[58].mxu0  ;;  %v1638_v34 = vshrl.u32 %v4644_v27, 16 }
 0x164   : > { %v1178_v39 = vpop.f32.mrb[58].mxu1  ;;  %v3543_v59 = vpop.f32.mrb[59].mxu0  ;;  %v1641_v35 = vshll.u32 %v4644_v27, 16 }
 0x165   : > { %v3659_v46 = vpop.f32.mrb[59].mxu1  ;;  %v4628_v54 = vadd.f32 %v1178_v39, %v848_v42  ;;  %v1636_v59 = vsel %vm1475_vm4, %v1626_v57, %v1635_v26  ;;  %v1640_v60 = vrot.slane %v1638_v34, 2 }
 0x166   : > { %3773 = vmatmul.mubr.msk.bf16.gmra.mrb[164].mxu0 %vm617_vm2, %v1618_v47  ;;  %v1643_v63 = vrot.slane %v1641_v35, 3 }
 0x167   : > { %3889 = vmatmul.mubr.msk.bf16.gmra.mrb[164].mxu1 %vm617_vm2, %v2168_v41  ;;  %3776 = vmatprep.mubr.msk.bf16.mxu0 %vm4034_vm0, %v5050_v1 }
 0x168   : > { %3892 = vmatprep.mubr.msk.bf16.mxu1 %vm4034_vm0, %v5050_v1  ;;  %v1644_v57 = vor.u32 %v1643_v63, %v1640_v60 }
 0x169   : > { %v853_v2 = vpop.f32.mrb[60].mxu0 }
 0x16a   : > { %v1183_v0 = vpop.f32.mrb[60].mxu1  ;;  %v3546_v10 = vpop.f32.mrb[61].mxu0  ;;  %v1645_v35 = vsel %vm1475_vm4, %v1635_v26, %v1644_v57 }
 0x16b   : > { %v3662_v4 = vpop.f32.mrb[61].mxu1  ;;  %v4639_v6 = vadd.f32 %v1183_v0, %v853_v2  ;;  %v856_v13 = vpop.f32.mrb[62].mxu0  ;;  %v4662_v0 = vld [vmem:[%s4100_s4 + $0xa0] sm:$0xff]  }
 0x16c   : > { %v1186_v11 = vpop.f32.mrb[62].mxu1  ;;  %v3547_v30 = vpop.f32.mrb[63].mxu0  ;;  %v1647_v10 = vshrl.u32 %v4662_v0, 16 }
 0x16d   : > { %v3663_v15 = vpop.f32.mrb[63].mxu1  ;;  %v4646_v28 = vadd.f32 %v1186_v11, %v856_v13  ;;  %v1650_v11 = vshll.u32 %v4662_v0, 16  ;;  %v2174_v30 = vsel %vm2137_vm3, %v2171_v25, %v2173_v55  ;;  %v2175_v25 = vrot.slane %v4662_v0, 3 }
 0x16e   : > { %3777 = vmatmul.mubr.msk.bf16.gmra.mrb[168].mxu0 %vm617_vm2, %v1627_v16 }
 0x16f   : > { %3893 = vmatmul.mubr.msk.bf16.gmra.mrb[168].mxu1 %vm617_vm2, %v2170_v12  ;;  %3780 = vmatprep.mubr.msk.bf16.mxu0 %vm4034_vm0, %v5050_v1 }
 0x170   : > { %3896 = vmatprep.mubr.msk.bf16.mxu1 %vm4034_vm0, %v5050_v1 }
 0x171   : > { %v861_v39 = vpop.f32.mrb[64].mxu0 }
 0x172   : > { %v1191_v38 = vpop.f32.mrb[64].mxu1  ;;  %v3550_v46 = vpop.f32.mrb[65].mxu0 }
 0x173   : > { %v3666_v41 = vpop.f32.mrb[65].mxu1  ;;  %v4657_v42 = vadd.f32 %v1191_v38, %v861_v39  ;;  %v864_v49 = vpop.f32.mrb[66].mxu0  ;;  %v1649_v38 = vrot.slane %v1647_v10, 2  ;;  %v1652_v39 = vrot.slane %v1650_v11, 3  ;;  %v2176_v11 = vsel %vm2137_vm3, %v2173_v55, %v2175_v25 }
 0x174   : > { %v1194_v47 = vpop.f32.mrb[66].mxu1  ;;  %v3551_v4 = vpop.f32.mrb[67].mxu0  ;;  %v4680_v41 = vld [vmem:[%s4100_s4 + $0xa8] sm:$0xff]  }
 0x175   : > { %v3667_v51 = vpop.f32.mrb[67].mxu1  ;;  %v4664_v2 = vadd.f32 %v1194_v47, %v864_v49  ;;  %v1653_v26 = vor.u32 %v1652_v39, %v1649_v38  ;;  %v1659_v49 = vshll.u32 %v4680_v41, 16  ;;  %v2177_v55 = vrot.slane %v4680_v41, 3 }
 0x176   : > { %3781 = vmatmul.mubr.msk.bf16.gmra.mrb[172].mxu0 %vm617_vm2, %v1636_v59 }
 0x177   : > { %3897 = vmatmul.mubr.msk.bf16.gmra.mrb[172].mxu1 %vm617_vm2, %v2172_v48  ;;  %3784 = vmatprep.mubr.msk.bf16.mxu0 %vm4034_vm0, %v5050_v1  ;;  %v1656_v48 = vshrl.u32 %v4680_v41, 16 }
 0x178   : > { %3900 = vmatprep.mubr.msk.bf16.mxu1 %vm4034_vm0, %v5050_v1 }
 0x179   : > { %v869_v13 = vpop.f32.mrb[68].mxu0 }
 0x17a   : > { %v1199_v12 = vpop.f32.mrb[68].mxu1  ;;  %v3554_v18 = vpop.f32.mrb[69].mxu0 }
 0x17b   : > { %v3670_v15 = vpop.f32.mrb[69].mxu1  ;;  %v4675_v16 = vadd.f32 %v1199_v12, %v869_v13  ;;  %v872_v34 = vpop.f32.mrb[70].mxu0  ;;  %v1654_v13 = vsel %vm1475_vm4, %v1644_v57, %v1653_v26  ;;  %v1661_v18 = vrot.slane %v1659_v49, 3 }
 0x17c   : > { %v1202_v22 = vpop.f32.mrb[70].mxu1  ;;  %v3555_v47 = vpop.f32.mrb[71].mxu0  ;;  %v1658_v15 = vrot.slane %v1656_v48, 2 }
 0x17d   : > { %v3671_v27 = vpop.f32.mrb[71].mxu1  ;;  %v4682_v46 = vadd.f32 %v1202_v22, %v872_v34  ;;  %v4698_v22 = vld [vmem:[%s4100_s4 + $0xb0] sm:$0xff]  }
 0x17e   : > { %3785 = vmatmul.mubr.msk.bf16.gmra.mrb[176].mxu0 %vm617_vm2, %v1645_v35  ;;  %v1662_v57 = vor.u32 %v1661_v18, %v1658_v15  ;;  %v1665_v27 = vshrl.u32 %v4698_v22, 16  ;;  %v1668_v35 = vshll.u32 %v4698_v22, 16 }
 0x17f   : > { %3901 = vmatmul.mubr.msk.bf16.gmra.mrb[176].mxu1 %vm617_vm2, %v2174_v30  ;;  %3788 = vmatprep.mubr.msk.bf16.mxu0 %vm4034_vm0, %v5050_v1 }
 0x180   : > { %3904 = vmatprep.mubr.msk.bf16.mxu1 %vm4034_vm0, %v5050_v1 }
 0x181   : > { %v877_v59 = vpop.f32.mrb[72].mxu0 }
 0x182   : > { %v1207_v51 = vpop.f32.mrb[72].mxu1  ;;  %v3558_v4 = vpop.f32.mrb[73].mxu0 }
 0x183   : > { %v3674_v60 = vpop.f32.mrb[73].mxu1  ;;  %v4693_v63 = vadd.f32 %v1207_v51, %v877_v59  ;;  %v880_v12 = vpop.f32.mrb[74].mxu0  ;;  %v2178_v59 = vsel %vm2137_vm3, %v2175_v25, %v2177_v55  ;;  %v1663_v4 = vsel %vm1475_vm4, %v1653_v26, %v1662_v57  ;;  %v2179_v25 = vrot.slane %v4698_v22, 3 }
 0x184   : > { %v1210_v10 = vpop.f32.mrb[74].mxu1  ;;  %v3559_v34 = vpop.f32.mrb[75].mxu0 }
 0x185   : > { %v3675_v0 = vpop.f32.mrb[75].mxu1  ;;  %v4700_v30 = vadd.f32 %v1210_v10, %v880_v12  ;;  %v1667_v10 = vrot.slane %v1665_v27, 2  ;;  %v4716_v12 = vld [vmem:[%s4100_s4 + $0xb8] sm:$0xff]  }
 0x186   : > { %3789 = vmatmul.mubr.msk.bf16.gmra.mrb[180].mxu0 %vm617_vm2, %v1654_v13  ;;  %v1674_v15 = vshrl.u32 %v4716_v12, 16  ;;  %v1677_v18 = vshll.u32 %v4716_v12, 16 }
 0x187   : > { %3905 = vmatmul.mubr.msk.bf16.gmra.mrb[180].mxu1 %vm617_vm2, %v2176_v11  ;;  %3792 = vmatprep.mubr.msk.bf16.mxu0 %vm4034_vm0, %v5050_v1  ;;  %v1670_v11 = vrot.slane %v1668_v35, 3 }
 0x188   : > { %3908 = vmatprep.mubr.msk.bf16.mxu1 %vm4034_vm0, %v5050_v1 }
 0x189   : > { %v885_v39 = vpop.f32.mrb[76].mxu0  ;;  %v1671_v26 = vor.u32 %v1670_v11, %v1667_v10 }
 0x18a   : > { %v1215_v38 = vpop.f32.mrb[76].mxu1  ;;  %v3562_v49 = vpop.f32.mrb[77].mxu0 }
 0x18b   : > { %v3678_v47 = vpop.f32.mrb[77].mxu1  ;;  %v4711_v48 = vadd.f32 %v1215_v38, %v885_v39  ;;  %v888_v60 = vpop.f32.mrb[78].mxu0  ;;  %v2180_v49 = vsel %vm2137_vm3, %v2177_v55, %v2179_v25  ;;  %v2181_v55 = vrot.slane %v4716_v12, 3 }
 0x18c   : > { %v1218_v51 = vpop.f32.mrb[78].mxu1  ;;  %v3563_v13 = vpop.f32.mrb[79].mxu0 }
 0x18d   : > { %v3679_v41 = vpop.f32.mrb[79].mxu1  ;;  %v4718_v0 = vadd.f32 %v1218_v51, %v888_v60  ;;  %v1676_v60 = vrot.slane %v1674_v15, 2 }
 0x18e   : > { %3793 = vmatmul.mubr.msk.bf16.gmra.mrb[184].mxu0 %vm617_vm2, %v1663_v4  ;;  %v1679_v41 = vrot.slane %v1677_v18, 3  ;;  %v4734_v4 = vld [vmem:[%s4100_s4 + $0xc0] sm:$0xff]  }
 0x18f   : > { %3909 = vmatmul.mubr.msk.bf16.gmra.mrb[184].mxu1 %vm617_vm2, %v2178_v59  ;;  %3796 = vmatprep.mubr.msk.bf16.mxu0 %vm4034_vm0, %v5050_v1  ;;  %v1672_v59 = vsel %vm1475_vm4, %v1662_v57, %v1671_v26  ;;  %v1683_v13 = vshrl.u32 %v4734_v4, 16  ;;  %v1686_v15 = vshll.u32 %v4734_v4, 16 }
 0x190   : > { %3912 = vmatprep.mubr.msk.bf16.mxu1 %vm4034_vm0, %v5050_v1  ;;  %v1680_v57 = vor.u32 %v1679_v41, %v1676_v60  ;;  %v4752_v60 = vld [vmem:[%s4100_s4 + $0xc8] sm:$0xff]  }
 0x191   : > { %v893_v27 = vpop.f32.mrb[80].mxu0 }
 0x192   : > { %v1223_v34 = vpop.f32.mrb[80].mxu1  ;;  %v3566_v39 = vpop.f32.mrb[81].mxu0 }
 0x193   : > { %v3682_v35 = vpop.f32.mrb[81].mxu1  ;;  %v4729_v38 = vadd.f32 %v1223_v34, %v893_v27  ;;  %v896_v51 = vpop.f32.mrb[82].mxu0 }
 0x194   : > { %v1226_v47 = vpop.f32.mrb[82].mxu1  ;;  %v3567_v11 = vpop.f32.mrb[83].mxu0 }
 0x195   : > { %5052 = vst [vmem:[#allocation2_spill] sm:$0xff] %v4729_v38  ;;  %v3683_v22 = vpop.f32.mrb[83].mxu1  ;;  %v4736_v10 = vadd.f32 %v1226_v47, %v896_v51  ;;  %v1688_v11 = vrot.slane %v1686_v15, 3  ;;  %v1695_v15 = vshll.u32 %v4752_v60, 16 }
 0x196   : > { %3797 = vmatmul.mubr.msk.bf16.gmra.mrb[188].mxu0 %vm617_vm2, %v1672_v59  ;;  %v1681_v22 = vsel %vm1475_vm4, %v1671_v26, %v1680_v57  ;;  %v1685_v59 = vrot.slane %v1683_v13, 2  ;;  %v1692_v13 = vshrl.u32 %v4752_v60, 16 }
 0x197   : > { %5053 = vst [vmem:[#allocation3_spill] sm:$0xff] %v4736_v10  ;;  %3913 = vmatmul.mubr.msk.bf16.gmra.mrb[188].mxu1 %vm617_vm2, %v2180_v49  ;;  %3800 = vmatprep.mubr.msk.bf16.mxu0 %vm4034_vm0, %v5050_v1  ;;  %v2182_v49 = vsel %vm2137_vm3, %v2179_v25, %v2181_v55  ;;  %v2183_v25 = vrot.slane %v4734_v4, 3 }
 0x198   : > { %3916 = vmatprep.mubr.msk.bf16.mxu1 %vm4034_vm0, %v5050_v1  ;;  %v1689_v26 = vor.u32 %v1688_v11, %v1685_v59  ;;  %v4022_v59 = vld [vmem:[%s4100_s4 + $0xd0] sm:$0xff]  }
 0x199   : > { %v901_v34 = vpop.f32.mrb[84].mxu0 }
 0x19a   : > { %v1231_v18 = vpop.f32.mrb[84].mxu1  ;;  %v3570_v39 = vpop.f32.mrb[85].mxu0 }
 0x19b   : > { %v3686_v27 = vpop.f32.mrb[85].mxu1  ;;  %v4747_v35 = vadd.f32 %v1231_v18, %v901_v34  ;;  %v904_v51 = vpop.f32.mrb[86].mxu0  ;;  %v5056_v18 = vmov 0.0  }
 0x19c   : > { %v1234_v47 = vpop.f32.mrb[86].mxu1  ;;  %v3571_v1 = vpop.f32.mrb[87].mxu0 }
 0x19d   : > { %5054 = vst [vmem:[#allocation4_spill] sm:$0xff] %v4747_v35  ;;  %v3687_v12 = vpop.f32.mrb[87].mxu1  ;;  %v4754_v41 = vadd.f32 %v1234_v47, %v904_v51  ;;  %v2184_v51 = vsel %vm2137_vm3, %v2181_v55, %v2183_v25  ;;  %v1697_v35 = vrot.slane %v1695_v15, 3 }
 0x19e   : > { %3801 = vmatmul.mubr.msk.bf16.gmra.mrb[192].mxu0 %vm617_vm2, %v1681_v22  ;;  %v1690_v22 = vsel %vm1475_vm4, %v1680_v57, %v1689_v26  ;;  %v1701_v57 = vshrl.u32 %v4022_v59, 16 }
 0x19f   : > { %5055 = vst [vmem:[#allocation5_spill] sm:$0xff] %v4754_v41  ;;  %3917 = vmatmul.mubr.msk.bf16.gmra.mrb[192].mxu1 %vm617_vm2, %v2182_v49  ;;  %3804 = vmatprep.mubr.msk.bf16.mxu0 %vm4034_vm0, %v5056_v18  ;;  %v1694_v41 = vrot.slane %v1692_v13, 2  ;;  %v1704_v13 = vshll.u32 %v4022_v59, 16 }
 0x1a0   : > { %3920 = vmatprep.mubr.msk.bf16.mxu1 %vm4034_vm0, %v5056_v18 }
 0x1a1   : > { %v909_v1 = vpop.f32.mrb[88].mxu0  ;;  %v1698_v55 = vor.u32 %v1697_v35, %v1694_v41  ;;  %v2187_v41 = vrot.slane %v4022_v59, 3 }
 0x1a2   : > { %v1239_v34 = vpop.f32.mrb[88].mxu1  ;;  %v3574_v47 = vpop.f32.mrb[89].mxu0 }
 0x1a3   : > { %v3690_v27 = vpop.f32.mrb[89].mxu1  ;;  %v4765_v39 = vadd.f32 %v1239_v34, %v909_v1  ;;  %v912_v12 = vpop.f32.mrb[90].mxu0  ;;  %v2185_v34 = vrot.slane %v4752_v60, 3  ;;  %v1699_v60 = vsel %vm1475_vm4, %v1689_v26, %v1698_v55 }
 0x1a4   : > { %v1242_v49 = vpop.f32.mrb[90].mxu1  ;;  %v3575_v10 = vpop.f32.mrb[91].mxu0 }
 0x1a5   : > { %5057 = vst [vmem:[#allocation6_spill] sm:$0xff] %v4765_v39  ;;  %v3691_v4 = vpop.f32.mrb[91].mxu1  ;;  %v4770_v11 = vadd.f32 %v1242_v49, %v912_v12  ;;  %v4023_v39 = vld [vmem:[%s4100_s4 + $0xd8] sm:$0x1f]  }
 0x1a6   : > { %3805 = vmatmul.mubr.msk.bf16.gmra.mrb[196].mxu0 %vm617_vm2, %v1690_v22  ;;  %v1703_v22 = vrot.slane %v1701_v57, 2  ;;  %v1713_v26 = vshll.u32 %v4023_v39, 16 }
 0x1a7   : > { %5058 = vst [vmem:[#allocation7_spill] sm:$0xff] %v4770_v11  ;;  %3921 = vmatmul.mubr.msk.bf16.gmra.mrb[196].mxu1 %vm617_vm2, %v2184_v51  ;;  %3808 = vmatprep.mubr.msk.bf16.mxu0 %vm4034_vm0, %v5056_v18  ;;  %v2186_v51 = vsel %vm2137_vm3, %v2183_v25, %v2185_v34  ;;  %v1706_v11 = vrot.slane %v1704_v13, 3 }
 0x1a8   : > { %3924 = vmatprep.mubr.msk.bf16.mxu1 %vm4034_vm0, %v5056_v18 }
 0x1a9   : > { %v917_v1 = vpop.f32.mrb[92].mxu0  ;;  %v1707_v25 = vor.u32 %v1706_v11, %v1703_v22  ;;  %v2189_v22 = vrot.slane %v4023_v39, 3 }
 0x1aa   : > { %v1247_v15 = vpop.f32.mrb[92].mxu1  ;;  %v3578_v47 = vpop.f32.mrb[93].mxu0 }
 0x1ab   : > { %v3694_v27 = vpop.f32.mrb[93].mxu1  ;;  %v4779_v10 = vadd.f32 %v1247_v15, %v917_v1  ;;  %v920_v12 = vpop.f32.mrb[94].mxu0  ;;  %v1710_v15 = vshrl.u32 %v4023_v39, 16 }
 0x1ac   : > { %v1250_v49 = vpop.f32.mrb[94].mxu1  ;;  %v3579_v35 = vpop.f32.mrb[95].mxu0 }
 0x1ad   : > { %v3695_v4 = vpop.f32.mrb[95].mxu1  ;;  %v4784_v38 = vadd.f32 %v1250_v49, %v920_v12  ;;  %v1712_v59 = vrot.slane %v1710_v15, 2  ;;  %v1715_v35 = vrot.slane %v1713_v26, 3 }
 0x1ae   : > { %3809 = vmatmul.mubr.msk.bf16.gmra.mrb[200].mxu0 %vm617_vm2, %v1699_v60  ;;  %v1708_v60 = vsel %vm1475_vm4, %v1698_v55, %v1707_v25 }
 0x1af   : > { %5059 = vst [vmem:[#allocation8_spill] sm:$0xff] %v4784_v38  ;;  %3925 = vmatmul.mubr.msk.bf16.gmra.mrb[200].mxu1 %vm617_vm2, %v2186_v51  ;;  %3812 = vmatprep.mubr.msk.bf16.mxu0 %vm4034_vm0, %v5056_v18  ;;  %v2188_v51 = vsel %vm2137_vm3, %v2185_v34, %v2187_v41  ;;  %v1716_v34 = vor.u32 %v1715_v35, %v1712_v59 }
 0x1b0   : > { %3928 = vmatprep.mubr.msk.bf16.mxu1 %vm4034_vm0, %v5056_v18 }
 0x1b1   : > { %v925_v13 = vpop.f32.mrb[96].mxu0 }
 0x1b2   : > { %v1255_v57 = vpop.f32.mrb[96].mxu1  ;;  %v3582_v47 = vpop.f32.mrb[97].mxu0 }
 0x1b3   : > { %v3698_v1 = vpop.f32.mrb[97].mxu1  ;;  %v4792_v27 = vadd.f32 %v1255_v57, %v925_v13  ;;  %v928_v12 = vpop.f32.mrb[98].mxu0  ;;  %v2190_v47 = vsel %vm2137_vm3, %v2187_v41, %v2189_v22 }
 0x1b4   : > { %v1258_v49 = vpop.f32.mrb[98].mxu1  ;;  %v3583_v11 = vpop.f32.mrb[99].mxu0 }
 0x1b5   : > { %v3699_v4 = vpop.f32.mrb[99].mxu1  ;;  %v4796_v38 = vadd.f32 %v1258_v49, %v928_v12  ;;  %v1717_v12 = vsel %vm1475_vm4, %v1707_v25, %v1716_v34 }
 0x1b6   : > { %3813 = vmatmul.mubr.msk.bf16.gmra.mrb[204].mxu0 %vm617_vm2, %v1708_v60 }
 0x1b7   : > { %3929 = vmatmul.mubr.msk.bf16.gmra.mrb[204].mxu1 %vm617_vm2, %v2188_v51  ;;  %3816 = vmatprep.mubr.msk.bf16.mxu0 %vm4034_vm0, %v5056_v18 }
 0x1b8   : > { %3932 = vmatprep.mubr.msk.bf16.mxu1 %vm4034_vm0, %v5056_v18 }
 0x1b9   : > { %v933_v13 = vpop.f32.mrb[100].mxu0 }
 0x1ba   : > { %v1263_v57 = vpop.f32.mrb[100].mxu1  ;;  %v3586_v26 = vpop.f32.mrb[101].mxu0 }
 0x1bb   : > { %v3702_v55 = vpop.f32.mrb[101].mxu1  ;;  %v4804_v15 = vadd.f32 %v1263_v57, %v933_v13  ;;  %v936_v49 = vpop.f32.mrb[102].mxu0 }
 0x1bc   : > { %v1266_v1 = vpop.f32.mrb[102].mxu1  ;;  %v3587_v39 = vpop.f32.mrb[103].mxu0 }
 0x1bd   : > { %v3703_v51 = vpop.f32.mrb[103].mxu1  ;;  %v4808_v4 = vadd.f32 %v1266_v1, %v936_v49 }
 0x1be   : > { %3817 = vmatmul.mubr.msk.bf16.gmra.mrb[208].mxu0 %vm617_vm2, %v1717_v12  ;;  %v4824_v12 = vld [vmem:[%s5048_s2] ss:$0 sm:$0xff] }
 0x1bf   : > { %3933 = vmatmul.mubr.msk.bf16.gmra.mrb[208].mxu1 %vm617_vm2, %v2190_v47  ;;  %3820 = vmatprep.mubr.msk.bf16.mxu0 %vm4034_vm0, %v5056_v18 }
 0x1c0   : > { %3936 = vmatprep.mubr.msk.bf16.mxu1 %vm4034_vm0, %v5056_v18 }
 0x1c1   : > { %v941_v59 = vpop.f32.mrb[104].mxu0 }
 0x1c2   : > { %v1271_v60 = vpop.f32.mrb[104].mxu1  ;;  %v3590_v11 = vpop.f32.mrb[105].mxu0 }
 0x1c3   : > { %v3706_v41 = vpop.f32.mrb[105].mxu1  ;;  %v4816_v35 = vadd.f32 %v1271_v60, %v941_v59  ;;  %v944_v57 = vpop.f32.mrb[106].mxu0 }
 0x1c4   : > { %v1274_v25 = vpop.f32.mrb[106].mxu1  ;;  %v3591_v55 = vpop.f32.mrb[107].mxu0 }
 0x1c5   : > { %v3707_v13 = vpop.f32.mrb[107].mxu1 }
 0x1c6   : > { %3821 = vmatmul.mubr.msk.bf16.gmra.mrb[212].mxu0 %vm617_vm2, %v1716_v34 }
 0x1c7   : > { %3937 = vmatmul.mubr.msk.bf16.gmra.mrb[212].mxu1 %vm617_vm2, %v2189_v22 }
 0x1c9   : > { %v1857_v1 = vpop.f32.mrb[108].mxu0 }
 0x1ca   : > { %v2330_v26 = vpop.f32.mrb[108].mxu1  ;;  %v2071_v18 = vadd.f32 %v1857_v1, %v4369_v14  ;;  %v3718_v49 = vpop.f32.mrb[109].mxu0 }
 0x1cb   : > { %v3834_v47 = vpop.f32.mrb[109].mxu1  ;;  %v1860_v39 = vpop.f32.mrb[110].mxu0 }
 0x1cc   : > { %v2333_v51 = vpop.f32.mrb[110].mxu1  ;;  %v2544_v59 = vadd.f32 %v2330_v26, %v2071_v18  ;;  %v2072_v41 = vadd.f32 %v1860_v39, %v4376_v24  ;;  %v3719_v22 = vpop.f32.mrb[111].mxu0 }
 0x1cd   : > { %v3835_v60 = vpop.f32.mrb[111].mxu1 }
 0x1ce   : > { %v2603_v34 = vadd.f32 %v4824_v12, %v2544_v59  ;;  %v2545_v11 = vadd.f32 %v2333_v51, %v2072_v41 }
 0x1d0   : > { %v2656_v25 = vmax.f32 %v2603_v34, 0.0  ;;  %v2604_v14 = vadd.f32 %v4824_v12, %v2545_v11 }
 0x1d1   : > { %v1865_v13 = vpop.f32.mrb[112].mxu0 }
 0x1d2   : > { %v2338_v57 = vpop.f32.mrb[112].mxu1  ;;  %v3299_v24 = vpack.c.bf16 %v2656_v25, %v2656_v25  ;;  %v2657_v26 = vmax.f32 %v2604_v14, 0.0  ;;  %v2073_v1 = vadd.f32 %v1865_v13, %v4387_v33  ;;  %v3722_v47 = vpop.f32.mrb[113].mxu0 }
 0x1d3   : > { %v3838_v55 = vpop.f32.mrb[113].mxu1  ;;  %v1868_v49 = vpop.f32.mrb[114].mxu0 }
 0x1d4   : > { %v2341_v18 = vpop.f32.mrb[114].mxu1  ;;  %2923 = vst.msk [vmem:[%s4833_s30] sm:$0xf] %vm2922_vm5, %v3299_v24  ;;  %v3300_v39 = vpack.c.bf16 %v2657_v26, %v2657_v26  ;;  %v2546_v60 = vadd.f32 %v2338_v57, %v2073_v1  ;;  %v2074_v59 = vadd.f32 %v1868_v49, %v4394_v43  ;;  %v3723_v41 = vpop.f32.mrb[115].mxu0 }
 0x1d5   : > { %v3839_v51 = vpop.f32.mrb[115].mxu1 }
 0x1d6   : > { %2924 = vst.msk [vmem:[%s4833_s30 + $0x4] sm:$0xf] %vm2922_vm5, %v3300_v39  ;;  %v2605_v22 = vadd.f32 %v4824_v12, %v2546_v60  ;;  %v2547_v34 = vadd.f32 %v2341_v18, %v2074_v59 }
 0x1d8   : > { %v2658_v11 = vmax.f32 %v2605_v22, 0.0  ;;  %v2606_v33 = vadd.f32 %v4824_v12, %v2547_v34 }
 0x1d9   : > { %v1873_v14 = vpop.f32.mrb[116].mxu0 }
 0x1da   : > { %v2346_v25 = vpop.f32.mrb[116].mxu1  ;;  %v3301_v55 = vpack.c.bf16 %v2658_v11, %v2658_v11  ;;  %v2659_v24 = vmax.f32 %v2606_v33, 0.0  ;;  %v2075_v57 = vadd.f32 %v1873_v14, %v4405_v52  ;;  %v3726_v26 = vpop.f32.mrb[117].mxu0 }
 0x1db   : > { %v3842_v13 = vpop.f32.mrb[117].mxu1  ;;  %v1876_v1 = vpop.f32.mrb[118].mxu0 }
 0x1dc   : > { %v2349_v43 = vpop.f32.mrb[118].mxu1  ;;  %2925 = vst.msk [vmem:[%s4833_s30 + $0x8] sm:$0xf] %vm2922_vm5, %v3301_v55  ;;  %v3302_v49 = vpack.c.bf16 %v2659_v24, %v2659_v24  ;;  %v2548_v51 = vadd.f32 %v2346_v25, %v2075_v57  ;;  %v2076_v18 = vadd.f32 %v1876_v1, %v4412_v62  ;;  %v3727_v39 = vpop.f32.mrb[119].mxu0 }
 0x1dd   : > { %v3843_v47 = vpop.f32.mrb[119].mxu1 }
 0x1de   : > { %2926 = vst.msk [vmem:[%s4833_s30 + $0xc] sm:$0xf] %vm2922_vm5, %v3302_v49  ;;  %v2607_v60 = vadd.f32 %v4824_v12, %v2548_v51  ;;  %v2549_v59 = vadd.f32 %v2349_v43, %v2076_v18 }
 0x1e0   : > { %v2660_v41 = vmax.f32 %v2607_v60, 0.0  ;;  %v2608_v52 = vadd.f32 %v4824_v12, %v2549_v59 }
 0x1e1   : > { %v1881_v34 = vpop.f32.mrb[120].mxu0 }
 0x1e2   : > { %v2354_v22 = vpop.f32.mrb[120].mxu1  ;;  %v3303_v33 = vpack.c.bf16 %v2660_v41, %v2660_v41  ;;  %v2661_v14 = vmax.f32 %v2608_v52, 0.0  ;;  %v2077_v25 = vadd.f32 %v1881_v34, %v4423_v8  ;;  %v3730_v13 = vpop.f32.mrb[121].mxu0 }
 0x1e3   : > { %v3846_v11 = vpop.f32.mrb[121].mxu1  ;;  %v1884_v55 = vpop.f32.mrb[122].mxu0 }
 0x1e4   : > { %v2357_v62 = vpop.f32.mrb[122].mxu1  ;;  %2927 = vst.msk [vmem:[%s4833_s30 + $0x10] sm:$0xf] %vm2922_vm5, %v3303_v33  ;;  %v3304_v57 = vpack.c.bf16 %v2661_v14, %v2661_v14  ;;  %v2550_v26 = vadd.f32 %v2354_v22, %v2077_v25  ;;  %v2078_v43 = vadd.f32 %v1884_v55, %v4430_v19  ;;  %v3731_v1 = vpop.f32.mrb[123].mxu0 }
 0x1e5   : > { %v3847_v24 = vpop.f32.mrb[123].mxu1 }
 0x1e6   : > { %2928 = vst.msk [vmem:[%s4833_s30 + $0x14] sm:$0xf] %vm2922_vm5, %v3304_v57  ;;  %v2609_v47 = vadd.f32 %v4824_v12, %v2550_v26  ;;  %v2551_v49 = vadd.f32 %v2357_v62, %v2078_v43 }
 0x1e8   : > { %v2662_v51 = vmax.f32 %v2609_v47, 0.0  ;;  %v2610_v8 = vadd.f32 %v4824_v12, %v2551_v49 }
 0x1e9   : > { %v1889_v39 = vpop.f32.mrb[124].mxu0 }
 0x1ea   : > { %v2362_v18 = vpop.f32.mrb[124].mxu1  ;;  %v3305_v59 = vpack.c.bf16 %v2662_v51, %v2662_v51  ;;  %v2663_v41 = vmax.f32 %v2610_v8, 0.0  ;;  %v2079_v52 = vadd.f32 %v1889_v39, %v4441_v29  ;;  %v3734_v22 = vpop.f32.mrb[125].mxu0 }
 0x1eb   : > { %v3850_v60 = vpop.f32.mrb[125].mxu1  ;;  %v1892_v34 = vpop.f32.mrb[126].mxu0 }
 0x1ec   : > { %v2365_v19 = vpop.f32.mrb[126].mxu1  ;;  %2929 = vst.msk [vmem:[%s4833_s30 + $0x18] sm:$0xf] %vm2922_vm5, %v3305_v59  ;;  %v3306_v33 = vpack.c.bf16 %v2663_v41, %v2663_v41  ;;  %v2552_v14 = vadd.f32 %v2362_v18, %v2079_v52  ;;  %v2080_v25 = vadd.f32 %v1892_v34, %v4448_v40  ;;  %v3735_v13 = vpop.f32.mrb[127].mxu0 }
 0x1ed   : > { %v3851_v11 = vpop.f32.mrb[127].mxu1 }
 0x1ee   : > { %2930 = vst.msk [vmem:[%s4833_s30 + $0x1c] sm:$0xf] %vm2922_vm5, %v3306_v33  ;;  %v2611_v62 = vadd.f32 %v4824_v12, %v2552_v14  ;;  %v2553_v55 = vadd.f32 %v2365_v19, %v2080_v25 }
 0x1f0   : > { %v2664_v24 = vmax.f32 %v2611_v62, 0.0  ;;  %v2612_v29 = vadd.f32 %v4824_v12, %v2553_v55 }
 0x1f1   : > { %v1897_v26 = vpop.f32.mrb[128].mxu0 }
 0x1f2   : > { %v2370_v57 = vpop.f32.mrb[128].mxu1  ;;  %v3307_v1 = vpack.c.bf16 %v2664_v24, %v2664_v24  ;;  %v2665_v47 = vmax.f32 %v2612_v29, 0.0  ;;  %v2081_v49 = vadd.f32 %v1897_v26, %v4459_v50  ;;  %v3738_v51 = vpop.f32.mrb[129].mxu0 }
 0x1f3   : > { %v3854_v43 = vpop.f32.mrb[129].mxu1  ;;  %v1900_v8 = vpop.f32.mrb[130].mxu0 }
 0x1f4   : > { %v2373_v40 = vpop.f32.mrb[130].mxu1  ;;  %2931 = vst.msk [vmem:[%s4833_s30 + $0x20] sm:$0xf] %vm2922_vm5, %v3307_v1  ;;  %v3308_v39 = vpack.c.bf16 %v2665_v47, %v2665_v47  ;;  %v2554_v60 = vadd.f32 %v2370_v57, %v2081_v49  ;;  %v2082_v59 = vadd.f32 %v1900_v8, %v4466_v61  ;;  %v3739_v41 = vpop.f32.mrb[131].mxu0 }
 0x1f5   : > { %v3855_v18 = vpop.f32.mrb[131].mxu1 }
 0x1f6   : > { %2932 = vst.msk [vmem:[%s4833_s30 + $0x24] sm:$0xf] %vm2922_vm5, %v3308_v39  ;;  %v2613_v52 = vadd.f32 %v4824_v12, %v2554_v60  ;;  %v2555_v22 = vadd.f32 %v2373_v40, %v2082_v59 }
 0x1f8   : > { %v2666_v19 = vmax.f32 %v2613_v52, 0.0  ;;  %v2614_v50 = vadd.f32 %v4824_v12, %v2555_v22 }
 0x1f9   : > { %v1905_v11 = vpop.f32.mrb[132].mxu0 }
 0x1fa   : > { %v2378_v34 = vpop.f32.mrb[132].mxu1  ;;  %v3309_v14 = vpack.c.bf16 %v2666_v19, %v2666_v19  ;;  %v2667_v25 = vmax.f32 %v2614_v50, 0.0  ;;  %v2083_v13 = vadd.f32 %v1905_v11, %v4477_v9  ;;  %v3742_v62 = vpop.f32.mrb[133].mxu0 }
 0x1fb   : > { %v3858_v33 = vpop.f32.mrb[133].mxu1  ;;  %v1908_v55 = vpop.f32.mrb[134].mxu0 }
 0x1fc   : > { %v2381_v61 = vpop.f32.mrb[134].mxu1  ;;  %2933 = vst.msk [vmem:[%s4833_s30 + $0x28] sm:$0xf] %vm2922_vm5, %v3309_v14  ;;  %v3310_v29 = vpack.c.bf16 %v2667_v25, %v2667_v25  ;;  %v2556_v57 = vadd.f32 %v2378_v34, %v2083_v13  ;;  %v2084_v26 = vadd.f32 %v1908_v55, %v4484_v21  ;;  %v3743_v43 = vpop.f32.mrb[135].mxu0 }
 0x1fd   : > { %v3859_v24 = vpop.f32.mrb[135].mxu1 }
 0x1fe   : > { %2934 = vst.msk [vmem:[%s4833_s30 + $0x2c] sm:$0xf] %vm2922_vm5, %v3310_v29  ;;  %v2615_v1 = vadd.f32 %v4824_v12, %v2556_v57  ;;  %v2557_v47 = vadd.f32 %v2381_v61, %v2084_v26 }
 0x200   : > { %v2668_v49 = vmax.f32 %v2615_v1, 0.0  ;;  %v2616_v9 = vadd.f32 %v4824_v12, %v2557_v47 }
 0x201   : > { %v1913_v40 = vpop.f32.mrb[136].mxu0 }
 0x202   : > { %v2386_v51 = vpop.f32.mrb[136].mxu1  ;;  %v3311_v18 = vpack.c.bf16 %v2668_v49, %v2668_v49  ;;  %v2669_v39 = vmax.f32 %v2616_v9, 0.0  ;;  %v2085_v60 = vadd.f32 %v1913_v40, %v4495_v32  ;;  %v3746_v59 = vpop.f32.mrb[137].mxu0 }
 0x203   : > { %v3862_v8 = vpop.f32.mrb[137].mxu1  ;;  %v1916_v41 = vpop.f32.mrb[138].mxu0 }
 0x204   : > { %v2389_v21 = vpop.f32.mrb[138].mxu1  ;;  %2935 = vst.msk [vmem:[%s4833_s30 + $0x30] sm:$0xf] %vm2922_vm5, %v3311_v18  ;;  %v3312_v22 = vpack.c.bf16 %v2669_v39, %v2669_v39  ;;  %v2558_v19 = vadd.f32 %v2386_v51, %v2085_v60  ;;  %v2086_v50 = vadd.f32 %v1916_v41, %v4502_v45  ;;  %v3747_v34 = vpop.f32.mrb[139].mxu0 }
 0x205   : > { %v3863_v52 = vpop.f32.mrb[139].mxu1 }
 0x206   : > { %2936 = vst.msk [vmem:[%s4833_s30 + $0x34] sm:$0xf] %vm2922_vm5, %v3312_v22  ;;  %v2617_v11 = vadd.f32 %v4824_v12, %v2558_v19  ;;  %v2559_v33 = vadd.f32 %v2389_v21, %v2086_v50 }
 0x208   : > { %v2670_v14 = vmax.f32 %v2617_v11, 0.0  ;;  %v2618_v32 = vadd.f32 %v4824_v12, %v2559_v33 }
 0x209   : > { %v1921_v13 = vpop.f32.mrb[140].mxu0 }
 0x20a   : > { %v2394_v25 = vpop.f32.mrb[140].mxu1  ;;  %v3313_v61 = vpack.c.bf16 %v2670_v14, %v2670_v14  ;;  %v2671_v55 = vmax.f32 %v2618_v32, 0.0  ;;  %v2087_v24 = vadd.f32 %v1921_v13, %v4513_v56  ;;  %v3750_v29 = vpop.f32.mrb[141].mxu0 }
 0x20b   : > { %v3866_v62 = vpop.f32.mrb[141].mxu1  ;;  %v1924_v57 = vpop.f32.mrb[142].mxu0 }
 0x20c   : > { %v2397_v45 = vpop.f32.mrb[142].mxu1  ;;  %2937 = vst.msk [vmem:[%s4833_s30 + $0x38] sm:$0xf] %vm2922_vm5, %v3313_v61  ;;  %v3314_v43 = vpack.c.bf16 %v2671_v55, %v2671_v55  ;;  %v2560_v1 = vadd.f32 %v2394_v25, %v2087_v24  ;;  %v2088_v47 = vadd.f32 %v1924_v57, %v4520_v5  ;;  %v3751_v49 = vpop.f32.mrb[143].mxu0 }
 0x20d   : > { %v3867_v26 = vpop.f32.mrb[143].mxu1 }
 0x20e   : > { %2938 = vst.msk [vmem:[%s4833_s30 + $0x3c] sm:$0xf] %vm2922_vm5, %v3314_v43  ;;  %v2619_v9 = vadd.f32 %v4824_v12, %v2560_v1  ;;  %v2561_v51 = vadd.f32 %v2397_v45, %v2088_v47 }
 0x210   : > { %v2672_v40 = vmax.f32 %v2619_v9, 0.0  ;;  %v2620_v56 = vadd.f32 %v4824_v12, %v2561_v51 }
 0x211   : > { %v1929_v18 = vpop.f32.mrb[144].mxu0 }
 0x212   : > { %v2402_v8 = vpop.f32.mrb[144].mxu1  ;;  %v3315_v60 = vpack.c.bf16 %v2672_v40, %v2672_v40  ;;  %v2673_v59 = vmax.f32 %v2620_v56, 0.0  ;;  %v2089_v21 = vadd.f32 %v1929_v18, %v4531_v17  ;;  %v3754_v41 = vpop.f32.mrb[145].mxu0 }
 0x213   : > { %v3870_v39 = vpop.f32.mrb[145].mxu1  ;;  %v1932_v52 = vpop.f32.mrb[146].mxu0 }
 0x214   : > { %v2405_v5 = vpop.f32.mrb[146].mxu1  ;;  %2939 = vst.msk [vmem:[%s4833_s30 + $0x40] sm:$0xf] %vm2922_vm5, %v3315_v60  ;;  %v3316_v19 = vpack.c.bf16 %v2673_v59, %v2673_v59  ;;  %v2562_v50 = vadd.f32 %v2402_v8, %v2089_v21  ;;  %v2090_v34 = vadd.f32 %v1932_v52, %v4538_v31  ;;  %v3755_v11 = vpop.f32.mrb[147].mxu0 }
 0x215   : > { %v3871_v22 = vpop.f32.mrb[147].mxu1 }
 0x216   : > { %2940 = vst.msk [vmem:[%s4833_s30 + $0x44] sm:$0xf] %vm2922_vm5, %v3316_v19  ;;  %v2621_v33 = vadd.f32 %v4824_v12, %v2562_v50  ;;  %v2563_v14 = vadd.f32 %v2405_v5, %v2090_v34 }
 0x218   : > { %v2674_v32 = vmax.f32 %v2621_v33, 0.0  ;;  %v2622_v17 = vadd.f32 %v4824_v12, %v2563_v14 }
 0x219   : > { %v1937_v13 = vpop.f32.mrb[148].mxu0 }
 0x21a   : > { %v2410_v25 = vpop.f32.mrb[148].mxu1  ;;  %v3317_v61 = vpack.c.bf16 %v2674_v32, %v2674_v32  ;;  %v2675_v55 = vmax.f32 %v2622_v17, 0.0  ;;  %v2091_v24 = vadd.f32 %v1937_v13, %v4549_v44  ;;  %v3758_v29 = vpop.f32.mrb[149].mxu0 }
 0x21b   : > { %v3874_v62 = vpop.f32.mrb[149].mxu1  ;;  %v1940_v45 = vpop.f32.mrb[150].mxu0 }
 0x21c   : > { %v2413_v31 = vpop.f32.mrb[150].mxu1  ;;  %2941 = vst.msk [vmem:[%s4833_s30 + $0x48] sm:$0xf] %vm2922_vm5, %v3317_v61  ;;  %v3318_v26 = vpack.c.bf16 %v2675_v55, %v2675_v55  ;;  %v2564_v43 = vadd.f32 %v2410_v25, %v2091_v24  ;;  %v2092_v1 = vadd.f32 %v1940_v45, %v4556_v58  ;;  %v3759_v47 = vpop.f32.mrb[151].mxu0 }
 0x21d   : > { %v3875_v57 = vpop.f32.mrb[151].mxu1 }
 0x21e   : > { %2942 = vst.msk [vmem:[%s4833_s30 + $0x4c] sm:$0xf] %vm2922_vm5, %v3318_v26  ;;  %v2623_v49 = vadd.f32 %v4824_v12, %v2564_v43  ;;  %v2565_v9 = vadd.f32 %v2413_v31, %v2092_v1 }
 0x220   : > { %v2676_v51 = vmax.f32 %v2623_v49, 0.0  ;;  %v2624_v44 = vadd.f32 %v4824_v12, %v2565_v9 }
 0x221   : > { %v1945_v56 = vpop.f32.mrb[152].mxu0 }
 0x222   : > { %v2418_v40 = vpop.f32.mrb[152].mxu1  ;;  %v3319_v18 = vpack.c.bf16 %v2676_v51, %v2676_v51  ;;  %v2677_v39 = vmax.f32 %v2624_v44, 0.0  ;;  %v2093_v60 = vadd.f32 %v1945_v56, %v4567_v7  ;;  %v3762_v59 = vpop.f32.mrb[153].mxu0 }
 0x223   : > { %v3878_v8 = vpop.f32.mrb[153].mxu1  ;;  %v1948_v21 = vpop.f32.mrb[154].mxu0 }
 0x224   : > { %v2421_v58 = vpop.f32.mrb[154].mxu1  ;;  %2943 = vst.msk [vmem:[%s4833_s30 + $0x50] sm:$0xf] %vm2922_vm5, %v3319_v18  ;;  %v3320_v5 = vpack.c.bf16 %v2677_v39, %v2677_v39  ;;  %v2566_v52 = vadd.f32 %v2418_v40, %v2093_v60  ;;  %v2094_v22 = vadd.f32 %v1948_v21, %v4574_v23  ;;  %v3763_v19 = vpop.f32.mrb[155].mxu0 }
 0x225   : > { %v3879_v41 = vpop.f32.mrb[155].mxu1 }
 0x226   : > { %2944 = vst.msk [vmem:[%s4833_s30 + $0x54] sm:$0xf] %vm2922_vm5, %v3320_v5  ;;  %v2625_v50 = vadd.f32 %v4824_v12, %v2566_v52  ;;  %v2567_v34 = vadd.f32 %v2421_v58, %v2094_v22 }
 0x228   : > { %v2678_v11 = vmax.f32 %v2625_v50, 0.0  ;;  %v2626_v7 = vadd.f32 %v4824_v12, %v2567_v34 }
 0x229   : > { %v1953_v14 = vpop.f32.mrb[156].mxu0 }
 0x22a   : > { %v2426_v33 = vpop.f32.mrb[156].mxu1  ;;  %v3321_v17 = vpack.c.bf16 %v2678_v11, %v2678_v11  ;;  %v2679_v25 = vmax.f32 %v2626_v7, 0.0  ;;  %v2095_v13 = vadd.f32 %v1953_v14, %v4585_v37  ;;  %v3766_v62 = vpop.f32.mrb[157].mxu0 }
 0x22b   : > { %v3882_v32 = vpop.f32.mrb[157].mxu1  ;;  %v1956_v61 = vpop.f32.mrb[158].mxu0 }
 0x22c   : > { %v2429_v23 = vpop.f32.mrb[158].mxu1  ;;  %2945 = vst.msk [vmem:[%s4833_s30 + $0x58] sm:$0xf] %vm2922_vm5, %v3321_v17  ;;  %v3322_v24 = vpack.c.bf16 %v2679_v25, %v2679_v25  ;;  %v2568_v29 = vadd.f32 %v2426_v33, %v2095_v13  ;;  %v2096_v31 = vadd.f32 %v1956_v61, %v4592_v53  ;;  %v3767_v45 = vpop.f32.mrb[159].mxu0 }
 0x22d   : > { %v3883_v55 = vpop.f32.mrb[159].mxu1 }
 0x22e   : > { %2946 = vst.msk [vmem:[%s4833_s30 + $0x5c] sm:$0xf] %vm2922_vm5, %v3322_v24  ;;  %v2627_v57 = vadd.f32 %v4824_v12, %v2568_v29  ;;  %v2569_v26 = vadd.f32 %v2429_v23, %v2096_v31 }
 0x230   : > { %v2680_v43 = vmax.f32 %v2627_v57, 0.0  ;;  %v2628_v37 = vadd.f32 %v4824_v12, %v2569_v26 }
 0x231   : > { %v1961_v47 = vpop.f32.mrb[160].mxu0 }
 0x232   : > { %v2434_v1 = vpop.f32.mrb[160].mxu1  ;;  %v3323_v9 = vpack.c.bf16 %v2680_v43, %v2680_v43  ;;  %v2681_v51 = vmax.f32 %v2628_v37, 0.0  ;;  %v2097_v44 = vadd.f32 %v1961_v47, %v4603_v3  ;;  %v3770_v40 = vpop.f32.mrb[161].mxu0 }
 0x233   : > { %v3886_v49 = vpop.f32.mrb[161].mxu1  ;;  %v1964_v56 = vpop.f32.mrb[162].mxu0 }
 0x234   : > { %v2437_v53 = vpop.f32.mrb[162].mxu1  ;;  %2947 = vst.msk [vmem:[%s4833_s30 + $0x60] sm:$0xf] %vm2922_vm5, %v3323_v9  ;;  %v3324_v18 = vpack.c.bf16 %v2681_v51, %v2681_v51  ;;  %v2570_v39 = vadd.f32 %v2434_v1, %v2097_v44  ;;  %v2098_v60 = vadd.f32 %v1964_v56, %v4610_v20  ;;  %v3771_v59 = vpop.f32.mrb[163].mxu0 }
 0x235   : > { %v3887_v8 = vpop.f32.mrb[163].mxu1 }
 0x236   : > { %2948 = vst.msk [vmem:[%s4833_s30 + $0x64] sm:$0xf] %vm2922_vm5, %v3324_v18  ;;  %v2629_v58 = vadd.f32 %v4824_v12, %v2570_v39  ;;  %v2571_v21 = vadd.f32 %v2437_v53, %v2098_v60 }
 0x238   : > { %v2682_v41 = vmax.f32 %v2629_v58, 0.0  ;;  %v2630_v3 = vadd.f32 %v4824_v12, %v2571_v21 }
 0x239   : > { %v1969_v52 = vpop.f32.mrb[164].mxu0 }
 0x23a   : > { %v2442_v5 = vpop.f32.mrb[164].mxu1  ;;  %v3325_v19 = vpack.c.bf16 %v2682_v41, %v2682_v41  ;;  %v2683_v50 = vmax.f32 %v2630_v3, 0.0  ;;  %v2099_v34 = vadd.f32 %v1969_v52, %v4621_v36  ;;  %v3774_v11 = vpop.f32.mrb[165].mxu0 }
 0x23b   : > { %v3890_v22 = vpop.f32.mrb[165].mxu1  ;;  %v1972_v7 = vpop.f32.mrb[166].mxu0 }
 0x23c   : > { %v2445_v20 = vpop.f32.mrb[166].mxu1  ;;  %2949 = vst.msk [vmem:[%s4833_s30 + $0x68] sm:$0xf] %vm2922_vm5, %v3325_v19  ;;  %v3326_v14 = vpack.c.bf16 %v2683_v50, %v2683_v50  ;;  %v2572_v32 = vadd.f32 %v2442_v5, %v2099_v34  ;;  %v2100_v17 = vadd.f32 %v1972_v7, %v4628_v54  ;;  %v3775_v25 = vpop.f32.mrb[167].mxu0 }
 0x23d   : > { %v3891_v33 = vpop.f32.mrb[167].mxu1 }
 0x23e   : > { %2950 = vst.msk [vmem:[%s4833_s30 + $0x6c] sm:$0xf] %vm2922_vm5, %v3326_v14  ;;  %v2631_v13 = vadd.f32 %v4824_v12, %v2572_v32  ;;  %v2573_v62 = vadd.f32 %v2445_v20, %v2100_v17 }
 0x240   : > { %v2684_v23 = vmax.f32 %v2631_v13, 0.0  ;;  %v2632_v36 = vadd.f32 %v4824_v12, %v2573_v62 }
 0x241   : > { %v1977_v55 = vpop.f32.mrb[168].mxu0 }
 0x242   : > { %v2450_v61 = vpop.f32.mrb[168].mxu1  ;;  %v3327_v29 = vpack.c.bf16 %v2684_v23, %v2684_v23  ;;  %v2685_v31 = vmax.f32 %v2632_v36, 0.0  ;;  %v2101_v45 = vadd.f32 %v1977_v55, %v4639_v6  ;;  %v3778_v57 = vpop.f32.mrb[169].mxu0 }
 0x243   : > { %v3894_v24 = vpop.f32.mrb[169].mxu1  ;;  %v1980_v26 = vpop.f32.mrb[170].mxu0 }
 0x244   : > { %v2453_v54 = vpop.f32.mrb[170].mxu1  ;;  %2951 = vst.msk [vmem:[%s4833_s30 + $0x70] sm:$0xf] %vm2922_vm5, %v3327_v29  ;;  %v3328_v37 = vpack.c.bf16 %v2685_v31, %v2685_v31  ;;  %v2574_v1 = vadd.f32 %v2450_v61, %v2101_v45  ;;  %v2102_v47 = vadd.f32 %v1980_v26, %v4646_v28  ;;  %v3779_v49 = vpop.f32.mrb[171].mxu0 }
 0x245   : > { %v3895_v43 = vpop.f32.mrb[171].mxu1 }
 0x246   : > { %2952 = vst.msk [vmem:[%s4833_s30 + $0x74] sm:$0xf] %vm2922_vm5, %v3328_v37  ;;  %v2633_v9 = vadd.f32 %v4824_v12, %v2574_v1  ;;  %v2575_v51 = vadd.f32 %v2453_v54, %v2102_v47 }
 0x248   : > { %v2686_v44 = vmax.f32 %v2633_v9, 0.0  ;;  %v2634_v6 = vadd.f32 %v4824_v12, %v2575_v51 }
 0x249   : > { %v1985_v53 = vpop.f32.mrb[172].mxu0 }
 0x24a   : > { %v2458_v40 = vpop.f32.mrb[172].mxu1  ;;  %v3329_v8 = vpack.c.bf16 %v2686_v44, %v2686_v44  ;;  %v2687_v18 = vmax.f32 %v2634_v6, 0.0  ;;  %v2103_v39 = vadd.f32 %v1985_v53, %v4657_v42  ;;  %v3782_v60 = vpop.f32.mrb[173].mxu0 }
 0x24b   : > { %v3898_v56 = vpop.f32.mrb[173].mxu1  ;;  %v1988_v59 = vpop.f32.mrb[174].mxu0 }
 0x24c   : > { %v2461_v28 = vpop.f32.mrb[174].mxu1  ;;  %2953 = vst.msk [vmem:[%s4833_s30 + $0x78] sm:$0xf] %vm2922_vm5, %v3329_v8  ;;  %v3330_v21 = vpack.c.bf16 %v2687_v18, %v2687_v18  ;;  %v2576_v41 = vadd.f32 %v2458_v40, %v2103_v39  ;;  %v2104_v3 = vadd.f32 %v1988_v59, %v4664_v2  ;;  %v3783_v5 = vpop.f32.mrb[175].mxu0 }
 0x24d   : > { %v3899_v58 = vpop.f32.mrb[175].mxu1 }
 0x24e   : > { %2954 = vst.msk [vmem:[%s4833_s30 + $0x7c] sm:$0xf] %vm2922_vm5, %v3330_v21  ;;  %v2635_v52 = vadd.f32 %v4824_v12, %v2576_v41  ;;  %v2577_v22 = vadd.f32 %v2461_v28, %v2104_v3 }
 0x250   : > { %v2688_v19 = vmax.f32 %v2635_v52, 0.0  ;;  %v2636_v42 = vadd.f32 %v4824_v12, %v2577_v22 }
 0x251   : > { %v1993_v34 = vpop.f32.mrb[176].mxu0 }
 0x252   : > { %v2466_v50 = vpop.f32.mrb[176].mxu1  ;;  %v3331_v20 = vpack.c.bf16 %v2688_v19, %v2688_v19  ;;  %v2689_v7 = vmax.f32 %v2636_v42, 0.0  ;;  %v2105_v33 = vadd.f32 %v1993_v34, %v4675_v16  ;;  %v3786_v14 = vpop.f32.mrb[177].mxu0 }
 0x253   : > { %v3902_v11 = vpop.f32.mrb[177].mxu1  ;;  %v1996_v32 = vpop.f32.mrb[178].mxu0 }
 0x254   : > { %v2469_v2 = vpop.f32.mrb[178].mxu1  ;;  %2955 = vst.msk [vmem:[%s4833_s30 + $0x80] sm:$0xf] %vm2922_vm5, %v3331_v20  ;;  %v3332_v25 = vpack.c.bf16 %v2689_v7, %v2689_v7  ;;  %v2578_v13 = vadd.f32 %v2466_v50, %v2105_v33  ;;  %v2106_v62 = vadd.f32 %v1996_v32, %v4682_v46  ;;  %v3787_v23 = vpop.f32.mrb[179].mxu0  ;;  %v5060_v20 = vld [vmem:[#allocation2_spill] sm:$0xff] }
 0x255   : > { %v3903_v17 = vpop.f32.mrb[179].mxu1 }
 0x256   : > { %2956 = vst.msk [vmem:[%s4833_s30 + $0x84] sm:$0xf] %vm2922_vm5, %v3332_v25  ;;  %v2637_v36 = vadd.f32 %v4824_v12, %v2578_v13  ;;  %v2579_v61 = vadd.f32 %v2469_v2, %v2106_v62  ;;  %v5061_v25 = vld [vmem:[#allocation3_spill] sm:$0xff] }
 0x258   : > { %v2690_v55 = vmax.f32 %v2637_v36, 0.0  ;;  %v2638_v16 = vadd.f32 %v4824_v12, %v2579_v61 }
 0x259   : > { %v2001_v29 = vpop.f32.mrb[180].mxu0 }
 0x25a   : > { %v2474_v24 = vpop.f32.mrb[180].mxu1  ;;  %v3333_v45 = vpack.c.bf16 %v2690_v55, %v2690_v55  ;;  %v2691_v57 = vmax.f32 %v2638_v16, 0.0  ;;  %v2107_v54 = vadd.f32 %v2001_v29, %v4693_v63  ;;  %v3790_v26 = vpop.f32.mrb[181].mxu0 }
 0x25b   : > { %v3906_v31 = vpop.f32.mrb[181].mxu1  ;;  %v2004_v43 = vpop.f32.mrb[182].mxu0 }
 0x25c   : > { %v2477_v46 = vpop.f32.mrb[182].mxu1  ;;  %2957 = vst.msk [vmem:[%s4833_s30 + $0x88] sm:$0xf] %vm2922_vm5, %v3333_v45  ;;  %v3334_v1 = vpack.c.bf16 %v2691_v57, %v2691_v57  ;;  %v2580_v47 = vadd.f32 %v2474_v24, %v2107_v54  ;;  %v2108_v49 = vadd.f32 %v2004_v43, %v4700_v30  ;;  %v3791_v9 = vpop.f32.mrb[183].mxu0  ;;  %v5062_v57 = vld [vmem:[#allocation4_spill] sm:$0xff] }
 0x25d   : > { %v3907_v37 = vpop.f32.mrb[183].mxu1 }
 0x25e   : > { %2958 = vst.msk [vmem:[%s4833_s30 + $0x8c] sm:$0xf] %vm2922_vm5, %v3334_v1  ;;  %v2639_v51 = vadd.f32 %v4824_v12, %v2580_v47  ;;  %v2581_v44 = vadd.f32 %v2477_v46, %v2108_v49  ;;  %v5063_v49 = vld [vmem:[#allocation5_spill] sm:$0xff] }
 0x260   : > { %v2692_v6 = vmax.f32 %v2639_v51, 0.0  ;;  %v2640_v63 = vadd.f32 %v4824_v12, %v2581_v44 }
 0x261   : > { %v2009_v53 = vpop.f32.mrb[184].mxu0 }
 0x262   : > { %v2482_v40 = vpop.f32.mrb[184].mxu1  ;;  %v3335_v8 = vpack.c.bf16 %v2692_v6, %v2692_v6  ;;  %v2693_v18 = vmax.f32 %v2640_v63, 0.0  ;;  %v2109_v39 = vadd.f32 %v2009_v53, %v4711_v48  ;;  %v3794_v60 = vpop.f32.mrb[185].mxu0 }
 0x263   : > { %v3910_v56 = vpop.f32.mrb[185].mxu1  ;;  %v2012_v28 = vpop.f32.mrb[186].mxu0  ;;  %v5064_v60 = vld [vmem:[#allocation6_spill] sm:$0xff] }
 0x264   : > { %v2485_v30 = vpop.f32.mrb[186].mxu1  ;;  %2959 = vst.msk [vmem:[%s4833_s30 + $0x90] sm:$0xf] %vm2922_vm5, %v3335_v8  ;;  %v3336_v58 = vpack.c.bf16 %v2693_v18, %v2693_v18  ;;  %v2582_v21 = vadd.f32 %v2482_v40, %v2109_v39  ;;  %v2110_v41 = vadd.f32 %v2012_v28, %v4718_v0  ;;  %v3795_v3 = vpop.f32.mrb[187].mxu0 }
 0x265   : > { %v3911_v59 = vpop.f32.mrb[187].mxu1 }
 0x266   : > { %2960 = vst.msk [vmem:[%s4833_s30 + $0x94] sm:$0xf] %vm2922_vm5, %v3336_v58  ;;  %v2641_v5 = vadd.f32 %v4824_v12, %v2582_v21  ;;  %v2583_v52 = vadd.f32 %v2485_v30, %v2110_v41 }
 0x268   : > { %v2694_v22 = vmax.f32 %v2641_v5, 0.0  ;;  %v2642_v48 = vadd.f32 %v4824_v12, %v2583_v52  ;;  %v5065_v5 = vld [vmem:[#allocation7_spill] sm:$0xff] }
 0x269   : > { %v2017_v42 = vpop.f32.mrb[188].mxu0 }
 0x26a   : > { %v2490_v19 = vpop.f32.mrb[188].mxu1  ;;  %v3337_v34 = vpack.c.bf16 %v2694_v22, %v2694_v22  ;;  %v2695_v11 = vmax.f32 %v2642_v48, 0.0  ;;  %v2111_v7 = vadd.f32 %v2017_v42, %v5060_v20  ;;  %v3798_v33 = vpop.f32.mrb[189].mxu0 }
 0x26b   : > { %v3914_v50 = vpop.f32.mrb[189].mxu1  ;;  %v2020_v14 = vpop.f32.mrb[190].mxu0 }
 0x26c   : > { %v2493_v0 = vpop.f32.mrb[190].mxu1  ;;  %2961 = vst.msk [vmem:[%s4833_s30 + $0x98] sm:$0xf] %vm2922_vm5, %v3337_v34  ;;  %v3338_v32 = vpack.c.bf16 %v2695_v11, %v2695_v11  ;;  %v2584_v17 = vadd.f32 %v2490_v19, %v2111_v7  ;;  %v2112_v13 = vadd.f32 %v2020_v14, %v5061_v25  ;;  %v3799_v62 = vpop.f32.mrb[191].mxu0 }
 0x26d   : > { %v3915_v2 = vpop.f32.mrb[191].mxu1  ;;  %v5066_v62 = vld [vmem:[#allocation8_spill] sm:$0xff] }
 0x26e   : > { %2962 = vst.msk [vmem:[%s4833_s30 + $0x9c] sm:$0xf] %vm2922_vm5, %v3338_v32  ;;  %v2643_v23 = vadd.f32 %v4824_v12, %v2584_v17  ;;  %v2585_v36 = vadd.f32 %v2493_v0, %v2112_v13 }
 0x270   : > { %v2696_v61 = vmax.f32 %v2643_v23, 0.0  ;;  %v2644_v55 = vadd.f32 %v4824_v12, %v2585_v36 }
 0x271   : > { %v2025_v24 = vpop.f32.mrb[192].mxu0 }
 0x272   : > { %v2498_v16 = vpop.f32.mrb[192].mxu1  ;;  %v3339_v31 = vpack.c.bf16 %v2696_v61, %v2696_v61  ;;  %v2697_v45 = vmax.f32 %v2644_v55, 0.0  ;;  %v2113_v54 = vadd.f32 %v2025_v24, %v5062_v57  ;;  %v3802_v26 = vpop.f32.mrb[193].mxu0 }
 0x273   : > { %v3918_v29 = vpop.f32.mrb[193].mxu1  ;;  %v2028_v43 = vpop.f32.mrb[194].mxu0 }
 0x274   : > { %v2501_v46 = vpop.f32.mrb[194].mxu1  ;;  %2963 = vst.msk [vmem:[%s4833_s30 + $0xa0] sm:$0xf] %vm2922_vm5, %v3339_v31  ;;  %v3340_v1 = vpack.c.bf16 %v2697_v45, %v2697_v45  ;;  %v2586_v47 = vadd.f32 %v2498_v16, %v2113_v54  ;;  %v2114_v9 = vadd.f32 %v2028_v43, %v5063_v49  ;;  %v3803_v51 = vpop.f32.mrb[195].mxu0 }
 0x275   : > { %v3919_v37 = vpop.f32.mrb[195].mxu1 }
 0x276   : > { %2964 = vst.msk [vmem:[%s4833_s30 + $0xa4] sm:$0xf] %vm2922_vm5, %v3340_v1  ;;  %v2645_v44 = vadd.f32 %v4824_v12, %v2586_v47  ;;  %v2587_v6 = vadd.f32 %v2501_v46, %v2114_v9 }
 0x278   : > { %v2698_v63 = vmax.f32 %v2645_v44, 0.0  ;;  %v2646_v40 = vadd.f32 %v4824_v12, %v2587_v6 }
 0x279   : > { %v2033_v56 = vpop.f32.mrb[196].mxu0 }
 0x27a   : > { %v2506_v53 = vpop.f32.mrb[196].mxu1  ;;  %v3341_v18 = vpack.c.bf16 %v2698_v63, %v2698_v63  ;;  %v2699_v39 = vmax.f32 %v2646_v40, 0.0  ;;  %v2115_v30 = vadd.f32 %v2033_v56, %v5064_v60  ;;  %v3806_v28 = vpop.f32.mrb[197].mxu0 }
 0x27b   : > { %v3922_v8 = vpop.f32.mrb[197].mxu1  ;;  %v2036_v58 = vpop.f32.mrb[198].mxu0 }
 0x27c   : > { %v2509_v59 = vpop.f32.mrb[198].mxu1  ;;  %2965 = vst.msk [vmem:[%s4833_s30 + $0xa8] sm:$0xf] %vm2922_vm5, %v3341_v18  ;;  %v3342_v41 = vpack.c.bf16 %v2699_v39, %v2699_v39  ;;  %v2588_v3 = vadd.f32 %v2506_v53, %v2115_v30  ;;  %v2116_v52 = vadd.f32 %v2036_v58, %v5065_v5  ;;  %v3807_v22 = vpop.f32.mrb[199].mxu0 }
 0x27d   : > { %v3923_v21 = vpop.f32.mrb[199].mxu1 }
 0x27e   : > { %2966 = vst.msk [vmem:[%s4833_s30 + $0xac] sm:$0xf] %vm2922_vm5, %v3342_v41  ;;  %v2647_v48 = vadd.f32 %v4824_v12, %v2588_v3  ;;  %v2589_v19 = vadd.f32 %v2509_v59, %v2116_v52 }
 0x280   : > { %v2700_v42 = vmax.f32 %v2647_v48, 0.0  ;;  %v2648_v50 = vadd.f32 %v4824_v12, %v2589_v19 }
 0x281   : > { %v2041_v11 = vpop.f32.mrb[200].mxu0 }
 0x282   : > { %v2514_v34 = vpop.f32.mrb[200].mxu1  ;;  %v3343_v7 = vpack.c.bf16 %v2700_v42, %v2700_v42  ;;  %v2701_v33 = vmax.f32 %v2648_v50, 0.0  ;;  %v2117_v0 = vadd.f32 %v2041_v11, %v4779_v10  ;;  %v3810_v14 = vpop.f32.mrb[201].mxu0 }
 0x283   : > { %v3926_v20 = vpop.f32.mrb[201].mxu1  ;;  %v2044_v32 = vpop.f32.mrb[202].mxu0 }
 0x284   : > { %v2517_v2 = vpop.f32.mrb[202].mxu1  ;;  %2967 = vst.msk [vmem:[%s4833_s30 + $0xb0] sm:$0xf] %vm2922_vm5, %v3343_v7  ;;  %v3344_v25 = vpack.c.bf16 %v2701_v33, %v2701_v33  ;;  %v2590_v13 = vadd.f32 %v2514_v34, %v2117_v0  ;;  %v2118_v23 = vadd.f32 %v2044_v32, %v5066_v62  ;;  %v3811_v36 = vpop.f32.mrb[203].mxu0 }
 0x285   : > { %v3927_v17 = vpop.f32.mrb[203].mxu1 }
 0x286   : > { %2968 = vst.msk [vmem:[%s4833_s30 + $0xb4] sm:$0xf] %vm2922_vm5, %v3344_v25  ;;  %v2649_v61 = vadd.f32 %v4824_v12, %v2590_v13  ;;  %v2591_v55 = vadd.f32 %v2517_v2, %v2118_v23 }
 0x288   : > { %v2702_v16 = vmax.f32 %v2649_v61, 0.0  ;;  %v2650_v10 = vadd.f32 %v4824_v12, %v2591_v55 }
 0x289   : > { %v2049_v29 = vpop.f32.mrb[204].mxu0 }
 0x28a   : > { %v2522_v24 = vpop.f32.mrb[204].mxu1  ;;  %v3345_v45 = vpack.c.bf16 %v2702_v16, %v2702_v16  ;;  %v2703_v57 = vmax.f32 %v2650_v10, 0.0  ;;  %v2119_v54 = vadd.f32 %v2049_v29, %v4792_v27  ;;  %v3814_v26 = vpop.f32.mrb[205].mxu0 }
 0x28b   : > { %v3930_v31 = vpop.f32.mrb[205].mxu1  ;;  %v2052_v43 = vpop.f32.mrb[206].mxu0 }
 0x28c   : > { %v2525_v46 = vpop.f32.mrb[206].mxu1  ;;  %2969 = vst.msk [vmem:[%s4833_s30 + $0xb8] sm:$0xf] %vm2922_vm5, %v3345_v45  ;;  %v3346_v1 = vpack.c.bf16 %v2703_v57, %v2703_v57  ;;  %v2592_v47 = vadd.f32 %v2522_v24, %v2119_v54  ;;  %v2120_v49 = vadd.f32 %v2052_v43, %v4796_v38  ;;  %v3815_v9 = vpop.f32.mrb[207].mxu0 }
 0x28d   : > { %v3931_v37 = vpop.f32.mrb[207].mxu1 }
 0x28e   : > { %2970 = vst.msk [vmem:[%s4833_s30 + $0xbc] sm:$0xf] %vm2922_vm5, %v3346_v1  ;;  %v2651_v51 = vadd.f32 %v4824_v12, %v2592_v47  ;;  %v2593_v44 = vadd.f32 %v2525_v46, %v2120_v49 }
 0x290   : > { %v2704_v6 = vmax.f32 %v2651_v51, 0.0  ;;  %v2652_v27 = vadd.f32 %v4824_v12, %v2593_v44 }
 0x291   : > { %v2057_v40 = vpop.f32.mrb[208].mxu0 }
 0x292   : > { %v2530_v63 = vpop.f32.mrb[208].mxu1  ;;  %v3347_v56 = vpack.c.bf16 %v2704_v6, %v2704_v6  ;;  %v2705_v8 = vmax.f32 %v2652_v27, 0.0  ;;  %v2121_v18 = vadd.f32 %v2057_v40, %v4804_v15  ;;  %v3818_v39 = vpop.f32.mrb[209].mxu0  ;;  %v4024_v15 = vld [vmem:[%s5048_s2] ss:$0 sm:$0xff] }
 0x293   : > { %v3934_v53 = vpop.f32.mrb[209].mxu1  ;;  %v2060_v60 = vpop.f32.mrb[210].mxu0 }
 0x294   : > { %v2533_v38 = vpop.f32.mrb[210].mxu1  ;;  %2971 = vst.msk [vmem:[%s4833_s30 + $0xc0] sm:$0xf] %vm2922_vm5, %v3347_v56  ;;  %v3348_v28 = vpack.c.bf16 %v2705_v8, %v2705_v8  ;;  %v2594_v59 = vadd.f32 %v2530_v63, %v2121_v18  ;;  %v2122_v58 = vadd.f32 %v2060_v60, %v4808_v4  ;;  %v3819_v21 = vpop.f32.mrb[211].mxu0 }
 0x295   : > { %v3935_v30 = vpop.f32.mrb[211].mxu1 }
 0x296   : > { %2972 = vst.msk [vmem:[%s4833_s30 + $0xc4] sm:$0xf] %vm2922_vm5, %v3348_v28  ;;  %v2653_v41 = vadd.f32 %v4824_v12, %v2594_v59  ;;  %v2595_v3 = vadd.f32 %v2533_v38, %v2122_v58 }
 0x298   : > { %v2706_v5 = vmax.f32 %v2653_v41, 0.0  ;;  %v2654_v52 = vadd.f32 %v4024_v15, %v2595_v3 }
 0x299   : > { %v2065_v48 = vpop.f32.mrb[212].mxu0 }
 0x29a   : > { %v2538_v22 = vpop.f32.mrb[212].mxu1  ;;  %v3349_v42 = vpack.c.bf16 %v2706_v5, %v2706_v5  ;;  %v2707_v4 = vmax.f32 %v2654_v52, 0.0  ;;  %v2123_v50 = vadd.f32 %v2065_v48, %v4816_v35  ;;  %v3822_v34 = vpop.f32.mrb[213].mxu0 }
 0x29b   : > { %v3938_v19 = vpop.f32.mrb[213].mxu1  ;;  %v2068_v20 = vpop.f32.mrb[214].mxu0 }
 0x29c   : > { %v2541_v11 = vpop.f32.mrb[214].mxu1  ;;  %2973 = vst.msk [vmem:[%s4833_s30 + $0xc8] sm:$0xf] %vm2922_vm5, %v3349_v42  ;;  %v3350_v7 = vpack.c.bf16 %v2707_v4, %v2707_v4  ;;  %v2596_v33 = vadd.f32 %v2538_v22, %v2123_v50  ;;  %v3823_v0 = vpop.f32.mrb[215].mxu0 }
 0x29d   : > { %v3939_v12 = vpop.f32.mrb[215].mxu1 }
 0x29e   : > { %2974 = vst.msk [vmem:[%s4833_s30 + $0xcc] sm:$0xf] %vm2922_vm5, %v3350_v7  ;;  %v2655_v14 = vadd.f32 %v4024_v15, %v2596_v33 }
 0x2a0   : > { %v2708_v2 = vmax.f32 %v2655_v14, 0.0 }
 0x2a2   : > { %v3351_v32 = vpack.c.bf16 %v2708_v2, %v2708_v2 }
 0x2a4   : > { %2976 = vst.msk [vmem:[%s4833_s30 + $0xd0] sm:$0x3] %vm2975_vm6, %v3351_v32 }
 0x2a5 PF: > { %s13_s12 = sadd.s32 1, %s4031_s12  }
 0x2a6   : > { %p10_p4 = scmp.ge.s32.totalorder %s13_s12, 4  }
 0x2a8   :  { %12 = sbr.rel (!%p10_p4) target bundleno = 1 (0x1), region = 65 }

// kernel: dqnetwork_forward.5
= control target key start
LH: loop header
LB: loop body
LE: loop exit
PB: predicated region body
PF: predicated region fallthrough
CT: control target
= control target key end

     0   :  { %s1684_s12 = smov 0   ;;  %s2009_s0 = inlined_call_operand.vmem [shape: bf16[2,116,128], index: 0, kind: input, shape index: {}]   ;;  %s2010_s1 = inlined_call_operand.vmem [shape: bf16[4,128,64], index: 1, kind: input, shape index: {}]   ;;  %s2011_s2 = inlined_call_operand.vmem [shape: f32[1,64], index: 2, kind: input, shape index: {}]   ;;  %s2012_s3 = inlined_call_operand.vmem [shape: bf16[2,98,64], index: 3, kind: output, shape index: {}]  }
   0x1 LB: > { %s1226_s13 = sadd.s32 4294967295, %s1660_s12   ;;  %p1230_p0 = scmp.ge.s32.totalorder %s1660_s12, 1  ;;  %s1660_s12 = sphi %s1684_s12, %s13_s12  }
   0x2   : > { %p137_p1 = scmp.lt.s32.totalorder %s1660_s12, 3 }
   0x4   : > { %p138_p2 = pnand %p1230_p0, %p137_p1 }
   0x5   : > { %v1606_v0 = vld [vmem:[%s2010_s1 + $0x40] sm:$0xff] (!%p138_p2)   ;;  %v1662_v1 = vmov (!%p138_p2), 0.0   ;;  %v1608_v3 = vld [vmem:[%s2010_s1 + $0x48] sm:$0xff] (!%p138_p2)   ;;  %vm1663_vm0 = vmmov (!%p138_p2), 0   ;;  %p161_p3 = scmp.lt.s32.totalorder (!%p138_p2), %s1226_s13, 1  ;;  %v1610_v5 = vld [vmem:[%s2010_s1 + $0x50] sm:$0xff] (!%p138_p2)  }
   0x6   : > { %141 = sbr.rel (%p138_p2) target bundleno = 365 (0x16d), region = 32  ;;  %1418 = vmatprep.subr.bf16.mxu0 (!%p138_p2), %v1662_v1  ;;  %1462 = vmatprep.subr.bf16.mxu1 (!%p138_p2), %v1662_v1  ;;  %v1607_v2 = vld [vmem:[%s2010_s1] sm:$0xff] (!%p138_p2)   ;;  %v1609_v4 = vld [vmem:[%s2010_s1 + $0x8] sm:$0xff] (!%p138_p2)   ;;  %v1611_v6 = vld [vmem:[%s2010_s1 + $0x10] sm:$0xff] (!%p138_p2)   ;;  %vm253_vm1 = vsmask.f32 (!%p138_p2), 7424 }
   0x7   : > { %1419 = vmatpush3.bf16.msra.mxu0 (!%p138_p2), %v1606_v0  ;;  %1434 = vmatprep.mubr.msk.bf16.mxu0 (!%p138_p2), %vm1663_vm0, %v1662_v1  ;;  %v1612_v7 = vld [vmem:[%s2010_s1 + $0x58] sm:$0xff] (!%p138_p2)   ;;  %v1614_v9 = vld [vmem:[%s2010_s1 + $0x60] sm:$0xff] (!%p138_p2)   ;;  %v1616_v11 = vld [vmem:[%s2010_s1 + $0x68] sm:$0xff] (!%p138_p2)   ;;  %vm661_vm2 = vcmask (!%p138_p2), 1046528   ;;  %vm852_vm3 = vsmask.f32 (!%p138_p2), 6400 }
   0x8   : > { %1463 = vmatpush3.bf16.msra.mxu1 (!%p138_p2), %v1607_v2  ;;  %1420 = vmatprep.subr.bf16.mxu0 (!%p138_p2), %v1662_v1  ;;  %v1613_v8 = vld [vmem:[%s2010_s1 + $0x18] sm:$0xff] (!%p138_p2)   ;;  %v1615_v10 = vld [vmem:[%s2010_s1 + $0x20] sm:$0xff] (!%p138_p2)   ;;  %v1617_v14 = vld [vmem:[%s2010_s1 + $0x28] sm:$0xff] (!%p138_p2)   ;;  %vm1156_vm4 = vcmask (!%p138_p2), 519168   ;;  %vm1169_vm5 = vcmask (!%p138_p2), 516096  }
   0x9   : > { %1464 = vmatprep.subr.bf16.mxu1 (!%p138_p2), %v1662_v1  ;;  %1478 = vmatprep.mubr.msk.bf16.mxu1 (!%p138_p2), %vm1663_vm0, %v1662_v1  ;;  %v1618_v16 = vld [vmem:[%s2010_s1 + $0x70] sm:$0xff] (!%p138_p2)   ;;  %v1620_v21 = vld [vmem:[%s2010_s1 + $0x78] sm:$0xff] (!%p138_p2)   ;;  %v1624_v26 = vld [vmem:[%s2010_s1 + $0x80] sm:$0xff] (!%p138_p2)  }
   0xa   : > { %v1619_v20 = vld [vmem:[%s2010_s1 + $0x30] sm:$0xff] (!%p138_p2)   ;;  %v1621_v22 = vld [vmem:[%s2010_s1 + $0x38] sm:$0xff] (!%p138_p2)   ;;  %v1625_v30 = vld [vmem:[%s2010_s1 + $0xc0] sm:$0xff] (!%p138_p2)  }
   0xb   : > { %1421 = vmatpush3.bf16.msra.mxu0 (!%p138_p2), %v1608_v3  ;;  %v1627_v31 = vld [vmem:[%s2010_s1 + $0x88] sm:$0xff] (!%p138_p2)   ;;  %v1629_v37 = vld [vmem:[%s2010_s1 + $0x90] sm:$0xff] (!%p138_p2)   ;;  %v1632_v44 = vld [vmem:[%s2010_s1 + $0x98] sm:$0xff] (!%p138_p2)  }
   0xc   : > { %1465 = vmatpush3.bf16.msra.mxu1 (!%p138_p2), %v1609_v4  ;;  %1422 = vmatprep.subr.bf16.mxu0 (!%p138_p2), %v1662_v1  ;;  %v1628_v35 = vld [vmem:[%s2010_s1 + $0xc8] sm:$0xff] (!%p138_p2)   ;;  %v1631_v40 = vld [vmem:[%s2010_s1 + $0xd0] sm:$0xff] (!%p138_p2)   ;;  %v1634_v45 = vld [vmem:[%s2010_s1 + $0xd8] sm:$0xff] (!%p138_p2)  }
   0xd   : > { %s2014_s13 = smov (!%p161_p3, %s1226_s13), 1  ;;  %1466 = vmatprep.subr.bf16.mxu1 %v1662_v1  ;;  %v1635_v49 = vld [vmem:[%s2010_s1 + $0xa0] sm:$0xff]   ;;  %v1638_v54 = vld [vmem:[%s2010_s1 + $0xa8] sm:$0xff]   ;;  %v1641_v59 = vld [vmem:[%s2010_s1 + $0xb0] sm:$0xff]  }
   0xe   : > { %s1594_s28 = smul.u32 60, %s2014_s13  ;;  %v1636_v50 = vld [vmem:[%s2010_s1 + $0xe0] sm:$0xff]   ;;  %v1639_v55 = vld [vmem:[%s2010_s1 + $0xe8] sm:$0xff]   ;;  %v1642_v60 = vld [vmem:[%s2010_s1 + $0xf0] sm:$0xff]  }
   0xf   : > { %1423 = vmatpush3.bf16.msra.mxu0 %v1610_v5  ;;  %v1644_v0 = vld [vmem:[%s2010_s1 + $0xb8] sm:$0xff]   ;;  %s1595_s7 = smul.u32 52, %s2014_s13 }
  0x10   : > { %1467 = vmatpush3.bf16.msra.mxu1 %v1611_v6  ;;  %1424 = vmatprep.subr.bf16.mxu0 %v1662_v1  ;;  %s1737_s8 = scalar_lea.vmem %s2009_s0, %s1594_s28  ;;  %v1645_v2 = vld [vmem:[%s2010_s1 + $0xf8] sm:$0xff]  }
  0x11   : > { %1468 = vmatprep.subr.bf16.mxu1 %v1662_v1  ;;  %v1622_v12 = vld [vmem:[%s1737_s8] sm:$0xff]   ;;  %v1623_v13 = vld [vmem:[%s1737_s8 + $0x8] sm:$0xff]   ;;  %v1626_v25 = vld [vmem:[%s1737_s8 + $0x10] sm:$0xff]   ;;  %s1957_s11 = scalar_lea.vmem %s2012_s3, %s1595_s7 }
  0x12   : > { %v257_v15 = vshll.u32 %v1622_v12, 16  ;;  %v255_v17 = vshrl.u32 %v1622_v12, 16  ;;  %v262_v19 = vshll.u32 %v1623_v13, 16  ;;  %v266_v28 = vshrl.u32 %v1623_v13, 16  ;;  %v1630_v34 = vld [vmem:[%s1737_s8 + $0x18] sm:$0xff]   ;;  %v1633_v43 = vld [vmem:[%s1737_s8 + $0x20] sm:$0xff]  }
  0x13   : > { %1425 = vmatpush3.bf16.msra.mxu0 %v1612_v7  ;;  %v270_v29 = vshll.u32 %v1626_v25, 16  ;;  %v274_v38 = vshrl.u32 %v1626_v25, 16  ;;  %v278_v39 = vshll.u32 %v1630_v34, 16  ;;  %v282_v47 = vshrl.u32 %v1630_v34, 16  ;;  %v1637_v53 = vld [vmem:[%s1737_s8 + $0x28] sm:$0xff]  }
  0x14   : > { %1469 = vmatpush3.bf16.msra.mxu1 %v1613_v8  ;;  %1426 = vmatprep.subr.bf16.mxu0 %v1662_v1  ;;  %v259_v18 = vrot.slane %v257_v15, 1  ;;  %v264_v24 = vrot.slane %v262_v19, 1  ;;  %v286_v48 = vshll.u32 %v1633_v43, 16  ;;  %v290_v57 = vshrl.u32 %v1633_v43, 16 }
  0x15   : > { %1470 = vmatprep.subr.bf16.mxu1 %v1662_v1  ;;  %v272_v33 = vrot.slane %v270_v29, 1  ;;  %v280_v42 = vrot.slane %v278_v39, 1  ;;  %v294_v58 = vshll.u32 %v1637_v53, 16  ;;  %v1640_v63 = vld [vmem:[%s1737_s8 + $0x30] ss:$0 sps:$4 sm:$0x33]  }
  0x16   : > { %v260_v23 = vor.u32 %v259_v18, %v255_v17  ;;  %v268_v32 = vor.u32 %v266_v28, %v264_v24  ;;  %v288_v52 = vrot.slane %v286_v48, 1  ;;  %v298_v4 = vshrl.u32 %v1637_v53, 16  ;;  %v1643_v17 = vld [vmem:[%s1737_s8 + $0x30] ss:$0 sps:$4 sm:$0x11]  }
  0x17   : > { %1427 = vmatpush3.bf16.msra.mxu0 %v1614_v9  ;;  %v276_v41 = vor.u32 %v274_v38, %v272_v33  ;;  %v284_v51 = vor.u32 %v282_v47, %v280_v42  ;;  %v296_v62 = vrot.slane %v294_v58, 1  ;;  %v302_v5 = vshll.u32 %v1640_v63, 16  ;;  %v1646_v9 = vld [vmem:[%s1737_s8 + $0x4] sm:$0xfe]  }
  0x18   : > { %1471 = vmatpush3.bf16.msra.mxu1 %v1615_v10  ;;  %1428 = vmatprep.subr.bf16.mxu0 %v1662_v1  ;;  %v265_v27 = vsel %vm253_vm1, %v260_v23, %v264_v24  ;;  %v273_v36 = vsel %vm253_vm1, %v268_v32, %v272_v33  ;;  %v292_v61 = vor.u32 %v290_v57, %v288_v52  ;;  %v1647_v10 = vld [vmem:[%s1737_s8 + $0xc] sm:$0xff]   ;;  %v662_v23 = vrot.slane %v1646_v9, 1  ;;  %v1649_v33 = vld [vmem:[%s1737_s8 + $0x1c] sm:$0xff]  }
  0x19   : > { %1472 = vmatprep.subr.bf16.mxu1 %v1662_v1  ;;  %v281_v46 = vsel %vm253_vm1, %v276_v41, %v280_v42  ;;  %v289_v56 = vsel %vm253_vm1, %v284_v51, %v288_v52  ;;  %v300_v6 = vor.u32 %v298_v4, %v296_v62  ;;  %v304_v7 = vrot.slane %v302_v5, 1  ;;  %v1650_v42 = vld [vmem:[%s1737_s8 + $0x24] sm:$0xff]   ;;  %v1651_v51 = vld [vmem:[%s1737_s8 + $0x2c] sm:$0xff]  }
  0x1a   : > { %v297_v3 = vsel %vm253_vm1, %v292_v61, %v296_v62  ;;  %v865_v15 = vshll.u32 %v1647_v10, 16  ;;  %v663_v24 = vrot.slane %v1647_v10, 1  ;;  %v669_v52 = vrot.slane %v1650_v42, 1 }
  0x1b   : > { %1429 = vmatpush3.bf16.msra.mxu0 %v1616_v11  ;;  %v305_v8 = vsel %vm253_vm1, %v300_v6, %v304_v7  ;;  %v306_v11 = vshrl.u32 %v1640_v63, 16  ;;  %v671_v61 = vrot.slane %v1651_v51, 1 }
  0x1c   : > { %1473 = vmatpush3.bf16.msra.mxu1 %v1617_v14  ;;  %1430 = vmatprep.subr.bf16.mxu0 %v1662_v1  ;;  %v862_v14 = vshrl.u32 %v1647_v10, 16  ;;  %v664_v29 = vsel %vm661_vm2, %v662_v23, %v663_v24 }
  0x1d   : > { %1474 = vmatprep.subr.bf16.mxu1 %v1662_v1 }
  0x1f   : > { %1431 = vmatpush3.bf16.msra.mxu0 %v1618_v16  ;;  %v308_v16 = vor.u32 %v306_v11, %v304_v7 }
  0x20   : > { %1475 = vmatpush3.bf16.msra.mxu1 %v1619_v20  ;;  %1432 = vmatprep.subr.bf16.mxu0 %v1662_v1  ;;  %v864_v20 = vrot.slane %v862_v14, 1 }
  0x21   : > { %1476 = vmatprep.subr.bf16.mxu1 %v1662_v1 }
  0x23   : > { %1433 = vmatpush3.bf16.msra.mxu0 %v1620_v21  ;;  %v867_v21 = vrot.slane %v865_v15, 2 }
  0x24   : > { %1477 = vmatpush3.bf16.msra.mxu1 %v1621_v22  ;;  %1506 = vmatprep.subr.bf16.mxu0 %v1662_v1  ;;  %v1648_v22 = vld [vmem:[%s1737_s8 + $0x14] sm:$0xff]  }
  0x25   : > { %1550 = vmatprep.subr.bf16.mxu1 %v1662_v1  ;;  %v874_v28 = vshll.u32 %v1648_v22, 16 }
  0x26   : > { %1435 = vmatmul.mubr.bf16.vlgmr.msra.gmra.mrb[0].mxu0 %v265_v27  ;;  %v871_v27 = vshrl.u32 %v1648_v22, 16 }
  0x27   : > { %1479 = vmatmul.mubr.bf16.vlgmr.msra.gmra.mrb[0].mxu1 %v1622_v12  ;;  %1507 = vmatpush3.bf16.msra.mxu0 %v1624_v26  ;;  %v854_v12 = vshrl.u32 %v1646_v9, 16  ;;  %v868_v26 = vor.u32 %v867_v21, %v864_v20  ;;  %v876_v32 = vrot.slane %v874_v28, 2 }
  0x28   : > { %1551 = vmatpush3.bf16.msra.mxu1 %v1625_v30  ;;  %1438 = vmatprep.mubr.msk.bf16.mxu0 %vm1663_vm0, %v1662_v1 }
  0x29   : > { %1482 = vmatprep.mubr.msk.bf16.mxu1 %vm1663_vm0, %v1662_v1  ;;  %1508 = vmatprep.subr.bf16.mxu0 %v1662_v1  ;;  %v856_v18 = vrot.slane %v854_v12, 1 }
  0x2a   : > { %1552 = vmatprep.subr.bf16.mxu1 %v1662_v1 }
  0x2b   : > { %1509 = vmatpush3.bf16.msra.mxu0 %v1627_v31  ;;  %v873_v31 = vrot.slane %v871_v27, 1 }
  0x2c   : > { %1553 = vmatpush3.bf16.msra.mxu1 %v1628_v35  ;;  %1510 = vmatprep.subr.bf16.mxu0 %v1662_v1 }
  0x2d   : > { %1554 = vmatprep.subr.bf16.mxu1 %v1662_v1  ;;  %v877_v35 = vor.u32 %v876_v32, %v873_v31 }
  0x2e   : > { %1439 = vmatmul.mubr.bf16.gmra.mrb[4].mxu0 %v273_v36  ;;  %v880_v36 = vshrl.u32 %v1649_v33, 16 }
  0x2f   : > { %1483 = vmatmul.mubr.bf16.gmra.mrb[4].mxu1 %v1623_v13  ;;  %1442 = vmatprep.mubr.msk.bf16.mxu0 %vm1663_vm0, %v1662_v1  ;;  %v857_v13 = vshll.u32 %v1646_v9, 16  ;;  %v878_v39 = vsel %vm852_vm3, %v868_v26, %v877_v35 }
  0x30   : > { %1486 = vmatprep.mubr.msk.bf16.mxu1 %vm1663_vm0, %v1662_v1  ;;  %1511 = vmatpush3.bf16.msra.mxu0 %v1629_v37  ;;  %v883_v37 = vshll.u32 %v1649_v33, 16 }
  0x31   : > { %1555 = vmatpush3.bf16.msra.mxu1 %v1631_v40  ;;  %1512 = vmatprep.subr.bf16.mxu0 %v1662_v1  ;;  %v859_v19 = vrot.slane %v857_v13, 2  ;;  %v882_v40 = vrot.slane %v880_v36, 1 }
  0x32   : > { %1556 = vmatprep.subr.bf16.mxu1 %v1662_v1  ;;  %v885_v41 = vrot.slane %v883_v37, 2 }
  0x34   : > { %1513 = vmatpush3.bf16.msra.mxu0 %v1632_v44  ;;  %v886_v44 = vor.u32 %v885_v41, %v882_v40 }
  0x35   : > { %1557 = vmatpush3.bf16.msra.mxu1 %v1634_v45  ;;  %1514 = vmatprep.subr.bf16.mxu0 %v1662_v1  ;;  %v889_v45 = vshrl.u32 %v1650_v42, 16 }
  0x36   : > { %1443 = vmatmul.mubr.bf16.gmra.mrb[8].mxu0 %v281_v46  ;;  %1558 = vmatprep.subr.bf16.mxu1 %v1662_v1  ;;  %v892_v46 = vshll.u32 %v1650_v42, 16  ;;  %v887_v48 = vsel %vm852_vm3, %v877_v35, %v886_v44 }
  0x37   : > { %1487 = vmatmul.mubr.bf16.gmra.mrb[8].mxu1 %v1626_v25  ;;  %1446 = vmatprep.mubr.msk.bf16.mxu0 %vm1663_vm0, %v1662_v1  ;;  %v860_v25 = vor.u32 %v859_v19, %v856_v18 }
  0x38   : > { %1490 = vmatprep.mubr.msk.bf16.mxu1 %vm1663_vm0, %v1662_v1  ;;  %1515 = vmatpush3.bf16.msra.mxu0 %v1635_v49  ;;  %v891_v49 = vrot.slane %v889_v45, 1 }
  0x39   : > { %1559 = vmatpush3.bf16.msra.mxu1 %v1636_v50  ;;  %1516 = vmatprep.subr.bf16.mxu0 %v1662_v1  ;;  %v869_v30 = vsel %vm852_vm3, %v860_v25, %v868_v26  ;;  %v894_v50 = vrot.slane %v892_v46, 2 }
  0x3a   : > { %1560 = vmatprep.subr.bf16.mxu1 %v1662_v1 }
  0x3c   : > { %1517 = vmatpush3.bf16.msra.mxu0 %v1638_v54  ;;  %v898_v54 = vshrl.u32 %v1651_v51, 16 }
  0x3d   : > { %1561 = vmatpush3.bf16.msra.mxu1 %v1639_v55  ;;  %1518 = vmatprep.subr.bf16.mxu0 %v1662_v1  ;;  %v901_v55 = vshll.u32 %v1651_v51, 16 }
  0x3e   : > { %1447 = vmatmul.mubr.bf16.gmra.mrb[12].mxu0 %v289_v56  ;;  %1562 = vmatprep.subr.bf16.mxu1 %v1662_v1  ;;  %v900_v58 = vrot.slane %v898_v54, 1 }
  0x3f   : > { %1491 = vmatmul.mubr.bf16.gmra.mrb[12].mxu1 %v1630_v34  ;;  %1450 = vmatprep.mubr.msk.bf16.mxu0 %vm1663_vm0, %v1662_v1  ;;  %v665_v34 = vrot.slane %v1648_v22, 1 }
  0x40   : > { %1494 = vmatprep.mubr.msk.bf16.mxu1 %vm1663_vm0, %v1662_v1  ;;  %1519 = vmatpush3.bf16.msra.mxu0 %v1641_v59  ;;  %v903_v59 = vrot.slane %v901_v55, 2 }
  0x41   : > { %1563 = vmatpush3.bf16.msra.mxu1 %v1642_v60  ;;  %1520 = vmatprep.subr.bf16.mxu0 %v1662_v1  ;;  %v666_v38 = vsel %vm661_vm2, %v663_v24, %v665_v34  ;;  %v1653_v60 = vld [vmem:[%s1737_s8 + $0x34] ss:$0 sps:$4 sm:$0x77]  }
  0x42   : > { %1564 = vmatprep.subr.bf16.mxu1 %v1662_v1  ;;  %v904_v62 = vor.u32 %v903_v59, %v900_v58  ;;  %v907_v63 = vshrl.u32 %v1653_v60, 16 }
  0x44   : > { %1521 = vmatpush3.bf16.msra.mxu0 %v1644_v0  ;;  %v910_v0 = vshll.u32 %v1653_v60, 16  ;;  %v909_v5 = vrot.slane %v907_v63, 1 }
  0x45   : > { %1565 = vmatpush3.bf16.msra.mxu1 %v1645_v2  ;;  %v672_v2 = vsel %vm661_vm2, %v669_v52, %v671_v61 }
  0x46   : > { %1451 = vmatmul.mubr.bf16.gmra.mrb[16].mxu0 %v297_v3  ;;  %v1652_v3 = vld [vmem:[%s1737_s8 + $0x34] ss:$0 sps:$4 sm:$0x33]   ;;  %v912_v6 = vrot.slane %v910_v0, 2 }
  0x47   : > { %1495 = vmatmul.mubr.bf16.gmra.mrb[16].mxu1 %v1633_v43  ;;  %1454 = vmatprep.mubr.msk.bf16.mxu0 %vm1663_vm0, %v1662_v1  ;;  %v667_v43 = vrot.slane %v1649_v33, 1  ;;  %v673_v7 = vrot.slane %v1652_v3, 1 }
  0x48   : > { %1498 = vmatprep.mubr.msk.bf16.mxu1 %vm1663_vm0, %v1662_v1 }
  0x49   : > { %v668_v47 = vsel %vm661_vm2, %v665_v34, %v667_v43  ;;  %v670_v56 = vsel %vm661_vm2, %v667_v43, %v669_v52  ;;  %v674_v9 = vsel %vm661_vm2, %v671_v61, %v673_v7 }
  0x4e   : > { %1455 = vmatmul.mubr.bf16.gmra.mrb[20].mxu0 %v305_v8  ;;  %v913_v8 = vor.u32 %v912_v6, %v909_v5 }
  0x4f   : > { %1499 = vmatmul.mubr.bf16.gmra.mrb[20].mxu1 %v1637_v53  ;;  %1458 = vmatprep.mubr.msk.bf16.mxu0 %vm1663_vm0, %v1662_v1  ;;  %v895_v53 = vor.u32 %v894_v50, %v891_v49 }
  0x50   : > { %1502 = vmatprep.mubr.msk.bf16.mxu1 %vm1663_vm0, %v1662_v1  ;;  %v914_v10 = vsel %vm852_vm3, %v904_v62, %v913_v8 }
  0x51   : > { %v896_v57 = vsel %vm852_vm3, %v886_v44, %v895_v53  ;;  %v905_v4 = vsel %vm852_vm3, %v895_v53, %v904_v62 }
  0x56   : > { %1459 = vmatmul.mubr.bf16.gmra.mrb[24].mxu0 %v308_v16 }
  0x57   : > { %1503 = vmatmul.mubr.bf16.gmra.mrb[24].mxu1 %v1643_v17  ;;  %1522 = vmatprep.mubr.msk.bf16.mxu0 %vm1663_vm0, %v1662_v1 }
  0x58   : > { %1566 = vmatprep.mubr.msk.bf16.mxu1 %vm1663_vm0, %v1662_v1 }
  0x5e   : > { %1523 = vmatmul.mubr.bf16.vlgmr.msra.gmra.mrb[28].mxu0 %v664_v29 }
  0x5f   : > { %1567 = vmatmul.mubr.bf16.vlgmr.msra.gmra.mrb[28].mxu1 %v869_v30  ;;  %1526 = vmatprep.mubr.msk.bf16.mxu0 %vm1663_vm0, %v1662_v1 }
  0x60   : > { %1570 = vmatprep.mubr.msk.bf16.mxu1 %vm1663_vm0, %v1662_v1 }
  0x66   : > { %1527 = vmatmul.mubr.bf16.gmra.mrb[32].mxu0 %v666_v38 }
  0x67   : > { %1571 = vmatmul.mubr.bf16.gmra.mrb[32].mxu1 %v878_v39  ;;  %1530 = vmatprep.mubr.msk.bf16.mxu0 %vm1663_vm0, %v1662_v1 }
  0x68   : > { %1574 = vmatprep.mubr.msk.bf16.mxu1 %vm1663_vm0, %v1662_v1 }
  0x6e   : > { %1531 = vmatmul.mubr.bf16.gmra.mrb[36].mxu0 %v668_v47 }
  0x6f   : > { %1575 = vmatmul.mubr.bf16.gmra.mrb[36].mxu1 %v887_v48  ;;  %1534 = vmatprep.mubr.msk.bf16.mxu0 %vm1663_vm0, %v1662_v1 }
  0x70   : > { %1578 = vmatprep.mubr.msk.bf16.mxu1 %vm1663_vm0, %v1662_v1 }
  0x76   : > { %1535 = vmatmul.mubr.bf16.gmra.mrb[40].mxu0 %v670_v56 }
  0x77   : > { %1579 = vmatmul.mubr.bf16.gmra.mrb[40].mxu1 %v896_v57  ;;  %1538 = vmatprep.mubr.msk.bf16.mxu0 %vm1663_vm0, %v1662_v1 }
  0x78   : > { %1582 = vmatprep.mubr.msk.bf16.mxu1 %vm1663_vm0, %v1662_v1 }
  0x7e   : > { %1539 = vmatmul.mubr.bf16.gmra.mrb[44].mxu0 %v672_v2 }
  0x7f   : > { %1583 = vmatmul.mubr.bf16.gmra.mrb[44].mxu1 %v905_v4  ;;  %1542 = vmatprep.mubr.msk.bf16.mxu0 %vm1663_vm0, %v1662_v1 }
  0x80   : > { %1586 = vmatprep.mubr.msk.bf16.mxu1 %vm1663_vm0, %v1662_v1 }
  0x86   : > { %1543 = vmatmul.mubr.bf16.gmra.mrb[48].mxu0 %v674_v9 }
  0x87   : > { %1587 = vmatmul.mubr.bf16.gmra.mrb[48].mxu1 %v914_v10  ;;  %1546 = vmatprep.mubr.msk.bf16.mxu0 %vm1663_vm0, %v1662_v1 }
  0x88   : > { %1590 = vmatprep.mubr.msk.bf16.mxu1 %vm1663_vm0, %v1662_v1 }
  0x8e   : > { %1547 = vmatmul.mubr.bf16.gmra.mrb[52].mxu0 %v673_v7 }
  0x8f   : > { %1591 = vmatmul.mubr.bf16.gmra.mrb[52].mxu1 %v913_v8 }
  0xf9   : > { %v398_v11 = vpop.f32.mrb[0].mxu0 }
  0xfa   : > { %v544_v12 = vpop.f32.mrb[0].mxu1  ;;  %v1436_v13 = vpop.f32.mrb[1].mxu0 }
  0xfb   : > { %v1918_v14 = vadd.f32 %v544_v12, %v398_v11  ;;  %v1480_v15 = vpop.f32.mrb[1].mxu1  ;;  %v401_v16 = vpop.f32.mrb[2].mxu0 }
  0xfc   : > { %v547_v17 = vpop.f32.mrb[2].mxu1  ;;  %v1437_v18 = vpop.f32.mrb[3].mxu0 }
  0xfd   : > { %v1920_v19 = vadd.f32 %v547_v17, %v401_v16  ;;  %v1481_v20 = vpop.f32.mrb[3].mxu1 }
 0x101   : > { %v406_v21 = vpop.f32.mrb[4].mxu0 }
 0x102   : > { %v552_v22 = vpop.f32.mrb[4].mxu1  ;;  %v1440_v23 = vpop.f32.mrb[5].mxu0 }
 0x103   : > { %v1922_v24 = vadd.f32 %v552_v22, %v406_v21  ;;  %v1484_v1 = vpop.f32.mrb[5].mxu1  ;;  %v409_v25 = vpop.f32.mrb[6].mxu0  ;;  %v1948_v22 = vld [vmem:[%s2011_s2] ss:$0 sm:$0xff] }
 0x104   : > { %v555_v26 = vpop.f32.mrb[6].mxu1  ;;  %v1441_v27 = vpop.f32.mrb[7].mxu0 }
 0x105   : > { %v1924_v28 = vadd.f32 %v555_v26, %v409_v25  ;;  %v1485_v29 = vpop.f32.mrb[7].mxu1 }
 0x109   : > { %v414_v30 = vpop.f32.mrb[8].mxu0 }
 0x10a   : > { %v560_v31 = vpop.f32.mrb[8].mxu1  ;;  %v1444_v32 = vpop.f32.mrb[9].mxu0 }
 0x10b   : > { %v1926_v33 = vadd.f32 %v560_v31, %v414_v30  ;;  %v1488_v34 = vpop.f32.mrb[9].mxu1  ;;  %v417_v35 = vpop.f32.mrb[10].mxu0 }
 0x10c   : > { %v563_v36 = vpop.f32.mrb[10].mxu1  ;;  %v1445_v37 = vpop.f32.mrb[11].mxu0 }
 0x10d   : > { %v1928_v38 = vadd.f32 %v563_v36, %v417_v35  ;;  %v1489_v39 = vpop.f32.mrb[11].mxu1 }
 0x111   : > { %v422_v40 = vpop.f32.mrb[12].mxu0 }
 0x112   : > { %v568_v41 = vpop.f32.mrb[12].mxu1  ;;  %v1448_v42 = vpop.f32.mrb[13].mxu0 }
 0x113   : > { %v1930_v43 = vadd.f32 %v568_v41, %v422_v40  ;;  %v1492_v44 = vpop.f32.mrb[13].mxu1  ;;  %v425_v45 = vpop.f32.mrb[14].mxu0 }
 0x114   : > { %v571_v46 = vpop.f32.mrb[14].mxu1  ;;  %v1449_v47 = vpop.f32.mrb[15].mxu0 }
 0x115   : > { %v1932_v48 = vadd.f32 %v571_v46, %v425_v45  ;;  %v1493_v49 = vpop.f32.mrb[15].mxu1 }
 0x119   : > { %v430_v50 = vpop.f32.mrb[16].mxu0 }
 0x11a   : > { %v576_v51 = vpop.f32.mrb[16].mxu1  ;;  %v1452_v52 = vpop.f32.mrb[17].mxu0 }
 0x11b   : > { %v1934_v53 = vadd.f32 %v576_v51, %v430_v50  ;;  %v1496_v54 = vpop.f32.mrb[17].mxu1  ;;  %v433_v55 = vpop.f32.mrb[18].mxu0 }
 0x11c   : > { %v579_v56 = vpop.f32.mrb[18].mxu1  ;;  %v1453_v57 = vpop.f32.mrb[19].mxu0 }
 0x11d   : > { %v1936_v58 = vadd.f32 %v579_v56, %v433_v55  ;;  %v1497_v59 = vpop.f32.mrb[19].mxu1 }
 0x121   : > { %v438_v60 = vpop.f32.mrb[20].mxu0 }
 0x122   : > { %v584_v61 = vpop.f32.mrb[20].mxu1  ;;  %v1456_v62 = vpop.f32.mrb[21].mxu0 }
 0x123   : > { %v1938_v63 = vadd.f32 %v584_v61, %v438_v60  ;;  %v1500_v0 = vpop.f32.mrb[21].mxu1  ;;  %v441_v2 = vpop.f32.mrb[22].mxu0 }
 0x124   : > { %v587_v3 = vpop.f32.mrb[22].mxu1  ;;  %v1457_v4 = vpop.f32.mrb[23].mxu0 }
 0x125   : > { %v1940_v5 = vadd.f32 %v587_v3, %v441_v2  ;;  %v1501_v6 = vpop.f32.mrb[23].mxu1 }
 0x129   : > { %v446_v7 = vpop.f32.mrb[24].mxu0 }
 0x12a   : > { %v592_v8 = vpop.f32.mrb[24].mxu1  ;;  %v1460_v9 = vpop.f32.mrb[25].mxu0 }
 0x12b   : > { %v1942_v10 = vadd.f32 %v592_v8, %v446_v7  ;;  %v1504_v11 = vpop.f32.mrb[25].mxu1  ;;  %v449_v12 = vpop.f32.mrb[26].mxu0 }
 0x12c   : > { %v595_v13 = vpop.f32.mrb[26].mxu1  ;;  %v1461_v15 = vpop.f32.mrb[27].mxu0 }
 0x12d   : > { %v1505_v16 = vpop.f32.mrb[27].mxu1 }
 0x131   : > { %v764_v17 = vpop.f32.mrb[28].mxu0 }
 0x132   : > { %v818_v18 = vadd.f32 %v764_v17, %v1918_v14  ;;  %v1004_v20 = vpop.f32.mrb[28].mxu1  ;;  %v1524_v21 = vpop.f32.mrb[29].mxu0 }
 0x133   : > { %v1568_v23 = vpop.f32.mrb[29].mxu1  ;;  %v767_v1 = vpop.f32.mrb[30].mxu0 }
 0x134   : > { %v1058_v25 = vadd.f32 %v1004_v20, %v818_v18  ;;  %v819_v26 = vadd.f32 %v767_v1, %v1920_v19  ;;  %v1007_v27 = vpop.f32.mrb[30].mxu1  ;;  %v1525_v29 = vpop.f32.mrb[31].mxu0 }
 0x135   : > { %v1569_v30 = vpop.f32.mrb[31].mxu1 }
 0x136   : > { %v1077_v31 = vadd.f32 %v1948_v22, %v1058_v25  ;;  %v1059_v32 = vadd.f32 %v1007_v27, %v819_v26 }
 0x138   : > { %v1090_v14 = vmax.f32 %v1077_v31, 0.0  ;;  %v1078_v34 = vadd.f32 %v1948_v22, %v1059_v32 }
 0x139   : > { %v772_v35 = vpop.f32.mrb[32].mxu0 }
 0x13a   : > { %v1345_v19 = vpack.c.bf16 %v1090_v14, %v1090_v14  ;;  %v1091_v36 = vmax.f32 %v1078_v34, 0.0  ;;  %v820_v37 = vadd.f32 %v772_v35, %v1922_v24  ;;  %v1012_v39 = vpop.f32.mrb[32].mxu1  ;;  %v1528_v40 = vpop.f32.mrb[33].mxu0 }
 0x13b   : > { %v1572_v41 = vpop.f32.mrb[33].mxu1  ;;  %v775_v42 = vpop.f32.mrb[34].mxu0 }
 0x13c   : > { %1157 = vst.msk [vmem:[%s1957_s11] sm:$0xf] %vm1156_vm4, %v1345_v19  ;;  %v1346_v44 = vpack.c.bf16 %v1091_v36, %v1091_v36  ;;  %v1060_v45 = vadd.f32 %v1012_v39, %v820_v37  ;;  %v821_v46 = vadd.f32 %v775_v42, %v1924_v28  ;;  %v1015_v47 = vpop.f32.mrb[34].mxu1  ;;  %v1529_v49 = vpop.f32.mrb[35].mxu0 }
 0x13d   : > { %v1573_v50 = vpop.f32.mrb[35].mxu1 }
 0x13e   : > { %1158 = vst.msk [vmem:[%s1957_s11 + $0x4] sm:$0xf] %vm1156_vm4, %v1346_v44  ;;  %v1079_v51 = vadd.f32 %v1948_v22, %v1060_v45  ;;  %v1061_v52 = vadd.f32 %v1015_v47, %v821_v46 }
 0x140   : > { %v1092_v24 = vmax.f32 %v1079_v51, 0.0  ;;  %v1080_v54 = vadd.f32 %v1948_v22, %v1061_v52 }
 0x141   : > { %v780_v55 = vpop.f32.mrb[36].mxu0 }
 0x142   : > { %v1347_v56 = vpack.c.bf16 %v1092_v24, %v1092_v24  ;;  %v1093_v57 = vmax.f32 %v1080_v54, 0.0  ;;  %v822_v59 = vadd.f32 %v780_v55, %v1926_v33  ;;  %v1020_v60 = vpop.f32.mrb[36].mxu1  ;;  %v1532_v28 = vpop.f32.mrb[37].mxu0 }
 0x143   : > { %v1576_v61 = vpop.f32.mrb[37].mxu1  ;;  %v783_v62 = vpop.f32.mrb[38].mxu0 }
 0x144   : > { %1159 = vst.msk [vmem:[%s1957_s11 + $0x8] sm:$0xf] %vm1156_vm4, %v1347_v56  ;;  %v1348_v0 = vpack.c.bf16 %v1093_v57, %v1093_v57  ;;  %v1062_v2 = vadd.f32 %v1020_v60, %v822_v59  ;;  %v823_v3 = vadd.f32 %v783_v62, %v1928_v38  ;;  %v1023_v4 = vpop.f32.mrb[38].mxu1  ;;  %v1533_v6 = vpop.f32.mrb[39].mxu0 }
 0x145   : > { %v1577_v7 = vpop.f32.mrb[39].mxu1 }
 0x146   : > { %1160 = vst.msk [vmem:[%s1957_s11 + $0xc] sm:$0xf] %vm1156_vm4, %v1348_v0  ;;  %v1081_v8 = vadd.f32 %v1948_v22, %v1062_v2  ;;  %v1063_v9 = vadd.f32 %v1023_v4, %v823_v3 }
 0x148   : > { %v1094_v33 = vmax.f32 %v1081_v8, 0.0  ;;  %v1082_v11 = vadd.f32 %v1948_v22, %v1063_v9 }
 0x149   : > { %v788_v12 = vpop.f32.mrb[40].mxu0 }
 0x14a   : > { %v1349_v13 = vpack.c.bf16 %v1094_v33, %v1094_v33  ;;  %v1095_v15 = vmax.f32 %v1082_v11, 0.0  ;;  %v824_v16 = vadd.f32 %v788_v12, %v1930_v43  ;;  %v1028_v17 = vpop.f32.mrb[40].mxu1  ;;  %v1536_v38 = vpop.f32.mrb[41].mxu0 }
 0x14b   : > { %v1580_v18 = vpop.f32.mrb[41].mxu1  ;;  %v791_v20 = vpop.f32.mrb[42].mxu0 }
 0x14c   : > { %1161 = vst.msk [vmem:[%s1957_s11 + $0x10] sm:$0xf] %vm1156_vm4, %v1349_v13  ;;  %v1350_v21 = vpack.c.bf16 %v1095_v15, %v1095_v15  ;;  %v1064_v23 = vadd.f32 %v1028_v17, %v824_v16  ;;  %v825_v1 = vadd.f32 %v791_v20, %v1932_v48  ;;  %v1031_v25 = vpop.f32.mrb[42].mxu1  ;;  %v1537_v26 = vpop.f32.mrb[43].mxu0 }
 0x14d   : > { %v1581_v27 = vpop.f32.mrb[43].mxu1 }
 0x14e   : > { %1162 = vst.msk [vmem:[%s1957_s11 + $0x14] sm:$0xf] %vm1156_vm4, %v1350_v21  ;;  %v1083_v29 = vadd.f32 %v1948_v22, %v1064_v23  ;;  %v1065_v30 = vadd.f32 %v1031_v25, %v825_v1 }
 0x150   : > { %v1096_v43 = vmax.f32 %v1083_v29, 0.0  ;;  %v1084_v31 = vadd.f32 %v1948_v22, %v1065_v30 }
 0x151   : > { %v796_v32 = vpop.f32.mrb[44].mxu0 }
 0x152   : > { %v1351_v14 = vpack.c.bf16 %v1096_v43, %v1096_v43  ;;  %v1097_v34 = vmax.f32 %v1084_v31, 0.0  ;;  %v826_v35 = vadd.f32 %v796_v32, %v1934_v53  ;;  %v1036_v19 = vpop.f32.mrb[44].mxu1  ;;  %v1540_v48 = vpop.f32.mrb[45].mxu0 }
 0x153   : > { %v1584_v36 = vpop.f32.mrb[45].mxu1  ;;  %v799_v37 = vpop.f32.mrb[46].mxu0 }
 0x154   : > { %1163 = vst.msk [vmem:[%s1957_s11 + $0x18] sm:$0xf] %vm1156_vm4, %v1351_v14  ;;  %v1352_v39 = vpack.c.bf16 %v1097_v34, %v1097_v34  ;;  %v1066_v40 = vadd.f32 %v1036_v19, %v826_v35  ;;  %v827_v41 = vadd.f32 %v799_v37, %v1936_v58  ;;  %v1039_v42 = vpop.f32.mrb[46].mxu1  ;;  %v1541_v44 = vpop.f32.mrb[47].mxu0 }
 0x155   : > { %v1585_v45 = vpop.f32.mrb[47].mxu1 }
 0x156   : > { %1164 = vst.msk [vmem:[%s1957_s11 + $0x1c] sm:$0xf] %vm1156_vm4, %v1352_v39  ;;  %v1085_v46 = vadd.f32 %v1948_v22, %v1066_v40  ;;  %v1067_v47 = vadd.f32 %v1039_v42, %v827_v41 }
 0x158   : > { %v1098_v53 = vmax.f32 %v1085_v46, 0.0  ;;  %v1086_v49 = vadd.f32 %v1948_v22, %v1067_v47 }
 0x159   : > { %v804_v50 = vpop.f32.mrb[48].mxu0 }
 0x15a   : > { %v1353_v51 = vpack.c.bf16 %v1098_v53, %v1098_v53  ;;  %v1099_v52 = vmax.f32 %v1086_v49, 0.0  ;;  %v828_v24 = vadd.f32 %v804_v50, %v1938_v63  ;;  %v1044_v54 = vpop.f32.mrb[48].mxu1  ;;  %v1544_v58 = vpop.f32.mrb[49].mxu0 }
 0x15b   : > { %v1588_v55 = vpop.f32.mrb[49].mxu1  ;;  %v807_v56 = vpop.f32.mrb[50].mxu0 }
 0x15c   : > { %1165 = vst.msk [vmem:[%s1957_s11 + $0x20] sm:$0xf] %vm1156_vm4, %v1353_v51  ;;  %v1354_v57 = vpack.c.bf16 %v1099_v52, %v1099_v52  ;;  %v1068_v59 = vadd.f32 %v1044_v54, %v828_v24  ;;  %v829_v60 = vadd.f32 %v807_v56, %v1940_v5  ;;  %v1047_v28 = vpop.f32.mrb[50].mxu1  ;;  %v1545_v61 = vpop.f32.mrb[51].mxu0 }
 0x15d   : > { %v1589_v62 = vpop.f32.mrb[51].mxu1 }
 0x15e   : > { %1166 = vst.msk [vmem:[%s1957_s11 + $0x24] sm:$0xf] %vm1156_vm4, %v1354_v57  ;;  %v1087_v0 = vadd.f32 %v1948_v22, %v1068_v59  ;;  %v1069_v2 = vadd.f32 %v1047_v28, %v829_v60 }
 0x160   : > { %v1100_v63 = vmax.f32 %v1087_v0, 0.0  ;;  %v1088_v3 = vadd.f32 %v1948_v22, %v1069_v2 }
 0x161   : > { %v812_v4 = vpop.f32.mrb[52].mxu0 }
 0x162   : > { %v1355_v6 = vpack.c.bf16 %v1100_v63, %v1100_v63  ;;  %v1101_v7 = vmax.f32 %v1088_v3, 0.0  ;;  %v830_v8 = vadd.f32 %v812_v4, %v1942_v10  ;;  %v1052_v5 = vpop.f32.mrb[52].mxu1  ;;  %v1548_v9 = vpop.f32.mrb[53].mxu0 }
 0x163   : > { %v1592_v33 = vpop.f32.mrb[53].mxu1  ;;  %v815_v11 = vpop.f32.mrb[54].mxu0 }
 0x164   : > { %1167 = vst.msk [vmem:[%s1957_s11 + $0x28] sm:$0xf] %vm1156_vm4, %v1355_v6  ;;  %v1356_v12 = vpack.c.bf16 %v1101_v7, %v1101_v7  ;;  %v1070_v13 = vadd.f32 %v1052_v5, %v830_v8  ;;  %v1055_v15 = vpop.f32.mrb[54].mxu1  ;;  %v1549_v16 = vpop.f32.mrb[55].mxu0 }
 0x165   : > { %v1593_v17 = vpop.f32.mrb[55].mxu1 }
 0x166   : > { %1168 = vst.msk [vmem:[%s1957_s11 + $0x2c] sm:$0xf] %vm1156_vm4, %v1356_v12  ;;  %v1089_v38 = vadd.f32 %v1948_v22, %v1070_v13 }
 0x168   : > { %v1102_v18 = vmax.f32 %v1089_v38, 0.0 }
 0x16a   : > { %v1357_v20 = vpack.c.bf16 %v1102_v18, %v1102_v18 }
 0x16c   : > { %1170 = vst.msk [vmem:[%s1957_s11 + $0x30] sm:$0x1] %vm1169_vm5, %v1357_v20 }
 0x16d PF: > { %s13_s12 = sadd.s32 1, %s1660_s12  }
 0x16e   : > { %p10_p4 = scmp.ge.s32.totalorder %s13_s12, 4  }
 0x170   :  { %12 = sbr.rel (!%p10_p4) target bundleno = 1 (0x1), region = 65 }

// kernel: dqnetwork_forward.6
= control target key start
LH: loop header
LB: loop body
LE: loop exit
PB: predicated region body
PF: predicated region fallthrough
CT: control target
= control target key end

     0   :  { %s2413_s12 = smov 0   ;;  %s2934_s0 = inlined_call_operand.vmem [shape: bf16[2,98,64], index: 0, kind: input, shape index: {}]   ;;  %s2935_s1 = inlined_call_operand.vmem [shape: bf16[9,64,64], index: 1, kind: input, shape index: {}]   ;;  %s2936_s2 = inlined_call_operand.vmem [shape: f32[1,64], index: 2, kind: input, shape index: {}]   ;;  %s2937_s3 = inlined_call_operand.vmem [shape: bf16[2,70,64], index: 3, kind: output, shape index: {}]  }
   0x1 LB: > { %s1771_s13 = sadd.s32 4294967295, %s2389_s12   ;;  %p1775_p0 = scmp.ge.s32.totalorder %s2389_s12, 1  ;;  %s2389_s12 = sphi %s2413_s12, %s13_s12  }
   0x2   : > { %p137_p1 = scmp.lt.s32.totalorder %s2389_s12, 3 }
   0x4   : > { %p138_p2 = pnand %p1775_p0, %p137_p1 }
   0x5   : > { %v2322_v0 = vld [vmem:[%s2935_s1 + $0x20] sm:$0xff] (!%p138_p2)   ;;  %v2391_v1 = vmov (!%p138_p2), 0.0   ;;  %v2323_v2 = vld [vmem:[%s2935_s1 + $0x28] sm:$0xff] (!%p138_p2)   ;;  %p161_p3 = scmp.lt.s32.totalorder (!%p138_p2), %s1771_s13, 1  ;;  %vm2392_vm0 = vmmov (!%p138_p2), 0   ;;  %v2324_v3 = vld [vmem:[%s2935_s1 + $0x30] sm:$0xff] (!%p138_p2)  }
   0x6   : > { %141 = sbr.rel (%p138_p2) target bundleno = 424 (0x1a8), region = 32  ;;  %2302 = vmatprep.subr.bf16.mxu1 (!%p138_p2), %v2391_v1  ;;  %2050 = vmatprep.subr.bf16.mxu0 (!%p138_p2), %v2391_v1  ;;  %v2325_v4 = vld [vmem:[%s2935_s1 + $0x38] sm:$0xff] (!%p138_p2)   ;;  %vm223_vm1 = vsmask.f32 (!%p138_p2), 7424  ;;  %vm287_vm2 = vcmask (!%p138_p2), 523264   ;;  %v2328_v19 = vld [vmem:[%s2935_s1] sm:$0xff] (!%p138_p2)  }
   0x7   : > { %2306 = vmatpush3.bf16.msra.mxu1 (!%p138_p2), %v2322_v0  ;;  %2051 = vmatpush3.bf16.msra.mxu0 (!%p138_p2), %v2322_v0  ;;  %v2333_v28 = vld [vmem:[%s2935_s1 + $0x40] sm:$0xff] (!%p138_p2)   ;;  %v2329_v30 = vld [vmem:[%s2935_s1 + $0x8] sm:$0xff] (!%p138_p2)   ;;  %v2334_v38 = vld [vmem:[%s2935_s1 + $0x10] sm:$0xff] (!%p138_p2)   ;;  %vm498_vm3 = vcmask (!%p138_p2), 1046528   ;;  %vm842_vm4 = vsmask.f32 (!%p138_p2), 6400 }
   0x8   : > { %2303 = vmatprep.subr.bf16.mxu1 (!%p138_p2), %v2391_v1  ;;  %2052 = vmatprep.subr.bf16.mxu0 (!%p138_p2), %v2391_v1  ;;  %v2335_v34 = vld [vmem:[%s2935_s1 + $0x48] sm:$0xff] (!%p138_p2)   ;;  %v2336_v41 = vld [vmem:[%s2935_s1 + $0x50] sm:$0xff] (!%p138_p2)   ;;  %v2337_v43 = vld [vmem:[%s2935_s1 + $0x18] sm:$0xff] (!%p138_p2)   ;;  %vm1020_vm5 = vcmask (!%p138_p2), 1045504   ;;  %vm1514_vm6 = vcmask (!%p138_p2), 1044480   ;;  %vm1705_vm8 = vcmask (!%p138_p2), 519168  }
   0x9   : > { %2066 = vmatprep.mubr.msk.bf16.mxu1 (!%p138_p2), %vm2392_vm0, %v2391_v1  ;;  %2058 = vmatprep.mubr.msk.bf16.mxu0 (!%p138_p2), %vm2392_vm0, %v2391_v1  ;;  %v2338_v44 = vld [vmem:[%s2935_s1 + $0x58] sm:$0xff] (!%p138_p2)   ;;  %v2341_v49 = vld [vmem:[%s2935_s1 + $0x80] sm:$0xff] (!%p138_p2)   ;;  %v2343_v51 = vld [vmem:[%s2935_s1 + $0x88] sm:$0xff] (!%p138_p2)   ;;  %vm1336_vm7 = vsmask.f32 (!%p138_p2), 5376  ;;  %vm1714_vm9 = vcmask (!%p138_p2), 518144  }
   0xa   : > { %v2340_v52 = vld [vmem:[%s2935_s1 + $0x60] sm:$0xff] (!%p138_p2)   ;;  %v2345_v55 = vld [vmem:[%s2935_s1 + $0x90] sm:$0xff] (!%p138_p2)   ;;  %v2342_v57 = vld [vmem:[%s2935_s1 + $0x68] sm:$0xff] (!%p138_p2)  }
   0xb   : > { %2307 = vmatpush3.bf16.msra.mxu1 (!%p138_p2), %v2323_v2  ;;  %2053 = vmatpush3.bf16.msra.mxu0 (!%p138_p2), %v2323_v2  ;;  %v2348_v61 = vld [vmem:[%s2935_s1 + $0x98] sm:$0xff] (!%p138_p2)   ;;  %v2344_v63 = vld [vmem:[%s2935_s1 + $0x70] sm:$0xff] (!%p138_p2)  }
   0xc   : > { %2304 = vmatprep.subr.bf16.mxu1 (!%p138_p2), %v2391_v1  ;;  %2054 = vmatprep.subr.bf16.mxu0 (!%p138_p2), %v2391_v1  ;;  %v2346_v2 = vld [vmem:[%s2935_s1 + $0x78] sm:$0xff] (!%p138_p2)  }
   0xd   : > { %s2939_s13 = smov (!%p161_p3, %s1771_s13), 1 }
   0xe   : > { %s2310_s20 = smul.u32 52, %s2939_s13 }
   0xf   : > { %2308 = vmatpush3.bf16.msra.mxu1 %v2324_v3  ;;  %2055 = vmatpush3.bf16.msra.mxu0 %v2324_v3  ;;  %s2311_s18 = smul.u32 36, %s2939_s13 }
  0x10   : > { %s2449_s25 = scalar_lea.vmem %s2934_s0, %s2310_s20  ;;  %2305 = vmatprep.subr.bf16.mxu1 %v2391_v1  ;;  %2056 = vmatprep.subr.bf16.mxu0 %v2391_v1 }
  0x11   : > { %v2452_v5 = vld [vmem:[%s2449_s25 + $0x10] sm:$0xff]   ;;  %v2455_v6 = vld [vmem:[%s2449_s25 + $0x18] sm:$0xff]   ;;  %v173_v7 = vld [vmem:[%s2449_s25] sm:$0xf]  ;;  %s2898_s21 = scalar_lea.vmem %s2937_s3, %s2311_s18 }
  0x12   : > { %v174_v8 = vld [vmem:[%s2449_s25 + $0x4] sm:$0xf]  ;;  %v240_v9 = vshll.u32 %v2452_v5, 16  ;;  %v244_v10 = vshrl.u32 %v2452_v5, 16  ;;  %v248_v11 = vshll.u32 %v2455_v6, 16  ;;  %v2467_v13 = vld [vmem:[%s2449_s25 + $0x8] sm:$0xff]  }
  0x13   : > { %v2464_v12 = vcombine.low %v173_v7, %v174_v8  ;;  %v2470_v14 = vld [vmem:[%s2449_s25 + $0x20] ss:$0 sps:$4 sm:$0xff]   ;;  %2309 = vmatpush3.bf16.msra.mxu1 %v2325_v4  ;;  %2057 = vmatpush3.bf16.msra.mxu0 %v2325_v4  ;;  %v232_v20 = vshll.u32 %v2467_v13, 16  ;;  %v252_v21 = vshrl.u32 %v2455_v6, 16  ;;  %v236_v29 = vshrl.u32 %v2467_v13, 16 }
  0x14   : > { %v242_v15 = vrot.slane %v240_v9, 1  ;;  %v250_v16 = vrot.slane %v248_v11, 1  ;;  %2078 = vmatprep.subr.bf16.mxu1 %v2391_v1  ;;  %2106 = vmatprep.subr.bf16.mxu0 %v2391_v1  ;;  %v256_v24 = vshll.u32 %v2470_v14, 16  ;;  %v485_v36 = vld [vmem:[%s2449_s25] sm:$0xe]  ;;  %v260_v40 = vshrl.u32 %v2470_v14, 16 }
  0x15   : > { %v225_v17 = vshrl.u32 %v2464_v12, 16  ;;  %v227_v18 = vshll.u32 %v2464_v12, 16  ;;  %v234_v25 = vrot.slane %v232_v20, 1  ;;  %v1818_v42 = vcombine.low %v485_v36, %v174_v8  ;;  %v2550_v53 = vld [vmem:[%s2449_s25 + $0x1c] sm:$0xff]   ;;  %v2560_v56 = vld [vmem:[%s2449_s25 + $0x24] ss:$0 sps:$4 sm:$0xff]  }
  0x16   : > { %v246_v22 = vor.u32 %v244_v10, %v242_v15  ;;  %v254_v32 = vor.u32 %v252_v21, %v250_v16  ;;  %v258_v33 = vrot.slane %v256_v24, 1  ;;  %v500_v46 = vrot.slane %v2467_v13, 1  ;;  %v798_v4 = vld [vmem:[%s2449_s25 + $0x4] sm:$0xe]  ;;  %v2605_v7 = vld [vmem:[%s2449_s25 + $0x8] sm:$0xf] }
  0x17   : > { %v229_v23 = vrot.slane %v227_v18, 1  ;;  %v238_v35 = vor.u32 %v236_v29, %v234_v25  ;;  %v499_v45 = vrot.slane %v1818_v42, 1  ;;  %v502_v50 = vrot.slane %v2452_v5, 1  ;;  %v2611_v10 = vld [vmem:[%s2449_s25 + $0xc] sm:$0xff]   ;;  %v2623_v18 = vld [vmem:[%s2449_s25 + $0x14] sm:$0xff]   ;;  %v2642_v29 = vld [vmem:[%s2449_s25 + $0x1c] sm:$0xff]  }
  0x18   : > { %v251_v26 = vsel %vm223_vm1, %v246_v22, %v250_v16  ;;  %v259_v37 = vsel %vm223_vm1, %v254_v32, %v258_v33  ;;  %v262_v47 = vor.u32 %v260_v40, %v258_v33  ;;  %v674_v58 = vrot.slane %v2550_v53, 1  ;;  %v2349_v24 = vld [vmem:[%s2449_s25 + $0x4] sm:$0xfe]   ;;  %v2362_v42 = vld [vmem:[%s2935_s1 + $0xd0] sm:$0xff]  }
  0x19   : > { %v230_v27 = vor.u32 %v229_v23, %v225_v17  ;;  %2067 = vmatmul.mubr.msk.bf16.vlgmr.msra.gmra.mrb[0].mxu1 %vm287_vm2, %v251_v26  ;;  %v243_v39 = vsel %vm223_vm1, %v238_v35, %v242_v15  ;;  %v501_v48 = vsel %vm498_vm3, %v499_v45, %v500_v46  ;;  %v503_v54 = vsel %vm498_vm3, %v500_v46, %v502_v50  ;;  %v2347_v23 = vld [vmem:[%s2449_s25 + $0x20] ss:$0 sps:$4 sm:$0x77]   ;;  %v2358_v33 = vld [vmem:[%s2935_s1 + $0xc8] sm:$0xff]  }
  0x1a   : > { %2079 = vmatpush3.bf16.msra.mxu1 %v2328_v19  ;;  %2070 = vmatprep.mubr.msk.bf16.mxu1 %vm2392_vm0, %v2391_v1  ;;  %v676_v59 = vrot.slane %v2560_v56, 1  ;;  %v504_v60 = vrot.slane %v2455_v6, 1  ;;  %v506_v3 = vrot.slane %v2470_v14, 1  ;;  %v1858_v9 = vcombine.low %v798_v4, %v2605_v7  ;;  %v2354_v26 = vld [vmem:[%s2935_s1 + $0xc0] sm:$0xff]   ;;  %v2357_v45 = vld [vmem:[%s2935_s1 + $0xa8] sm:$0xff]  }
  0x1b   : > { %v235_v31 = vsel %vm223_vm1, %v230_v27, %v234_v25  ;;  %2080 = vmatprep.subr.bf16.mxu1 %v2391_v1  ;;  %v855_v14 = vshll.u32 %v2611_v10, 16  ;;  %v861_v21 = vshrl.u32 %v2623_v18, 16  ;;  %v864_v22 = vshll.u32 %v2623_v18, 16  ;;  %v2350_v25 = vld [vmem:[%s2449_s25 + $0xc] sm:$0xff]   ;;  %v1150_v53 = vld [vmem:[%s2449_s25 + $0x8] sm:$0xc] }
  0x1c   : > { %2059 = vmatmul.mubr.msk.bf16.vlgmr.msra.gmra.mrb[0].mxu0 %vm287_vm2, %v235_v31  ;;  %v2583_v62 = vsel %vm498_vm3, %v674_v58, %v676_v59  ;;  %v505_v0 = vsel %vm498_vm3, %v502_v50, %v504_v60  ;;  %v507_v8 = vsel %vm498_vm3, %v504_v60, %v506_v3  ;;  %v844_v11 = vshrl.u32 %v1858_v9, 16  ;;  %v2374_v56 = vld [vmem:[%s2935_s1 + $0x108] sm:$0xff]  }
  0x1d   : > { %2107 = vmatpush3.bf16.msra.mxu0 %v2333_v28  ;;  %2062 = vmatprep.mubr.msk.bf16.mxu0 %vm2392_vm0, %v2391_v1  ;;  %v857_v17 = vrot.slane %v855_v14, 2  ;;  %v863_v27 = vrot.slane %v861_v21, 1  ;;  %v866_v28 = vrot.slane %v864_v22, 2  ;;  %v670_v31 = vrot.slane %v2350_v25, 1  ;;  %v2381_v21 = vld [vmem:[%s2935_s1 + $0x118] sm:$0xff]  }
  0x1e   : > { %2108 = vmatprep.subr.bf16.mxu0 %v2391_v1  ;;  %2081 = vmatpush3.bf16.msra.mxu1 %v2329_v30  ;;  %v846_v15 = vrot.slane %v844_v11, 1  ;;  %v669_v30 = vrot.slane %v2349_v24, 1  ;;  %v873_v35 = vshll.u32 %v2642_v29, 16  ;;  %v1022_v14 = vrot.slane %v2611_v10, 2  ;;  %v2783_v22 = vld [vmem:[%s2449_s25 + $0x28] sm:$0xf] }
  0x1f   : > { %2082 = vmatprep.subr.bf16.mxu1 %v2391_v1  ;;  %v867_v32 = vor.u32 %v866_v28, %v863_v27  ;;  %v2376_v24 = vld [vmem:[%s2935_s1 + $0xf0] sm:$0xff]   ;;  %v2380_v27 = vld [vmem:[%s2935_s1 + $0xf8] sm:$0xff]  }
  0x20   : > { %v671_v36 = vsel %vm498_vm3, %v669_v30, %v670_v31 }
  0x21   : > { %2109 = vmatpush3.bf16.msra.mxu0 %v2335_v34  ;;  %2071 = vmatmul.mubr.msk.bf16.gmra.mrb[4].mxu1 %vm287_vm2, %v259_v37  ;;  %v870_v34 = vshrl.u32 %v2642_v29, 16  ;;  %v2353_v37 = vld [vmem:[%s2935_s1 + $0xa0] sm:$0xff]  }
  0x22   : > { %2110 = vmatprep.subr.bf16.mxu0 %v2391_v1  ;;  %2083 = vmatpush3.bf16.msra.mxu1 %v2334_v38  ;;  %v2355_v38 = vld [vmem:[%s2449_s25 + $0x14] sm:$0xff]  }
  0x23   : > { %2074 = vmatprep.mubr.msk.bf16.mxu1 %vm2392_vm0, %v2391_v1  ;;  %2084 = vmatprep.subr.bf16.mxu1 %v2391_v1  ;;  %v872_v40 = vrot.slane %v870_v34, 1 }
  0x24   : > { %2063 = vmatmul.mubr.msk.bf16.gmra.mrb[4].mxu0 %vm287_vm2, %v243_v39 }
  0x25   : > { %2111 = vmatpush3.bf16.msra.mxu0 %v2336_v41  ;;  %2114 = vmatprep.mubr.msk.bf16.mxu0 %vm2392_vm0, %v2391_v1  ;;  %v875_v41 = vrot.slane %v873_v35, 2 }
  0x26   : > { %2112 = vmatprep.subr.bf16.mxu0 %v2391_v1  ;;  %2085 = vmatpush3.bf16.msra.mxu1 %v2337_v43  ;;  %v2666_v43 = vld [vmem:[%s2449_s25 + $0x24] sm:$0x1f]  }
  0x27   : > { %2134 = vmatprep.subr.bf16.mxu1 %v2391_v1  ;;  %v876_v46 = vor.u32 %v875_v41, %v872_v40 }
  0x29   : > { %2113 = vmatpush3.bf16.msra.mxu0 %v2338_v44  ;;  %2075 = vmatmul.mubr.msk.bf16.gmra.mrb[8].mxu1 %vm287_vm2, %v262_v47  ;;  %v672_v44 = vrot.slane %v2355_v38, 1  ;;  %v879_v47 = vshrl.u32 %v2666_v43, 16 }
  0x2a   : > { %2162 = vmatprep.subr.bf16.mxu0 %v2391_v1  ;;  %2086 = vmatprep.mubr.msk.bf16.mxu1 %vm2392_vm0, %v2391_v1 }
  0x2b   : > { %v673_v50 = vsel %vm498_vm3, %v670_v31, %v672_v44 }
  0x2c   : > { %2115 = vmatmul.mubr.msk.bf16.vlgmr.msra.gmra.mrb[8].mxu0 %vm287_vm2, %v501_v48  ;;  %v882_v48 = vshll.u32 %v2666_v43, 16 }
  0x2d   : > { %2163 = vmatpush3.bf16.msra.mxu0 %v2341_v49  ;;  %2118 = vmatprep.mubr.msk.bf16.mxu0 %vm2392_vm0, %v2391_v1  ;;  %v2366_v49 = vld [vmem:[%s2935_s1 + $0xd8] sm:$0xff]  }
  0x2e   : > { %2164 = vmatprep.subr.bf16.mxu0 %v2391_v1 }
  0x31   : > { %2165 = vmatpush3.bf16.msra.mxu0 %v2343_v51  ;;  %2087 = vmatmul.mubr.msk.bf16.vlgmr.msra.gmra.mrb[12].mxu1 %vm287_vm2, %v2464_v12  ;;  %v847_v12 = vshll.u32 %v1858_v9, 16  ;;  %v2361_v51 = vld [vmem:[%s2935_s1 + $0xb0] sm:$0xff]  }
  0x32   : > { %2166 = vmatprep.subr.bf16.mxu0 %v2391_v1  ;;  %2135 = vmatpush3.bf16.msra.mxu1 %v2340_v52  ;;  %v877_v52 = vsel %vm842_vm4, %v867_v32, %v876_v46 }
  0x33   : > { %2090 = vmatprep.mubr.msk.bf16.mxu1 %vm2392_vm0, %v2391_v1  ;;  %2136 = vmatprep.subr.bf16.mxu1 %v2391_v1  ;;  %v849_v16 = vrot.slane %v847_v12, 2  ;;  %v2739_v12 = vld [vmem:[%s2449_s25 + $0x18] sm:$0xff]  }
  0x34   : > { %2119 = vmatmul.mubr.msk.bf16.gmra.mrb[12].mxu0 %vm287_vm2, %v503_v54  ;;  %v881_v54 = vrot.slane %v879_v47, 1 }
  0x35   : > { %2122 = vmatprep.mubr.msk.bf16.mxu0 %vm2392_vm0, %v2391_v1  ;;  %2167 = vmatpush3.bf16.msra.mxu0 %v2345_v55  ;;  %v850_v19 = vor.u32 %v849_v16, %v846_v15  ;;  %v884_v55 = vrot.slane %v882_v48, 2  ;;  %v2761_v16 = vld [vmem:[%s2449_s25 + $0x20] sm:$0xff]   ;;  %v1355_v48 = vshrl.u32 %v2739_v12, 16 }
  0x36   : > { %2168 = vmatprep.subr.bf16.mxu0 %v2391_v1  ;;  %2137 = vmatpush3.bf16.msra.mxu1 %v2342_v57  ;;  %v2365_v57 = vld [vmem:[%s2935_s1 + $0xb8] sm:$0xff]  }
  0x37   : > { %2138 = vmatprep.subr.bf16.mxu1 %v2391_v1  ;;  %v885_v60 = vor.u32 %v884_v55, %v881_v54 }
  0x39   : > { %2169 = vmatpush3.bf16.msra.mxu0 %v2348_v61  ;;  %2091 = vmatmul.mubr.msk.bf16.gmra.mrb[16].mxu1 %vm287_vm2, %v2467_v13  ;;  %v852_v13 = vshrl.u32 %v2611_v10, 16  ;;  %v675_v61 = vsel %vm498_vm3, %v672_v44, %v674_v58  ;;  %v2370_v10 = vld [vmem:[%s2935_s1 + $0xe0] sm:$0xff]  }
  0x3a   : > { %2218 = vmatprep.subr.bf16.mxu0 %v2391_v1  ;;  %2094 = vmatprep.mubr.msk.bf16.mxu1 %vm2392_vm0, %v2391_v1 }
  0x3b   : > { %2139 = vmatpush3.bf16.msra.mxu1 %v2344_v63  ;;  %v886_v63 = vsel %vm842_vm4, %v876_v46, %v885_v60 }
  0x3c   : > { %2123 = vmatmul.mubr.msk.bf16.gmra.mrb[16].mxu0 %vm287_vm2, %v505_v0  ;;  %2140 = vmatprep.subr.bf16.mxu1 %v2391_v1  ;;  %v2715_v0 = vld [vmem:[%s2449_s25 + $0xc] sm:$0xf] }
  0x3d   : > { %2126 = vmatprep.mubr.msk.bf16.mxu0 %vm2392_vm0, %v2391_v1  ;;  %v2718_v58 = vcombine.low %v1150_v53, %v2715_v0  ;;  %v1520_v53 = vrot.slane %v2761_v16, 3 }
  0x3f   : > { %2141 = vmatpush3.bf16.msra.mxu1 %v2346_v2  ;;  %v2721_v2 = vld [vmem:[%s2449_s25 + $0x10] sm:$0xff]   ;;  %v1194_v4 = vrot.slane %v2718_v58, 2  ;;  %v1338_v35 = vshrl.u32 %v2718_v58, 16 }
  0x40   : > { %2190 = vmatprep.subr.bf16.mxu1 %v2391_v1  ;;  %v1349_v38 = vshll.u32 %v2721_v2, 16  ;;  %v1516_v40 = vrot.slane %v2721_v2, 3 }
  0x41   : > { %2095 = vmatmul.mubr.msk.bf16.gmra.mrb[20].mxu1 %vm287_vm2, %v2452_v5  ;;  %v854_v5 = vrot.slane %v852_v13, 1  ;;  %v1340_v41 = vrot.slane %v1338_v35, 2 }
  0x42   : > { %2098 = vmatprep.mubr.msk.bf16.mxu1 %vm2392_vm0, %v2391_v1  ;;  %v1351_v44 = vrot.slane %v1349_v38, 3 }
  0x43   : > { %v858_v20 = vor.u32 %v857_v17, %v854_v5  ;;  %v2377_v5 = vld [vmem:[%s2935_s1 + $0x110] sm:$0xff]   ;;  %v1024_v17 = vrot.slane %v2623_v18, 2  ;;  %v1159_v18 = vld [vmem:[%s2449_s25 + $0x2c] sm:$0x1] }
  0x44   : > { %2127 = vmatmul.mubr.msk.bf16.gmra.mrb[20].mxu0 %vm287_vm2, %v507_v8  ;;  %v1195_v8 = vrot.slane %v2721_v2, 2 }
  0x45   : > { %2130 = vmatprep.mubr.msk.bf16.mxu0 %vm2392_vm0, %v2391_v1  ;;  %v868_v39 = vsel %vm842_vm4, %v858_v20, %v867_v32  ;;  %v1501_v32 = vld [vmem:[%s2449_s25 + $0x8] sm:$0x8] }
  0x46   : > { %v1196_v11 = vsel %vm1020_vm5, %v1194_v4, %v1195_v8  ;;  %v1938_v34 = vcombine.low %v1501_v32, %v2715_v0 }
  0x49   : > { %2099 = vmatmul.mubr.msk.bf16.gmra.mrb[24].mxu1 %vm287_vm2, %v2455_v6  ;;  %v859_v6 = vsel %vm842_vm4, %v850_v19, %v858_v20  ;;  %v2373_v19 = vld [vmem:[%s2935_s1 + $0xe8] sm:$0xff]   ;;  %v1199_v20 = vrot.slane %v2761_v16, 2 }
  0x4a   : > { %2102 = vmatprep.mubr.msk.bf16.mxu1 %vm2392_vm0, %v2391_v1 }
  0x4c   : > { %2131 = vmatmul.mubr.msk.bf16.gmra.mrb[24].mxu0 %vm287_vm2, %v506_v3  ;;  %v1007_v3 = vld [vmem:[%s2449_s25 + $0x4] sm:$0xc] }
  0x4d   : > { %2170 = vmatprep.mubr.msk.bf16.mxu0 %vm2392_vm0, %v2391_v1  ;;  %v1880_v9 = vcombine.low %v1007_v3, %v2605_v7  ;;  %v1197_v7 = vrot.slane %v2739_v12, 2 }
  0x4f   : > { %v1021_v13 = vrot.slane %v1880_v9, 2  ;;  %v1198_v15 = vsel %vm1020_vm5, %v1195_v8, %v1197_v7  ;;  %v1200_v25 = vsel %vm1020_vm5, %v1197_v7, %v1199_v20 }
  0x51   : > { %2103 = vmatmul.mubr.msk.bf16.gmra.mrb[28].mxu1 %vm287_vm2, %v2347_v23  ;;  %v1025_v23 = vsel %vm1020_vm5, %v1022_v14, %v1024_v17 }
  0x52   : > { %2142 = vmatprep.mubr.msk.bf16.mxu1 %vm2392_vm0, %v2391_v1 }
  0x54   : > { %2171 = vmatmul.mubr.msk.bf16.vlgmr.msra.gmra.mrb[28].mxu0 %vm287_vm2, %v859_v6  ;;  %v1902_v6 = vcombine.low %v2783_v22, %v1159_v18 }
  0x55   : > { %2219 = vmatpush3.bf16.msra.mxu0 %v2354_v26  ;;  %2174 = vmatprep.mubr.msk.bf16.mxu0 %vm2392_vm0, %v2391_v1  ;;  %v1026_v26 = vrot.slane %v2642_v29, 2  ;;  %v1028_v29 = vrot.slane %v2666_v43, 2 }
  0x56   : > { %2220 = vmatprep.subr.bf16.mxu0 %v2391_v1  ;;  %v1201_v28 = vrot.slane %v1902_v6, 2 }
  0x57   : > { %v1027_v30 = vsel %vm1020_vm5, %v1024_v17, %v1026_v26 }
  0x58   : > { %v1202_v31 = vsel %vm1020_vm5, %v1199_v20, %v1201_v28 }
  0x59   : > { %2221 = vmatpush3.bf16.msra.mxu0 %v2358_v33  ;;  %2143 = vmatmul.mubr.msk.bf16.vlgmr.msra.gmra.mrb[32].mxu1 %vm287_vm2, %v671_v36  ;;  %v1029_v33 = vsel %vm1020_vm5, %v1026_v26, %v1028_v29  ;;  %v1341_v36 = vshll.u32 %v2718_v58, 16 }
  0x5a   : > { %2222 = vmatprep.subr.bf16.mxu0 %v2391_v1  ;;  %2191 = vmatpush3.bf16.msra.mxu1 %v2353_v37  ;;  %v1346_v37 = vshrl.u32 %v2721_v2, 16 }
  0x5b   : > { %2146 = vmatprep.mubr.msk.bf16.mxu1 %vm2392_vm0, %v2391_v1  ;;  %2192 = vmatprep.subr.bf16.mxu1 %v2391_v1 }
  0x5c   : > { %2175 = vmatmul.mubr.msk.bf16.gmra.mrb[32].mxu0 %vm287_vm2, %v868_v39  ;;  %v1515_v39 = vrot.slane %v1938_v34, 3  ;;  %v1348_v43 = vrot.slane %v1346_v37, 2 }
  0x5d   : > { %2178 = vmatprep.mubr.msk.bf16.mxu0 %vm2392_vm0, %v2391_v1  ;;  %2223 = vmatpush3.bf16.msra.mxu0 %v2362_v42  ;;  %v1343_v42 = vrot.slane %v1341_v36, 3 }
  0x5e   : > { %2224 = vmatprep.subr.bf16.mxu0 %v2391_v1  ;;  %2193 = vmatpush3.bf16.msra.mxu1 %v2357_v45  ;;  %v1517_v45 = vsel %vm1514_vm6, %v1515_v39, %v1516_v40  ;;  %v1352_v47 = vor.u32 %v1351_v44, %v1348_v43 }
  0x5f   : > { %2194 = vmatprep.subr.bf16.mxu1 %v2391_v1  ;;  %v1344_v46 = vor.u32 %v1343_v42, %v1340_v41 }
  0x61   : > { %2225 = vmatpush3.bf16.msra.mxu0 %v2366_v49  ;;  %2147 = vmatmul.mubr.msk.bf16.gmra.mrb[36].mxu1 %vm287_vm2, %v673_v50  ;;  %v1358_v49 = vshll.u32 %v2739_v12, 16  ;;  %v1518_v50 = vrot.slane %v2739_v12, 3 }
  0x62   : > { %2274 = vmatprep.subr.bf16.mxu0 %v2391_v1  ;;  %2150 = vmatprep.mubr.msk.bf16.mxu1 %vm2392_vm0, %v2391_v1 }
  0x63   : > { %2195 = vmatpush3.bf16.msra.mxu1 %v2361_v51  ;;  %v1353_v51 = vsel %vm1336_vm7, %v1344_v46, %v1352_v47  ;;  %v1360_v54 = vrot.slane %v1358_v49, 3  ;;  %v1519_v55 = vsel %vm1514_vm6, %v1516_v40, %v1518_v50  ;;  %v1521_v4 = vsel %vm1514_vm6, %v1518_v50, %v1520_v53 }
  0x64   : > { %2179 = vmatmul.mubr.msk.bf16.gmra.mrb[36].mxu0 %vm287_vm2, %v877_v52  ;;  %2196 = vmatprep.subr.bf16.mxu1 %v2391_v1  ;;  %v1357_v52 = vrot.slane %v1355_v48, 2 }
  0x65   : > { %2182 = vmatprep.mubr.msk.bf16.mxu0 %vm2392_vm0, %v2391_v1 }
  0x67   : > { %2197 = vmatpush3.bf16.msra.mxu1 %v2365_v57  ;;  %v1361_v57 = vor.u32 %v1360_v54, %v1357_v52 }
  0x68   : > { %2246 = vmatprep.subr.bf16.mxu1 %v2391_v1 }
  0x69   : > { %2151 = vmatmul.mubr.msk.bf16.gmra.mrb[40].mxu1 %vm287_vm2, %v675_v61  ;;  %v1367_v61 = vshll.u32 %v2761_v16, 16  ;;  %v1362_v58 = vsel %vm1336_vm7, %v1352_v47, %v1361_v57 }
  0x6a   : > { %2154 = vmatprep.mubr.msk.bf16.mxu1 %vm2392_vm0, %v2391_v1 }
  0x6b   : > { %v1369_v3 = vrot.slane %v1367_v61, 3 }
  0x6c   : > { %2183 = vmatmul.mubr.msk.bf16.gmra.mrb[40].mxu0 %vm287_vm2, %v886_v63  ;;  %v1323_v63 = vld [vmem:[%s2449_s25 + $0x2c] sm:$0x3] }
  0x6d   : > { %2186 = vmatprep.mubr.msk.bf16.mxu0 %vm2392_vm0, %v2391_v1  ;;  %v1920_v0 = vcombine.low %v2783_v22, %v1323_v63 }
  0x6f   : > { %v1373_v9 = vshrl.u32 %v1920_v0, 16 }
  0x71   : > { %2155 = vmatmul.mubr.msk.bf16.gmra.mrb[44].mxu1 %vm287_vm2, %v2583_v62  ;;  %v2371_v62 = vld [vmem:[%s2935_s1 + $0x100] sm:$0xff]  }
  0x72   : > { %2158 = vmatprep.mubr.msk.bf16.mxu1 %vm2392_vm0, %v2391_v1 }
  0x74   : > { %2187 = vmatmul.mubr.msk.bf16.gmra.mrb[44].mxu0 %vm287_vm2, %v885_v60  ;;  %v1364_v60 = vshrl.u32 %v2761_v16, 16 }
  0x75   : > { %2226 = vmatprep.mubr.msk.bf16.mxu0 %vm2392_vm0, %v2391_v1 }
  0x76   : > { %v1366_v2 = vrot.slane %v1364_v60, 2 }
  0x78   : > { %v1370_v8 = vor.u32 %v1369_v3, %v1366_v2 }
  0x79   : > { %2159 = vmatmul.mubr.msk.bf16.gmra.mrb[48].mxu1 %vm287_vm2, %v676_v59  ;;  %v1023_v59 = vsel %vm1020_vm5, %v1021_v13, %v1022_v14  ;;  %v1375_v13 = vrot.slane %v1373_v9, 2 }
  0x7a   : > { %2198 = vmatprep.mubr.msk.bf16.mxu1 %vm2392_vm0, %v2391_v1  ;;  %v1371_v12 = vsel %vm1336_vm7, %v1361_v57, %v1370_v8 }
  0x7c   : > { %2227 = vmatmul.mubr.msk.bf16.vlgmr.msra.gmra.mrb[48].mxu0 %vm287_vm2, %v1196_v11  ;;  %v1376_v11 = vshll.u32 %v1920_v0, 16 }
  0x7d   : > { %2275 = vmatpush3.bf16.msra.mxu0 %v2371_v62  ;;  %2230 = vmatprep.mubr.msk.bf16.mxu0 %vm2392_vm0, %v2391_v1  ;;  %v1522_v62 = vrot.slane %v1920_v0, 3 }
  0x7e   : > { %2276 = vmatprep.subr.bf16.mxu0 %v2391_v1  ;;  %v1378_v14 = vrot.slane %v1376_v11, 3 }
  0x7f   : > { %v1523_v7 = vsel %vm1514_vm6, %v1520_v53, %v1522_v62 }
  0x81   : > { %2277 = vmatpush3.bf16.msra.mxu0 %v2374_v56  ;;  %2199 = vmatmul.mubr.msk.bf16.vlgmr.msra.gmra.mrb[52].mxu1 %vm287_vm2, %v1023_v59  ;;  %v1379_v56 = vor.u32 %v1378_v14, %v1375_v13 }
  0x82   : > { %2278 = vmatprep.subr.bf16.mxu0 %v2391_v1  ;;  %2247 = vmatpush3.bf16.msra.mxu1 %v2370_v10 }
  0x83   : > { %2202 = vmatprep.mubr.msk.bf16.mxu1 %vm2392_vm0, %v2391_v1  ;;  %2248 = vmatprep.subr.bf16.mxu1 %v2391_v1  ;;  %v1380_v59 = vsel %vm1336_vm7, %v1370_v8, %v1379_v56 }
  0x84   : > { %2231 = vmatmul.mubr.msk.bf16.gmra.mrb[52].mxu0 %vm287_vm2, %v1198_v15 }
  0x85   : > { %2234 = vmatprep.mubr.msk.bf16.mxu0 %vm2392_vm0, %v2391_v1  ;;  %2279 = vmatpush3.bf16.msra.mxu0 %v2377_v5 }
  0x86   : > { %2280 = vmatprep.subr.bf16.mxu0 %v2391_v1  ;;  %2249 = vmatpush3.bf16.msra.mxu1 %v2373_v19 }
  0x87   : > { %2250 = vmatprep.subr.bf16.mxu1 %v2391_v1 }
  0x89   : > { %2281 = vmatpush3.bf16.msra.mxu0 %v2381_v21  ;;  %2203 = vmatmul.mubr.msk.bf16.gmra.mrb[56].mxu1 %vm287_vm2, %v1025_v23 }
  0x8a   : > { %2206 = vmatprep.mubr.msk.bf16.mxu1 %vm2392_vm0, %v2391_v1  ;;  %2251 = vmatpush3.bf16.msra.mxu1 %v2376_v24 }
  0x8b   : > { %2252 = vmatprep.subr.bf16.mxu1 %v2391_v1 }
  0x8c   : > { %2235 = vmatmul.mubr.msk.bf16.gmra.mrb[56].mxu0 %vm287_vm2, %v1200_v25 }
  0x8d   : > { %2238 = vmatprep.mubr.msk.bf16.mxu0 %vm2392_vm0, %v2391_v1 }
  0x8e   : > { %2253 = vmatpush3.bf16.msra.mxu1 %v2380_v27 }
  0x91   : > { %2207 = vmatmul.mubr.msk.bf16.gmra.mrb[60].mxu1 %vm287_vm2, %v1027_v30 }
  0x92   : > { %2210 = vmatprep.mubr.msk.bf16.mxu1 %vm2392_vm0, %v2391_v1 }
  0x94   : > { %2239 = vmatmul.mubr.msk.bf16.gmra.mrb[60].mxu0 %vm287_vm2, %v1202_v31 }
  0x95   : > { %2242 = vmatprep.mubr.msk.bf16.mxu0 %vm2392_vm0, %v2391_v1 }
  0x99   : > { %2211 = vmatmul.mubr.msk.bf16.gmra.mrb[64].mxu1 %vm287_vm2, %v1029_v33 }
  0x9a   : > { %2214 = vmatprep.mubr.msk.bf16.mxu1 %vm2392_vm0, %v2391_v1 }
  0x9c   : > { %2243 = vmatmul.mubr.msk.bf16.gmra.mrb[64].mxu0 %vm287_vm2, %v1201_v28 }
  0x9d   : > { %2282 = vmatprep.mubr.msk.bf16.mxu0 %vm2392_vm0, %v2391_v1 }
  0xa1   : > { %2215 = vmatmul.mubr.msk.bf16.gmra.mrb[68].mxu1 %vm287_vm2, %v1028_v29 }
  0xa2   : > { %2254 = vmatprep.mubr.msk.bf16.mxu1 %vm2392_vm0, %v2391_v1 }
  0xa4   : > { %2283 = vmatmul.mubr.msk.bf16.vlgmr.msra.gmra.mrb[68].mxu0 %vm287_vm2, %v1517_v45 }
  0xa5   : > { %2286 = vmatprep.mubr.msk.bf16.mxu0 %vm2392_vm0, %v2391_v1 }
  0xa9   : > { %2255 = vmatmul.mubr.msk.bf16.vlgmr.msra.gmra.mrb[72].mxu1 %vm287_vm2, %v1353_v51 }
  0xaa   : > { %2258 = vmatprep.mubr.msk.bf16.mxu1 %vm2392_vm0, %v2391_v1 }
  0xac   : > { %2287 = vmatmul.mubr.msk.bf16.gmra.mrb[72].mxu0 %vm287_vm2, %v1519_v55 }
  0xad   : > { %2290 = vmatprep.mubr.msk.bf16.mxu0 %vm2392_vm0, %v2391_v1 }
  0xb1   : > { %2259 = vmatmul.mubr.msk.bf16.gmra.mrb[76].mxu1 %vm287_vm2, %v1362_v58 }
  0xb2   : > { %2262 = vmatprep.mubr.msk.bf16.mxu1 %vm2392_vm0, %v2391_v1 }
  0xb4   : > { %2291 = vmatmul.mubr.msk.bf16.gmra.mrb[76].mxu0 %vm287_vm2, %v1521_v4 }
  0xb5   : > { %2294 = vmatprep.mubr.msk.bf16.mxu0 %vm2392_vm0, %v2391_v1 }
  0xb9   : > { %2263 = vmatmul.mubr.msk.bf16.gmra.mrb[80].mxu1 %vm287_vm2, %v1371_v12 }
  0xba   : > { %2266 = vmatprep.mubr.msk.bf16.mxu1 %vm2392_vm0, %v2391_v1 }
  0xbc   : > { %2295 = vmatmul.mubr.msk.bf16.gmra.mrb[80].mxu0 %vm287_vm2, %v1523_v7 }
  0xbd   : > { %2298 = vmatprep.mubr.msk.bf16.mxu0 %vm2392_vm0, %v2391_v1 }
  0xc1   : > { %2267 = vmatmul.mubr.msk.bf16.gmra.mrb[84].mxu1 %vm287_vm2, %v1380_v59 }
  0xc2   : > { %2270 = vmatprep.mubr.msk.bf16.mxu1 %vm2392_vm0, %v2391_v1 }
  0xc4   : > { %2299 = vmatmul.mubr.msk.bf16.gmra.mrb[84].mxu0 %vm287_vm2, %v1522_v62 }
  0xc9   : > { %2271 = vmatmul.mubr.msk.bf16.gmra.mrb[88].mxu1 %vm287_vm2, %v1379_v56 }
  0xec   : > { %v353_v10 = vpop.f32.mrb[0].mxu1 }
  0xed   : > { %v2068_v15 = vpop.f32.mrb[1].mxu1 }
  0xee   : > { %v356_v16 = vpop.f32.mrb[2].mxu1 }
  0xef   : > { %v337_v5 = vpop.f32.mrb[0].mxu0  ;;  %v2069_v17 = vpop.f32.mrb[3].mxu1 }
  0xf0   : > { %v2060_v19 = vpop.f32.mrb[1].mxu0 }
  0xf1   : > { %v340_v20 = vpop.f32.mrb[2].mxu0 }
  0xf2   : > { %v2061_v21 = vpop.f32.mrb[3].mxu0 }
  0xf4   : > { %v361_v22 = vpop.f32.mrb[4].mxu1 }
  0xf5   : > { %v2072_v18 = vpop.f32.mrb[5].mxu1 }
  0xf6   : > { %v364_v23 = vpop.f32.mrb[6].mxu1 }
  0xf7   : > { %v345_v24 = vpop.f32.mrb[4].mxu0  ;;  %v2073_v25 = vpop.f32.mrb[7].mxu1 }
  0xf8   : > { %v2064_v6 = vpop.f32.mrb[5].mxu0 }
  0xf9   : > { %v348_v26 = vpop.f32.mrb[6].mxu0 }
  0xfa   : > { %v2065_v1 = vpop.f32.mrb[7].mxu0 }
  0xfc   : > { %v369_v27 = vpop.f32.mrb[8].mxu1 }
  0xfd   : > { %v2076_v28 = vpop.f32.mrb[9].mxu1 }
  0xfe   : > { %v372_v30 = vpop.f32.mrb[10].mxu1 }
  0xff   : > { %v581_v31 = vpop.f32.mrb[8].mxu0  ;;  %v2077_v29 = vpop.f32.mrb[11].mxu1 }
 0x100   : > { %v2116_v32 = vpop.f32.mrb[9].mxu0 }
 0x101   : > { %v584_v33 = vpop.f32.mrb[10].mxu0 }
 0x102   : > { %v2117_v34 = vpop.f32.mrb[11].mxu0 }
 0x104   : > { %v447_v35 = vpop.f32.mrb[12].mxu1 }
 0x105   : > { %v448_v36 = vadd.f32 %v447_v35, %v337_v5  ;;  %v2088_v37 = vpop.f32.mrb[13].mxu1 }
 0x106   : > { %v450_v38 = vpop.f32.mrb[14].mxu1 }
 0x107   : > { %v589_v39 = vpop.f32.mrb[12].mxu0  ;;  %v619_v40 = vadd.f32 %v581_v31, %v448_v36  ;;  %v451_v41 = vadd.f32 %v450_v38, %v340_v20  ;;  %v2089_v42 = vpop.f32.mrb[15].mxu1 }
 0x108   : > { %v2120_v43 = vpop.f32.mrb[13].mxu0 }
 0x109   : > { %v592_v44 = vpop.f32.mrb[14].mxu0  ;;  %v620_v45 = vadd.f32 %v584_v33, %v451_v41 }
 0x10a   : > { %v2121_v46 = vpop.f32.mrb[15].mxu0 }
 0x10c   : > { %v455_v47 = vpop.f32.mrb[16].mxu1 }
 0x10d   : > { %v456_v48 = vadd.f32 %v455_v47, %v345_v24  ;;  %v2092_v49 = vpop.f32.mrb[17].mxu1 }
 0x10e   : > { %v458_v50 = vpop.f32.mrb[18].mxu1 }
 0x10f   : > { %v597_v51 = vpop.f32.mrb[16].mxu0  ;;  %v621_v52 = vadd.f32 %v589_v39, %v456_v48  ;;  %v459_v54 = vadd.f32 %v458_v50, %v348_v26  ;;  %v2093_v55 = vpop.f32.mrb[19].mxu1 }
 0x110   : > { %v2124_v57 = vpop.f32.mrb[17].mxu0 }
 0x111   : > { %v600_v60 = vpop.f32.mrb[18].mxu0  ;;  %v622_v61 = vadd.f32 %v592_v44, %v459_v54 }
 0x112   : > { %v2125_v63 = vpop.f32.mrb[19].mxu0 }
 0x114   : > { %v463_v53 = vpop.f32.mrb[20].mxu1 }
 0x115   : > { %v464_v0 = vadd.f32 %v463_v53, %v353_v10  ;;  %v2096_v58 = vpop.f32.mrb[21].mxu1 }
 0x116   : > { %v466_v2 = vpop.f32.mrb[22].mxu1 }
 0x117   : > { %v605_v3 = vpop.f32.mrb[20].mxu0  ;;  %v623_v4 = vadd.f32 %v597_v51, %v464_v0  ;;  %v467_v8 = vadd.f32 %v466_v2, %v356_v16  ;;  %v2097_v9 = vpop.f32.mrb[23].mxu1 }
 0x118   : > { %v2128_v11 = vpop.f32.mrb[21].mxu0 }
 0x119   : > { %v608_v62 = vpop.f32.mrb[22].mxu0  ;;  %v624_v12 = vadd.f32 %v600_v60, %v467_v8 }
 0x11a   : > { %v2129_v13 = vpop.f32.mrb[23].mxu0 }
 0x11c   : > { %v471_v14 = vpop.f32.mrb[24].mxu1 }
 0x11d   : > { %v472_v7 = vadd.f32 %v471_v14, %v361_v22  ;;  %v2100_v56 = vpop.f32.mrb[25].mxu1 }
 0x11e   : > { %v474_v59 = vpop.f32.mrb[26].mxu1 }
 0x11f   : > { %v613_v15 = vpop.f32.mrb[24].mxu0  ;;  %v625_v5 = vadd.f32 %v605_v3, %v472_v7  ;;  %v475_v17 = vadd.f32 %v474_v59, %v364_v23  ;;  %v2101_v19 = vpop.f32.mrb[27].mxu1 }
 0x120   : > { %v2132_v20 = vpop.f32.mrb[25].mxu0 }
 0x121   : > { %v616_v10 = vpop.f32.mrb[26].mxu0  ;;  %v626_v21 = vadd.f32 %v608_v62, %v475_v17 }
 0x122   : > { %v2133_v18 = vpop.f32.mrb[27].mxu0 }
 0x124   : > { %v479_v24 = vpop.f32.mrb[28].mxu1 }
 0x125   : > { %v480_v25 = vadd.f32 %v479_v24, %v369_v27  ;;  %v2104_v16 = vpop.f32.mrb[29].mxu1 }
 0x126   : > { %v482_v6 = vpop.f32.mrb[30].mxu1 }
 0x127   : > { %v960_v26 = vpop.f32.mrb[28].mxu0  ;;  %v627_v1 = vadd.f32 %v613_v15, %v480_v25  ;;  %v2105_v28 = vpop.f32.mrb[31].mxu1 }
 0x128   : > { %v2172_v30 = vpop.f32.mrb[29].mxu0 }
 0x129   : > { %v963_v31 = vpop.f32.mrb[30].mxu0 }
 0x12a   : > { %v2173_v22 = vpop.f32.mrb[31].mxu0 }
 0x12c   : > { %v751_v29 = vpop.f32.mrb[32].mxu1 }
 0x12d   : > { %v789_v32 = vadd.f32 %v751_v29, %v619_v40  ;;  %v2144_v33 = vpop.f32.mrb[33].mxu1 }
 0x12e   : > { %v754_v34 = vpop.f32.mrb[34].mxu1 }
 0x12f   : > { %v968_v23 = vpop.f32.mrb[32].mxu0  ;;  %v998_v35 = vadd.f32 %v960_v26, %v789_v32  ;;  %v790_v36 = vadd.f32 %v754_v34, %v620_v45  ;;  %v2145_v37 = vpop.f32.mrb[35].mxu1 }
 0x130   : > { %v2176_v38 = vpop.f32.mrb[33].mxu0 }
 0x131   : > { %v971_v39 = vpop.f32.mrb[34].mxu0  ;;  %v999_v41 = vadd.f32 %v963_v31, %v790_v36 }
 0x132   : > { %v2177_v27 = vpop.f32.mrb[35].mxu0 }
 0x134   : > { %v759_v42 = vpop.f32.mrb[36].mxu1 }
 0x135   : > { %v791_v43 = vadd.f32 %v759_v42, %v621_v52  ;;  %v2148_v44 = vpop.f32.mrb[37].mxu1 }
 0x136   : > { %v762_v46 = vpop.f32.mrb[38].mxu1 }
 0x137   : > { %v976_v47 = vpop.f32.mrb[36].mxu0  ;;  %v1000_v48 = vadd.f32 %v968_v23, %v791_v43  ;;  %v792_v49 = vadd.f32 %v762_v46, %v622_v61  ;;  %v2149_v50 = vpop.f32.mrb[39].mxu1 }
 0x138   : > { %v2180_v51 = vpop.f32.mrb[37].mxu0 }
 0x139   : > { %v979_v40 = vpop.f32.mrb[38].mxu0  ;;  %v1001_v54 = vadd.f32 %v971_v39, %v792_v49 }
 0x13a   : > { %v2181_v55 = vpop.f32.mrb[39].mxu0 }
 0x13c   : > { %v767_v57 = vpop.f32.mrb[40].mxu1 }
 0x13d   : > { %v793_v60 = vadd.f32 %v767_v57, %v623_v4  ;;  %v2152_v45 = vpop.f32.mrb[41].mxu1 }
 0x13e   : > { %v770_v63 = vpop.f32.mrb[42].mxu1 }
 0x13f   : > { %v984_v53 = vpop.f32.mrb[40].mxu0  ;;  %v1002_v0 = vadd.f32 %v976_v47, %v793_v60  ;;  %v794_v58 = vadd.f32 %v770_v63, %v624_v12  ;;  %v2153_v2 = vpop.f32.mrb[43].mxu1 }
 0x140   : > { %v2184_v3 = vpop.f32.mrb[41].mxu0 }
 0x141   : > { %v987_v52 = vpop.f32.mrb[42].mxu0  ;;  %v1003_v8 = vadd.f32 %v979_v40, %v794_v58 }
 0x142   : > { %v2185_v9 = vpop.f32.mrb[43].mxu0 }
 0x144   : > { %v775_v11 = vpop.f32.mrb[44].mxu1 }
 0x145   : > { %v795_v62 = vadd.f32 %v775_v11, %v625_v5  ;;  %v2156_v61 = vpop.f32.mrb[45].mxu1 }
 0x146   : > { %v778_v13 = vpop.f32.mrb[46].mxu1 }
 0x147   : > { %v992_v14 = vpop.f32.mrb[44].mxu0  ;;  %v1004_v7 = vadd.f32 %v984_v53, %v795_v62  ;;  %v796_v56 = vadd.f32 %v778_v13, %v626_v21  ;;  %v2157_v59 = vpop.f32.mrb[47].mxu1 }
 0x148   : > { %v2188_v15 = vpop.f32.mrb[45].mxu0 }
 0x149   : > { %v995_v4 = vpop.f32.mrb[46].mxu0  ;;  %v1005_v17 = vadd.f32 %v987_v52, %v796_v56 }
 0x14a   : > { %v2189_v19 = vpop.f32.mrb[47].mxu0 }
 0x14c   : > { %v783_v20 = vpop.f32.mrb[48].mxu1 }
 0x14d   : > { %v797_v10 = vadd.f32 %v783_v20, %v627_v1  ;;  %v2160_v12 = vpop.f32.mrb[49].mxu1 }
 0x14e   : > { %v786_v18 = vpop.f32.mrb[50].mxu1 }
 0x14f   : > { %v1276_v24 = vpop.f32.mrb[48].mxu0  ;;  %v1006_v25 = vadd.f32 %v992_v14, %v797_v10  ;;  %v2161_v16 = vpop.f32.mrb[51].mxu1 }
 0x150   : > { %v2228_v6 = vpop.f32.mrb[49].mxu0 }
 0x151   : > { %v1279_v26 = vpop.f32.mrb[50].mxu0 }
 0x152   : > { %v2229_v5 = vpop.f32.mrb[51].mxu0 }
 0x154   : > { %v1103_v28 = vpop.f32.mrb[52].mxu1 }
 0x155   : > { %v1141_v30 = vadd.f32 %v1103_v28, %v998_v35  ;;  %v2200_v31 = vpop.f32.mrb[53].mxu1 }
 0x156   : > { %v1106_v22 = vpop.f32.mrb[54].mxu1 }
 0x157   : > { %v1284_v21 = vpop.f32.mrb[52].mxu0  ;;  %v1314_v29 = vadd.f32 %v1276_v24, %v1141_v30  ;;  %v1142_v32 = vadd.f32 %v1106_v22, %v999_v41  ;;  %v2201_v33 = vpop.f32.mrb[55].mxu1 }
 0x158   : > { %v2232_v34 = vpop.f32.mrb[53].mxu0 }
 0x159   : > { %v1287_v23 = vpop.f32.mrb[54].mxu0  ;;  %v1315_v36 = vadd.f32 %v1279_v26, %v1142_v32  ;;  %v2890_v26 = vld [vmem:[%s2936_s2] ss:$0 sm:$0xff] }
 0x15a   : > { %v2233_v1 = vpop.f32.mrb[55].mxu0 }
 0x15c   : > { %v1111_v37 = vpop.f32.mrb[56].mxu1 }
 0x15d   : > { %v1143_v38 = vadd.f32 %v1111_v37, %v1000_v48  ;;  %v2204_v39 = vpop.f32.mrb[57].mxu1 }
 0x15e   : > { %v1114_v27 = vpop.f32.mrb[58].mxu1 }
 0x15f   : > { %v1292_v42 = vpop.f32.mrb[56].mxu0  ;;  %v2873_v43 = vadd.f32 %v1284_v21, %v1143_v38  ;;  %v1144_v44 = vadd.f32 %v1114_v27, %v1001_v54  ;;  %v2205_v46 = vpop.f32.mrb[59].mxu1 }
 0x160   : > { %v2236_v35 = vpop.f32.mrb[57].mxu0 }
 0x161   : > { %v1295_v47 = vpop.f32.mrb[58].mxu0  ;;  %v2875_v49 = vadd.f32 %v1287_v23, %v1144_v44 }
 0x162   : > { %v2237_v50 = vpop.f32.mrb[59].mxu0 }
 0x164   : > { %v1119_v41 = vpop.f32.mrb[60].mxu1 }
 0x165   : > { %v1145_v51 = vadd.f32 %v1119_v41, %v1002_v0  ;;  %v2208_v40 = vpop.f32.mrb[61].mxu1 }
 0x166   : > { %v1122_v55 = vpop.f32.mrb[62].mxu1 }
 0x167   : > { %v1300_v57 = vpop.f32.mrb[60].mxu0  ;;  %v2877_v60 = vadd.f32 %v1292_v42, %v1145_v51  ;;  %v1146_v48 = vadd.f32 %v1122_v55, %v1003_v8  ;;  %v2209_v45 = vpop.f32.mrb[63].mxu1 }
 0x168   : > { %v2240_v63 = vpop.f32.mrb[61].mxu0 }
 0x169   : > { %v1303_v53 = vpop.f32.mrb[62].mxu0  ;;  %v2879_v58 = vadd.f32 %v1295_v47, %v1146_v48 }
 0x16a   : > { %v2241_v54 = vpop.f32.mrb[63].mxu0 }
 0x16c   : > { %v1127_v2 = vpop.f32.mrb[64].mxu1 }
 0x16d   : > { %v1147_v3 = vadd.f32 %v1127_v2, %v1004_v7  ;;  %v2212_v52 = vpop.f32.mrb[65].mxu1 }
 0x16e   : > { %v1130_v9 = vpop.f32.mrb[66].mxu1 }
 0x16f   : > { %v1308_v11 = vpop.f32.mrb[64].mxu0  ;;  %v2881_v62 = vadd.f32 %v1300_v57, %v1147_v3  ;;  %v1148_v0 = vadd.f32 %v1130_v9, %v1005_v17  ;;  %v2213_v61 = vpop.f32.mrb[67].mxu1 }
 0x170   : > { %v2244_v13 = vpop.f32.mrb[65].mxu0 }
 0x171   : > { %v1311_v14 = vpop.f32.mrb[66].mxu0  ;;  %v2883_v56 = vadd.f32 %v1303_v53, %v1148_v0 }
 0x172   : > { %v2245_v8 = vpop.f32.mrb[67].mxu0 }
 0x174   : > { %v1135_v59 = vpop.f32.mrb[68].mxu1 }
 0x175   : > { %v1149_v15 = vadd.f32 %v1135_v59, %v1006_v25  ;;  %v2216_v4 = vpop.f32.mrb[69].mxu1 }
 0x176   : > { %v1138_v19 = vpop.f32.mrb[70].mxu1 }
 0x177   : > { %v1597_v20 = vpop.f32.mrb[68].mxu0  ;;  %v2885_v10 = vadd.f32 %v1308_v11, %v1149_v15  ;;  %v2217_v7 = vpop.f32.mrb[71].mxu1 }
 0x178   : > { %v2284_v12 = vpop.f32.mrb[69].mxu0 }
 0x179   : > { %v1600_v18 = vpop.f32.mrb[70].mxu0 }
 0x17a   : > { %v2285_v24 = vpop.f32.mrb[71].mxu0 }
 0x17c   : > { %v1454_v16 = vpop.f32.mrb[72].mxu1 }
 0x17d   : > { %v1492_v17 = vadd.f32 %v1454_v16, %v1314_v29  ;;  %v2256_v6 = vpop.f32.mrb[73].mxu1 }
 0x17e   : > { %v1457_v5 = vpop.f32.mrb[74].mxu1 }
 0x17f   : > { %v1605_v25 = vpop.f32.mrb[72].mxu0  ;;  %v1635_v28 = vadd.f32 %v1597_v20, %v1492_v17  ;;  %v1493_v30 = vadd.f32 %v1457_v5, %v1315_v36  ;;  %v2257_v31 = vpop.f32.mrb[75].mxu1 }
 0x180   : > { %v2288_v22 = vpop.f32.mrb[73].mxu0 }
 0x181   : > { %v1608_v21 = vpop.f32.mrb[74].mxu0  ;;  %v1650_v32 = vadd.f32 %v2890_v26, %v1635_v28  ;;  %v1636_v33 = vadd.f32 %v1600_v18, %v1493_v30 }
 0x182   : > { %v2289_v34 = vpop.f32.mrb[75].mxu0 }
 0x183   : > { %v1659_v23 = vmax.f32 %v1650_v32, 0.0  ;;  %v1651_v29 = vadd.f32 %v2890_v26, %v1636_v33 }
 0x184   : > { %v1462_v36 = vpop.f32.mrb[76].mxu1 }
 0x185   : > { %v1960_v1 = vpack.c.bf16 %v1659_v23, %v1659_v23  ;;  %v1660_v37 = vmax.f32 %v1651_v29, 0.0  ;;  %v1494_v38 = vadd.f32 %v1462_v36, %v2873_v43  ;;  %v2260_v39 = vpop.f32.mrb[77].mxu1 }
 0x186   : > { %v1465_v27 = vpop.f32.mrb[78].mxu1 }
 0x187   : > { %v1613_v42 = vpop.f32.mrb[76].mxu0  ;;  %1706 = vst.msk [vmem:[%s2898_s21] sm:$0xf] %vm1705_vm8, %v1960_v1  ;;  %v1961_v44 = vpack.c.bf16 %v1660_v37, %v1660_v37  ;;  %v1637_v46 = vadd.f32 %v1605_v25, %v1494_v38  ;;  %v1495_v35 = vadd.f32 %v1465_v27, %v2875_v49  ;;  %v2261_v47 = vpop.f32.mrb[79].mxu1 }
 0x188   : > { %v2292_v50 = vpop.f32.mrb[77].mxu0 }
 0x189   : > { %v1616_v41 = vpop.f32.mrb[78].mxu0  ;;  %1707 = vst.msk [vmem:[%s2898_s21 + $0x4] sm:$0xf] %vm1705_vm8, %v1961_v44  ;;  %v1652_v51 = vadd.f32 %v2890_v26, %v1637_v46  ;;  %v1638_v40 = vadd.f32 %v1608_v21, %v1495_v35 }
 0x18a   : > { %v2293_v55 = vpop.f32.mrb[79].mxu0 }
 0x18b   : > { %v1661_v43 = vmax.f32 %v1652_v51, 0.0  ;;  %v1653_v57 = vadd.f32 %v2890_v26, %v1638_v40 }
 0x18c   : > { %v1470_v48 = vpop.f32.mrb[80].mxu1 }
 0x18d   : > { %v1962_v45 = vpack.c.bf16 %v1661_v43, %v1661_v43  ;;  %v1662_v63 = vmax.f32 %v1653_v57, 0.0  ;;  %v1496_v53 = vadd.f32 %v1470_v48, %v2877_v60  ;;  %v2264_v49 = vpop.f32.mrb[81].mxu1 }
 0x18e   : > { %v1473_v54 = vpop.f32.mrb[82].mxu1 }
 0x18f   : > { %v1621_v2 = vpop.f32.mrb[80].mxu0  ;;  %1708 = vst.msk [vmem:[%s2898_s21 + $0x8] sm:$0xf] %vm1705_vm8, %v1962_v45  ;;  %v1963_v3 = vpack.c.bf16 %v1662_v63, %v1662_v63  ;;  %v1639_v52 = vadd.f32 %v1613_v42, %v1496_v53  ;;  %v1497_v9 = vadd.f32 %v1473_v54, %v2879_v58  ;;  %v2265_v11 = vpop.f32.mrb[83].mxu1 }
 0x190   : > { %v2296_v0 = vpop.f32.mrb[81].mxu0 }
 0x191   : > { %v1624_v61 = vpop.f32.mrb[82].mxu0  ;;  %1709 = vst.msk [vmem:[%s2898_s21 + $0xc] sm:$0xf] %vm1705_vm8, %v1963_v3  ;;  %v1654_v13 = vadd.f32 %v2890_v26, %v1639_v52  ;;  %v1640_v14 = vadd.f32 %v1616_v41, %v1497_v9 }
 0x192   : > { %v2297_v8 = vpop.f32.mrb[83].mxu0 }
 0x193   : > { %v1663_v60 = vmax.f32 %v1654_v13, 0.0  ;;  %v1655_v59 = vadd.f32 %v2890_v26, %v1640_v14 }
 0x194   : > { %v1478_v15 = vpop.f32.mrb[84].mxu1 }
 0x195   : > { %v1964_v4 = vpack.c.bf16 %v1663_v60, %v1663_v60  ;;  %v1664_v19 = vmax.f32 %v1655_v59, 0.0  ;;  %v1498_v20 = vadd.f32 %v1478_v15, %v2881_v62  ;;  %v2268_v58 = vpop.f32.mrb[85].mxu1 }
 0x196   : > { %v1481_v7 = vpop.f32.mrb[86].mxu1 }
 0x197   : > { %v1629_v12 = vpop.f32.mrb[84].mxu0  ;;  %1710 = vst.msk [vmem:[%s2898_s21 + $0x10] sm:$0xf] %vm1705_vm8, %v1964_v4  ;;  %v1965_v18 = vpack.c.bf16 %v1664_v19, %v1664_v19  ;;  %v1641_v24 = vadd.f32 %v1621_v2, %v1498_v20  ;;  %v1499_v16 = vadd.f32 %v1481_v7, %v2883_v56  ;;  %v2269_v17 = vpop.f32.mrb[87].mxu1 }
 0x198   : > { %v2300_v6 = vpop.f32.mrb[85].mxu0 }
 0x199   : > { %v1632_v5 = vpop.f32.mrb[86].mxu0  ;;  %1711 = vst.msk [vmem:[%s2898_s21 + $0x14] sm:$0xf] %vm1705_vm8, %v1965_v18  ;;  %v1656_v25 = vadd.f32 %v2890_v26, %v1641_v24  ;;  %v1642_v28 = vadd.f32 %v1624_v61, %v1499_v16 }
 0x19a   : > { %v2301_v62 = vpop.f32.mrb[87].mxu0 }
 0x19b   : > { %v1665_v30 = vmax.f32 %v1656_v25, 0.0  ;;  %v1657_v31 = vadd.f32 %v2890_v26, %v1642_v28 }
 0x19c   : > { %v1486_v22 = vpop.f32.mrb[88].mxu1 }
 0x19d   : > { %v1966_v21 = vpack.c.bf16 %v1665_v30, %v1665_v30  ;;  %v1666_v32 = vmax.f32 %v1657_v31, 0.0  ;;  %v1500_v56 = vadd.f32 %v1486_v22, %v2885_v10  ;;  %v2272_v33 = vpop.f32.mrb[89].mxu1 }
 0x19e   : > { %v1489_v34 = vpop.f32.mrb[90].mxu1 }
 0x19f   : > { %1712 = vst.msk [vmem:[%s2898_s21 + $0x18] sm:$0xf] %vm1705_vm8, %v1966_v21  ;;  %v1967_v23 = vpack.c.bf16 %v1666_v32, %v1666_v32  ;;  %v1643_v29 = vadd.f32 %v1629_v12, %v1500_v56  ;;  %v2273_v36 = vpop.f32.mrb[91].mxu1 }
 0x1a1   : > { %1713 = vst.msk [vmem:[%s2898_s21 + $0x1c] sm:$0xf] %vm1705_vm8, %v1967_v23  ;;  %v1658_v1 = vadd.f32 %v2890_v26, %v1643_v29 }
 0x1a3   : > { %v1667_v37 = vmax.f32 %v1658_v1, 0.0 }
 0x1a5   : > { %v1968_v38 = vpack.c.bf16 %v1667_v37, %v1667_v37 }
 0x1a7   : > { %1715 = vst.msk [vmem:[%s2898_s21 + $0x20] sm:$0x7] %vm1714_vm9, %v1968_v38 }
 0x1a8 PF: > { %s13_s12 = sadd.s32 1, %s2389_s12  }
 0x1a9   : > { %p10_p4 = scmp.ge.s32.totalorder %s13_s12, 4  }
 0x1ab   :  { %12 = sbr.rel (!%p10_p4) target bundleno = 1 (0x1), region = 70 }

// kernel: dqnetwork_forward.7
= control target key start
LH: loop header
LB: loop body
LE: loop exit
PB: predicated region body
PF: predicated region fallthrough
CT: control target
= control target key end

     0   :  { %v812_v36 = vlaneseq  ;;  %v8599_v37 = vmov 1966171168   ;;  %s11244_s0 = inlined_call_operand.vmem [shape: bf16[2,3136], index: 0, kind: input, shape index: {}]   ;;  %s11245_s1 = inlined_call_operand.vmem [shape: bf16[3136,512], index: 1, kind: input, shape index: {}]   ;;  %s11246_s2 = inlined_call_operand.vmem [shape: f32[1,512], index: 2, kind: input, shape index: {}]   ;;  %s11247_s3 = inlined_call_operand.vmem [shape: bf16[512,128], index: 3, kind: input, shape index: {}]   ;;  %s11248_s4 = inlined_call_operand.vmem [shape: f32[1,128], index: 4, kind: input, shape index: {}]   ;;  %s11249_s5 = inlined_call_operand.hbm [shape: f32[2,128], index: 5, kind: output, shape index: {}]  }
   0x1   :  { %v7362_v0 = vld [vmem:[%s11245_s1 + $0x4] ss:$16 sps:$4 sm:$0xff]   ;;  %v7364_v1 = vld [vmem:[%s11245_s1 + $0xc] ss:$16 sps:$4 sm:$0xff]   ;;  %v7366_v2 = vld [vmem:[%s11245_s1] ss:$16 sps:$4 sm:$0xff]   ;;  %v838_v38 = vunpack.c.l.s4 %v8599_v37 }
   0x2   :  { %4945 = vmatprep.subr.bf16.mxu0 %v7362_v0  ;;  %v7367_v3 = vld [vmem:[%s11245_s1 + $0x8] ss:$16 sps:$4 sm:$0xff]   ;;  %5478 = vmatprep.subr.bf16.mxu1 %v7364_v1  ;;  %v7368_v4 = vld [vmem:[%s11245_s1 + $0x24] ss:$16 sps:$4 sm:$0xff]   ;;  %v7370_v5 = vld [vmem:[%s11245_s1 + $0x2c] ss:$16 sps:$4 sm:$0xff]  }
   0x3   :  { %4946 = vmatpush1.bf16.msra.mxu0 %v7366_v2  ;;  %5479 = vmatpush1.bf16.msra.mxu1 %v7367_v3  ;;  %v7372_v6 = vld [vmem:[%s11245_s1 + $0x20] ss:$16 sps:$4 sm:$0xff]   ;;  %v7373_v7 = vld [vmem:[%s11245_s1 + $0x28] ss:$16 sps:$4 sm:$0xff]   ;;  %v7374_v8 = vld [vmem:[%s11245_s1 + $0x44] ss:$16 sps:$4 sm:$0xff]   ;;  %v839_v43 = vunpack.c.0.s8 %v838_v38 }
   0x4   :  { %4947 = vmatprep.subr.bf16.mxu0 %v7368_v4  ;;  %5480 = vmatprep.subr.bf16.mxu1 %v7370_v5  ;;  %v7376_v9 = vld [vmem:[%s11245_s1 + $0x4c] ss:$16 sps:$4 sm:$0xff]   ;;  %v7378_v10 = vld [vmem:[%s11245_s1 + $0x40] ss:$16 sps:$4 sm:$0xff]   ;;  %v7379_v11 = vld [vmem:[%s11245_s1 + $0x48] ss:$16 sps:$4 sm:$0xff]  }
   0x5   :  { %v7380_v12 = vld [vmem:[%s11245_s1 + $0x64] ss:$16 sps:$4 sm:$0xff]   ;;  %v7382_v13 = vld [vmem:[%s11245_s1 + $0x6c] ss:$16 sps:$4 sm:$0xff]   ;;  %v7384_v14 = vld [vmem:[%s11245_s1 + $0x60] ss:$16 sps:$4 sm:$0xff]  }
   0x6   :  { %v7385_v15 = vld [vmem:[%s11245_s1 + $0x68] ss:$16 sps:$4 sm:$0xff]   ;;  %v7386_v16 = vld [vmem:[%s11245_s1 + $0x84] ss:$16 sps:$4 sm:$0xff]   ;;  %v7388_v17 = vld [vmem:[%s11245_s1 + $0x8c] ss:$16 sps:$4 sm:$0xff]  }
   0x7   :  { %4948 = vmatpush1.bf16.msra.mxu0 %v7372_v6  ;;  %5481 = vmatpush1.bf16.msra.mxu1 %v7373_v7  ;;  %v7390_v18 = vld [vmem:[%s11245_s1 + $0x80] ss:$16 sps:$4 sm:$0xff]   ;;  %v7391_v19 = vld [vmem:[%s11245_s1 + $0x88] ss:$16 sps:$4 sm:$0xff]   ;;  %v7392_v20 = vld [vmem:[%s11245_s1 + $0xa4] ss:$16 sps:$4 sm:$0xff]  }
   0x8   :  { %4949 = vmatprep.subr.bf16.mxu0 %v7374_v8  ;;  %5482 = vmatprep.subr.bf16.mxu1 %v7376_v9  ;;  %v7394_v21 = vld [vmem:[%s11245_s1 + $0xac] ss:$16 sps:$4 sm:$0xff]   ;;  %v7396_v22 = vld [vmem:[%s11245_s1 + $0xa0] ss:$16 sps:$4 sm:$0xff]   ;;  %v7397_v23 = vld [vmem:[%s11245_s1 + $0xa8] ss:$16 sps:$4 sm:$0xff]  }
   0x9   :  { %v7398_v24 = vld [vmem:[%s11245_s1 + $0xc4] ss:$16 sps:$4 sm:$0xff]   ;;  %v7400_v25 = vld [vmem:[%s11245_s1 + $0xcc] ss:$16 sps:$4 sm:$0xff]   ;;  %v7402_v26 = vld [vmem:[%s11245_s1 + $0xc0] ss:$16 sps:$4 sm:$0xff]  }
   0xa   :  { %v7403_v27 = vld [vmem:[%s11245_s1 + $0xc8] ss:$16 sps:$4 sm:$0xff]   ;;  %v7404_v28 = vld [vmem:[%s11245_s1 + $0xe4] ss:$16 sps:$4 sm:$0xff]   ;;  %v7406_v29 = vld [vmem:[%s11245_s1 + $0xec] ss:$16 sps:$4 sm:$0xff]  }
   0xb   :  { %4950 = vmatpush1.bf16.msra.mxu0 %v7378_v10  ;;  %5483 = vmatpush1.bf16.msra.mxu1 %v7379_v11  ;;  %v7408_v30 = vld [vmem:[%s11245_s1 + $0xe0] ss:$16 sps:$4 sm:$0xff]   ;;  %v7409_v31 = vld [vmem:[%s11245_s1 + $0xe8] ss:$16 sps:$4 sm:$0xff]   ;;  %v7410_v32 = vld [vmem:[%s11245_s1 + $0x104] ss:$16 sps:$4 sm:$0xff]  }
   0xc   :  { %4951 = vmatprep.subr.bf16.mxu0 %v7380_v12  ;;  %5484 = vmatprep.subr.bf16.mxu1 %v7382_v13  ;;  %v7412_v33 = vld [vmem:[%s11245_s1 + $0x10c] ss:$16 sps:$4 sm:$0xff]   ;;  %v7414_v34 = vld [vmem:[%s11245_s1 + $0x100] ss:$16 sps:$4 sm:$0xff]   ;;  %v7415_v35 = vld [vmem:[%s11245_s1 + $0x108] ss:$16 sps:$4 sm:$0xff]  }
   0xd   :  { %v7416_v39 = vld [vmem:[%s11245_s1 + $0x124] ss:$16 sps:$4 sm:$0xff]   ;;  %v7418_v40 = vld [vmem:[%s11245_s1 + $0x12c] ss:$16 sps:$4 sm:$0xff]   ;;  %v7420_v41 = vld [vmem:[%s11245_s1 + $0x120] ss:$16 sps:$4 sm:$0xff]  }
   0xe   :  { %v8751_v42 = vshrl.u32 %v812_v36, 7  ;;  %v7421_v44 = vld [vmem:[%s11245_s1 + $0x128] ss:$16 sps:$4 sm:$0xff]   ;;  %v7422_v45 = vld [vmem:[%s11245_s1 + $0x144] ss:$16 sps:$4 sm:$0xff]  }
   0xf   :  { %4952 = vmatpush1.bf16.msra.mxu0 %v7384_v14  ;;  %5485 = vmatpush1.bf16.msra.mxu1 %v7385_v15  ;;  %v7424_v46 = vld [vmem:[%s11245_s1 + $0x14c] ss:$16 sps:$4 sm:$0xff]   ;;  %v7426_v47 = vld [vmem:[%s11245_s1 + $0x140] ss:$16 sps:$4 sm:$0xff]   ;;  %v7427_v48 = vld [vmem:[%s11245_s1 + $0x148] ss:$16 sps:$4 sm:$0xff]  }
  0x10   :  { %4953 = vmatprep.subr.bf16.mxu0 %v7386_v16  ;;  %5486 = vmatprep.subr.bf16.mxu1 %v7388_v17  ;;  %v8769_v49 = vsub.s32 %v839_v43, %v8751_v42  ;;  %v7428_v50 = vld [vmem:[%s11245_s1 + $0x164] ss:$16 sps:$4 sm:$0xff]   ;;  %v7430_v51 = vld [vmem:[%s11245_s1 + $0x16c] ss:$16 sps:$4 sm:$0xff]   ;;  %v7432_v53 = vld [vmem:[%s11245_s1 + $0x160] ss:$16 sps:$4 sm:$0xff]  }
  0x11   :  { %v8780_v52 = vld [vmem:[%s11244_s0] sm:$0xff]  ;;  %v7433_v55 = vld [vmem:[%s11245_s1 + $0x168] ss:$16 sps:$4 sm:$0xff]   ;;  %v7436_v57 = vld [vmem:[%s11245_s1 + $0x18c] ss:$16 sps:$4 sm:$0xff]  }
  0x12   :  { %v843_v54 = vrot.slane %v8780_v52, %v8769_v49  ;;  %v7434_v56 = vld [vmem:[%s11245_s1 + $0x184] ss:$16 sps:$4 sm:$0xff]   ;;  %v7438_v59 = vld [vmem:[%s11245_s1 + $0x180] ss:$16 sps:$4 sm:$0xff]   ;;  %v7439_v61 = vld [vmem:[%s11245_s1 + $0x188] ss:$16 sps:$4 sm:$0xff]  }
  0x13   :  { %4954 = vmatpush1.bf16.msra.mxu0 %v7390_v18  ;;  %5487 = vmatpush1.bf16.msra.mxu1 %v7391_v19  ;;  %v7440_v62 = vld [vmem:[%s11245_s1 + $0x1a4] ss:$16 sps:$4 sm:$0xff]   ;;  %v7442_v63 = vld [vmem:[%s11245_s1 + $0x1ac] ss:$16 sps:$4 sm:$0xff]   ;;  %v7444_v0 = vld [vmem:[%s11245_s1 + $0x1a0] ss:$16 sps:$4 sm:$0xff]  }
  0x14   :  { %4955 = vmatprep.subr.bf16.mxu0 %v7392_v20  ;;  %5488 = vmatprep.subr.bf16.mxu1 %v7394_v21  ;;  %v851_v58 = vcombine.high %v843_v54, %v843_v54  ;;  %v7445_v1 = vld [vmem:[%s11245_s1 + $0x1a8] ss:$16 sps:$4 sm:$0xff]   ;;  %v7446_v2 = vld [vmem:[%s11245_s1 + $0x1c4] ss:$16 sps:$4 sm:$0xff]   ;;  %v7448_v3 = vld [vmem:[%s11245_s1 + $0x1cc] ss:$16 sps:$4 sm:$0xff]   ;;  %v8849_v13 = vrot.slane %v843_v54, %v8769_v49 }
  0x15   :  { %v7450_v4 = vld [vmem:[%s11245_s1 + $0x1c0] ss:$16 sps:$4 sm:$0xff]   ;;  %v7451_v5 = vld [vmem:[%s11245_s1 + $0x1c8] ss:$16 sps:$4 sm:$0xff]   ;;  %v7452_v6 = vld [vmem:[%s11245_s1 + $0x1e4] ss:$16 sps:$4 sm:$0xff]  }
  0x16   :  { %v873_v60 = vrot.slane %v851_v58, %v8769_v49  ;;  %v7454_v7 = vld [vmem:[%s11245_s1 + $0x1ec] ss:$16 sps:$4 sm:$0xff]   ;;  %v7456_v8 = vld [vmem:[%s11245_s1 + $0x1e0] ss:$16 sps:$4 sm:$0xff]   ;;  %v7457_v9 = vld [vmem:[%s11245_s1 + $0x1e8] ss:$16 sps:$4 sm:$0xff]  }
  0x17   :  { %4956 = vmatpush1.bf16.msra.mxu0 %v7396_v22  ;;  %5489 = vmatpush1.bf16.msra.mxu1 %v7397_v23  ;;  %v7460_v10 = vld [vmem:[%s11245_s1 + $0x204] ss:$16 sps:$4 sm:$0xff]   ;;  %v7463_v11 = vld [vmem:[%s11245_s1 + $0x20c] ss:$16 sps:$4 sm:$0xff]   ;;  %v7458_v12 = vld [vmem:[%s11245_s1 + $0x200] ss:$16 sps:$4 sm:$0xff]  }
  0x18   :  { %4957 = vmatprep.subr.bf16.mxu0 %v7398_v24  ;;  %5490 = vmatprep.subr.bf16.mxu1 %v7400_v25  ;;  %v7461_v14 = vld [vmem:[%s11245_s1 + $0x208] ss:$16 sps:$4 sm:$0xff]   ;;  %v7466_v15 = vld [vmem:[%s11245_s1 + $0x224] ss:$16 sps:$4 sm:$0xff]   ;;  %v7469_v16 = vld [vmem:[%s11245_s1 + $0x22c] ss:$16 sps:$4 sm:$0xff]   ;;  %v883_v17 = vcombine.high %v873_v60, %v873_v60 }
  0x19   :  { %4977 = vmatprep.mubr.bf16.mxu0 %v873_v60  ;;  %5510 = vmatprep.mubr.bf16.mxu1 %v873_v60  ;;  %v7464_v18 = vld [vmem:[%s11245_s1 + $0x220] ss:$16 sps:$4 sm:$0xff]   ;;  %v7467_v19 = vld [vmem:[%s11245_s1 + $0x228] ss:$16 sps:$4 sm:$0xff]   ;;  %v7472_v20 = vld [vmem:[%s11245_s1 + $0x244] ss:$16 sps:$4 sm:$0xff]  }
  0x1a   :  { %v7475_v21 = vld [vmem:[%s11245_s1 + $0x24c] ss:$16 sps:$4 sm:$0xff]   ;;  %v7470_v22 = vld [vmem:[%s11245_s1 + $0x240] ss:$16 sps:$4 sm:$0xff]   ;;  %v7473_v23 = vld [vmem:[%s11245_s1 + $0x248] ss:$16 sps:$4 sm:$0xff]  }
  0x1b   :  { %4958 = vmatpush1.bf16.msra.mxu0 %v7402_v26  ;;  %5491 = vmatpush1.bf16.msra.mxu1 %v7403_v27  ;;  %v7478_v24 = vld [vmem:[%s11245_s1 + $0x264] ss:$16 sps:$4 sm:$0xff]   ;;  %v7481_v25 = vld [vmem:[%s11245_s1 + $0x26c] ss:$16 sps:$4 sm:$0xff]   ;;  %v7476_v26 = vld [vmem:[%s11245_s1 + $0x260] ss:$16 sps:$4 sm:$0xff]  }
  0x1c   :  { %4959 = vmatprep.subr.bf16.mxu0 %v7404_v28  ;;  %5492 = vmatprep.subr.bf16.mxu1 %v7406_v29  ;;  %v7479_v27 = vld [vmem:[%s11245_s1 + $0x268] ss:$16 sps:$4 sm:$0xff]   ;;  %v7484_v28 = vld [vmem:[%s11245_s1 + $0x284] ss:$16 sps:$4 sm:$0xff]   ;;  %v7487_v29 = vld [vmem:[%s11245_s1 + $0x28c] ss:$16 sps:$4 sm:$0xff]  }
  0x1d   :  { %v7496_v37 = vld [vmem:[%s11245_s1 + $0x2c4] ss:$16 sps:$4 sm:$0xff]   ;;  %v7499_v38 = vld [vmem:[%s11245_s1 + $0x2cc] ss:$16 sps:$4 sm:$0xff]   ;;  %v7512_v54 = vld [vmem:[%s11245_s1 + $0x320] ss:$16 sps:$4 sm:$0xff]  }
  0x1e   :  { %v7505_v43 = vld [vmem:[%s11245_s1 + $0x2ec] ss:$16 sps:$4 sm:$0xff]   ;;  %v7518_v58 = vld [vmem:[%s11245_s1 + $0x340] ss:$16 sps:$4 sm:$0xff]   ;;  %v7526_v60 = vld [vmem:[%s11245_s1 + $0x364] ss:$16 sps:$4 sm:$0xff]  }
  0x1f   :  { %4960 = vmatpush1.bf16.msra.mxu0 %v7408_v30  ;;  %5493 = vmatpush1.bf16.msra.mxu1 %v7409_v31  ;;  %v7482_v30 = vld [vmem:[%s11245_s1 + $0x280] ss:$16 sps:$4 sm:$0xff]   ;;  %v7485_v31 = vld [vmem:[%s11245_s1 + $0x288] ss:$16 sps:$4 sm:$0xff]  }
  0x20   :  { %4961 = vmatprep.subr.bf16.mxu0 %v7410_v32  ;;  %5494 = vmatprep.subr.bf16.mxu1 %v7412_v33  ;;  %v7490_v32 = vld [vmem:[%s11245_s1 + $0x2a4] ss:$16 sps:$4 sm:$0xff]   ;;  %v7493_v33 = vld [vmem:[%s11245_s1 + $0x2ac] ss:$16 sps:$4 sm:$0xff]  }
  0x23   :  { %4962 = vmatpush1.bf16.msra.mxu0 %v7414_v34  ;;  %5495 = vmatpush1.bf16.msra.mxu1 %v7415_v35  ;;  %v7488_v34 = vld [vmem:[%s11245_s1 + $0x2a0] ss:$16 sps:$4 sm:$0xff]   ;;  %v7491_v35 = vld [vmem:[%s11245_s1 + $0x2a8] ss:$16 sps:$4 sm:$0xff]  }
  0x24   :  { %4963 = vmatprep.subr.bf16.mxu0 %v7416_v39  ;;  %5496 = vmatprep.subr.bf16.mxu1 %v7418_v40  ;;  %v7494_v39 = vld [vmem:[%s11245_s1 + $0x2c0] ss:$16 sps:$4 sm:$0xff]   ;;  %v7497_v40 = vld [vmem:[%s11245_s1 + $0x2c8] ss:$16 sps:$4 sm:$0xff]  }
  0x27   :  { %4964 = vmatpush1.bf16.msra.mxu0 %v7420_v41  ;;  %5497 = vmatpush1.bf16.msra.mxu1 %v7421_v44  ;;  %v7502_v41 = vld [vmem:[%s11245_s1 + $0x2e4] ss:$16 sps:$4 sm:$0xff]   ;;  %v7500_v44 = vld [vmem:[%s11245_s1 + $0x2e0] ss:$16 sps:$4 sm:$0xff]  }
  0x28   :  { %4965 = vmatprep.subr.bf16.mxu0 %v7422_v45  ;;  %5498 = vmatprep.subr.bf16.mxu1 %v7424_v46  ;;  %v7503_v45 = vld [vmem:[%s11245_s1 + $0x2e8] ss:$16 sps:$4 sm:$0xff]   ;;  %v7508_v46 = vld [vmem:[%s11245_s1 + $0x304] ss:$16 sps:$4 sm:$0xff]  }
  0x2b   :  { %4966 = vmatpush1.bf16.msra.mxu0 %v7426_v47  ;;  %5499 = vmatpush1.bf16.msra.mxu1 %v7427_v48  ;;  %v7511_v47 = vld [vmem:[%s11245_s1 + $0x30c] ss:$16 sps:$4 sm:$0xff]   ;;  %v7506_v48 = vld [vmem:[%s11245_s1 + $0x300] ss:$16 sps:$4 sm:$0xff]  }
  0x2c   :  { %4967 = vmatprep.subr.bf16.mxu0 %v7428_v50  ;;  %5500 = vmatprep.subr.bf16.mxu1 %v7430_v51  ;;  %v7509_v50 = vld [vmem:[%s11245_s1 + $0x308] ss:$16 sps:$4 sm:$0xff]   ;;  %v7514_v51 = vld [vmem:[%s11245_s1 + $0x324] ss:$16 sps:$4 sm:$0xff]  }
  0x2f   :  { %4968 = vmatpush1.bf16.msra.mxu0 %v7432_v53  ;;  %5501 = vmatpush1.bf16.msra.mxu1 %v7433_v55  ;;  %v7517_v53 = vld [vmem:[%s11245_s1 + $0x32c] ss:$16 sps:$4 sm:$0xff]   ;;  %v7515_v55 = vld [vmem:[%s11245_s1 + $0x328] ss:$16 sps:$4 sm:$0xff]  }
  0x30   :  { %4969 = vmatprep.subr.bf16.mxu0 %v7434_v56  ;;  %5502 = vmatprep.subr.bf16.mxu1 %v7436_v57  ;;  %v7520_v56 = vld [vmem:[%s11245_s1 + $0x344] ss:$16 sps:$4 sm:$0xff]   ;;  %v7523_v57 = vld [vmem:[%s11245_s1 + $0x34c] ss:$16 sps:$4 sm:$0xff]  }
  0x33   :  { %4970 = vmatpush1.bf16.msra.mxu0 %v7438_v59  ;;  %5503 = vmatpush1.bf16.msra.mxu1 %v7439_v61  ;;  %v7521_v59 = vld [vmem:[%s11245_s1 + $0x348] ss:$16 sps:$4 sm:$0xff]   ;;  %v7529_v61 = vld [vmem:[%s11245_s1 + $0x36c] ss:$16 sps:$4 sm:$0xff]  }
  0x34   :  { %4971 = vmatprep.subr.bf16.mxu0 %v7440_v62  ;;  %5504 = vmatprep.subr.bf16.mxu1 %v7442_v63  ;;  %v7524_v62 = vld [vmem:[%s11245_s1 + $0x360] ss:$16 sps:$4 sm:$0xff]   ;;  %v7527_v63 = vld [vmem:[%s11245_s1 + $0x368] ss:$16 sps:$4 sm:$0xff]  }
  0x37   :  { %4972 = vmatpush1.bf16.msra.mxu0 %v7444_v0  ;;  %5505 = vmatpush1.bf16.msra.mxu1 %v7445_v1  ;;  %v7532_v0 = vld [vmem:[%s11245_s1 + $0x384] ss:$16 sps:$4 sm:$0xff]   ;;  %v7535_v1 = vld [vmem:[%s11245_s1 + $0x38c] ss:$16 sps:$4 sm:$0xff]  }
  0x38   :  { %4973 = vmatprep.subr.bf16.mxu0 %v7446_v2  ;;  %5506 = vmatprep.subr.bf16.mxu1 %v7448_v3  ;;  %v7530_v2 = vld [vmem:[%s11245_s1 + $0x380] ss:$16 sps:$4 sm:$0xff]   ;;  %v7533_v3 = vld [vmem:[%s11245_s1 + $0x388] ss:$16 sps:$4 sm:$0xff]  }
  0x3b   :  { %4974 = vmatpush1.bf16.msra.mxu0 %v7450_v4  ;;  %5507 = vmatpush1.bf16.msra.mxu1 %v7451_v5  ;;  %v7538_v4 = vld [vmem:[%s11245_s1 + $0x3a4] ss:$16 sps:$4 sm:$0xff]   ;;  %v7541_v5 = vld [vmem:[%s11245_s1 + $0x3ac] ss:$16 sps:$4 sm:$0xff]  }
  0x3c   :  { %4975 = vmatprep.subr.bf16.mxu0 %v7452_v6  ;;  %5508 = vmatprep.subr.bf16.mxu1 %v7454_v7  ;;  %v7536_v6 = vld [vmem:[%s11245_s1 + $0x3a0] ss:$16 sps:$4 sm:$0xff]   ;;  %v7539_v7 = vld [vmem:[%s11245_s1 + $0x3a8] ss:$16 sps:$4 sm:$0xff]  }
  0x3f   :  { %4976 = vmatpush1.bf16.msra.mxu0 %v7456_v8  ;;  %5509 = vmatpush1.bf16.msra.mxu1 %v7457_v9  ;;  %v7544_v8 = vld [vmem:[%s11245_s1 + $0x3c4] ss:$16 sps:$4 sm:$0xff]   ;;  %v7547_v9 = vld [vmem:[%s11245_s1 + $0x3cc] ss:$16 sps:$4 sm:$0xff]  }
  0x40   :  { %4986 = vmatprep.subr.bf16.mxu0 %v7460_v10  ;;  %5519 = vmatprep.subr.bf16.mxu1 %v7463_v11  ;;  %v836_v10 = vcombine.high %v8780_v52, %v8780_v52  ;;  %v7542_v11 = vld [vmem:[%s11245_s1 + $0x3c0] ss:$16 sps:$4 sm:$0xff]   ;;  %v7553_v52 = vld [vmem:[%s11245_s1 + $0x3ec] ss:$16 sps:$4 sm:$0xff]  }
  0x42   :  { %4978 = vmatmul.mubr.bf16.vlgmr.msra.gmra.mrb[0].mxu0 %v8849_v13  ;;  %5511 = vmatmul.mubr.bf16.vlgmr.msra.gmra.mrb[0].mxu1 %v8849_v13 }
  0x43   :  { %4987 = vmatpush1.bf16.msra.mxu0 %v7458_v12  ;;  %5520 = vmatpush1.bf16.msra.mxu1 %v7461_v14  ;;  %v7545_v12 = vld [vmem:[%s11245_s1 + $0x3c8] ss:$16 sps:$4 sm:$0xff]   ;;  %v7550_v14 = vld [vmem:[%s11245_s1 + $0x3e4] ss:$16 sps:$4 sm:$0xff]  }
  0x44   :  { %4988 = vmatprep.subr.bf16.mxu0 %v7466_v15  ;;  %5521 = vmatprep.subr.bf16.mxu1 %v7469_v16  ;;  %v9033_v15 = vrot.slane %v836_v10, %v8769_v49  ;;  %v7548_v16 = vld [vmem:[%s11245_s1 + $0x3e0] ss:$16 sps:$4 sm:$0xff]  }
  0x45   :  { %5018 = vmatprep.mubr.bf16.mxu0 %v883_v17  ;;  %5551 = vmatprep.mubr.bf16.mxu1 %v883_v17  ;;  %v7551_v17 = vld [vmem:[%s11245_s1 + $0x3e8] ss:$16 sps:$4 sm:$0xff]   ;;  %v7626_v10 = vld [vmem:[%s11245_s1 + $0x580] ss:$16 sps:$4 sm:$0xff]  }
  0x47   :  { %4989 = vmatpush1.bf16.msra.mxu0 %v7464_v18  ;;  %5522 = vmatpush1.bf16.msra.mxu1 %v7467_v19  ;;  %v7556_v18 = vld [vmem:[%s11245_s1 + $0x404] ss:$16 sps:$4 sm:$0xff]   ;;  %v7559_v19 = vld [vmem:[%s11245_s1 + $0x40c] ss:$16 sps:$4 sm:$0xff]  }
  0x48   :  { %4990 = vmatprep.subr.bf16.mxu0 %v7472_v20  ;;  %5523 = vmatprep.subr.bf16.mxu1 %v7475_v21  ;;  %v852_v20 = vcombine.high %v9033_v15, %v9033_v15  ;;  %v7554_v21 = vld [vmem:[%s11245_s1 + $0x400] ss:$16 sps:$4 sm:$0xff]  }
  0x4b   :  { %4991 = vmatpush1.bf16.msra.mxu0 %v7470_v22  ;;  %5524 = vmatpush1.bf16.msra.mxu1 %v7473_v23  ;;  %v881_v22 = vcombine.high %v8849_v13, %v8849_v13  ;;  %v7557_v23 = vld [vmem:[%s11245_s1 + $0x408] ss:$16 sps:$4 sm:$0xff]   ;;  %v7560_v13 = vld [vmem:[%s11245_s1 + $0x420] ss:$16 sps:$4 sm:$0xff]  }
  0x4c   :  { %4992 = vmatprep.subr.bf16.mxu0 %v7478_v24  ;;  %5525 = vmatprep.subr.bf16.mxu1 %v7481_v25  ;;  %v7562_v24 = vld [vmem:[%s11245_s1 + $0x424] ss:$16 sps:$4 sm:$0xff]   ;;  %v7565_v25 = vld [vmem:[%s11245_s1 + $0x42c] ss:$16 sps:$4 sm:$0xff]  }
  0x4f   :  { %4993 = vmatpush1.bf16.msra.mxu0 %v7476_v26  ;;  %5526 = vmatpush1.bf16.msra.mxu1 %v7479_v27  ;;  %v9064_v26 = vrot.slane %v852_v20, %v8769_v49  ;;  %v7563_v27 = vld [vmem:[%s11245_s1 + $0x428] ss:$16 sps:$4 sm:$0xff]  }
  0x50   :  { %4994 = vmatprep.subr.bf16.mxu0 %v7484_v28  ;;  %5527 = vmatprep.subr.bf16.mxu1 %v7487_v29  ;;  %v7568_v28 = vld [vmem:[%s11245_s1 + $0x444] ss:$16 sps:$4 sm:$0xff]   ;;  %v7571_v29 = vld [vmem:[%s11245_s1 + $0x44c] ss:$16 sps:$4 sm:$0xff]   ;;  %v7641_v20 = vld [vmem:[%s11245_s1 + $0x5c8] ss:$16 sps:$4 sm:$0xff]  }
  0x53   :  { %4995 = vmatpush1.bf16.msra.mxu0 %v7482_v30  ;;  %5528 = vmatpush1.bf16.msra.mxu1 %v7485_v31  ;;  %v7566_v30 = vld [vmem:[%s11245_s1 + $0x440] ss:$16 sps:$4 sm:$0xff]   ;;  %v7569_v31 = vld [vmem:[%s11245_s1 + $0x448] ss:$16 sps:$4 sm:$0xff]  }
  0x54   :  { %4996 = vmatprep.subr.bf16.mxu0 %v7490_v32  ;;  %5529 = vmatprep.subr.bf16.mxu1 %v7493_v33  ;;  %v7574_v32 = vld [vmem:[%s11245_s1 + $0x464] ss:$16 sps:$4 sm:$0xff]   ;;  %v7577_v33 = vld [vmem:[%s11245_s1 + $0x46c] ss:$16 sps:$4 sm:$0xff]  }
  0x57   :  { %4997 = vmatpush1.bf16.msra.mxu0 %v7488_v34  ;;  %5530 = vmatpush1.bf16.msra.mxu1 %v7491_v35  ;;  %v7572_v34 = vld [vmem:[%s11245_s1 + $0x460] ss:$16 sps:$4 sm:$0xff]   ;;  %v7575_v35 = vld [vmem:[%s11245_s1 + $0x468] ss:$16 sps:$4 sm:$0xff]  }
  0x58   :  { %4998 = vmatprep.subr.bf16.mxu0 %v7496_v37  ;;  %5531 = vmatprep.subr.bf16.mxu1 %v7499_v38  ;;  %v7580_v37 = vld [vmem:[%s11245_s1 + $0x484] ss:$16 sps:$4 sm:$0xff]   ;;  %v7583_v38 = vld [vmem:[%s11245_s1 + $0x48c] ss:$16 sps:$4 sm:$0xff]  }
  0x5b   :  { %4999 = vmatpush1.bf16.msra.mxu0 %v7494_v39  ;;  %5532 = vmatpush1.bf16.msra.mxu1 %v7497_v40  ;;  %v7578_v39 = vld [vmem:[%s11245_s1 + $0x480] ss:$16 sps:$4 sm:$0xff]   ;;  %v7581_v40 = vld [vmem:[%s11245_s1 + $0x488] ss:$16 sps:$4 sm:$0xff]  }
  0x5c   :  { %5000 = vmatprep.subr.bf16.mxu0 %v7502_v41  ;;  %5533 = vmatprep.subr.bf16.mxu1 %v7505_v43  ;;  %v7586_v41 = vld [vmem:[%s11245_s1 + $0x4a4] ss:$16 sps:$4 sm:$0xff]   ;;  %v7589_v43 = vld [vmem:[%s11245_s1 + $0x4ac] ss:$16 sps:$4 sm:$0xff]  }
  0x5f   :  { %5001 = vmatpush1.bf16.msra.mxu0 %v7500_v44  ;;  %5534 = vmatpush1.bf16.msra.mxu1 %v7503_v45  ;;  %v7584_v44 = vld [vmem:[%s11245_s1 + $0x4a0] ss:$16 sps:$4 sm:$0xff]   ;;  %v7587_v45 = vld [vmem:[%s11245_s1 + $0x4a8] ss:$16 sps:$4 sm:$0xff]  }
  0x60   :  { %5002 = vmatprep.subr.bf16.mxu0 %v7508_v46  ;;  %5535 = vmatprep.subr.bf16.mxu1 %v7511_v47  ;;  %v7592_v46 = vld [vmem:[%s11245_s1 + $0x4c4] ss:$16 sps:$4 sm:$0xff]   ;;  %v7595_v47 = vld [vmem:[%s11245_s1 + $0x4cc] ss:$16 sps:$4 sm:$0xff]  }
  0x63   :  { %5003 = vmatpush1.bf16.msra.mxu0 %v7506_v48  ;;  %5536 = vmatpush1.bf16.msra.mxu1 %v7509_v50  ;;  %v7590_v48 = vld [vmem:[%s11245_s1 + $0x4c0] ss:$16 sps:$4 sm:$0xff]   ;;  %v7593_v50 = vld [vmem:[%s11245_s1 + $0x4c8] ss:$16 sps:$4 sm:$0xff]  }
  0x64   :  { %5004 = vmatprep.subr.bf16.mxu0 %v7514_v51  ;;  %5537 = vmatprep.subr.bf16.mxu1 %v7517_v53  ;;  %v7598_v51 = vld [vmem:[%s11245_s1 + $0x4e4] ss:$16 sps:$4 sm:$0xff]   ;;  %v7601_v53 = vld [vmem:[%s11245_s1 + $0x4ec] ss:$16 sps:$4 sm:$0xff]  }
  0x67   :  { %5005 = vmatpush1.bf16.msra.mxu0 %v7512_v54  ;;  %5538 = vmatpush1.bf16.msra.mxu1 %v7515_v55  ;;  %v7596_v54 = vld [vmem:[%s11245_s1 + $0x4e0] ss:$16 sps:$4 sm:$0xff]   ;;  %v7599_v55 = vld [vmem:[%s11245_s1 + $0x4e8] ss:$16 sps:$4 sm:$0xff]  }
  0x68   :  { %5006 = vmatprep.subr.bf16.mxu0 %v7520_v56  ;;  %5539 = vmatprep.subr.bf16.mxu1 %v7523_v57  ;;  %v7604_v56 = vld [vmem:[%s11245_s1 + $0x504] ss:$16 sps:$4 sm:$0xff]   ;;  %v7607_v57 = vld [vmem:[%s11245_s1 + $0x50c] ss:$16 sps:$4 sm:$0xff]  }
  0x6b   :  { %5007 = vmatpush1.bf16.msra.mxu0 %v7518_v58  ;;  %5540 = vmatpush1.bf16.msra.mxu1 %v7521_v59  ;;  %v7602_v58 = vld [vmem:[%s11245_s1 + $0x500] ss:$16 sps:$4 sm:$0xff]   ;;  %v7605_v59 = vld [vmem:[%s11245_s1 + $0x508] ss:$16 sps:$4 sm:$0xff]  }
  0x6c   :  { %5008 = vmatprep.subr.bf16.mxu0 %v7526_v60  ;;  %5541 = vmatprep.subr.bf16.mxu1 %v7529_v61  ;;  %v7610_v60 = vld [vmem:[%s11245_s1 + $0x524] ss:$16 sps:$4 sm:$0xff]   ;;  %v7613_v61 = vld [vmem:[%s11245_s1 + $0x52c] ss:$16 sps:$4 sm:$0xff]  }
  0x6f   :  { %5009 = vmatpush1.bf16.msra.mxu0 %v7524_v62  ;;  %5542 = vmatpush1.bf16.msra.mxu1 %v7527_v63  ;;  %v7608_v62 = vld [vmem:[%s11245_s1 + $0x520] ss:$16 sps:$4 sm:$0xff]   ;;  %v7611_v63 = vld [vmem:[%s11245_s1 + $0x528] ss:$16 sps:$4 sm:$0xff]  }
  0x70   :  { %5010 = vmatprep.subr.bf16.mxu0 %v7532_v0  ;;  %5543 = vmatprep.subr.bf16.mxu1 %v7535_v1  ;;  %v7616_v0 = vld [vmem:[%s11245_s1 + $0x544] ss:$16 sps:$4 sm:$0xff]   ;;  %v7619_v1 = vld [vmem:[%s11245_s1 + $0x54c] ss:$16 sps:$4 sm:$0xff]  }
  0x73   :  { %5011 = vmatpush1.bf16.msra.mxu0 %v7530_v2  ;;  %5544 = vmatpush1.bf16.msra.mxu1 %v7533_v3  ;;  %v7614_v2 = vld [vmem:[%s11245_s1 + $0x540] ss:$16 sps:$4 sm:$0xff]   ;;  %v7617_v3 = vld [vmem:[%s11245_s1 + $0x548] ss:$16 sps:$4 sm:$0xff]  }
  0x74   :  { %5012 = vmatprep.subr.bf16.mxu0 %v7538_v4  ;;  %5545 = vmatprep.subr.bf16.mxu1 %v7541_v5  ;;  %v7622_v4 = vld [vmem:[%s11245_s1 + $0x564] ss:$16 sps:$4 sm:$0xff]   ;;  %v7625_v5 = vld [vmem:[%s11245_s1 + $0x56c] ss:$16 sps:$4 sm:$0xff]  }
  0x77   :  { %5013 = vmatpush1.bf16.msra.mxu0 %v7536_v6  ;;  %5546 = vmatpush1.bf16.msra.mxu1 %v7539_v7  ;;  %v7620_v6 = vld [vmem:[%s11245_s1 + $0x560] ss:$16 sps:$4 sm:$0xff]   ;;  %v7623_v7 = vld [vmem:[%s11245_s1 + $0x568] ss:$16 sps:$4 sm:$0xff]  }
  0x78   :  { %5014 = vmatprep.subr.bf16.mxu0 %v7544_v8  ;;  %5547 = vmatprep.subr.bf16.mxu1 %v7547_v9  ;;  %v7628_v8 = vld [vmem:[%s11245_s1 + $0x584] ss:$16 sps:$4 sm:$0xff]   ;;  %v7631_v9 = vld [vmem:[%s11245_s1 + $0x58c] ss:$16 sps:$4 sm:$0xff]  }
  0x7b   :  { %5015 = vmatpush1.bf16.msra.mxu0 %v7542_v11  ;;  %5548 = vmatpush1.bf16.msra.mxu1 %v7545_v12  ;;  %v7629_v11 = vld [vmem:[%s11245_s1 + $0x588] ss:$16 sps:$4 sm:$0xff]   ;;  %v7634_v12 = vld [vmem:[%s11245_s1 + $0x5a4] ss:$16 sps:$4 sm:$0xff]  }
  0x7c   :  { %5016 = vmatprep.subr.bf16.mxu0 %v7550_v14  ;;  %5549 = vmatprep.subr.bf16.mxu1 %v7553_v52  ;;  %v7637_v14 = vld [vmem:[%s11245_s1 + $0x5ac] ss:$16 sps:$4 sm:$0xff]   ;;  %v7632_v52 = vld [vmem:[%s11245_s1 + $0x5a0] ss:$16 sps:$4 sm:$0xff]  }
  0x7f   :  { %5017 = vmatpush1.bf16.msra.mxu0 %v7548_v16  ;;  %5550 = vmatpush1.bf16.msra.mxu1 %v7551_v17  ;;  %v7635_v16 = vld [vmem:[%s11245_s1 + $0x5a8] ss:$16 sps:$4 sm:$0xff]   ;;  %v7640_v17 = vld [vmem:[%s11245_s1 + $0x5c4] ss:$16 sps:$4 sm:$0xff]  }
  0x80   :  { %5027 = vmatprep.subr.bf16.mxu0 %v7556_v18  ;;  %5560 = vmatprep.subr.bf16.mxu1 %v7559_v19  ;;  %v7643_v18 = vld [vmem:[%s11245_s1 + $0x5cc] ss:$16 sps:$4 sm:$0xff]   ;;  %v7638_v19 = vld [vmem:[%s11245_s1 + $0x5c0] ss:$16 sps:$4 sm:$0xff]  }
  0x82   :  { %5019 = vmatmul.mubr.bf16.vlgmr.msra.gmra.mrb[0].mxu0 %v881_v22  ;;  %5552 = vmatmul.mubr.bf16.vlgmr.msra.gmra.mrb[0].mxu1 %v881_v22  ;;  %v7649_v22 = vld [vmem:[%s11245_s1 + $0x5ec] ss:$16 sps:$4 sm:$0xff]  }
  0x83   :  { %5028 = vmatpush1.bf16.msra.mxu0 %v7554_v21  ;;  %5561 = vmatpush1.bf16.msra.mxu1 %v7557_v23  ;;  %v7646_v21 = vld [vmem:[%s11245_s1 + $0x5e4] ss:$16 sps:$4 sm:$0xff]   ;;  %v7644_v23 = vld [vmem:[%s11245_s1 + $0x5e0] ss:$16 sps:$4 sm:$0xff]  }
  0x84   :  { %5029 = vmatprep.subr.bf16.mxu0 %v7562_v24  ;;  %5562 = vmatprep.subr.bf16.mxu1 %v7565_v25  ;;  %v7647_v24 = vld [vmem:[%s11245_s1 + $0x5e8] ss:$16 sps:$4 sm:$0xff]   ;;  %v7653_v25 = vld [vmem:[%s11245_s1 + $0x604] ss:$16 sps:$4 sm:$0xff]  }
  0x85   :  { %5059 = vmatprep.mubr.bf16.mxu0 %v9064_v26  ;;  %5592 = vmatprep.mubr.bf16.mxu1 %v9064_v26 }
  0x87   :  { %5030 = vmatpush1.bf16.msra.mxu0 %v7560_v13  ;;  %5563 = vmatpush1.bf16.msra.mxu1 %v7563_v27  ;;  %v7656_v13 = vld [vmem:[%s11245_s1 + $0x60c] ss:$16 sps:$4 sm:$0xff]   ;;  %v7651_v27 = vld [vmem:[%s11245_s1 + $0x600] ss:$16 sps:$4 sm:$0xff]  }
  0x88   :  { %5031 = vmatprep.subr.bf16.mxu0 %v7568_v28  ;;  %5564 = vmatprep.subr.bf16.mxu1 %v7571_v29  ;;  %v9253_v28 = vrot.slane %v9033_v15, %v8769_v49  ;;  %v7654_v29 = vld [vmem:[%s11245_s1 + $0x608] ss:$16 sps:$4 sm:$0xff]   ;;  %v884_v15 = vcombine.high %v9064_v26, %v9064_v26  ;;  %v7665_v26 = vld [vmem:[%s11245_s1 + $0x644] ss:$16 sps:$4 sm:$0xff]  }
  0x8b   :  { %5032 = vmatpush1.bf16.msra.mxu0 %v7566_v30  ;;  %5565 = vmatpush1.bf16.msra.mxu1 %v7569_v31  ;;  %v7659_v30 = vld [vmem:[%s11245_s1 + $0x624] ss:$16 sps:$4 sm:$0xff]   ;;  %v7662_v31 = vld [vmem:[%s11245_s1 + $0x62c] ss:$16 sps:$4 sm:$0xff]  }
  0x8c   :  { %5033 = vmatprep.subr.bf16.mxu0 %v7574_v32  ;;  %5566 = vmatprep.subr.bf16.mxu1 %v7577_v33  ;;  %v7657_v32 = vld [vmem:[%s11245_s1 + $0x620] ss:$16 sps:$4 sm:$0xff]   ;;  %v7660_v33 = vld [vmem:[%s11245_s1 + $0x628] ss:$16 sps:$4 sm:$0xff]  }
  0x8f   :  { %5034 = vmatpush1.bf16.msra.mxu0 %v7572_v34  ;;  %5567 = vmatpush1.bf16.msra.mxu1 %v7575_v35  ;;  %v7668_v34 = vld [vmem:[%s11245_s1 + $0x64c] ss:$16 sps:$4 sm:$0xff]   ;;  %v7663_v35 = vld [vmem:[%s11245_s1 + $0x640] ss:$16 sps:$4 sm:$0xff]  }
  0x90   :  { %5035 = vmatprep.subr.bf16.mxu0 %v7580_v37  ;;  %5568 = vmatprep.subr.bf16.mxu1 %v7583_v38  ;;  %v7666_v37 = vld [vmem:[%s11245_s1 + $0x648] ss:$16 sps:$4 sm:$0xff]   ;;  %v7671_v38 = vld [vmem:[%s11245_s1 + $0x664] ss:$16 sps:$4 sm:$0xff]  }
  0x93   :  { %5036 = vmatpush1.bf16.msra.mxu0 %v7578_v39  ;;  %5569 = vmatpush1.bf16.msra.mxu1 %v7581_v40  ;;  %v7674_v39 = vld [vmem:[%s11245_s1 + $0x66c] ss:$16 sps:$4 sm:$0xff]   ;;  %v7669_v40 = vld [vmem:[%s11245_s1 + $0x660] ss:$16 sps:$4 sm:$0xff]  }
  0x94   :  { %5037 = vmatprep.subr.bf16.mxu0 %v7586_v41  ;;  %5570 = vmatprep.subr.bf16.mxu1 %v7589_v43  ;;  %v7672_v41 = vld [vmem:[%s11245_s1 + $0x668] ss:$16 sps:$4 sm:$0xff]   ;;  %v7677_v43 = vld [vmem:[%s11245_s1 + $0x684] ss:$16 sps:$4 sm:$0xff]  }
  0x97   :  { %5038 = vmatpush1.bf16.msra.mxu0 %v7584_v44  ;;  %5571 = vmatpush1.bf16.msra.mxu1 %v7587_v45  ;;  %v7680_v44 = vld [vmem:[%s11245_s1 + $0x68c] ss:$16 sps:$4 sm:$0xff]   ;;  %v7675_v45 = vld [vmem:[%s11245_s1 + $0x680] ss:$16 sps:$4 sm:$0xff]  }
  0x98   :  { %5039 = vmatprep.subr.bf16.mxu0 %v7592_v46  ;;  %5572 = vmatprep.subr.bf16.mxu1 %v7595_v47  ;;  %v7678_v46 = vld [vmem:[%s11245_s1 + $0x688] ss:$16 sps:$4 sm:$0xff]   ;;  %v7683_v47 = vld [vmem:[%s11245_s1 + $0x6a4] ss:$16 sps:$4 sm:$0xff]  }
  0x9b   :  { %5040 = vmatpush1.bf16.msra.mxu0 %v7590_v48  ;;  %5573 = vmatpush1.bf16.msra.mxu1 %v7593_v50  ;;  %v7686_v48 = vld [vmem:[%s11245_s1 + $0x6ac] ss:$16 sps:$4 sm:$0xff]   ;;  %v7681_v50 = vld [vmem:[%s11245_s1 + $0x6a0] ss:$16 sps:$4 sm:$0xff]  }
  0x9c   :  { %5041 = vmatprep.subr.bf16.mxu0 %v7598_v51  ;;  %5574 = vmatprep.subr.bf16.mxu1 %v7601_v53  ;;  %v7684_v51 = vld [vmem:[%s11245_s1 + $0x6a8] ss:$16 sps:$4 sm:$0xff]   ;;  %v7689_v53 = vld [vmem:[%s11245_s1 + $0x6c4] ss:$16 sps:$4 sm:$0xff]  }
  0x9f   :  { %5042 = vmatpush1.bf16.msra.mxu0 %v7596_v54  ;;  %5575 = vmatpush1.bf16.msra.mxu1 %v7599_v55  ;;  %v7692_v54 = vld [vmem:[%s11245_s1 + $0x6cc] ss:$16 sps:$4 sm:$0xff]   ;;  %v7687_v55 = vld [vmem:[%s11245_s1 + $0x6c0] ss:$16 sps:$4 sm:$0xff]  }
  0xa0   :  { %5043 = vmatprep.subr.bf16.mxu0 %v7604_v56  ;;  %5576 = vmatprep.subr.bf16.mxu1 %v7607_v57  ;;  %v7690_v56 = vld [vmem:[%s11245_s1 + $0x6c8] ss:$16 sps:$4 sm:$0xff]   ;;  %v7695_v57 = vld [vmem:[%s11245_s1 + $0x6e4] ss:$16 sps:$4 sm:$0xff]  }
  0xa3   :  { %5044 = vmatpush1.bf16.msra.mxu0 %v7602_v58  ;;  %5577 = vmatpush1.bf16.msra.mxu1 %v7605_v59  ;;  %v7698_v58 = vld [vmem:[%s11245_s1 + $0x6ec] ss:$16 sps:$4 sm:$0xff]   ;;  %v7693_v59 = vld [vmem:[%s11245_s1 + $0x6e0] ss:$16 sps:$4 sm:$0xff]  }
  0xa4   :  { %5045 = vmatprep.subr.bf16.mxu0 %v7610_v60  ;;  %5578 = vmatprep.subr.bf16.mxu1 %v7613_v61  ;;  %v7696_v60 = vld [vmem:[%s11245_s1 + $0x6e8] ss:$16 sps:$4 sm:$0xff]   ;;  %v7701_v61 = vld [vmem:[%s11245_s1 + $0x704] ss:$16 sps:$4 sm:$0xff]  }
  0xa7   :  { %5046 = vmatpush1.bf16.msra.mxu0 %v7608_v62  ;;  %5579 = vmatpush1.bf16.msra.mxu1 %v7611_v63  ;;  %v7704_v62 = vld [vmem:[%s11245_s1 + $0x70c] ss:$16 sps:$4 sm:$0xff]   ;;  %v7699_v63 = vld [vmem:[%s11245_s1 + $0x700] ss:$16 sps:$4 sm:$0xff]  }
  0xa8   :  { %5047 = vmatprep.subr.bf16.mxu0 %v7616_v0  ;;  %5580 = vmatprep.subr.bf16.mxu1 %v7619_v1  ;;  %v7702_v0 = vld [vmem:[%s11245_s1 + $0x708] ss:$16 sps:$4 sm:$0xff]   ;;  %v7707_v1 = vld [vmem:[%s11245_s1 + $0x724] ss:$16 sps:$4 sm:$0xff]  }
  0xab   :  { %5048 = vmatpush1.bf16.msra.mxu0 %v7614_v2  ;;  %5581 = vmatpush1.bf16.msra.mxu1 %v7617_v3  ;;  %v7710_v2 = vld [vmem:[%s11245_s1 + $0x72c] ss:$16 sps:$4 sm:$0xff]   ;;  %v7705_v3 = vld [vmem:[%s11245_s1 + $0x720] ss:$16 sps:$4 sm:$0xff]  }
  0xac   :  { %5049 = vmatprep.subr.bf16.mxu0 %v7622_v4  ;;  %5582 = vmatprep.subr.bf16.mxu1 %v7625_v5  ;;  %v7708_v4 = vld [vmem:[%s11245_s1 + $0x728] ss:$16 sps:$4 sm:$0xff]   ;;  %v7713_v5 = vld [vmem:[%s11245_s1 + $0x744] ss:$16 sps:$4 sm:$0xff]  }
  0xaf   :  { %5050 = vmatpush1.bf16.msra.mxu0 %v7620_v6  ;;  %5583 = vmatpush1.bf16.msra.mxu1 %v7623_v7  ;;  %v7716_v6 = vld [vmem:[%s11245_s1 + $0x74c] ss:$16 sps:$4 sm:$0xff]   ;;  %v7711_v7 = vld [vmem:[%s11245_s1 + $0x740] ss:$16 sps:$4 sm:$0xff]  }
  0xb0   :  { %5051 = vmatprep.subr.bf16.mxu0 %v7628_v8  ;;  %5584 = vmatprep.subr.bf16.mxu1 %v7631_v9  ;;  %v7714_v8 = vld [vmem:[%s11245_s1 + $0x748] ss:$16 sps:$4 sm:$0xff]   ;;  %v7719_v9 = vld [vmem:[%s11245_s1 + $0x764] ss:$16 sps:$4 sm:$0xff]  }
  0xb3   :  { %5052 = vmatpush1.bf16.msra.mxu0 %v7626_v10  ;;  %5585 = vmatpush1.bf16.msra.mxu1 %v7629_v11  ;;  %v7722_v10 = vld [vmem:[%s11245_s1 + $0x76c] ss:$16 sps:$4 sm:$0xff]   ;;  %v7717_v11 = vld [vmem:[%s11245_s1 + $0x760] ss:$16 sps:$4 sm:$0xff]  }
  0xb4   :  { %5053 = vmatprep.subr.bf16.mxu0 %v7634_v12  ;;  %5586 = vmatprep.subr.bf16.mxu1 %v7637_v14  ;;  %v7720_v12 = vld [vmem:[%s11245_s1 + $0x768] ss:$16 sps:$4 sm:$0xff]   ;;  %v7725_v14 = vld [vmem:[%s11245_s1 + $0x784] ss:$16 sps:$4 sm:$0xff]  }
  0xb7   :  { %5054 = vmatpush1.bf16.msra.mxu0 %v7632_v52  ;;  %5587 = vmatpush1.bf16.msra.mxu1 %v7635_v16  ;;  %v7728_v52 = vld [vmem:[%s11245_s1 + $0x78c] ss:$16 sps:$4 sm:$0xff]   ;;  %v7723_v16 = vld [vmem:[%s11245_s1 + $0x780] ss:$16 sps:$4 sm:$0xff]  }
  0xb8   :  { %5055 = vmatprep.subr.bf16.mxu0 %v7640_v17  ;;  %5588 = vmatprep.subr.bf16.mxu1 %v7643_v18  ;;  %v7726_v17 = vld [vmem:[%s11245_s1 + $0x788] ss:$16 sps:$4 sm:$0xff]   ;;  %v7731_v18 = vld [vmem:[%s11245_s1 + $0x7a4] ss:$16 sps:$4 sm:$0xff]  }
  0xbb   :  { %5056 = vmatpush1.bf16.msra.mxu0 %v7638_v19  ;;  %5589 = vmatpush1.bf16.msra.mxu1 %v7641_v20  ;;  %v7734_v19 = vld [vmem:[%s11245_s1 + $0x7ac] ss:$16 sps:$4 sm:$0xff]   ;;  %v7729_v20 = vld [vmem:[%s11245_s1 + $0x7a0] ss:$16 sps:$4 sm:$0xff]  }
  0xbc   :  { %5057 = vmatprep.subr.bf16.mxu0 %v7646_v21  ;;  %5590 = vmatprep.subr.bf16.mxu1 %v7649_v22  ;;  %v7732_v21 = vld [vmem:[%s11245_s1 + $0x7a8] ss:$16 sps:$4 sm:$0xff]   ;;  %v7737_v22 = vld [vmem:[%s11245_s1 + $0x7c4] ss:$16 sps:$4 sm:$0xff]  }
  0xbf   :  { %5058 = vmatpush1.bf16.msra.mxu0 %v7644_v23  ;;  %5591 = vmatpush1.bf16.msra.mxu1 %v7647_v24  ;;  %v7740_v23 = vld [vmem:[%s11245_s1 + $0x7cc] ss:$16 sps:$4 sm:$0xff]  }
  0xc0   :  { %5068 = vmatprep.subr.bf16.mxu0 %v7653_v25  ;;  %5601 = vmatprep.subr.bf16.mxu1 %v7656_v13  ;;  %v9427_v24 = vld.sshfl [vmem:[%s11244_s0 + $0x8] sm:$0xff pattern:$0x75316420]  ;;  %v7735_v25 = vld [vmem:[%s11245_s1 + $0x7c0] ss:$16 sps:$4 sm:$0xff]  }
  0xc1   :  { %v7738_v13 = vld [vmem:[%s11245_s1 + $0x7c8] ss:$16 sps:$4 sm:$0xff]  }
  0xc2   :  { %5060 = vmatmul.mubr.bf16.vlgmr.msra.gmra.mrb[0].mxu0 %v9253_v28  ;;  %5593 = vmatmul.mubr.bf16.vlgmr.msra.gmra.mrb[0].mxu1 %v9253_v28 }
  0xc3   :  { %5069 = vmatpush1.bf16.msra.mxu0 %v7651_v27  ;;  %5602 = vmatpush1.bf16.msra.mxu1 %v7654_v29  ;;  %v7743_v27 = vld [vmem:[%s11245_s1 + $0x7e4] ss:$16 sps:$4 sm:$0xff]   ;;  %v7746_v29 = vld [vmem:[%s11245_s1 + $0x7ec] ss:$16 sps:$4 sm:$0xff]  }
  0xc4   :  { %5070 = vmatprep.subr.bf16.mxu0 %v7659_v30  ;;  %5603 = vmatprep.subr.bf16.mxu1 %v7662_v31  ;;  %v7741_v30 = vld [vmem:[%s11245_s1 + $0x7e0] ss:$16 sps:$4 sm:$0xff]   ;;  %v7744_v31 = vld [vmem:[%s11245_s1 + $0x7e8] ss:$16 sps:$4 sm:$0xff]  }
  0xc5   :  { %5100 = vmatprep.mubr.bf16.mxu0 %v884_v15  ;;  %5633 = vmatprep.mubr.bf16.mxu1 %v884_v15  ;;  %v7749_v15 = vld [vmem:[%s11245_s1 + $0x804] ss:$16 sps:$4 sm:$0xff]  }
  0xc7   :  { %5071 = vmatpush1.bf16.msra.mxu0 %v7657_v32  ;;  %5604 = vmatpush1.bf16.msra.mxu1 %v7660_v33  ;;  %v7752_v32 = vld [vmem:[%s11245_s1 + $0x80c] ss:$16 sps:$4 sm:$0xff]   ;;  %v900_v33 = vcombine.high %v9427_v24, %v9427_v24 }
  0xc8   :  { %5072 = vmatprep.subr.bf16.mxu0 %v7665_v26  ;;  %5605 = vmatprep.subr.bf16.mxu1 %v7668_v34  ;;  %v882_v26 = vcombine.high %v9253_v28, %v9253_v28  ;;  %v7747_v34 = vld [vmem:[%s11245_s1 + $0x800] ss:$16 sps:$4 sm:$0xff]   ;;  %v7758_v28 = vld [vmem:[%s11245_s1 + $0x82c] ss:$16 sps:$4 sm:$0xff]  }
  0xcb   :  { %5073 = vmatpush1.bf16.msra.mxu0 %v7663_v35  ;;  %5606 = vmatpush1.bf16.msra.mxu1 %v7666_v37  ;;  %v7750_v35 = vld [vmem:[%s11245_s1 + $0x808] ss:$16 sps:$4 sm:$0xff]   ;;  %v7755_v37 = vld [vmem:[%s11245_s1 + $0x824] ss:$16 sps:$4 sm:$0xff]  }
  0xcc   :  { %5074 = vmatprep.subr.bf16.mxu0 %v7671_v38  ;;  %5607 = vmatprep.subr.bf16.mxu1 %v7674_v39  ;;  %v9470_v38 = vrot.slane %v900_v33, %v8769_v49  ;;  %v7753_v39 = vld [vmem:[%s11245_s1 + $0x820] ss:$16 sps:$4 sm:$0xff]   ;;  %v7834_v33 = vld [vmem:[%s11245_s1 + $0x9c8] ss:$16 sps:$4 sm:$0xff]  }
  0xcf   :  { %5075 = vmatpush1.bf16.msra.mxu0 %v7669_v40  ;;  %5608 = vmatpush1.bf16.msra.mxu1 %v7672_v41  ;;  %v7756_v40 = vld [vmem:[%s11245_s1 + $0x828] ss:$16 sps:$4 sm:$0xff]   ;;  %v7761_v41 = vld [vmem:[%s11245_s1 + $0x844] ss:$16 sps:$4 sm:$0xff]  }
  0xd0   :  { %5076 = vmatprep.subr.bf16.mxu0 %v7677_v43  ;;  %5609 = vmatprep.subr.bf16.mxu1 %v7680_v44  ;;  %v7764_v43 = vld [vmem:[%s11245_s1 + $0x84c] ss:$16 sps:$4 sm:$0xff]   ;;  %v7759_v44 = vld [vmem:[%s11245_s1 + $0x840] ss:$16 sps:$4 sm:$0xff]  }
  0xd3   :  { %5077 = vmatpush1.bf16.msra.mxu0 %v7675_v45  ;;  %5610 = vmatpush1.bf16.msra.mxu1 %v7678_v46  ;;  %v7762_v45 = vld [vmem:[%s11245_s1 + $0x848] ss:$16 sps:$4 sm:$0xff]   ;;  %v7767_v46 = vld [vmem:[%s11245_s1 + $0x864] ss:$16 sps:$4 sm:$0xff]  }
  0xd4   :  { %5078 = vmatprep.subr.bf16.mxu0 %v7683_v47  ;;  %5611 = vmatprep.subr.bf16.mxu1 %v7686_v48  ;;  %v7770_v47 = vld [vmem:[%s11245_s1 + $0x86c] ss:$16 sps:$4 sm:$0xff]   ;;  %v7765_v48 = vld [vmem:[%s11245_s1 + $0x860] ss:$16 sps:$4 sm:$0xff]  }
  0xd7   :  { %5079 = vmatpush1.bf16.msra.mxu0 %v7681_v50  ;;  %5612 = vmatpush1.bf16.msra.mxu1 %v7684_v51  ;;  %v7768_v50 = vld [vmem:[%s11245_s1 + $0x868] ss:$16 sps:$4 sm:$0xff]   ;;  %v7773_v51 = vld [vmem:[%s11245_s1 + $0x884] ss:$16 sps:$4 sm:$0xff]  }
  0xd8   :  { %5080 = vmatprep.subr.bf16.mxu0 %v7689_v53  ;;  %5613 = vmatprep.subr.bf16.mxu1 %v7692_v54  ;;  %v7776_v53 = vld [vmem:[%s11245_s1 + $0x88c] ss:$16 sps:$4 sm:$0xff]   ;;  %v7771_v54 = vld [vmem:[%s11245_s1 + $0x880] ss:$16 sps:$4 sm:$0xff]  }
  0xdb   :  { %5081 = vmatpush1.bf16.msra.mxu0 %v7687_v55  ;;  %5614 = vmatpush1.bf16.msra.mxu1 %v7690_v56  ;;  %v7774_v55 = vld [vmem:[%s11245_s1 + $0x888] ss:$16 sps:$4 sm:$0xff]   ;;  %v7779_v56 = vld [vmem:[%s11245_s1 + $0x8a4] ss:$16 sps:$4 sm:$0xff]  }
  0xdc   :  { %5082 = vmatprep.subr.bf16.mxu0 %v7695_v57  ;;  %5615 = vmatprep.subr.bf16.mxu1 %v7698_v58  ;;  %v7782_v57 = vld [vmem:[%s11245_s1 + $0x8ac] ss:$16 sps:$4 sm:$0xff]   ;;  %v7777_v58 = vld [vmem:[%s11245_s1 + $0x8a0] ss:$16 sps:$4 sm:$0xff]  }
  0xdf   :  { %5083 = vmatpush1.bf16.msra.mxu0 %v7693_v59  ;;  %5616 = vmatpush1.bf16.msra.mxu1 %v7696_v60  ;;  %v7780_v59 = vld [vmem:[%s11245_s1 + $0x8a8] ss:$16 sps:$4 sm:$0xff]   ;;  %v7785_v60 = vld [vmem:[%s11245_s1 + $0x8c4] ss:$16 sps:$4 sm:$0xff]  }
  0xe0   :  { %5084 = vmatprep.subr.bf16.mxu0 %v7701_v61  ;;  %5617 = vmatprep.subr.bf16.mxu1 %v7704_v62  ;;  %v7788_v61 = vld [vmem:[%s11245_s1 + $0x8cc] ss:$16 sps:$4 sm:$0xff]   ;;  %v7783_v62 = vld [vmem:[%s11245_s1 + $0x8c0] ss:$16 sps:$4 sm:$0xff]  }
  0xe3   :  { %5085 = vmatpush1.bf16.msra.mxu0 %v7699_v63  ;;  %5618 = vmatpush1.bf16.msra.mxu1 %v7702_v0  ;;  %v7786_v63 = vld [vmem:[%s11245_s1 + $0x8c8] ss:$16 sps:$4 sm:$0xff]   ;;  %v7791_v0 = vld [vmem:[%s11245_s1 + $0x8e4] ss:$16 sps:$4 sm:$0xff]  }
  0xe4   :  { %5086 = vmatprep.subr.bf16.mxu0 %v7707_v1  ;;  %5619 = vmatprep.subr.bf16.mxu1 %v7710_v2  ;;  %v7794_v1 = vld [vmem:[%s11245_s1 + $0x8ec] ss:$16 sps:$4 sm:$0xff]   ;;  %v7789_v2 = vld [vmem:[%s11245_s1 + $0x8e0] ss:$16 sps:$4 sm:$0xff]  }
  0xe7   :  { %5087 = vmatpush1.bf16.msra.mxu0 %v7705_v3  ;;  %5620 = vmatpush1.bf16.msra.mxu1 %v7708_v4  ;;  %v7792_v3 = vld [vmem:[%s11245_s1 + $0x8e8] ss:$16 sps:$4 sm:$0xff]   ;;  %v7797_v4 = vld [vmem:[%s11245_s1 + $0x904] ss:$16 sps:$4 sm:$0xff]  }
  0xe8   :  { %5088 = vmatprep.subr.bf16.mxu0 %v7713_v5  ;;  %5621 = vmatprep.subr.bf16.mxu1 %v7716_v6  ;;  %v7800_v5 = vld [vmem:[%s11245_s1 + $0x90c] ss:$16 sps:$4 sm:$0xff]   ;;  %v7795_v6 = vld [vmem:[%s11245_s1 + $0x900] ss:$16 sps:$4 sm:$0xff]  }
  0xeb   :  { %5089 = vmatpush1.bf16.msra.mxu0 %v7711_v7  ;;  %5622 = vmatpush1.bf16.msra.mxu1 %v7714_v8  ;;  %v7798_v7 = vld [vmem:[%s11245_s1 + $0x908] ss:$16 sps:$4 sm:$0xff]   ;;  %v7803_v8 = vld [vmem:[%s11245_s1 + $0x924] ss:$16 sps:$4 sm:$0xff]  }
  0xec   :  { %5090 = vmatprep.subr.bf16.mxu0 %v7719_v9  ;;  %5623 = vmatprep.subr.bf16.mxu1 %v7722_v10  ;;  %v7806_v9 = vld [vmem:[%s11245_s1 + $0x92c] ss:$16 sps:$4 sm:$0xff]   ;;  %v7801_v10 = vld [vmem:[%s11245_s1 + $0x920] ss:$16 sps:$4 sm:$0xff]  }
  0xef   :  { %5091 = vmatpush1.bf16.msra.mxu0 %v7717_v11  ;;  %5624 = vmatpush1.bf16.msra.mxu1 %v7720_v12  ;;  %v7804_v11 = vld [vmem:[%s11245_s1 + $0x928] ss:$16 sps:$4 sm:$0xff]   ;;  %v7809_v12 = vld [vmem:[%s11245_s1 + $0x944] ss:$16 sps:$4 sm:$0xff]  }
  0xf0   :  { %5092 = vmatprep.subr.bf16.mxu0 %v7725_v14  ;;  %5625 = vmatprep.subr.bf16.mxu1 %v7728_v52  ;;  %v7812_v14 = vld [vmem:[%s11245_s1 + $0x94c] ss:$16 sps:$4 sm:$0xff]   ;;  %v7807_v52 = vld [vmem:[%s11245_s1 + $0x940] ss:$16 sps:$4 sm:$0xff]  }
  0xf3   :  { %5093 = vmatpush1.bf16.msra.mxu0 %v7723_v16  ;;  %5626 = vmatpush1.bf16.msra.mxu1 %v7726_v17  ;;  %v7810_v16 = vld [vmem:[%s11245_s1 + $0x948] ss:$16 sps:$4 sm:$0xff]   ;;  %v7815_v17 = vld [vmem:[%s11245_s1 + $0x964] ss:$16 sps:$4 sm:$0xff]  }
  0xf4   :  { %5094 = vmatprep.subr.bf16.mxu0 %v7731_v18  ;;  %5627 = vmatprep.subr.bf16.mxu1 %v7734_v19  ;;  %v7818_v18 = vld [vmem:[%s11245_s1 + $0x96c] ss:$16 sps:$4 sm:$0xff]   ;;  %v7813_v19 = vld [vmem:[%s11245_s1 + $0x960] ss:$16 sps:$4 sm:$0xff]  }
  0xf7   :  { %5095 = vmatpush1.bf16.msra.mxu0 %v7729_v20  ;;  %5628 = vmatpush1.bf16.msra.mxu1 %v7732_v21  ;;  %v7816_v20 = vld [vmem:[%s11245_s1 + $0x968] ss:$16 sps:$4 sm:$0xff]   ;;  %v7821_v21 = vld [vmem:[%s11245_s1 + $0x984] ss:$16 sps:$4 sm:$0xff]  }
  0xf8   :  { %5096 = vmatprep.subr.bf16.mxu0 %v7737_v22  ;;  %5629 = vmatprep.subr.bf16.mxu1 %v7740_v23  ;;  %v7824_v22 = vld [vmem:[%s11245_s1 + $0x98c] ss:$16 sps:$4 sm:$0xff]   ;;  %v7819_v23 = vld [vmem:[%s11245_s1 + $0x980] ss:$16 sps:$4 sm:$0xff]  }
  0xfb   :  { %5097 = vmatpush1.bf16.msra.mxu0 %v7735_v25  ;;  %5630 = vmatpush1.bf16.msra.mxu1 %v7738_v13  ;;  %v7822_v25 = vld [vmem:[%s11245_s1 + $0x988] ss:$16 sps:$4 sm:$0xff]   ;;  %v7827_v13 = vld [vmem:[%s11245_s1 + $0x9a4] ss:$16 sps:$4 sm:$0xff]  }
  0xfc   :  { %5098 = vmatprep.subr.bf16.mxu0 %v7743_v27  ;;  %5631 = vmatprep.subr.bf16.mxu1 %v7746_v29  ;;  %v7830_v27 = vld [vmem:[%s11245_s1 + $0x9ac] ss:$16 sps:$4 sm:$0xff]   ;;  %v7825_v29 = vld [vmem:[%s11245_s1 + $0x9a0] ss:$16 sps:$4 sm:$0xff]  }
  0xff   :  { %5099 = vmatpush1.bf16.msra.mxu0 %v7741_v30  ;;  %5632 = vmatpush1.bf16.msra.mxu1 %v7744_v31  ;;  %v7828_v30 = vld [vmem:[%s11245_s1 + $0x9a8] ss:$16 sps:$4 sm:$0xff]   ;;  %v7833_v31 = vld [vmem:[%s11245_s1 + $0x9c4] ss:$16 sps:$4 sm:$0xff]  }
 0x100   :  { %5109 = vmatprep.subr.bf16.mxu0 %v7749_v15  ;;  %5642 = vmatprep.subr.bf16.mxu1 %v7752_v32  ;;  %v7836_v15 = vld [vmem:[%s11245_s1 + $0x9cc] ss:$16 sps:$4 sm:$0xff]   ;;  %v7831_v32 = vld [vmem:[%s11245_s1 + $0x9c0] ss:$16 sps:$4 sm:$0xff]  }
 0x102   :  { %5101 = vmatmul.mubr.bf16.vlgmr.msra.gmra.mrb[0].mxu0 %v882_v26  ;;  %5634 = vmatmul.mubr.bf16.vlgmr.msra.gmra.mrb[0].mxu1 %v882_v26  ;;  %v7839_v26 = vld [vmem:[%s11245_s1 + $0x9e4] ss:$16 sps:$4 sm:$0xff]  }
 0x103   :  { %5110 = vmatpush1.bf16.msra.mxu0 %v7747_v34  ;;  %5643 = vmatpush1.bf16.msra.mxu1 %v7750_v35  ;;  %v7842_v34 = vld [vmem:[%s11245_s1 + $0x9ec] ss:$16 sps:$4 sm:$0xff]   ;;  %v7837_v35 = vld [vmem:[%s11245_s1 + $0x9e0] ss:$16 sps:$4 sm:$0xff]  }
 0x104   :  { %5111 = vmatprep.subr.bf16.mxu0 %v7755_v37  ;;  %5644 = vmatprep.subr.bf16.mxu1 %v7758_v28  ;;  %v7840_v37 = vld [vmem:[%s11245_s1 + $0x9e8] ss:$16 sps:$4 sm:$0xff]   ;;  %v7845_v28 = vld [vmem:[%s11245_s1 + $0xa04] ss:$16 sps:$4 sm:$0xff]  }
 0x105   :  { %5141 = vmatprep.mubr.bf16.mxu0 %v9470_v38  ;;  %5674 = vmatprep.mubr.bf16.mxu1 %v9470_v38 }
 0x107   :  { %5112 = vmatpush1.bf16.msra.mxu0 %v7753_v39  ;;  %5645 = vmatpush1.bf16.msra.mxu1 %v7756_v40  ;;  %v7848_v39 = vld [vmem:[%s11245_s1 + $0xa0c] ss:$16 sps:$4 sm:$0xff]   ;;  %v9656_v40 = vrot.slane %v9427_v24, %v8769_v49 }
 0x108   :  { %5113 = vmatprep.subr.bf16.mxu0 %v7761_v41  ;;  %5646 = vmatprep.subr.bf16.mxu1 %v7764_v43  ;;  %v7843_v41 = vld [vmem:[%s11245_s1 + $0xa00] ss:$16 sps:$4 sm:$0xff]   ;;  %v7846_v43 = vld [vmem:[%s11245_s1 + $0xa08] ss:$16 sps:$4 sm:$0xff]   ;;  %v7854_v24 = vld [vmem:[%s11245_s1 + $0xa2c] ss:$16 sps:$4 sm:$0xff]  }
 0x10b   :  { %5114 = vmatpush1.bf16.msra.mxu0 %v7759_v44  ;;  %5647 = vmatpush1.bf16.msra.mxu1 %v7762_v45  ;;  %v7851_v44 = vld [vmem:[%s11245_s1 + $0xa24] ss:$16 sps:$4 sm:$0xff]   ;;  %v932_v45 = vcombine.high %v9470_v38, %v9470_v38 }
 0x10c   :  { %5115 = vmatprep.subr.bf16.mxu0 %v7767_v46  ;;  %5648 = vmatprep.subr.bf16.mxu1 %v7770_v47  ;;  %v7849_v46 = vld [vmem:[%s11245_s1 + $0xa20] ss:$16 sps:$4 sm:$0xff]   ;;  %v7852_v47 = vld [vmem:[%s11245_s1 + $0xa28] ss:$16 sps:$4 sm:$0xff]   ;;  %v7857_v38 = vld [vmem:[%s11245_s1 + $0xa44] ss:$16 sps:$4 sm:$0xff]  }
 0x10f   :  { %5116 = vmatpush1.bf16.msra.mxu0 %v7765_v48  ;;  %5649 = vmatpush1.bf16.msra.mxu1 %v7768_v50  ;;  %v7860_v48 = vld [vmem:[%s11245_s1 + $0xa4c] ss:$16 sps:$4 sm:$0xff]   ;;  %v7855_v50 = vld [vmem:[%s11245_s1 + $0xa40] ss:$16 sps:$4 sm:$0xff]  }
 0x110   :  { %5117 = vmatprep.subr.bf16.mxu0 %v7773_v51  ;;  %5650 = vmatprep.subr.bf16.mxu1 %v7776_v53  ;;  %v7858_v51 = vld [vmem:[%s11245_s1 + $0xa48] ss:$16 sps:$4 sm:$0xff]   ;;  %v7863_v53 = vld [vmem:[%s11245_s1 + $0xa64] ss:$16 sps:$4 sm:$0xff]  }
 0x113   :  { %5118 = vmatpush1.bf16.msra.mxu0 %v7771_v54  ;;  %5651 = vmatpush1.bf16.msra.mxu1 %v7774_v55  ;;  %v7866_v54 = vld [vmem:[%s11245_s1 + $0xa6c] ss:$16 sps:$4 sm:$0xff]   ;;  %v7861_v55 = vld [vmem:[%s11245_s1 + $0xa60] ss:$16 sps:$4 sm:$0xff]  }
 0x114   :  { %5119 = vmatprep.subr.bf16.mxu0 %v7779_v56  ;;  %5652 = vmatprep.subr.bf16.mxu1 %v7782_v57  ;;  %v7864_v56 = vld [vmem:[%s11245_s1 + $0xa68] ss:$16 sps:$4 sm:$0xff]   ;;  %v7869_v57 = vld [vmem:[%s11245_s1 + $0xa84] ss:$16 sps:$4 sm:$0xff]  }
 0x117   :  { %5120 = vmatpush1.bf16.msra.mxu0 %v7777_v58  ;;  %5653 = vmatpush1.bf16.msra.mxu1 %v7780_v59  ;;  %v7872_v58 = vld [vmem:[%s11245_s1 + $0xa8c] ss:$16 sps:$4 sm:$0xff]   ;;  %v7867_v59 = vld [vmem:[%s11245_s1 + $0xa80] ss:$16 sps:$4 sm:$0xff]  }
 0x118   :  { %5121 = vmatprep.subr.bf16.mxu0 %v7785_v60  ;;  %5654 = vmatprep.subr.bf16.mxu1 %v7788_v61  ;;  %v7870_v60 = vld [vmem:[%s11245_s1 + $0xa88] ss:$16 sps:$4 sm:$0xff]   ;;  %v7875_v61 = vld [vmem:[%s11245_s1 + $0xaa4] ss:$16 sps:$4 sm:$0xff]  }
 0x11b   :  { %5122 = vmatpush1.bf16.msra.mxu0 %v7783_v62  ;;  %5655 = vmatpush1.bf16.msra.mxu1 %v7786_v63  ;;  %v7878_v62 = vld [vmem:[%s11245_s1 + $0xaac] ss:$16 sps:$4 sm:$0xff]   ;;  %v7873_v63 = vld [vmem:[%s11245_s1 + $0xaa0] ss:$16 sps:$4 sm:$0xff]  }
 0x11c   :  { %5123 = vmatprep.subr.bf16.mxu0 %v7791_v0  ;;  %5656 = vmatprep.subr.bf16.mxu1 %v7794_v1  ;;  %v7876_v0 = vld [vmem:[%s11245_s1 + $0xaa8] ss:$16 sps:$4 sm:$0xff]   ;;  %v7881_v1 = vld [vmem:[%s11245_s1 + $0xac4] ss:$16 sps:$4 sm:$0xff]  }
 0x11f   :  { %5124 = vmatpush1.bf16.msra.mxu0 %v7789_v2  ;;  %5657 = vmatpush1.bf16.msra.mxu1 %v7792_v3  ;;  %v7884_v2 = vld [vmem:[%s11245_s1 + $0xacc] ss:$16 sps:$4 sm:$0xff]   ;;  %v7879_v3 = vld [vmem:[%s11245_s1 + $0xac0] ss:$16 sps:$4 sm:$0xff]  }
 0x120   :  { %5125 = vmatprep.subr.bf16.mxu0 %v7797_v4  ;;  %5658 = vmatprep.subr.bf16.mxu1 %v7800_v5  ;;  %v7882_v4 = vld [vmem:[%s11245_s1 + $0xac8] ss:$16 sps:$4 sm:$0xff]   ;;  %v7887_v5 = vld [vmem:[%s11245_s1 + $0xae4] ss:$16 sps:$4 sm:$0xff]  }
 0x123   :  { %5126 = vmatpush1.bf16.msra.mxu0 %v7795_v6  ;;  %5659 = vmatpush1.bf16.msra.mxu1 %v7798_v7  ;;  %v7890_v6 = vld [vmem:[%s11245_s1 + $0xaec] ss:$16 sps:$4 sm:$0xff]   ;;  %v7885_v7 = vld [vmem:[%s11245_s1 + $0xae0] ss:$16 sps:$4 sm:$0xff]  }
 0x124   :  { %5127 = vmatprep.subr.bf16.mxu0 %v7803_v8  ;;  %5660 = vmatprep.subr.bf16.mxu1 %v7806_v9  ;;  %v7888_v8 = vld [vmem:[%s11245_s1 + $0xae8] ss:$16 sps:$4 sm:$0xff]   ;;  %v7893_v9 = vld [vmem:[%s11245_s1 + $0xb04] ss:$16 sps:$4 sm:$0xff]  }
 0x127   :  { %5128 = vmatpush1.bf16.msra.mxu0 %v7801_v10  ;;  %5661 = vmatpush1.bf16.msra.mxu1 %v7804_v11  ;;  %v7896_v10 = vld [vmem:[%s11245_s1 + $0xb0c] ss:$16 sps:$4 sm:$0xff]   ;;  %v7891_v11 = vld [vmem:[%s11245_s1 + $0xb00] ss:$16 sps:$4 sm:$0xff]  }
 0x128   :  { %5129 = vmatprep.subr.bf16.mxu0 %v7809_v12  ;;  %5662 = vmatprep.subr.bf16.mxu1 %v7812_v14  ;;  %v7894_v12 = vld [vmem:[%s11245_s1 + $0xb08] ss:$16 sps:$4 sm:$0xff]   ;;  %v7899_v14 = vld [vmem:[%s11245_s1 + $0xb24] ss:$16 sps:$4 sm:$0xff]  }
 0x12b   :  { %5130 = vmatpush1.bf16.msra.mxu0 %v7807_v52  ;;  %5663 = vmatpush1.bf16.msra.mxu1 %v7810_v16  ;;  %v7902_v52 = vld [vmem:[%s11245_s1 + $0xb2c] ss:$16 sps:$4 sm:$0xff]   ;;  %v7897_v16 = vld [vmem:[%s11245_s1 + $0xb20] ss:$16 sps:$4 sm:$0xff]  }
 0x12c   :  { %5131 = vmatprep.subr.bf16.mxu0 %v7815_v17  ;;  %5664 = vmatprep.subr.bf16.mxu1 %v7818_v18  ;;  %v7900_v17 = vld [vmem:[%s11245_s1 + $0xb28] ss:$16 sps:$4 sm:$0xff]   ;;  %v7905_v18 = vld [vmem:[%s11245_s1 + $0xb44] ss:$16 sps:$4 sm:$0xff]  }
 0x12f   :  { %5132 = vmatpush1.bf16.msra.mxu0 %v7813_v19  ;;  %5665 = vmatpush1.bf16.msra.mxu1 %v7816_v20  ;;  %v7908_v19 = vld [vmem:[%s11245_s1 + $0xb4c] ss:$16 sps:$4 sm:$0xff]   ;;  %v7903_v20 = vld [vmem:[%s11245_s1 + $0xb40] ss:$16 sps:$4 sm:$0xff]  }
 0x130   :  { %5133 = vmatprep.subr.bf16.mxu0 %v7821_v21  ;;  %5666 = vmatprep.subr.bf16.mxu1 %v7824_v22  ;;  %v7906_v21 = vld [vmem:[%s11245_s1 + $0xb48] ss:$16 sps:$4 sm:$0xff]   ;;  %v7911_v22 = vld [vmem:[%s11245_s1 + $0xb64] ss:$16 sps:$4 sm:$0xff]  }
 0x133   :  { %5134 = vmatpush1.bf16.msra.mxu0 %v7819_v23  ;;  %5667 = vmatpush1.bf16.msra.mxu1 %v7822_v25  ;;  %v7914_v23 = vld [vmem:[%s11245_s1 + $0xb6c] ss:$16 sps:$4 sm:$0xff]   ;;  %v7909_v25 = vld [vmem:[%s11245_s1 + $0xb60] ss:$16 sps:$4 sm:$0xff]  }
 0x134   :  { %5135 = vmatprep.subr.bf16.mxu0 %v7827_v13  ;;  %5668 = vmatprep.subr.bf16.mxu1 %v7830_v27  ;;  %v7912_v13 = vld [vmem:[%s11245_s1 + $0xb68] ss:$16 sps:$4 sm:$0xff]   ;;  %v7917_v27 = vld [vmem:[%s11245_s1 + $0xb84] ss:$16 sps:$4 sm:$0xff]  }
 0x137   :  { %5136 = vmatpush1.bf16.msra.mxu0 %v7825_v29  ;;  %5669 = vmatpush1.bf16.msra.mxu1 %v7828_v30  ;;  %v7920_v29 = vld [vmem:[%s11245_s1 + $0xb8c] ss:$16 sps:$4 sm:$0xff]   ;;  %v7915_v30 = vld [vmem:[%s11245_s1 + $0xb80] ss:$16 sps:$4 sm:$0xff]  }
 0x138   :  { %5137 = vmatprep.subr.bf16.mxu0 %v7833_v31  ;;  %5670 = vmatprep.subr.bf16.mxu1 %v7836_v15  ;;  %v7918_v31 = vld [vmem:[%s11245_s1 + $0xb88] ss:$16 sps:$4 sm:$0xff]   ;;  %v7923_v15 = vld [vmem:[%s11245_s1 + $0xba4] ss:$16 sps:$4 sm:$0xff]  }
 0x13b   :  { %5138 = vmatpush1.bf16.msra.mxu0 %v7831_v32  ;;  %5671 = vmatpush1.bf16.msra.mxu1 %v7834_v33  ;;  %v7926_v32 = vld [vmem:[%s11245_s1 + $0xbac] ss:$16 sps:$4 sm:$0xff]   ;;  %v7921_v33 = vld [vmem:[%s11245_s1 + $0xba0] ss:$16 sps:$4 sm:$0xff]  }
 0x13c   :  { %5139 = vmatprep.subr.bf16.mxu0 %v7839_v26  ;;  %5672 = vmatprep.subr.bf16.mxu1 %v7842_v34  ;;  %v7924_v26 = vld [vmem:[%s11245_s1 + $0xba8] ss:$16 sps:$4 sm:$0xff]   ;;  %v7929_v34 = vld [vmem:[%s11245_s1 + $0xbc4] ss:$16 sps:$4 sm:$0xff]  }
 0x13f   :  { %5140 = vmatpush1.bf16.msra.mxu0 %v7837_v35  ;;  %5673 = vmatpush1.bf16.msra.mxu1 %v7840_v37  ;;  %v7932_v35 = vld [vmem:[%s11245_s1 + $0xbcc] ss:$16 sps:$4 sm:$0xff]  }
 0x140   :  { %5150 = vmatprep.subr.bf16.mxu0 %v7845_v28  ;;  %5683 = vmatprep.subr.bf16.mxu1 %v7848_v39  ;;  %v8573_v37 = vld [vmem:[%s11244_s0 + $0x8] sm:$0xff]  ;;  %v7927_v39 = vld [vmem:[%s11245_s1 + $0xbc0] ss:$16 sps:$4 sm:$0xff]  }
 0x141   :  { %v885_v28 = vcombine.high %v8573_v37, %v8573_v37  ;;  %v8016_v37 = vld [vmem:[%s11245_s1 + $0xd8c] ss:$16 sps:$4 sm:$0xff]  }
 0x142   :  { %5142 = vmatmul.mubr.bf16.vlgmr.msra.gmra.mrb[0].mxu0 %v9656_v40  ;;  %5675 = vmatmul.mubr.bf16.vlgmr.msra.gmra.mrb[0].mxu1 %v9656_v40 }
 0x143   :  { %5151 = vmatpush1.bf16.msra.mxu0 %v7843_v41  ;;  %5684 = vmatpush1.bf16.msra.mxu1 %v7846_v43  ;;  %v7930_v41 = vld [vmem:[%s11245_s1 + $0xbc8] ss:$16 sps:$4 sm:$0xff]   ;;  %v7935_v43 = vld [vmem:[%s11245_s1 + $0xbe4] ss:$16 sps:$4 sm:$0xff]  }
 0x144   :  { %5152 = vmatprep.subr.bf16.mxu0 %v7851_v44  ;;  %5685 = vmatprep.subr.bf16.mxu1 %v7854_v24  ;;  %v7938_v44 = vld [vmem:[%s11245_s1 + $0xbec] ss:$16 sps:$4 sm:$0xff]   ;;  %v9846_v24 = vrot.slane %v885_v28, %v8769_v49  ;;  %v8011_v28 = vld [vmem:[%s11245_s1 + $0xd80] ss:$16 sps:$4 sm:$0xff]  }
 0x145   :  { %5182 = vmatprep.mubr.bf16.mxu0 %v932_v45  ;;  %5715 = vmatprep.mubr.bf16.mxu1 %v932_v45  ;;  %v7933_v45 = vld [vmem:[%s11245_s1 + $0xbe0] ss:$16 sps:$4 sm:$0xff]  }
 0x147   :  { %5153 = vmatpush1.bf16.msra.mxu0 %v7849_v46  ;;  %5686 = vmatpush1.bf16.msra.mxu1 %v7852_v47  ;;  %v7936_v46 = vld [vmem:[%s11245_s1 + $0xbe8] ss:$16 sps:$4 sm:$0xff]   ;;  %v7941_v47 = vld [vmem:[%s11245_s1 + $0xc04] ss:$16 sps:$4 sm:$0xff]  }
 0x148   :  { %5154 = vmatprep.subr.bf16.mxu0 %v7857_v38  ;;  %5687 = vmatprep.subr.bf16.mxu1 %v7860_v48  ;;  %v7944_v38 = vld [vmem:[%s11245_s1 + $0xc0c] ss:$16 sps:$4 sm:$0xff]   ;;  %v901_v48 = vcombine.high %v9846_v24, %v9846_v24 }
 0x14b   :  { %5155 = vmatpush1.bf16.msra.mxu0 %v7855_v50  ;;  %5688 = vmatpush1.bf16.msra.mxu1 %v7858_v51  ;;  %v930_v50 = vcombine.high %v9656_v40, %v9656_v40  ;;  %v7939_v51 = vld [vmem:[%s11245_s1 + $0xc00] ss:$16 sps:$4 sm:$0xff]   ;;  %v7950_v40 = vld [vmem:[%s11245_s1 + $0xc2c] ss:$16 sps:$4 sm:$0xff]  }
 0x14c   :  { %5156 = vmatprep.subr.bf16.mxu0 %v7863_v53  ;;  %5689 = vmatprep.subr.bf16.mxu1 %v7866_v54  ;;  %v7942_v53 = vld [vmem:[%s11245_s1 + $0xc08] ss:$16 sps:$4 sm:$0xff]   ;;  %v7947_v54 = vld [vmem:[%s11245_s1 + $0xc24] ss:$16 sps:$4 sm:$0xff]  }
 0x14f   :  { %5157 = vmatpush1.bf16.msra.mxu0 %v7861_v55  ;;  %5690 = vmatpush1.bf16.msra.mxu1 %v7864_v56  ;;  %v9877_v55 = vrot.slane %v901_v48, %v8769_v49  ;;  %v7945_v56 = vld [vmem:[%s11245_s1 + $0xc20] ss:$16 sps:$4 sm:$0xff]   ;;  %v8026_v48 = vld [vmem:[%s11245_s1 + $0xdc8] ss:$16 sps:$4 sm:$0xff]  }
 0x150   :  { %5158 = vmatprep.subr.bf16.mxu0 %v7869_v57  ;;  %5691 = vmatprep.subr.bf16.mxu1 %v7872_v58  ;;  %v7948_v57 = vld [vmem:[%s11245_s1 + $0xc28] ss:$16 sps:$4 sm:$0xff]   ;;  %v7953_v58 = vld [vmem:[%s11245_s1 + $0xc44] ss:$16 sps:$4 sm:$0xff]  }
 0x153   :  { %5159 = vmatpush1.bf16.msra.mxu0 %v7867_v59  ;;  %5692 = vmatpush1.bf16.msra.mxu1 %v7870_v60  ;;  %v7956_v59 = vld [vmem:[%s11245_s1 + $0xc4c] ss:$16 sps:$4 sm:$0xff]   ;;  %v7951_v60 = vld [vmem:[%s11245_s1 + $0xc40] ss:$16 sps:$4 sm:$0xff]  }
 0x154   :  { %5160 = vmatprep.subr.bf16.mxu0 %v7875_v61  ;;  %5693 = vmatprep.subr.bf16.mxu1 %v7878_v62  ;;  %v7954_v61 = vld [vmem:[%s11245_s1 + $0xc48] ss:$16 sps:$4 sm:$0xff]   ;;  %v7959_v62 = vld [vmem:[%s11245_s1 + $0xc64] ss:$16 sps:$4 sm:$0xff]  }
 0x157   :  { %5161 = vmatpush1.bf16.msra.mxu0 %v7873_v63  ;;  %5694 = vmatpush1.bf16.msra.mxu1 %v7876_v0  ;;  %v7962_v63 = vld [vmem:[%s11245_s1 + $0xc6c] ss:$16 sps:$4 sm:$0xff]   ;;  %v7957_v0 = vld [vmem:[%s11245_s1 + $0xc60] ss:$16 sps:$4 sm:$0xff]  }
 0x158   :  { %5162 = vmatprep.subr.bf16.mxu0 %v7881_v1  ;;  %5695 = vmatprep.subr.bf16.mxu1 %v7884_v2  ;;  %v7960_v1 = vld [vmem:[%s11245_s1 + $0xc68] ss:$16 sps:$4 sm:$0xff]   ;;  %v7965_v2 = vld [vmem:[%s11245_s1 + $0xc84] ss:$16 sps:$4 sm:$0xff]  }
 0x15b   :  { %5163 = vmatpush1.bf16.msra.mxu0 %v7879_v3  ;;  %5696 = vmatpush1.bf16.msra.mxu1 %v7882_v4  ;;  %v7968_v3 = vld [vmem:[%s11245_s1 + $0xc8c] ss:$16 sps:$4 sm:$0xff]   ;;  %v7963_v4 = vld [vmem:[%s11245_s1 + $0xc80] ss:$16 sps:$4 sm:$0xff]  }
 0x15c   :  { %5164 = vmatprep.subr.bf16.mxu0 %v7887_v5  ;;  %5697 = vmatprep.subr.bf16.mxu1 %v7890_v6  ;;  %v7966_v5 = vld [vmem:[%s11245_s1 + $0xc88] ss:$16 sps:$4 sm:$0xff]   ;;  %v7971_v6 = vld [vmem:[%s11245_s1 + $0xca4] ss:$16 sps:$4 sm:$0xff]  }
 0x15f   :  { %5165 = vmatpush1.bf16.msra.mxu0 %v7885_v7  ;;  %5698 = vmatpush1.bf16.msra.mxu1 %v7888_v8  ;;  %v7974_v7 = vld [vmem:[%s11245_s1 + $0xcac] ss:$16 sps:$4 sm:$0xff]   ;;  %v7969_v8 = vld [vmem:[%s11245_s1 + $0xca0] ss:$16 sps:$4 sm:$0xff]  }
 0x160   :  { %5166 = vmatprep.subr.bf16.mxu0 %v7893_v9  ;;  %5699 = vmatprep.subr.bf16.mxu1 %v7896_v10  ;;  %v7972_v9 = vld [vmem:[%s11245_s1 + $0xca8] ss:$16 sps:$4 sm:$0xff]   ;;  %v7977_v10 = vld [vmem:[%s11245_s1 + $0xcc4] ss:$16 sps:$4 sm:$0xff]  }
 0x163   :  { %5167 = vmatpush1.bf16.msra.mxu0 %v7891_v11  ;;  %5700 = vmatpush1.bf16.msra.mxu1 %v7894_v12  ;;  %v7980_v11 = vld [vmem:[%s11245_s1 + $0xccc] ss:$16 sps:$4 sm:$0xff]   ;;  %v7975_v12 = vld [vmem:[%s11245_s1 + $0xcc0] ss:$16 sps:$4 sm:$0xff]  }
 0x164   :  { %5168 = vmatprep.subr.bf16.mxu0 %v7899_v14  ;;  %5701 = vmatprep.subr.bf16.mxu1 %v7902_v52  ;;  %v7978_v14 = vld [vmem:[%s11245_s1 + $0xcc8] ss:$16 sps:$4 sm:$0xff]   ;;  %v7983_v52 = vld [vmem:[%s11245_s1 + $0xce4] ss:$16 sps:$4 sm:$0xff]  }
 0x167   :  { %5169 = vmatpush1.bf16.msra.mxu0 %v7897_v16  ;;  %5702 = vmatpush1.bf16.msra.mxu1 %v7900_v17  ;;  %v7986_v16 = vld [vmem:[%s11245_s1 + $0xcec] ss:$16 sps:$4 sm:$0xff]   ;;  %v7981_v17 = vld [vmem:[%s11245_s1 + $0xce0] ss:$16 sps:$4 sm:$0xff]  }
 0x168   :  { %5170 = vmatprep.subr.bf16.mxu0 %v7905_v18  ;;  %5703 = vmatprep.subr.bf16.mxu1 %v7908_v19  ;;  %v7984_v18 = vld [vmem:[%s11245_s1 + $0xce8] ss:$16 sps:$4 sm:$0xff]   ;;  %v7989_v19 = vld [vmem:[%s11245_s1 + $0xd04] ss:$16 sps:$4 sm:$0xff]  }
 0x16b   :  { %5171 = vmatpush1.bf16.msra.mxu0 %v7903_v20  ;;  %5704 = vmatpush1.bf16.msra.mxu1 %v7906_v21  ;;  %v7992_v20 = vld [vmem:[%s11245_s1 + $0xd0c] ss:$16 sps:$4 sm:$0xff]   ;;  %v7987_v21 = vld [vmem:[%s11245_s1 + $0xd00] ss:$16 sps:$4 sm:$0xff]  }
 0x16c   :  { %5172 = vmatprep.subr.bf16.mxu0 %v7911_v22  ;;  %5705 = vmatprep.subr.bf16.mxu1 %v7914_v23  ;;  %v7990_v22 = vld [vmem:[%s11245_s1 + $0xd08] ss:$16 sps:$4 sm:$0xff]   ;;  %v7995_v23 = vld [vmem:[%s11245_s1 + $0xd24] ss:$16 sps:$4 sm:$0xff]  }
 0x16f   :  { %5173 = vmatpush1.bf16.msra.mxu0 %v7909_v25  ;;  %5706 = vmatpush1.bf16.msra.mxu1 %v7912_v13  ;;  %v7998_v25 = vld [vmem:[%s11245_s1 + $0xd2c] ss:$16 sps:$4 sm:$0xff]   ;;  %v7993_v13 = vld [vmem:[%s11245_s1 + $0xd20] ss:$16 sps:$4 sm:$0xff]  }
 0x170   :  { %5174 = vmatprep.subr.bf16.mxu0 %v7917_v27  ;;  %5707 = vmatprep.subr.bf16.mxu1 %v7920_v29  ;;  %v7996_v27 = vld [vmem:[%s11245_s1 + $0xd28] ss:$16 sps:$4 sm:$0xff]   ;;  %v8001_v29 = vld [vmem:[%s11245_s1 + $0xd44] ss:$16 sps:$4 sm:$0xff]  }
 0x173   :  { %5175 = vmatpush1.bf16.msra.mxu0 %v7915_v30  ;;  %5708 = vmatpush1.bf16.msra.mxu1 %v7918_v31  ;;  %v8004_v30 = vld [vmem:[%s11245_s1 + $0xd4c] ss:$16 sps:$4 sm:$0xff]   ;;  %v7999_v31 = vld [vmem:[%s11245_s1 + $0xd40] ss:$16 sps:$4 sm:$0xff]  }
 0x174   :  { %5176 = vmatprep.subr.bf16.mxu0 %v7923_v15  ;;  %5709 = vmatprep.subr.bf16.mxu1 %v7926_v32  ;;  %v8002_v15 = vld [vmem:[%s11245_s1 + $0xd48] ss:$16 sps:$4 sm:$0xff]   ;;  %v8007_v32 = vld [vmem:[%s11245_s1 + $0xd64] ss:$16 sps:$4 sm:$0xff]  }
 0x177   :  { %5177 = vmatpush1.bf16.msra.mxu0 %v7921_v33  ;;  %5710 = vmatpush1.bf16.msra.mxu1 %v7924_v26  ;;  %v8010_v33 = vld [vmem:[%s11245_s1 + $0xd6c] ss:$16 sps:$4 sm:$0xff]   ;;  %v8005_v26 = vld [vmem:[%s11245_s1 + $0xd60] ss:$16 sps:$4 sm:$0xff]  }
 0x178   :  { %5178 = vmatprep.subr.bf16.mxu0 %v7929_v34  ;;  %5711 = vmatprep.subr.bf16.mxu1 %v7932_v35  ;;  %v8008_v34 = vld [vmem:[%s11245_s1 + $0xd68] ss:$16 sps:$4 sm:$0xff]   ;;  %v8013_v35 = vld [vmem:[%s11245_s1 + $0xd84] ss:$16 sps:$4 sm:$0xff]  }
 0x17b   :  { %5179 = vmatpush1.bf16.msra.mxu0 %v7927_v39  ;;  %5712 = vmatpush1.bf16.msra.mxu1 %v7930_v41  ;;  %v8014_v39 = vld [vmem:[%s11245_s1 + $0xd88] ss:$16 sps:$4 sm:$0xff]   ;;  %v8019_v41 = vld [vmem:[%s11245_s1 + $0xda4] ss:$16 sps:$4 sm:$0xff]  }
 0x17c   :  { %5180 = vmatprep.subr.bf16.mxu0 %v7935_v43  ;;  %5713 = vmatprep.subr.bf16.mxu1 %v7938_v44  ;;  %v8022_v43 = vld [vmem:[%s11245_s1 + $0xdac] ss:$16 sps:$4 sm:$0xff]   ;;  %v8017_v44 = vld [vmem:[%s11245_s1 + $0xda0] ss:$16 sps:$4 sm:$0xff]  }
 0x17f   :  { %5181 = vmatpush1.bf16.msra.mxu0 %v7933_v45  ;;  %5714 = vmatpush1.bf16.msra.mxu1 %v7936_v46  ;;  %v8020_v45 = vld [vmem:[%s11245_s1 + $0xda8] ss:$16 sps:$4 sm:$0xff]   ;;  %v8025_v46 = vld [vmem:[%s11245_s1 + $0xdc4] ss:$16 sps:$4 sm:$0xff]  }
 0x180   :  { %5191 = vmatprep.subr.bf16.mxu0 %v7941_v47  ;;  %5724 = vmatprep.subr.bf16.mxu1 %v7944_v38  ;;  %v8028_v47 = vld [vmem:[%s11245_s1 + $0xdcc] ss:$16 sps:$4 sm:$0xff]   ;;  %v8023_v38 = vld [vmem:[%s11245_s1 + $0xdc0] ss:$16 sps:$4 sm:$0xff]  }
 0x182   :  { %5183 = vmatmul.mubr.bf16.vlgmr.msra.gmra.mrb[0].mxu0 %v930_v50  ;;  %5716 = vmatmul.mubr.bf16.vlgmr.msra.gmra.mrb[0].mxu1 %v930_v50  ;;  %v8031_v50 = vld [vmem:[%s11245_s1 + $0xde4] ss:$16 sps:$4 sm:$0xff]  }
 0x183   :  { %5192 = vmatpush1.bf16.msra.mxu0 %v7939_v51  ;;  %5725 = vmatpush1.bf16.msra.mxu1 %v7942_v53  ;;  %v8034_v51 = vld [vmem:[%s11245_s1 + $0xdec] ss:$16 sps:$4 sm:$0xff]   ;;  %v8029_v53 = vld [vmem:[%s11245_s1 + $0xde0] ss:$16 sps:$4 sm:$0xff]  }
 0x184   :  { %5193 = vmatprep.subr.bf16.mxu0 %v7947_v54  ;;  %5726 = vmatprep.subr.bf16.mxu1 %v7950_v40  ;;  %v8032_v54 = vld [vmem:[%s11245_s1 + $0xde8] ss:$16 sps:$4 sm:$0xff]   ;;  %v8038_v40 = vld [vmem:[%s11245_s1 + $0xe04] ss:$16 sps:$4 sm:$0xff]  }
 0x185   :  { %5223 = vmatprep.mubr.bf16.mxu0 %v9877_v55  ;;  %5756 = vmatprep.mubr.bf16.mxu1 %v9877_v55 }
 0x187   :  { %5194 = vmatpush1.bf16.msra.mxu0 %v7945_v56  ;;  %5727 = vmatpush1.bf16.msra.mxu1 %v7948_v57  ;;  %v8041_v56 = vld [vmem:[%s11245_s1 + $0xe0c] ss:$16 sps:$4 sm:$0xff]   ;;  %v10063_v57 = vrot.slane %v9846_v24, %v8769_v49 }
 0x188   :  { %5195 = vmatprep.subr.bf16.mxu0 %v7953_v58  ;;  %5728 = vmatprep.subr.bf16.mxu1 %v7956_v59  ;;  %v8036_v58 = vld [vmem:[%s11245_s1 + $0xe00] ss:$16 sps:$4 sm:$0xff]   ;;  %v8039_v59 = vld [vmem:[%s11245_s1 + $0xe08] ss:$16 sps:$4 sm:$0xff]   ;;  %v8047_v24 = vld [vmem:[%s11245_s1 + $0xe2c] ss:$16 sps:$4 sm:$0xff]  }
 0x18b   :  { %5196 = vmatpush1.bf16.msra.mxu0 %v7951_v60  ;;  %5729 = vmatpush1.bf16.msra.mxu1 %v7954_v61  ;;  %v8044_v60 = vld [vmem:[%s11245_s1 + $0xe24] ss:$16 sps:$4 sm:$0xff]   ;;  %v933_v61 = vcombine.high %v9877_v55, %v9877_v55 }
 0x18c   :  { %5197 = vmatprep.subr.bf16.mxu0 %v7959_v62  ;;  %5730 = vmatprep.subr.bf16.mxu1 %v7962_v63  ;;  %v8042_v62 = vld [vmem:[%s11245_s1 + $0xe20] ss:$16 sps:$4 sm:$0xff]   ;;  %v8045_v63 = vld [vmem:[%s11245_s1 + $0xe28] ss:$16 sps:$4 sm:$0xff]   ;;  %v8050_v55 = vld [vmem:[%s11245_s1 + $0xe44] ss:$16 sps:$4 sm:$0xff]  }
 0x18f   :  { %5198 = vmatpush1.bf16.msra.mxu0 %v7957_v0  ;;  %5731 = vmatpush1.bf16.msra.mxu1 %v7960_v1  ;;  %v8053_v0 = vld [vmem:[%s11245_s1 + $0xe4c] ss:$16 sps:$4 sm:$0xff]   ;;  %v8048_v1 = vld [vmem:[%s11245_s1 + $0xe40] ss:$16 sps:$4 sm:$0xff]  }
 0x190   :  { %5199 = vmatprep.subr.bf16.mxu0 %v7965_v2  ;;  %5732 = vmatprep.subr.bf16.mxu1 %v7968_v3  ;;  %v8051_v2 = vld [vmem:[%s11245_s1 + $0xe48] ss:$16 sps:$4 sm:$0xff]   ;;  %v8056_v3 = vld [vmem:[%s11245_s1 + $0xe64] ss:$16 sps:$4 sm:$0xff]  }
 0x193   :  { %5200 = vmatpush1.bf16.msra.mxu0 %v7963_v4  ;;  %5733 = vmatpush1.bf16.msra.mxu1 %v7966_v5  ;;  %v8059_v4 = vld [vmem:[%s11245_s1 + $0xe6c] ss:$16 sps:$4 sm:$0xff]   ;;  %v8054_v5 = vld [vmem:[%s11245_s1 + $0xe60] ss:$16 sps:$4 sm:$0xff]  }
 0x194   :  { %5201 = vmatprep.subr.bf16.mxu0 %v7971_v6  ;;  %5734 = vmatprep.subr.bf16.mxu1 %v7974_v7  ;;  %v8057_v6 = vld [vmem:[%s11245_s1 + $0xe68] ss:$16 sps:$4 sm:$0xff]   ;;  %v8062_v7 = vld [vmem:[%s11245_s1 + $0xe84] ss:$16 sps:$4 sm:$0xff]  }
 0x197   :  { %5202 = vmatpush1.bf16.msra.mxu0 %v7969_v8  ;;  %5735 = vmatpush1.bf16.msra.mxu1 %v7972_v9  ;;  %v8065_v8 = vld [vmem:[%s11245_s1 + $0xe8c] ss:$16 sps:$4 sm:$0xff]   ;;  %v8060_v9 = vld [vmem:[%s11245_s1 + $0xe80] ss:$16 sps:$4 sm:$0xff]  }
 0x198   :  { %5203 = vmatprep.subr.bf16.mxu0 %v7977_v10  ;;  %5736 = vmatprep.subr.bf16.mxu1 %v7980_v11  ;;  %v8063_v10 = vld [vmem:[%s11245_s1 + $0xe88] ss:$16 sps:$4 sm:$0xff]   ;;  %v8068_v11 = vld [vmem:[%s11245_s1 + $0xea4] ss:$16 sps:$4 sm:$0xff]  }
 0x19b   :  { %5204 = vmatpush1.bf16.msra.mxu0 %v7975_v12  ;;  %5737 = vmatpush1.bf16.msra.mxu1 %v7978_v14  ;;  %v8071_v12 = vld [vmem:[%s11245_s1 + $0xeac] ss:$16 sps:$4 sm:$0xff]   ;;  %v8066_v14 = vld [vmem:[%s11245_s1 + $0xea0] ss:$16 sps:$4 sm:$0xff]  }
 0x19c   :  { %5205 = vmatprep.subr.bf16.mxu0 %v7983_v52  ;;  %5738 = vmatprep.subr.bf16.mxu1 %v7986_v16  ;;  %v8069_v52 = vld [vmem:[%s11245_s1 + $0xea8] ss:$16 sps:$4 sm:$0xff]   ;;  %v8074_v16 = vld [vmem:[%s11245_s1 + $0xec4] ss:$16 sps:$4 sm:$0xff]  }
 0x19f   :  { %5206 = vmatpush1.bf16.msra.mxu0 %v7981_v17  ;;  %5739 = vmatpush1.bf16.msra.mxu1 %v7984_v18  ;;  %v8077_v17 = vld [vmem:[%s11245_s1 + $0xecc] ss:$16 sps:$4 sm:$0xff]   ;;  %v8072_v18 = vld [vmem:[%s11245_s1 + $0xec0] ss:$16 sps:$4 sm:$0xff]  }
 0x1a0   :  { %5207 = vmatprep.subr.bf16.mxu0 %v7989_v19  ;;  %5740 = vmatprep.subr.bf16.mxu1 %v7992_v20  ;;  %v8075_v19 = vld [vmem:[%s11245_s1 + $0xec8] ss:$16 sps:$4 sm:$0xff]   ;;  %v8080_v20 = vld [vmem:[%s11245_s1 + $0xee4] ss:$16 sps:$4 sm:$0xff]  }
 0x1a3   :  { %5208 = vmatpush1.bf16.msra.mxu0 %v7987_v21  ;;  %5741 = vmatpush1.bf16.msra.mxu1 %v7990_v22  ;;  %v8083_v21 = vld [vmem:[%s11245_s1 + $0xeec] ss:$16 sps:$4 sm:$0xff]   ;;  %v8078_v22 = vld [vmem:[%s11245_s1 + $0xee0] ss:$16 sps:$4 sm:$0xff]  }
 0x1a4   :  { %5209 = vmatprep.subr.bf16.mxu0 %v7995_v23  ;;  %5742 = vmatprep.subr.bf16.mxu1 %v7998_v25  ;;  %v8081_v23 = vld [vmem:[%s11245_s1 + $0xee8] ss:$16 sps:$4 sm:$0xff]   ;;  %v8086_v25 = vld [vmem:[%s11245_s1 + $0xf04] ss:$16 sps:$4 sm:$0xff]  }
 0x1a7   :  { %5210 = vmatpush1.bf16.msra.mxu0 %v7993_v13  ;;  %5743 = vmatpush1.bf16.msra.mxu1 %v7996_v27  ;;  %v8089_v13 = vld [vmem:[%s11245_s1 + $0xf0c] ss:$16 sps:$4 sm:$0xff]   ;;  %v8084_v27 = vld [vmem:[%s11245_s1 + $0xf00] ss:$16 sps:$4 sm:$0xff]  }
 0x1a8   :  { %5211 = vmatprep.subr.bf16.mxu0 %v8001_v29  ;;  %5744 = vmatprep.subr.bf16.mxu1 %v8004_v30  ;;  %v8087_v29 = vld [vmem:[%s11245_s1 + $0xf08] ss:$16 sps:$4 sm:$0xff]   ;;  %v8092_v30 = vld [vmem:[%s11245_s1 + $0xf24] ss:$16 sps:$4 sm:$0xff]  }
 0x1ab   :  { %5212 = vmatpush1.bf16.msra.mxu0 %v7999_v31  ;;  %5745 = vmatpush1.bf16.msra.mxu1 %v8002_v15  ;;  %v8095_v31 = vld [vmem:[%s11245_s1 + $0xf2c] ss:$16 sps:$4 sm:$0xff]   ;;  %v8090_v15 = vld [vmem:[%s11245_s1 + $0xf20] ss:$16 sps:$4 sm:$0xff]  }
 0x1ac   :  { %5213 = vmatprep.subr.bf16.mxu0 %v8007_v32  ;;  %5746 = vmatprep.subr.bf16.mxu1 %v8010_v33  ;;  %v8093_v32 = vld [vmem:[%s11245_s1 + $0xf28] ss:$16 sps:$4 sm:$0xff]   ;;  %v8098_v33 = vld [vmem:[%s11245_s1 + $0xf44] ss:$16 sps:$4 sm:$0xff]  }
 0x1af   :  { %5214 = vmatpush1.bf16.msra.mxu0 %v8005_v26  ;;  %5747 = vmatpush1.bf16.msra.mxu1 %v8008_v34  ;;  %v8101_v26 = vld [vmem:[%s11245_s1 + $0xf4c] ss:$16 sps:$4 sm:$0xff]   ;;  %v8096_v34 = vld [vmem:[%s11245_s1 + $0xf40] ss:$16 sps:$4 sm:$0xff]  }
 0x1b0   :  { %5215 = vmatprep.subr.bf16.mxu0 %v8013_v35  ;;  %5748 = vmatprep.subr.bf16.mxu1 %v8016_v37  ;;  %v8099_v35 = vld [vmem:[%s11245_s1 + $0xf48] ss:$16 sps:$4 sm:$0xff]   ;;  %v8104_v37 = vld [vmem:[%s11245_s1 + $0xf64] ss:$16 sps:$4 sm:$0xff]  }
 0x1b3   :  { %5216 = vmatpush1.bf16.msra.mxu0 %v8011_v28  ;;  %5749 = vmatpush1.bf16.msra.mxu1 %v8014_v39  ;;  %v8107_v28 = vld [vmem:[%s11245_s1 + $0xf6c] ss:$16 sps:$4 sm:$0xff]  }
 0x1b4   :  { %5217 = vmatprep.subr.bf16.mxu0 %v8019_v41  ;;  %5750 = vmatprep.subr.bf16.mxu1 %v8022_v43 }
 0x1b7   :  { %5218 = vmatpush1.bf16.msra.mxu0 %v8017_v44  ;;  %5751 = vmatpush1.bf16.msra.mxu1 %v8020_v45 }
 0x1b8   :  { %5219 = vmatprep.subr.bf16.mxu0 %v8025_v46  ;;  %5752 = vmatprep.subr.bf16.mxu1 %v8028_v47 }
 0x1bb   :  { %5220 = vmatpush1.bf16.msra.mxu0 %v8023_v38  ;;  %5753 = vmatpush1.bf16.msra.mxu1 %v8026_v48 }
 0x1bc   :  { %5221 = vmatprep.subr.bf16.mxu0 %v8031_v50  ;;  %5754 = vmatprep.subr.bf16.mxu1 %v8034_v51 }
 0x1bf   :  { %5222 = vmatpush1.bf16.msra.mxu0 %v8029_v53  ;;  %5755 = vmatpush1.bf16.msra.mxu1 %v8032_v54 }
 0x1c0   :  { %5232 = vmatprep.subr.bf16.mxu0 %v8038_v40  ;;  %5765 = vmatprep.subr.bf16.mxu1 %v8041_v56 }
 0x1c2   :  { %5224 = vmatmul.mubr.bf16.vlgmr.msra.gmra.mrb[0].mxu0 %v10063_v57  ;;  %5757 = vmatmul.mubr.bf16.vlgmr.msra.gmra.mrb[0].mxu1 %v10063_v57 }
 0x1c3   :  { %5233 = vmatpush1.bf16.msra.mxu0 %v8036_v58  ;;  %5766 = vmatpush1.bf16.msra.mxu1 %v8039_v59 }
 0x1c4   :  { %5234 = vmatprep.subr.bf16.mxu0 %v8044_v60  ;;  %5767 = vmatprep.subr.bf16.mxu1 %v8047_v24 }
 0x1c5   :  { %5264 = vmatprep.mubr.bf16.mxu0 %v933_v61  ;;  %5797 = vmatprep.mubr.bf16.mxu1 %v933_v61 }
 0x1c7   :  { %5235 = vmatpush1.bf16.msra.mxu0 %v8042_v62  ;;  %5768 = vmatpush1.bf16.msra.mxu1 %v8045_v63 }
 0x1c8   :  { %5236 = vmatprep.subr.bf16.mxu0 %v8050_v55  ;;  %5769 = vmatprep.subr.bf16.mxu1 %v8053_v0 }
 0x1cb   :  { %5237 = vmatpush1.bf16.msra.mxu0 %v8048_v1  ;;  %5770 = vmatpush1.bf16.msra.mxu1 %v8051_v2 }
 0x1cc   :  { %5238 = vmatprep.subr.bf16.mxu0 %v8056_v3  ;;  %5771 = vmatprep.subr.bf16.mxu1 %v8059_v4 }
 0x1cf   :  { %5239 = vmatpush1.bf16.msra.mxu0 %v8054_v5  ;;  %5772 = vmatpush1.bf16.msra.mxu1 %v8057_v6 }
 0x1d0   :  { %5240 = vmatprep.subr.bf16.mxu0 %v8062_v7  ;;  %5773 = vmatprep.subr.bf16.mxu1 %v8065_v8 }
 0x1d3   :  { %5241 = vmatpush1.bf16.msra.mxu0 %v8060_v9  ;;  %5774 = vmatpush1.bf16.msra.mxu1 %v8063_v10 }
 0x1d4   :  { %5242 = vmatprep.subr.bf16.mxu0 %v8068_v11  ;;  %5775 = vmatprep.subr.bf16.mxu1 %v8071_v12 }
 0x1d7   :  { %5243 = vmatpush1.bf16.msra.mxu0 %v8066_v14  ;;  %5776 = vmatpush1.bf16.msra.mxu1 %v8069_v52 }
 0x1d8   :  { %5244 = vmatprep.subr.bf16.mxu0 %v8074_v16  ;;  %5777 = vmatprep.subr.bf16.mxu1 %v8077_v17 }
 0x1db   :  { %5245 = vmatpush1.bf16.msra.mxu0 %v8072_v18  ;;  %5778 = vmatpush1.bf16.msra.mxu1 %v8075_v19 }
 0x1dc   :  { %5246 = vmatprep.subr.bf16.mxu0 %v8080_v20  ;;  %5779 = vmatprep.subr.bf16.mxu1 %v8083_v21 }
 0x1df   :  { %5247 = vmatpush1.bf16.msra.mxu0 %v8078_v22  ;;  %5780 = vmatpush1.bf16.msra.mxu1 %v8081_v23 }
 0x1e0   :  { %5248 = vmatprep.subr.bf16.mxu0 %v8086_v25  ;;  %5781 = vmatprep.subr.bf16.mxu1 %v8089_v13 }
 0x1e3   :  { %5249 = vmatpush1.bf16.msra.mxu0 %v8084_v27  ;;  %5782 = vmatpush1.bf16.msra.mxu1 %v8087_v29 }
 0x1e4   :  { %5250 = vmatprep.subr.bf16.mxu0 %v8092_v30  ;;  %5783 = vmatprep.subr.bf16.mxu1 %v8095_v31 }
 0x1e7   :  { %5251 = vmatpush1.bf16.msra.mxu0 %v8090_v15  ;;  %5784 = vmatpush1.bf16.msra.mxu1 %v8093_v32 }
 0x1e8   :  { %5252 = vmatprep.subr.bf16.mxu0 %v8098_v33  ;;  %5785 = vmatprep.subr.bf16.mxu1 %v8101_v26 }
 0x1e9   :  { %10 = vsyncpa [#allocation3], 0  ;;  %v8102_v39 = vld [vmem:[%s11245_s1 + $0xf60] ss:$16 sps:$4 sm:$0xff]   ;;  %v8105_v41 = vld [vmem:[%s11245_s1 + $0xf68] ss:$16 sps:$4 sm:$0xff]   ;;  %v931_v0 = vcombine.high %v10063_v57, %v10063_v57 }
 0x1ea   :  { %v8110_v43 = vld [vmem:[%s11245_s1 + $0xf84] ss:$16 sps:$4 sm:$0xff]   ;;  %v8113_v44 = vld [vmem:[%s11245_s1 + $0xf8c] ss:$16 sps:$4 sm:$0xff]   ;;  %v8108_v45 = vld [vmem:[%s11245_s1 + $0xf80] ss:$16 sps:$4 sm:$0xff]  }
 0x1eb   :  { %5253 = vmatpush1.bf16.msra.mxu0 %v8096_v34  ;;  %5786 = vmatpush1.bf16.msra.mxu1 %v8099_v35  ;;  %v8111_v46 = vld [vmem:[%s11245_s1 + $0xf88] ss:$16 sps:$4 sm:$0xff]   ;;  %v8116_v47 = vld [vmem:[%s11245_s1 + $0xfa4] ss:$16 sps:$4 sm:$0xff]   ;;  %v8119_v38 = vld [vmem:[%s11245_s1 + $0xfac] ss:$16 sps:$4 sm:$0xff]  }
 0x1ec   :  { %5254 = vmatprep.subr.bf16.mxu0 %v8104_v37  ;;  %5787 = vmatprep.subr.bf16.mxu1 %v8107_v28  ;;  %v8114_v48 = vld [vmem:[%s11245_s1 + $0xfa0] ss:$16 sps:$4 sm:$0xff]   ;;  %v8117_v50 = vld [vmem:[%s11245_s1 + $0xfa8] ss:$16 sps:$4 sm:$0xff]   ;;  %v8122_v51 = vld [vmem:[%s11245_s1 + $0xfc4] ss:$16 sps:$4 sm:$0xff]  }
 0x1ed   :  { %v8125_v53 = vld [vmem:[%s11245_s1 + $0xfcc] ss:$16 sps:$4 sm:$0xff]   ;;  %v10240_v54 = vld [vmem:[%s11244_s0 + $0x10] sm:$0xff]  ;;  %v8123_v56 = vld [vmem:[%s11245_s1 + $0xfc8] ss:$16 sps:$4 sm:$0xff]   ;;  %vm4941_vm0 = vcmask 523264  }
 0x1ee   :  { %v8120_v40 = vld [vmem:[%s11245_s1 + $0xfc0] ss:$16 sps:$4 sm:$0xff]   ;;  %v8128_v58 = vld [vmem:[%s11245_s1 + $0xfe4] ss:$16 sps:$4 sm:$0xff]   ;;  %v8131_v59 = vld [vmem:[%s11245_s1 + $0xfec] ss:$16 sps:$4 sm:$0xff]   ;;  %v10256_v60 = vrot.slane %v10240_v54, %v8769_v49 }
 0x1ef   :  { %5255 = vmatpush1.bf16.msra.mxu0 %v8102_v39  ;;  %5788 = vmatpush1.bf16.msra.mxu1 %v8105_v41  ;;  %v8126_v24 = vld [vmem:[%s11245_s1 + $0xfe0] ss:$16 sps:$4 sm:$0xff]   ;;  %v8129_v61 = vld [vmem:[%s11245_s1 + $0xfe8] ss:$16 sps:$4 sm:$0xff]   ;;  %v8134_v62 = vld [vmem:[%s11245_s1 + $0x1004] ss:$16 sps:$4 sm:$0xff]  }
 0x1f0   :  { %5256 = vmatprep.subr.bf16.mxu0 %v8110_v43  ;;  %5789 = vmatprep.subr.bf16.mxu1 %v8113_v44  ;;  %v8137_v63 = vld [vmem:[%s11245_s1 + $0x100c] ss:$16 sps:$4 sm:$0xff]   ;;  %v949_v55 = vcombine.high %v10256_v60, %v10256_v60  ;;  %v8132_v1 = vld [vmem:[%s11245_s1 + $0x1000] ss:$16 sps:$4 sm:$0xff]   ;;  %v8135_v2 = vld [vmem:[%s11245_s1 + $0x1008] ss:$16 sps:$4 sm:$0xff]  }
 0x1f1   :  { %v8140_v3 = vld [vmem:[%s11245_s1 + $0x1024] ss:$16 sps:$4 sm:$0xff]   ;;  %v8143_v57 = vld [vmem:[%s11245_s1 + $0x102c] ss:$16 sps:$4 sm:$0xff]   ;;  %v8138_v5 = vld [vmem:[%s11245_s1 + $0x1020] ss:$16 sps:$4 sm:$0xff]  }
 0x1f2   :  { %v10287_v4 = vrot.slane %v949_v55, %v8769_v49  ;;  %v8141_v6 = vld [vmem:[%s11245_s1 + $0x1028] ss:$16 sps:$4 sm:$0xff]   ;;  %v8146_v7 = vld [vmem:[%s11245_s1 + $0x1044] ss:$16 sps:$4 sm:$0xff]   ;;  %v8149_v8 = vld [vmem:[%s11245_s1 + $0x104c] ss:$16 sps:$4 sm:$0xff]  }
 0x1f3   :  { %5257 = vmatpush1.bf16.msra.mxu0 %v8108_v45  ;;  %5790 = vmatpush1.bf16.msra.mxu1 %v8111_v46  ;;  %v8144_v9 = vld [vmem:[%s11245_s1 + $0x1040] ss:$16 sps:$4 sm:$0xff]   ;;  %v8147_v10 = vld [vmem:[%s11245_s1 + $0x1048] ss:$16 sps:$4 sm:$0xff]   ;;  %v8152_v11 = vld [vmem:[%s11245_s1 + $0x1064] ss:$16 sps:$4 sm:$0xff]  }
 0x1f4   :  { %5258 = vmatprep.subr.bf16.mxu0 %v8116_v47  ;;  %5791 = vmatprep.subr.bf16.mxu1 %v8119_v38  ;;  %v8155_v12 = vld [vmem:[%s11245_s1 + $0x106c] ss:$16 sps:$4 sm:$0xff]   ;;  %v8150_v14 = vld [vmem:[%s11245_s1 + $0x1060] ss:$16 sps:$4 sm:$0xff]   ;;  %v8153_v52 = vld [vmem:[%s11245_s1 + $0x1068] ss:$16 sps:$4 sm:$0xff]  }
 0x1f5   :  { %v8158_v16 = vld [vmem:[%s11245_s1 + $0x1084] ss:$16 sps:$4 sm:$0xff]   ;;  %v8161_v17 = vld [vmem:[%s11245_s1 + $0x108c] ss:$16 sps:$4 sm:$0xff]   ;;  %v8156_v18 = vld [vmem:[%s11245_s1 + $0x1080] ss:$16 sps:$4 sm:$0xff]  }
 0x1f6   :  { %v8159_v19 = vld [vmem:[%s11245_s1 + $0x1088] ss:$16 sps:$4 sm:$0xff]   ;;  %v8164_v20 = vld [vmem:[%s11245_s1 + $0x10a4] ss:$16 sps:$4 sm:$0xff]   ;;  %v8167_v21 = vld [vmem:[%s11245_s1 + $0x10ac] ss:$16 sps:$4 sm:$0xff]  }
 0x1f7   :  { %5259 = vmatpush1.bf16.msra.mxu0 %v8114_v48  ;;  %5792 = vmatpush1.bf16.msra.mxu1 %v8117_v50  ;;  %v8162_v22 = vld [vmem:[%s11245_s1 + $0x10a0] ss:$16 sps:$4 sm:$0xff]   ;;  %v8165_v23 = vld [vmem:[%s11245_s1 + $0x10a8] ss:$16 sps:$4 sm:$0xff]   ;;  %v8170_v25 = vld [vmem:[%s11245_s1 + $0x10c4] ss:$16 sps:$4 sm:$0xff]  }
 0x1f8   :  { %5260 = vmatprep.subr.bf16.mxu0 %v8122_v51  ;;  %5793 = vmatprep.subr.bf16.mxu1 %v8125_v53  ;;  %v8173_v13 = vld [vmem:[%s11245_s1 + $0x10cc] ss:$16 sps:$4 sm:$0xff]   ;;  %v8168_v27 = vld [vmem:[%s11245_s1 + $0x10c0] ss:$16 sps:$4 sm:$0xff]   ;;  %v8171_v29 = vld [vmem:[%s11245_s1 + $0x10c8] ss:$16 sps:$4 sm:$0xff]  }
 0x1f9   :  { %v8176_v30 = vld [vmem:[%s11245_s1 + $0x10e4] ss:$16 sps:$4 sm:$0xff]   ;;  %v8179_v31 = vld [vmem:[%s11245_s1 + $0x10ec] ss:$16 sps:$4 sm:$0xff]   ;;  %v8174_v15 = vld [vmem:[%s11245_s1 + $0x10e0] ss:$16 sps:$4 sm:$0xff]  }
 0x1fa   :  { %v8177_v32 = vld [vmem:[%s11245_s1 + $0x10e8] ss:$16 sps:$4 sm:$0xff]   ;;  %v8182_v33 = vld [vmem:[%s11245_s1 + $0x1104] ss:$16 sps:$4 sm:$0xff]   ;;  %v8185_v26 = vld [vmem:[%s11245_s1 + $0x110c] ss:$16 sps:$4 sm:$0xff]  }
 0x1fb   :  { %5261 = vmatpush1.bf16.msra.mxu0 %v8120_v40  ;;  %5794 = vmatpush1.bf16.msra.mxu1 %v8123_v56  ;;  %v8180_v34 = vld [vmem:[%s11245_s1 + $0x1100] ss:$16 sps:$4 sm:$0xff]   ;;  %v8183_v35 = vld [vmem:[%s11245_s1 + $0x1108] ss:$16 sps:$4 sm:$0xff]   ;;  %v8188_v37 = vld [vmem:[%s11245_s1 + $0x1124] ss:$16 sps:$4 sm:$0xff]  }
 0x1fc   :  { %5262 = vmatprep.subr.bf16.mxu0 %v8128_v58  ;;  %5795 = vmatprep.subr.bf16.mxu1 %v8131_v59  ;;  %v8191_v28 = vld [vmem:[%s11245_s1 + $0x112c] ss:$16 sps:$4 sm:$0xff]   ;;  %v8186_v39 = vld [vmem:[%s11245_s1 + $0x1120] ss:$16 sps:$4 sm:$0xff]   ;;  %v8189_v41 = vld [vmem:[%s11245_s1 + $0x1128] ss:$16 sps:$4 sm:$0xff]  }
 0x1fd   :  { %v8194_v43 = vld [vmem:[%s11245_s1 + $0x1144] ss:$16 sps:$4 sm:$0xff]   ;;  %v8197_v44 = vld [vmem:[%s11245_s1 + $0x114c] ss:$16 sps:$4 sm:$0xff]   ;;  %v8192_v45 = vld [vmem:[%s11245_s1 + $0x1140] ss:$16 sps:$4 sm:$0xff]  }
 0x1fe   :  { %v8195_v46 = vld [vmem:[%s11245_s1 + $0x1148] ss:$16 sps:$4 sm:$0xff]   ;;  %v8200_v47 = vld [vmem:[%s11245_s1 + $0x1164] ss:$16 sps:$4 sm:$0xff]   ;;  %v8203_v38 = vld [vmem:[%s11245_s1 + $0x116c] ss:$16 sps:$4 sm:$0xff]  }
 0x1ff   :  { %5263 = vmatpush1.bf16.msra.mxu0 %v8126_v24  ;;  %5796 = vmatpush1.bf16.msra.mxu1 %v8129_v61  ;;  %v8198_v48 = vld [vmem:[%s11245_s1 + $0x1160] ss:$16 sps:$4 sm:$0xff]   ;;  %v8201_v50 = vld [vmem:[%s11245_s1 + $0x1168] ss:$16 sps:$4 sm:$0xff]   ;;  %v8206_v51 = vld [vmem:[%s11245_s1 + $0x1184] ss:$16 sps:$4 sm:$0xff]  }
 0x200   :  { %5273 = vmatprep.subr.bf16.mxu0 %v8134_v62  ;;  %5806 = vmatprep.subr.bf16.mxu1 %v8137_v63  ;;  %v8209_v53 = vld [vmem:[%s11245_s1 + $0x118c] ss:$16 sps:$4 sm:$0xff]   ;;  %v8204_v40 = vld [vmem:[%s11245_s1 + $0x1180] ss:$16 sps:$4 sm:$0xff]   ;;  %v8207_v56 = vld [vmem:[%s11245_s1 + $0x1188] ss:$16 sps:$4 sm:$0xff]  }
 0x201   :  { %v8212_v58 = vld [vmem:[%s11245_s1 + $0x11a4] ss:$16 sps:$4 sm:$0xff]   ;;  %v8215_v59 = vld [vmem:[%s11245_s1 + $0x11ac] ss:$16 sps:$4 sm:$0xff]   ;;  %v8210_v24 = vld [vmem:[%s11245_s1 + $0x11a0] ss:$16 sps:$4 sm:$0xff]  }
 0x202   :  { %5265 = vmatmul.mubr.bf16.vlgmr.msra.gmra.mrb[0].mxu0 %v931_v0  ;;  %5798 = vmatmul.mubr.bf16.vlgmr.msra.gmra.mrb[0].mxu1 %v931_v0  ;;  %v8213_v61 = vld [vmem:[%s11245_s1 + $0x11a8] ss:$16 sps:$4 sm:$0xff]   ;;  %v8218_v62 = vld [vmem:[%s11245_s1 + $0x11c4] ss:$16 sps:$4 sm:$0xff]   ;;  %v8221_v63 = vld [vmem:[%s11245_s1 + $0x11cc] ss:$16 sps:$4 sm:$0xff]  }
 0x203   :  { %5274 = vmatpush1.bf16.msra.mxu0 %v8132_v1  ;;  %5807 = vmatpush1.bf16.msra.mxu1 %v8135_v2  ;;  %v8216_v55 = vld [vmem:[%s11245_s1 + $0x11c0] ss:$16 sps:$4 sm:$0xff]   ;;  %v8219_v0 = vld [vmem:[%s11245_s1 + $0x11c8] ss:$16 sps:$4 sm:$0xff]   ;;  %v8224_v1 = vld [vmem:[%s11245_s1 + $0x11e4] ss:$16 sps:$4 sm:$0xff]  }
 0x204   :  { %5275 = vmatprep.subr.bf16.mxu0 %v8140_v3  ;;  %5808 = vmatprep.subr.bf16.mxu1 %v8143_v57  ;;  %v8227_v2 = vld [vmem:[%s11245_s1 + $0x11ec] ss:$16 sps:$4 sm:$0xff]   ;;  %v8222_v3 = vld [vmem:[%s11245_s1 + $0x11e0] ss:$16 sps:$4 sm:$0xff]   ;;  %v8225_v57 = vld [vmem:[%s11245_s1 + $0x11e8] ss:$16 sps:$4 sm:$0xff]  }
 0x205   :  { %5305 = vmatprep.mubr.bf16.mxu0 %v10287_v4  ;;  %5838 = vmatprep.mubr.bf16.mxu1 %v10287_v4  ;;  %vm6366_vm2 = vcmask 1041408  }
 0x207   :  { %5276 = vmatpush1.bf16.msra.mxu0 %v8138_v5  ;;  %5809 = vmatpush1.bf16.msra.mxu1 %v8141_v6  ;;  %v8230_v5 = vld [vmem:[%s11245_s1 + $0x1204] ss:$16 sps:$4 sm:$0xff]   ;;  %v8233_v6 = vld [vmem:[%s11245_s1 + $0x120c] ss:$16 sps:$4 sm:$0xff]  }
 0x208   :  { %5277 = vmatprep.subr.bf16.mxu0 %v8146_v7  ;;  %5810 = vmatprep.subr.bf16.mxu1 %v8149_v8  ;;  %v10473_v7 = vrot.slane %v10256_v60, %v8769_v49  ;;  %v8228_v8 = vld [vmem:[%s11245_s1 + $0x1200] ss:$16 sps:$4 sm:$0xff]   ;;  %v8239_v60 = vld [vmem:[%s11245_s1 + $0x122c] ss:$16 sps:$4 sm:$0xff]  }
 0x20b   :  { %5278 = vmatpush1.bf16.msra.mxu0 %v8144_v9  ;;  %5811 = vmatpush1.bf16.msra.mxu1 %v8147_v10  ;;  %v8231_v9 = vld [vmem:[%s11245_s1 + $0x1208] ss:$16 sps:$4 sm:$0xff]   ;;  %v8236_v10 = vld [vmem:[%s11245_s1 + $0x1224] ss:$16 sps:$4 sm:$0xff]  }
 0x20c   :  { %5279 = vmatprep.subr.bf16.mxu0 %v8152_v11  ;;  %5812 = vmatprep.subr.bf16.mxu1 %v8155_v12  ;;  %v981_v11 = vcombine.high %v10287_v4, %v10287_v4  ;;  %v8234_v12 = vld [vmem:[%s11245_s1 + $0x1220] ss:$16 sps:$4 sm:$0xff]   ;;  %v8242_v4 = vld [vmem:[%s11245_s1 + $0x1244] ss:$16 sps:$4 sm:$0xff]  }
 0x20f   :  { %5280 = vmatpush1.bf16.msra.mxu0 %v8150_v14  ;;  %5813 = vmatpush1.bf16.msra.mxu1 %v8153_v52  ;;  %v8237_v14 = vld [vmem:[%s11245_s1 + $0x1228] ss:$16 sps:$4 sm:$0xff]   ;;  %v8245_v52 = vld [vmem:[%s11245_s1 + $0x124c] ss:$16 sps:$4 sm:$0xff]  }
 0x210   :  { %5281 = vmatprep.subr.bf16.mxu0 %v8158_v16  ;;  %5814 = vmatprep.subr.bf16.mxu1 %v8161_v17  ;;  %v8240_v16 = vld [vmem:[%s11245_s1 + $0x1240] ss:$16 sps:$4 sm:$0xff]   ;;  %v8243_v17 = vld [vmem:[%s11245_s1 + $0x1248] ss:$16 sps:$4 sm:$0xff]  }
 0x213   :  { %5282 = vmatpush1.bf16.msra.mxu0 %v8156_v18  ;;  %5815 = vmatpush1.bf16.msra.mxu1 %v8159_v19  ;;  %v8248_v18 = vld [vmem:[%s11245_s1 + $0x1264] ss:$16 sps:$4 sm:$0xff]   ;;  %v8251_v19 = vld [vmem:[%s11245_s1 + $0x126c] ss:$16 sps:$4 sm:$0xff]  }
 0x214   :  { %5283 = vmatprep.subr.bf16.mxu0 %v8164_v20  ;;  %5816 = vmatprep.subr.bf16.mxu1 %v8167_v21  ;;  %v8246_v20 = vld [vmem:[%s11245_s1 + $0x1260] ss:$16 sps:$4 sm:$0xff]   ;;  %v8249_v21 = vld [vmem:[%s11245_s1 + $0x1268] ss:$16 sps:$4 sm:$0xff]  }
 0x217   :  { %5284 = vmatpush1.bf16.msra.mxu0 %v8162_v22  ;;  %5817 = vmatpush1.bf16.msra.mxu1 %v8165_v23  ;;  %v8254_v22 = vld [vmem:[%s11245_s1 + $0x1284] ss:$16 sps:$4 sm:$0xff]   ;;  %v8257_v23 = vld [vmem:[%s11245_s1 + $0x128c] ss:$16 sps:$4 sm:$0xff]  }
 0x218   :  { %5285 = vmatprep.subr.bf16.mxu0 %v8170_v25  ;;  %5818 = vmatprep.subr.bf16.mxu1 %v8173_v13  ;;  %v8252_v25 = vld [vmem:[%s11245_s1 + $0x1280] ss:$16 sps:$4 sm:$0xff]   ;;  %v8255_v13 = vld [vmem:[%s11245_s1 + $0x1288] ss:$16 sps:$4 sm:$0xff]  }
 0x21b   :  { %5286 = vmatpush1.bf16.msra.mxu0 %v8168_v27  ;;  %5819 = vmatpush1.bf16.msra.mxu1 %v8171_v29  ;;  %v8260_v27 = vld [vmem:[%s11245_s1 + $0x12a4] ss:$16 sps:$4 sm:$0xff]   ;;  %v8263_v29 = vld [vmem:[%s11245_s1 + $0x12ac] ss:$16 sps:$4 sm:$0xff]  }
 0x21c   :  { %5287 = vmatprep.subr.bf16.mxu0 %v8176_v30  ;;  %5820 = vmatprep.subr.bf16.mxu1 %v8179_v31  ;;  %v8258_v30 = vld [vmem:[%s11245_s1 + $0x12a0] ss:$16 sps:$4 sm:$0xff]   ;;  %v8261_v31 = vld [vmem:[%s11245_s1 + $0x12a8] ss:$16 sps:$4 sm:$0xff]  }
 0x21f   :  { %5288 = vmatpush1.bf16.msra.mxu0 %v8174_v15  ;;  %5821 = vmatpush1.bf16.msra.mxu1 %v8177_v32  ;;  %v8266_v15 = vld [vmem:[%s11245_s1 + $0x12c4] ss:$16 sps:$4 sm:$0xff]   ;;  %v8269_v32 = vld [vmem:[%s11245_s1 + $0x12cc] ss:$16 sps:$4 sm:$0xff]  }
 0x220   :  { %5289 = vmatprep.subr.bf16.mxu0 %v8182_v33  ;;  %5822 = vmatprep.subr.bf16.mxu1 %v8185_v26  ;;  %v8264_v33 = vld [vmem:[%s11245_s1 + $0x12c0] ss:$16 sps:$4 sm:$0xff]   ;;  %v8267_v26 = vld [vmem:[%s11245_s1 + $0x12c8] ss:$16 sps:$4 sm:$0xff]  }
 0x223   :  { %5290 = vmatpush1.bf16.msra.mxu0 %v8180_v34  ;;  %5823 = vmatpush1.bf16.msra.mxu1 %v8183_v35  ;;  %v8272_v34 = vld [vmem:[%s11245_s1 + $0x12e4] ss:$16 sps:$4 sm:$0xff]   ;;  %v8275_v35 = vld [vmem:[%s11245_s1 + $0x12ec] ss:$16 sps:$4 sm:$0xff]  }
 0x224   :  { %5291 = vmatprep.subr.bf16.mxu0 %v8188_v37  ;;  %5824 = vmatprep.subr.bf16.mxu1 %v8191_v28  ;;  %v8270_v37 = vld [vmem:[%s11245_s1 + $0x12e0] ss:$16 sps:$4 sm:$0xff]   ;;  %v8273_v28 = vld [vmem:[%s11245_s1 + $0x12e8] ss:$16 sps:$4 sm:$0xff]  }
 0x227   :  { %5292 = vmatpush1.bf16.msra.mxu0 %v8186_v39  ;;  %5825 = vmatpush1.bf16.msra.mxu1 %v8189_v41  ;;  %v8278_v39 = vld [vmem:[%s11245_s1 + $0x1304] ss:$16 sps:$4 sm:$0xff]   ;;  %v8281_v41 = vld [vmem:[%s11245_s1 + $0x130c] ss:$16 sps:$4 sm:$0xff]  }
 0x228   :  { %5293 = vmatprep.subr.bf16.mxu0 %v8194_v43  ;;  %5826 = vmatprep.subr.bf16.mxu1 %v8197_v44  ;;  %v8276_v43 = vld [vmem:[%s11245_s1 + $0x1300] ss:$16 sps:$4 sm:$0xff]   ;;  %v8279_v44 = vld [vmem:[%s11245_s1 + $0x1308] ss:$16 sps:$4 sm:$0xff]  }
 0x22b   :  { %5294 = vmatpush1.bf16.msra.mxu0 %v8192_v45  ;;  %5827 = vmatpush1.bf16.msra.mxu1 %v8195_v46  ;;  %v8284_v45 = vld [vmem:[%s11245_s1 + $0x1324] ss:$16 sps:$4 sm:$0xff]   ;;  %v8287_v46 = vld [vmem:[%s11245_s1 + $0x132c] ss:$16 sps:$4 sm:$0xff]  }
 0x22c   :  { %5295 = vmatprep.subr.bf16.mxu0 %v8200_v47  ;;  %5828 = vmatprep.subr.bf16.mxu1 %v8203_v38  ;;  %v8282_v47 = vld [vmem:[%s11245_s1 + $0x1320] ss:$16 sps:$4 sm:$0xff]   ;;  %v8285_v38 = vld [vmem:[%s11245_s1 + $0x1328] ss:$16 sps:$4 sm:$0xff]  }
 0x22f   :  { %5296 = vmatpush1.bf16.msra.mxu0 %v8198_v48  ;;  %5829 = vmatpush1.bf16.msra.mxu1 %v8201_v50  ;;  %v8290_v48 = vld [vmem:[%s11245_s1 + $0x1344] ss:$16 sps:$4 sm:$0xff]   ;;  %v8293_v50 = vld [vmem:[%s11245_s1 + $0x134c] ss:$16 sps:$4 sm:$0xff]  }
 0x230   :  { %5297 = vmatprep.subr.bf16.mxu0 %v8206_v51  ;;  %5830 = vmatprep.subr.bf16.mxu1 %v8209_v53  ;;  %v8288_v51 = vld [vmem:[%s11245_s1 + $0x1340] ss:$16 sps:$4 sm:$0xff]   ;;  %v8291_v53 = vld [vmem:[%s11245_s1 + $0x1348] ss:$16 sps:$4 sm:$0xff]  }
 0x233   :  { %5298 = vmatpush1.bf16.msra.mxu0 %v8204_v40  ;;  %5831 = vmatpush1.bf16.msra.mxu1 %v8207_v56  ;;  %v8296_v40 = vld [vmem:[%s11245_s1 + $0x1364] ss:$16 sps:$4 sm:$0xff]   ;;  %v8299_v56 = vld [vmem:[%s11245_s1 + $0x136c] ss:$16 sps:$4 sm:$0xff]  }
 0x234   :  { %5299 = vmatprep.subr.bf16.mxu0 %v8212_v58  ;;  %5832 = vmatprep.subr.bf16.mxu1 %v8215_v59  ;;  %v8294_v58 = vld [vmem:[%s11245_s1 + $0x1360] ss:$16 sps:$4 sm:$0xff]   ;;  %v8297_v59 = vld [vmem:[%s11245_s1 + $0x1368] ss:$16 sps:$4 sm:$0xff]  }
 0x237   :  { %5300 = vmatpush1.bf16.msra.mxu0 %v8210_v24  ;;  %5833 = vmatpush1.bf16.msra.mxu1 %v8213_v61  ;;  %v8302_v24 = vld [vmem:[%s11245_s1 + $0x1384] ss:$16 sps:$4 sm:$0xff]   ;;  %v8305_v61 = vld [vmem:[%s11245_s1 + $0x138c] ss:$16 sps:$4 sm:$0xff]  }
 0x238   :  { %5301 = vmatprep.subr.bf16.mxu0 %v8218_v62  ;;  %5834 = vmatprep.subr.bf16.mxu1 %v8221_v63  ;;  %v8300_v62 = vld [vmem:[%s11245_s1 + $0x1380] ss:$16 sps:$4 sm:$0xff]   ;;  %v8303_v63 = vld [vmem:[%s11245_s1 + $0x1388] ss:$16 sps:$4 sm:$0xff]  }
 0x23b   :  { %5302 = vmatpush1.bf16.msra.mxu0 %v8216_v55  ;;  %5835 = vmatpush1.bf16.msra.mxu1 %v8219_v0  ;;  %v8308_v55 = vld [vmem:[%s11245_s1 + $0x13a4] ss:$16 sps:$4 sm:$0xff]   ;;  %v8311_v0 = vld [vmem:[%s11245_s1 + $0x13ac] ss:$16 sps:$4 sm:$0xff]  }
 0x23c   :  { %5303 = vmatprep.subr.bf16.mxu0 %v8224_v1  ;;  %5836 = vmatprep.subr.bf16.mxu1 %v8227_v2  ;;  %v8306_v1 = vld [vmem:[%s11245_s1 + $0x13a0] ss:$16 sps:$4 sm:$0xff]   ;;  %v8309_v2 = vld [vmem:[%s11245_s1 + $0x13a8] ss:$16 sps:$4 sm:$0xff]  }
 0x23f   :  { %5304 = vmatpush1.bf16.msra.mxu0 %v8222_v3  ;;  %5837 = vmatpush1.bf16.msra.mxu1 %v8225_v57  ;;  %v8314_v3 = vld [vmem:[%s11245_s1 + $0x13c4] ss:$16 sps:$4 sm:$0xff]   ;;  %v8317_v57 = vld [vmem:[%s11245_s1 + $0x13cc] ss:$16 sps:$4 sm:$0xff]  }
 0x240   :  { %5314 = vmatprep.subr.bf16.mxu0 %v8230_v5  ;;  %5847 = vmatprep.subr.bf16.mxu1 %v8233_v6  ;;  %v934_v5 = vcombine.high %v10240_v54, %v10240_v54  ;;  %v8312_v6 = vld [vmem:[%s11245_s1 + $0x13c0] ss:$16 sps:$4 sm:$0xff]   ;;  %v8323_v54 = vld [vmem:[%s11245_s1 + $0x13ec] ss:$16 sps:$4 sm:$0xff]  }
 0x242   :  { %5306 = vmatmul.mubr.bf16.vlgmr.msra.gmra.mrb[0].mxu0 %v10473_v7  ;;  %5839 = vmatmul.mubr.bf16.vlgmr.msra.gmra.mrb[0].mxu1 %v10473_v7 }
 0x243   :  { %5315 = vmatpush1.bf16.msra.mxu0 %v8228_v8  ;;  %5848 = vmatpush1.bf16.msra.mxu1 %v8231_v9  ;;  %v8315_v8 = vld [vmem:[%s11245_s1 + $0x13c8] ss:$16 sps:$4 sm:$0xff]   ;;  %v8320_v9 = vld [vmem:[%s11245_s1 + $0x13e4] ss:$16 sps:$4 sm:$0xff]  }
 0x244   :  { %5316 = vmatprep.subr.bf16.mxu0 %v8236_v10  ;;  %5849 = vmatprep.subr.bf16.mxu1 %v8239_v60  ;;  %v10662_v10 = vrot.slane %v934_v5, %v8769_v49  ;;  %v8318_v60 = vld [vmem:[%s11245_s1 + $0x13e0] ss:$16 sps:$4 sm:$0xff]  }
 0x245   :  { %5346 = vmatprep.mubr.bf16.mxu0 %v981_v11  ;;  %5879 = vmatprep.mubr.bf16.mxu1 %v981_v11  ;;  %v8321_v11 = vld [vmem:[%s11245_s1 + $0x13e8] ss:$16 sps:$4 sm:$0xff]   ;;  %v8396_v5 = vld [vmem:[%s11245_s1 + $0x1580] ss:$16 sps:$4 sm:$0xff]  }
 0x247   :  { %5317 = vmatpush1.bf16.msra.mxu0 %v8234_v12  ;;  %5850 = vmatpush1.bf16.msra.mxu1 %v8237_v14  ;;  %v8326_v12 = vld [vmem:[%s11245_s1 + $0x1404] ss:$16 sps:$4 sm:$0xff]   ;;  %v8329_v14 = vld [vmem:[%s11245_s1 + $0x140c] ss:$16 sps:$4 sm:$0xff]  }
 0x248   :  { %5318 = vmatprep.subr.bf16.mxu0 %v8242_v4  ;;  %5851 = vmatprep.subr.bf16.mxu1 %v8245_v52  ;;  %v950_v4 = vcombine.high %v10662_v10, %v10662_v10  ;;  %v979_v52 = vcombine.high %v10473_v7, %v10473_v7  ;;  %v8335_v7 = vld [vmem:[%s11245_s1 + $0x142c] ss:$16 sps:$4 sm:$0xff]  }
 0x24b   :  { %5319 = vmatpush1.bf16.msra.mxu0 %v8240_v16  ;;  %5852 = vmatpush1.bf16.msra.mxu1 %v8243_v17  ;;  %v8324_v16 = vld [vmem:[%s11245_s1 + $0x1400] ss:$16 sps:$4 sm:$0xff]   ;;  %v8327_v17 = vld [vmem:[%s11245_s1 + $0x1408] ss:$16 sps:$4 sm:$0xff]  }
 0x24c   :  { %5320 = vmatprep.subr.bf16.mxu0 %v8248_v18  ;;  %5853 = vmatprep.subr.bf16.mxu1 %v8251_v19  ;;  %v8332_v18 = vld [vmem:[%s11245_s1 + $0x1424] ss:$16 sps:$4 sm:$0xff]   ;;  %v10693_v19 = vrot.slane %v950_v4, %v8769_v49  ;;  %v8411_v4 = vld [vmem:[%s11245_s1 + $0x15c8] ss:$16 sps:$4 sm:$0xff]  }
 0x24f   :  { %5321 = vmatpush1.bf16.msra.mxu0 %v8246_v20  ;;  %5854 = vmatpush1.bf16.msra.mxu1 %v8249_v21  ;;  %v8330_v20 = vld [vmem:[%s11245_s1 + $0x1420] ss:$16 sps:$4 sm:$0xff]   ;;  %v8333_v21 = vld [vmem:[%s11245_s1 + $0x1428] ss:$16 sps:$4 sm:$0xff]  }
 0x250   :  { %5322 = vmatprep.subr.bf16.mxu0 %v8254_v22  ;;  %5855 = vmatprep.subr.bf16.mxu1 %v8257_v23  ;;  %v8338_v22 = vld [vmem:[%s11245_s1 + $0x1444] ss:$16 sps:$4 sm:$0xff]   ;;  %v8341_v23 = vld [vmem:[%s11245_s1 + $0x144c] ss:$16 sps:$4 sm:$0xff]  }
 0x253   :  { %5323 = vmatpush1.bf16.msra.mxu0 %v8252_v25  ;;  %5856 = vmatpush1.bf16.msra.mxu1 %v8255_v13  ;;  %v8336_v25 = vld [vmem:[%s11245_s1 + $0x1440] ss:$16 sps:$4 sm:$0xff]   ;;  %v8339_v13 = vld [vmem:[%s11245_s1 + $0x1448] ss:$16 sps:$4 sm:$0xff]  }
 0x254   :  { %5324 = vmatprep.subr.bf16.mxu0 %v8260_v27  ;;  %5857 = vmatprep.subr.bf16.mxu1 %v8263_v29  ;;  %v8344_v27 = vld [vmem:[%s11245_s1 + $0x1464] ss:$16 sps:$4 sm:$0xff]   ;;  %v8347_v29 = vld [vmem:[%s11245_s1 + $0x146c] ss:$16 sps:$4 sm:$0xff]  }
 0x257   :  { %5325 = vmatpush1.bf16.msra.mxu0 %v8258_v30  ;;  %5858 = vmatpush1.bf16.msra.mxu1 %v8261_v31  ;;  %v8342_v30 = vld [vmem:[%s11245_s1 + $0x1460] ss:$16 sps:$4 sm:$0xff]   ;;  %v8345_v31 = vld [vmem:[%s11245_s1 + $0x1468] ss:$16 sps:$4 sm:$0xff]  }
 0x258   :  { %5326 = vmatprep.subr.bf16.mxu0 %v8266_v15  ;;  %5859 = vmatprep.subr.bf16.mxu1 %v8269_v32  ;;  %v8350_v15 = vld [vmem:[%s11245_s1 + $0x1484] ss:$16 sps:$4 sm:$0xff]   ;;  %v8353_v32 = vld [vmem:[%s11245_s1 + $0x148c] ss:$16 sps:$4 sm:$0xff]  }
 0x25b   :  { %5327 = vmatpush1.bf16.msra.mxu0 %v8264_v33  ;;  %5860 = vmatpush1.bf16.msra.mxu1 %v8267_v26  ;;  %v8348_v33 = vld [vmem:[%s11245_s1 + $0x1480] ss:$16 sps:$4 sm:$0xff]   ;;  %v8351_v26 = vld [vmem:[%s11245_s1 + $0x1488] ss:$16 sps:$4 sm:$0xff]  }
 0x25c   :  { %5328 = vmatprep.subr.bf16.mxu0 %v8272_v34  ;;  %5861 = vmatprep.subr.bf16.mxu1 %v8275_v35  ;;  %v8356_v34 = vld [vmem:[%s11245_s1 + $0x14a4] ss:$16 sps:$4 sm:$0xff]   ;;  %v8359_v35 = vld [vmem:[%s11245_s1 + $0x14ac] ss:$16 sps:$4 sm:$0xff]  }
 0x25f   :  { %5329 = vmatpush1.bf16.msra.mxu0 %v8270_v37  ;;  %5862 = vmatpush1.bf16.msra.mxu1 %v8273_v28  ;;  %v8354_v37 = vld [vmem:[%s11245_s1 + $0x14a0] ss:$16 sps:$4 sm:$0xff]   ;;  %v8357_v28 = vld [vmem:[%s11245_s1 + $0x14a8] ss:$16 sps:$4 sm:$0xff]  }
 0x260   :  { %5330 = vmatprep.subr.bf16.mxu0 %v8278_v39  ;;  %5863 = vmatprep.subr.bf16.mxu1 %v8281_v41  ;;  %v8362_v39 = vld [vmem:[%s11245_s1 + $0x14c4] ss:$16 sps:$4 sm:$0xff]   ;;  %v8365_v41 = vld [vmem:[%s11245_s1 + $0x14cc] ss:$16 sps:$4 sm:$0xff]  }
 0x263   :  { %5331 = vmatpush1.bf16.msra.mxu0 %v8276_v43  ;;  %5864 = vmatpush1.bf16.msra.mxu1 %v8279_v44  ;;  %v8360_v43 = vld [vmem:[%s11245_s1 + $0x14c0] ss:$16 sps:$4 sm:$0xff]   ;;  %v8363_v44 = vld [vmem:[%s11245_s1 + $0x14c8] ss:$16 sps:$4 sm:$0xff]  }
 0x264   :  { %5332 = vmatprep.subr.bf16.mxu0 %v8284_v45  ;;  %5865 = vmatprep.subr.bf16.mxu1 %v8287_v46  ;;  %v8368_v45 = vld [vmem:[%s11245_s1 + $0x14e4] ss:$16 sps:$4 sm:$0xff]   ;;  %v8371_v46 = vld [vmem:[%s11245_s1 + $0x14ec] ss:$16 sps:$4 sm:$0xff]  }
 0x267   :  { %5333 = vmatpush1.bf16.msra.mxu0 %v8282_v47  ;;  %5866 = vmatpush1.bf16.msra.mxu1 %v8285_v38  ;;  %v8366_v47 = vld [vmem:[%s11245_s1 + $0x14e0] ss:$16 sps:$4 sm:$0xff]   ;;  %v8369_v38 = vld [vmem:[%s11245_s1 + $0x14e8] ss:$16 sps:$4 sm:$0xff]  }
 0x268   :  { %5334 = vmatprep.subr.bf16.mxu0 %v8290_v48  ;;  %5867 = vmatprep.subr.bf16.mxu1 %v8293_v50  ;;  %v8374_v48 = vld [vmem:[%s11245_s1 + $0x1504] ss:$16 sps:$4 sm:$0xff]   ;;  %v8377_v50 = vld [vmem:[%s11245_s1 + $0x150c] ss:$16 sps:$4 sm:$0xff]  }
 0x26b   :  { %5335 = vmatpush1.bf16.msra.mxu0 %v8288_v51  ;;  %5868 = vmatpush1.bf16.msra.mxu1 %v8291_v53  ;;  %v8372_v51 = vld [vmem:[%s11245_s1 + $0x1500] ss:$16 sps:$4 sm:$0xff]   ;;  %v8375_v53 = vld [vmem:[%s11245_s1 + $0x1508] ss:$16 sps:$4 sm:$0xff]  }
 0x26c   :  { %5336 = vmatprep.subr.bf16.mxu0 %v8296_v40  ;;  %5869 = vmatprep.subr.bf16.mxu1 %v8299_v56  ;;  %v8380_v40 = vld [vmem:[%s11245_s1 + $0x1524] ss:$16 sps:$4 sm:$0xff]   ;;  %v8383_v56 = vld [vmem:[%s11245_s1 + $0x152c] ss:$16 sps:$4 sm:$0xff]  }
 0x26f   :  { %5337 = vmatpush1.bf16.msra.mxu0 %v8294_v58  ;;  %5870 = vmatpush1.bf16.msra.mxu1 %v8297_v59  ;;  %v8378_v58 = vld [vmem:[%s11245_s1 + $0x1520] ss:$16 sps:$4 sm:$0xff]   ;;  %v8381_v59 = vld [vmem:[%s11245_s1 + $0x1528] ss:$16 sps:$4 sm:$0xff]  }
 0x270   :  { %5338 = vmatprep.subr.bf16.mxu0 %v8302_v24  ;;  %5871 = vmatprep.subr.bf16.mxu1 %v8305_v61  ;;  %v8386_v24 = vld [vmem:[%s11245_s1 + $0x1544] ss:$16 sps:$4 sm:$0xff]   ;;  %v8389_v61 = vld [vmem:[%s11245_s1 + $0x154c] ss:$16 sps:$4 sm:$0xff]  }
 0x273   :  { %5339 = vmatpush1.bf16.msra.mxu0 %v8300_v62  ;;  %5872 = vmatpush1.bf16.msra.mxu1 %v8303_v63  ;;  %v8384_v62 = vld [vmem:[%s11245_s1 + $0x1540] ss:$16 sps:$4 sm:$0xff]   ;;  %v8387_v63 = vld [vmem:[%s11245_s1 + $0x1548] ss:$16 sps:$4 sm:$0xff]  }
 0x274   :  { %5340 = vmatprep.subr.bf16.mxu0 %v8308_v55  ;;  %5873 = vmatprep.subr.bf16.mxu1 %v8311_v0  ;;  %v8392_v55 = vld [vmem:[%s11245_s1 + $0x1564] ss:$16 sps:$4 sm:$0xff]   ;;  %v8395_v0 = vld [vmem:[%s11245_s1 + $0x156c] ss:$16 sps:$4 sm:$0xff]  }
 0x277   :  { %5341 = vmatpush1.bf16.msra.mxu0 %v8306_v1  ;;  %5874 = vmatpush1.bf16.msra.mxu1 %v8309_v2  ;;  %v8390_v1 = vld [vmem:[%s11245_s1 + $0x1560] ss:$16 sps:$4 sm:$0xff]   ;;  %v8393_v2 = vld [vmem:[%s11245_s1 + $0x1568] ss:$16 sps:$4 sm:$0xff]  }
 0x278   :  { %5342 = vmatprep.subr.bf16.mxu0 %v8314_v3  ;;  %5875 = vmatprep.subr.bf16.mxu1 %v8317_v57  ;;  %v8398_v3 = vld [vmem:[%s11245_s1 + $0x1584] ss:$16 sps:$4 sm:$0xff]   ;;  %v8401_v57 = vld [vmem:[%s11245_s1 + $0x158c] ss:$16 sps:$4 sm:$0xff]  }
 0x27b   :  { %5343 = vmatpush1.bf16.msra.mxu0 %v8312_v6  ;;  %5876 = vmatpush1.bf16.msra.mxu1 %v8315_v8  ;;  %v8399_v6 = vld [vmem:[%s11245_s1 + $0x1588] ss:$16 sps:$4 sm:$0xff]   ;;  %v8404_v8 = vld [vmem:[%s11245_s1 + $0x15a4] ss:$16 sps:$4 sm:$0xff]  }
 0x27c   :  { %5344 = vmatprep.subr.bf16.mxu0 %v8320_v9  ;;  %5877 = vmatprep.subr.bf16.mxu1 %v8323_v54  ;;  %v8407_v9 = vld [vmem:[%s11245_s1 + $0x15ac] ss:$16 sps:$4 sm:$0xff]   ;;  %v8402_v54 = vld [vmem:[%s11245_s1 + $0x15a0] ss:$16 sps:$4 sm:$0xff]  }
 0x27f   :  { %5345 = vmatpush1.bf16.msra.mxu0 %v8318_v60  ;;  %5878 = vmatpush1.bf16.msra.mxu1 %v8321_v11  ;;  %v8405_v60 = vld [vmem:[%s11245_s1 + $0x15a8] ss:$16 sps:$4 sm:$0xff]   ;;  %v8410_v11 = vld [vmem:[%s11245_s1 + $0x15c4] ss:$16 sps:$4 sm:$0xff]  }
 0x280   :  { %5355 = vmatprep.subr.bf16.mxu0 %v8326_v12  ;;  %5888 = vmatprep.subr.bf16.mxu1 %v8329_v14  ;;  %v8413_v12 = vld [vmem:[%s11245_s1 + $0x15cc] ss:$16 sps:$4 sm:$0xff]   ;;  %v8408_v14 = vld [vmem:[%s11245_s1 + $0x15c0] ss:$16 sps:$4 sm:$0xff]  }
 0x282   :  { %5347 = vmatmul.mubr.bf16.vlgmr.msra.gmra.mrb[0].mxu0 %v979_v52  ;;  %5880 = vmatmul.mubr.bf16.vlgmr.msra.gmra.mrb[0].mxu1 %v979_v52  ;;  %v8416_v52 = vld [vmem:[%s11245_s1 + $0x15e4] ss:$16 sps:$4 sm:$0xff]  }
 0x283   :  { %5356 = vmatpush1.bf16.msra.mxu0 %v8324_v16  ;;  %5889 = vmatpush1.bf16.msra.mxu1 %v8327_v17  ;;  %v8419_v16 = vld [vmem:[%s11245_s1 + $0x15ec] ss:$16 sps:$4 sm:$0xff]   ;;  %v8414_v17 = vld [vmem:[%s11245_s1 + $0x15e0] ss:$16 sps:$4 sm:$0xff]  }
 0x284   :  { %5357 = vmatprep.subr.bf16.mxu0 %v8332_v18  ;;  %5890 = vmatprep.subr.bf16.mxu1 %v8335_v7  ;;  %v8417_v18 = vld [vmem:[%s11245_s1 + $0x15e8] ss:$16 sps:$4 sm:$0xff]   ;;  %v8423_v7 = vld [vmem:[%s11245_s1 + $0x1604] ss:$16 sps:$4 sm:$0xff]  }
 0x285   :  { %5387 = vmatprep.mubr.bf16.mxu0 %v10693_v19  ;;  %5920 = vmatprep.mubr.bf16.mxu1 %v10693_v19 }
 0x287   :  { %5358 = vmatpush1.bf16.msra.mxu0 %v8330_v20  ;;  %5891 = vmatpush1.bf16.msra.mxu1 %v8333_v21  ;;  %v8426_v20 = vld [vmem:[%s11245_s1 + $0x160c] ss:$16 sps:$4 sm:$0xff]   ;;  %v10879_v21 = vrot.slane %v10662_v10, %v8769_v49 }
 0x288   :  { %5359 = vmatprep.subr.bf16.mxu0 %v8338_v22  ;;  %5892 = vmatprep.subr.bf16.mxu1 %v8341_v23  ;;  %v8421_v22 = vld [vmem:[%s11245_s1 + $0x1600] ss:$16 sps:$4 sm:$0xff]   ;;  %v8424_v23 = vld [vmem:[%s11245_s1 + $0x1608] ss:$16 sps:$4 sm:$0xff]   ;;  %v8432_v10 = vld [vmem:[%s11245_s1 + $0x162c] ss:$16 sps:$4 sm:$0xff]  }
 0x28b   :  { %5360 = vmatpush1.bf16.msra.mxu0 %v8336_v25  ;;  %5893 = vmatpush1.bf16.msra.mxu1 %v8339_v13  ;;  %v8429_v25 = vld [vmem:[%s11245_s1 + $0x1624] ss:$16 sps:$4 sm:$0xff]   ;;  %v982_v13 = vcombine.high %v10693_v19, %v10693_v19 }
 0x28c   :  { %5361 = vmatprep.subr.bf16.mxu0 %v8344_v27  ;;  %5894 = vmatprep.subr.bf16.mxu1 %v8347_v29  ;;  %v8427_v27 = vld [vmem:[%s11245_s1 + $0x1620] ss:$16 sps:$4 sm:$0xff]   ;;  %v8430_v29 = vld [vmem:[%s11245_s1 + $0x1628] ss:$16 sps:$4 sm:$0xff]   ;;  %v8435_v19 = vld [vmem:[%s11245_s1 + $0x1644] ss:$16 sps:$4 sm:$0xff]  }
 0x28f   :  { %5362 = vmatpush1.bf16.msra.mxu0 %v8342_v30  ;;  %5895 = vmatpush1.bf16.msra.mxu1 %v8345_v31  ;;  %v8438_v30 = vld [vmem:[%s11245_s1 + $0x164c] ss:$16 sps:$4 sm:$0xff]   ;;  %v8433_v31 = vld [vmem:[%s11245_s1 + $0x1640] ss:$16 sps:$4 sm:$0xff]  }
 0x290   :  { %5363 = vmatprep.subr.bf16.mxu0 %v8350_v15  ;;  %5896 = vmatprep.subr.bf16.mxu1 %v8353_v32  ;;  %v8436_v15 = vld [vmem:[%s11245_s1 + $0x1648] ss:$16 sps:$4 sm:$0xff]   ;;  %v8441_v32 = vld [vmem:[%s11245_s1 + $0x1664] ss:$16 sps:$4 sm:$0xff]  }
 0x293   :  { %5364 = vmatpush1.bf16.msra.mxu0 %v8348_v33  ;;  %5897 = vmatpush1.bf16.msra.mxu1 %v8351_v26  ;;  %v8444_v33 = vld [vmem:[%s11245_s1 + $0x166c] ss:$16 sps:$4 sm:$0xff]   ;;  %v8439_v26 = vld [vmem:[%s11245_s1 + $0x1660] ss:$16 sps:$4 sm:$0xff]  }
 0x294   :  { %5365 = vmatprep.subr.bf16.mxu0 %v8356_v34  ;;  %5898 = vmatprep.subr.bf16.mxu1 %v8359_v35  ;;  %v8442_v34 = vld [vmem:[%s11245_s1 + $0x1668] ss:$16 sps:$4 sm:$0xff]   ;;  %v8447_v35 = vld [vmem:[%s11245_s1 + $0x1684] ss:$16 sps:$4 sm:$0xff]  }
 0x297   :  { %5366 = vmatpush1.bf16.msra.mxu0 %v8354_v37  ;;  %5899 = vmatpush1.bf16.msra.mxu1 %v8357_v28  ;;  %v8450_v37 = vld [vmem:[%s11245_s1 + $0x168c] ss:$16 sps:$4 sm:$0xff]   ;;  %v8445_v28 = vld [vmem:[%s11245_s1 + $0x1680] ss:$16 sps:$4 sm:$0xff]  }
 0x298   :  { %5367 = vmatprep.subr.bf16.mxu0 %v8362_v39  ;;  %5900 = vmatprep.subr.bf16.mxu1 %v8365_v41  ;;  %v8448_v39 = vld [vmem:[%s11245_s1 + $0x1688] ss:$16 sps:$4 sm:$0xff]   ;;  %v8453_v41 = vld [vmem:[%s11245_s1 + $0x16a4] ss:$16 sps:$4 sm:$0xff]  }
 0x29b   :  { %5368 = vmatpush1.bf16.msra.mxu0 %v8360_v43  ;;  %5901 = vmatpush1.bf16.msra.mxu1 %v8363_v44  ;;  %v8456_v43 = vld [vmem:[%s11245_s1 + $0x16ac] ss:$16 sps:$4 sm:$0xff]   ;;  %v8451_v44 = vld [vmem:[%s11245_s1 + $0x16a0] ss:$16 sps:$4 sm:$0xff]  }
 0x29c   :  { %5369 = vmatprep.subr.bf16.mxu0 %v8368_v45  ;;  %5902 = vmatprep.subr.bf16.mxu1 %v8371_v46  ;;  %v8454_v45 = vld [vmem:[%s11245_s1 + $0x16a8] ss:$16 sps:$4 sm:$0xff]   ;;  %v8459_v46 = vld [vmem:[%s11245_s1 + $0x16c4] ss:$16 sps:$4 sm:$0xff]  }
 0x29f   :  { %5370 = vmatpush1.bf16.msra.mxu0 %v8366_v47  ;;  %5903 = vmatpush1.bf16.msra.mxu1 %v8369_v38  ;;  %v8462_v47 = vld [vmem:[%s11245_s1 + $0x16cc] ss:$16 sps:$4 sm:$0xff]   ;;  %v8457_v38 = vld [vmem:[%s11245_s1 + $0x16c0] ss:$16 sps:$4 sm:$0xff]  }
 0x2a0   :  { %5371 = vmatprep.subr.bf16.mxu0 %v8374_v48  ;;  %5904 = vmatprep.subr.bf16.mxu1 %v8377_v50  ;;  %v8460_v48 = vld [vmem:[%s11245_s1 + $0x16c8] ss:$16 sps:$4 sm:$0xff]   ;;  %v8465_v50 = vld [vmem:[%s11245_s1 + $0x16e4] ss:$16 sps:$4 sm:$0xff]  }
 0x2a3   :  { %5372 = vmatpush1.bf16.msra.mxu0 %v8372_v51  ;;  %5905 = vmatpush1.bf16.msra.mxu1 %v8375_v53  ;;  %v8468_v51 = vld [vmem:[%s11245_s1 + $0x16ec] ss:$16 sps:$4 sm:$0xff]   ;;  %v8463_v53 = vld [vmem:[%s11245_s1 + $0x16e0] ss:$16 sps:$4 sm:$0xff]  }
 0x2a4   :  { %5373 = vmatprep.subr.bf16.mxu0 %v8380_v40  ;;  %5906 = vmatprep.subr.bf16.mxu1 %v8383_v56  ;;  %v8466_v40 = vld [vmem:[%s11245_s1 + $0x16e8] ss:$16 sps:$4 sm:$0xff]   ;;  %v8471_v56 = vld [vmem:[%s11245_s1 + $0x1704] ss:$16 sps:$4 sm:$0xff]  }
 0x2a7   :  { %5374 = vmatpush1.bf16.msra.mxu0 %v8378_v58  ;;  %5907 = vmatpush1.bf16.msra.mxu1 %v8381_v59  ;;  %v8474_v58 = vld [vmem:[%s11245_s1 + $0x170c] ss:$16 sps:$4 sm:$0xff]   ;;  %v8469_v59 = vld [vmem:[%s11245_s1 + $0x1700] ss:$16 sps:$4 sm:$0xff]  }
 0x2a8   :  { %5375 = vmatprep.subr.bf16.mxu0 %v8386_v24  ;;  %5908 = vmatprep.subr.bf16.mxu1 %v8389_v61  ;;  %v8472_v24 = vld [vmem:[%s11245_s1 + $0x1708] ss:$16 sps:$4 sm:$0xff]   ;;  %v8477_v61 = vld [vmem:[%s11245_s1 + $0x1724] ss:$16 sps:$4 sm:$0xff]  }
 0x2ab   :  { %5376 = vmatpush1.bf16.msra.mxu0 %v8384_v62  ;;  %5909 = vmatpush1.bf16.msra.mxu1 %v8387_v63  ;;  %v8480_v62 = vld [vmem:[%s11245_s1 + $0x172c] ss:$16 sps:$4 sm:$0xff]   ;;  %v8475_v63 = vld [vmem:[%s11245_s1 + $0x1720] ss:$16 sps:$4 sm:$0xff]  }
 0x2ac   :  { %5377 = vmatprep.subr.bf16.mxu0 %v8392_v55  ;;  %5910 = vmatprep.subr.bf16.mxu1 %v8395_v0  ;;  %v8478_v55 = vld [vmem:[%s11245_s1 + $0x1728] ss:$16 sps:$4 sm:$0xff]   ;;  %v8483_v0 = vld [vmem:[%s11245_s1 + $0x1744] ss:$16 sps:$4 sm:$0xff]  }
 0x2af   :  { %5378 = vmatpush1.bf16.msra.mxu0 %v8390_v1  ;;  %5911 = vmatpush1.bf16.msra.mxu1 %v8393_v2  ;;  %v8486_v1 = vld [vmem:[%s11245_s1 + $0x174c] ss:$16 sps:$4 sm:$0xff]   ;;  %v8481_v2 = vld [vmem:[%s11245_s1 + $0x1740] ss:$16 sps:$4 sm:$0xff]  }
 0x2b0   :  { %5379 = vmatprep.subr.bf16.mxu0 %v8398_v3  ;;  %5912 = vmatprep.subr.bf16.mxu1 %v8401_v57  ;;  %v8484_v3 = vld [vmem:[%s11245_s1 + $0x1748] ss:$16 sps:$4 sm:$0xff]   ;;  %v8489_v57 = vld [vmem:[%s11245_s1 + $0x1764] ss:$16 sps:$4 sm:$0xff]  }
 0x2b3   :  { %5380 = vmatpush1.bf16.msra.mxu0 %v8396_v5  ;;  %5913 = vmatpush1.bf16.msra.mxu1 %v8399_v6  ;;  %v8492_v5 = vld [vmem:[%s11245_s1 + $0x176c] ss:$16 sps:$4 sm:$0xff]   ;;  %v8487_v6 = vld [vmem:[%s11245_s1 + $0x1760] ss:$16 sps:$4 sm:$0xff]  }
 0x2b4   :  { %5381 = vmatprep.subr.bf16.mxu0 %v8404_v8  ;;  %5914 = vmatprep.subr.bf16.mxu1 %v8407_v9  ;;  %v8490_v8 = vld [vmem:[%s11245_s1 + $0x1768] ss:$16 sps:$4 sm:$0xff]   ;;  %v8495_v9 = vld [vmem:[%s11245_s1 + $0x1784] ss:$16 sps:$4 sm:$0xff]  }
 0x2b7   :  { %5382 = vmatpush1.bf16.msra.mxu0 %v8402_v54  ;;  %5915 = vmatpush1.bf16.msra.mxu1 %v8405_v60  ;;  %v8498_v54 = vld [vmem:[%s11245_s1 + $0x178c] ss:$16 sps:$4 sm:$0xff]   ;;  %v8493_v60 = vld [vmem:[%s11245_s1 + $0x1780] ss:$16 sps:$4 sm:$0xff]  }
 0x2b8   :  { %5383 = vmatprep.subr.bf16.mxu0 %v8410_v11  ;;  %5916 = vmatprep.subr.bf16.mxu1 %v8413_v12  ;;  %v8496_v11 = vld [vmem:[%s11245_s1 + $0x1788] ss:$16 sps:$4 sm:$0xff]   ;;  %v8501_v12 = vld [vmem:[%s11245_s1 + $0x17a4] ss:$16 sps:$4 sm:$0xff]  }
 0x2bb   :  { %5384 = vmatpush1.bf16.msra.mxu0 %v8408_v14  ;;  %5917 = vmatpush1.bf16.msra.mxu1 %v8411_v4  ;;  %v8504_v14 = vld [vmem:[%s11245_s1 + $0x17ac] ss:$16 sps:$4 sm:$0xff]   ;;  %v8499_v4 = vld [vmem:[%s11245_s1 + $0x17a0] ss:$16 sps:$4 sm:$0xff]  }
 0x2bc   :  { %5385 = vmatprep.subr.bf16.mxu0 %v8416_v52  ;;  %5918 = vmatprep.subr.bf16.mxu1 %v8419_v16  ;;  %v8502_v52 = vld [vmem:[%s11245_s1 + $0x17a8] ss:$16 sps:$4 sm:$0xff]   ;;  %v8507_v16 = vld [vmem:[%s11245_s1 + $0x17c4] ss:$16 sps:$4 sm:$0xff]  }
 0x2bf   :  { %5386 = vmatpush1.bf16.msra.mxu0 %v8414_v17  ;;  %5919 = vmatpush1.bf16.msra.mxu1 %v8417_v18  ;;  %v8510_v17 = vld [vmem:[%s11245_s1 + $0x17cc] ss:$16 sps:$4 sm:$0xff]   ;;  %v8505_v18 = vld [vmem:[%s11245_s1 + $0x17c0] ss:$16 sps:$4 sm:$0xff]  }
 0x2c0   :  { %5396 = vmatprep.subr.bf16.mxu0 %v8423_v7  ;;  %5929 = vmatprep.subr.bf16.mxu1 %v8426_v20  ;;  %v8508_v7 = vld [vmem:[%s11245_s1 + $0x17c8] ss:$16 sps:$4 sm:$0xff]   ;;  %v8513_v20 = vld [vmem:[%s11245_s1 + $0x17e4] ss:$16 sps:$4 sm:$0xff]  }
 0x2c2   :  { %5388 = vmatmul.mubr.bf16.vlgmr.msra.gmra.mrb[0].mxu0 %v10879_v21  ;;  %5921 = vmatmul.mubr.bf16.vlgmr.msra.gmra.mrb[0].mxu1 %v10879_v21 }
 0x2c3   :  { %5397 = vmatpush1.bf16.msra.mxu0 %v8421_v22  ;;  %5930 = vmatpush1.bf16.msra.mxu1 %v8424_v23  ;;  %v8516_v22 = vld [vmem:[%s11245_s1 + $0x17ec] ss:$16 sps:$4 sm:$0xff]   ;;  %v8511_v23 = vld [vmem:[%s11245_s1 + $0x17e0] ss:$16 sps:$4 sm:$0xff]  }
 0x2c4   :  { %5398 = vmatprep.subr.bf16.mxu0 %v8429_v25  ;;  %5931 = vmatprep.subr.bf16.mxu1 %v8432_v10  ;;  %v8514_v25 = vld [vmem:[%s11245_s1 + $0x17e8] ss:$16 sps:$4 sm:$0xff]   ;;  %v8519_v10 = vld [vmem:[%s11245_s1 + $0x1804] ss:$16 sps:$4 sm:$0xff]  }
 0x2c5   :  { %5428 = vmatprep.mubr.bf16.mxu0 %v982_v13  ;;  %5961 = vmatprep.mubr.bf16.mxu1 %v982_v13  ;;  %v8522_v13 = vld [vmem:[%s11245_s1 + $0x180c] ss:$16 sps:$4 sm:$0xff]  }
 0x2c7   :  { %5399 = vmatpush1.bf16.msra.mxu0 %v8427_v27  ;;  %5932 = vmatpush1.bf16.msra.mxu1 %v8430_v29  ;;  %v980_v27 = vcombine.high %v10879_v21, %v10879_v21  ;;  %v8517_v29 = vld [vmem:[%s11245_s1 + $0x1800] ss:$16 sps:$4 sm:$0xff]   ;;  %v8528_v21 = vld [vmem:[%s11245_s1 + $0x182c] ss:$16 sps:$4 sm:$0xff]  }
 0x2c8   :  { %5400 = vmatprep.subr.bf16.mxu0 %v8435_v19  ;;  %5933 = vmatprep.subr.bf16.mxu1 %v8438_v30  ;;  %v8520_v19 = vld [vmem:[%s11245_s1 + $0x1808] ss:$16 sps:$4 sm:$0xff]   ;;  %v8525_v30 = vld [vmem:[%s11245_s1 + $0x1824] ss:$16 sps:$4 sm:$0xff]  }
 0x2cb   :  { %5401 = vmatpush1.bf16.msra.mxu0 %v8433_v31  ;;  %5934 = vmatpush1.bf16.msra.mxu1 %v8436_v15  ;;  %v8523_v31 = vld [vmem:[%s11245_s1 + $0x1820] ss:$16 sps:$4 sm:$0xff]   ;;  %v8526_v15 = vld [vmem:[%s11245_s1 + $0x1828] ss:$16 sps:$4 sm:$0xff]  }
 0x2cc   :  { %5402 = vmatprep.subr.bf16.mxu0 %v8441_v32  ;;  %5935 = vmatprep.subr.bf16.mxu1 %v8444_v33  ;;  %v8531_v32 = vld [vmem:[%s11245_s1 + $0x1844] ss:$16 sps:$4 sm:$0xff]   ;;  %v8534_v33 = vld [vmem:[%s11245_s1 + $0x184c] ss:$16 sps:$4 sm:$0xff]  }
 0x2cf   :  { %5403 = vmatpush1.bf16.msra.mxu0 %v8439_v26  ;;  %5936 = vmatpush1.bf16.msra.mxu1 %v8442_v34  ;;  %v8600_v26 = vmov 0   ;;  %v8529_v34 = vld [vmem:[%s11245_s1 + $0x1840] ss:$16 sps:$4 sm:$0xff]  }
 0x2d0   :  { %5404 = vmatprep.subr.bf16.mxu0 %v8447_v35  ;;  %5937 = vmatprep.subr.bf16.mxu1 %v8450_v37  ;;  %v8532_v35 = vld [vmem:[%s11245_s1 + $0x1848] ss:$16 sps:$4 sm:$0xff]   ;;  %v8537_v37 = vld [vmem:[%s11245_s1 + $0x1864] ss:$16 sps:$4 sm:$0xff]  }
 0x2d3   :  { %5405 = vmatpush1.bf16.msra.mxu0 %v8445_v28  ;;  %5938 = vmatpush1.bf16.msra.mxu1 %v8448_v39  ;;  %v8540_v28 = vld [vmem:[%s11245_s1 + $0x186c] ss:$16 sps:$4 sm:$0xff]   ;;  %v8535_v39 = vld [vmem:[%s11245_s1 + $0x1860] ss:$16 sps:$4 sm:$0xff]  }
 0x2d4   :  { %5406 = vmatprep.subr.bf16.mxu0 %v8453_v41  ;;  %5939 = vmatprep.subr.bf16.mxu1 %v8456_v43  ;;  %v8538_v41 = vld [vmem:[%s11245_s1 + $0x1868] ss:$16 sps:$4 sm:$0xff]  }
 0x2d5   :  { %v6393_v43 = vld.sshfl [vmem:[%s11244_s0 + $0x18] sm:$0x1 pattern:$0x75316420] }
 0x2d7   :  { %5407 = vmatpush1.bf16.msra.mxu0 %v8451_v44  ;;  %5940 = vmatpush1.bf16.msra.mxu1 %v8454_v45  ;;  %v8541_v44 = vld [vmem:[%s11247_s3 + $0x40] sm:$0xff]  }
 0x2d8   :  { %5408 = vmatprep.subr.bf16.mxu0 %v8459_v46  ;;  %5941 = vmatprep.subr.bf16.mxu1 %v8462_v47  ;;  %v8542_v45 = vld [vmem:[%s11247_s3 + $0xc0] sm:$0xff]   ;;  %v996_v46 = vrot.slane %v6393_v43, %v8769_v49  ;;  %v8546_v49 = vld [vmem:[%s11247_s3 + $0xc8] sm:$0xff]   ;;  %v8601_v43 = vmov 17  }
 0x2d9   :  { %v8543_v47 = vld [vmem:[%s11247_s3] sm:$0xff]   ;;  %7361 = vset.pattern.permute.xlu0 %v8601_v43 }
 0x2db   :  { %5409 = vmatpush1.bf16.msra.mxu0 %v8457_v38  ;;  %5942 = vmatpush1.bf16.msra.mxu1 %v8460_v48  ;;  %v8544_v38 = vld [vmem:[%s11247_s3 + $0x80] sm:$0xff]   ;;  %v8545_v48 = vld [vmem:[%s11247_s3 + $0x48] sm:$0xff]  }
 0x2dc   :  { %5410 = vmatprep.subr.bf16.mxu0 %v8465_v50  ;;  %5943 = vmatprep.subr.bf16.mxu1 %v8468_v51  ;;  %v8547_v50 = vld [vmem:[%s11247_s3 + $0x8] sm:$0xff]  }
 0x2dd   :  { %v8548_v51 = vld [vmem:[%s11247_s3 + $0x88] sm:$0xff]  }
 0x2df   :  { %5411 = vmatpush1.bf16.msra.mxu0 %v8463_v53  ;;  %5944 = vmatpush1.bf16.msra.mxu1 %v8466_v40  ;;  %v8549_v53 = vld [vmem:[%s11247_s3 + $0x50] sm:$0xff]  }
 0x2e0   :  { %5412 = vmatprep.subr.bf16.mxu0 %v8471_v56  ;;  %5945 = vmatprep.subr.bf16.mxu1 %v8474_v58  ;;  %v8550_v40 = vld [vmem:[%s11247_s3 + $0xd0] sm:$0xff]  }
 0x2e1   :  { %v8551_v56 = vld [vmem:[%s11247_s3 + $0x10] sm:$0xff]  }
 0x2e2   :  { %v8552_v58 = vld [vmem:[%s11247_s3 + $0x90] sm:$0xff]  }
 0x2e3   :  { %5413 = vmatpush1.bf16.msra.mxu0 %v8469_v59  ;;  %5946 = vmatpush1.bf16.msra.mxu1 %v8472_v24  ;;  %v8553_v59 = vld [vmem:[%s11247_s3 + $0x58] sm:$0xff]  }
 0x2e4   :  { %5414 = vmatprep.subr.bf16.mxu0 %v8477_v61  ;;  %5947 = vmatprep.subr.bf16.mxu1 %v8480_v62  ;;  %v8554_v24 = vld [vmem:[%s11247_s3 + $0xd8] sm:$0xff]  }
 0x2e5   :  { %v8555_v61 = vld [vmem:[%s11247_s3 + $0x18] sm:$0xff]  }
 0x2e6   :  { %v8556_v62 = vld [vmem:[%s11247_s3 + $0x98] sm:$0xff]  }
 0x2e7   :  { %5415 = vmatpush1.bf16.msra.mxu0 %v8475_v63  ;;  %5948 = vmatpush1.bf16.msra.mxu1 %v8478_v55  ;;  %v8557_v63 = vld [vmem:[%s11247_s3 + $0x60] sm:$0xff]  }
 0x2e8   :  { %5416 = vmatprep.subr.bf16.mxu0 %v8483_v0  ;;  %5949 = vmatprep.subr.bf16.mxu1 %v8486_v1  ;;  %v8558_v55 = vld [vmem:[%s11247_s3 + $0xe0] sm:$0xff]  }
 0x2e9   :  { %v8559_v0 = vld [vmem:[%s11247_s3 + $0x20] sm:$0xff]  }
 0x2ea   :  { %v8560_v1 = vld [vmem:[%s11247_s3 + $0xa0] sm:$0xff]  }
 0x2eb   :  { %5417 = vmatpush1.bf16.msra.mxu0 %v8481_v2  ;;  %5950 = vmatpush1.bf16.msra.mxu1 %v8484_v3  ;;  %v8561_v2 = vld [vmem:[%s11247_s3 + $0x68] sm:$0xff]  }
 0x2ec   :  { %5418 = vmatprep.subr.bf16.mxu0 %v8489_v57  ;;  %5951 = vmatprep.subr.bf16.mxu1 %v8492_v5  ;;  %v8562_v3 = vld [vmem:[%s11247_s3 + $0xe8] sm:$0xff]  }
 0x2ed   :  { %v8563_v57 = vld [vmem:[%s11247_s3 + $0x28] sm:$0xff]  }
 0x2ee   :  { %v8564_v5 = vld [vmem:[%s11247_s3 + $0xa8] sm:$0xff]  }
 0x2ef   :  { %5419 = vmatpush1.bf16.msra.mxu0 %v8487_v6  ;;  %5952 = vmatpush1.bf16.msra.mxu1 %v8490_v8  ;;  %v8565_v6 = vld [vmem:[%s11247_s3 + $0x70] sm:$0xff]  }
 0x2f0   :  { %5420 = vmatprep.subr.bf16.mxu0 %v8495_v9  ;;  %5953 = vmatprep.subr.bf16.mxu1 %v8498_v54  ;;  %v8566_v8 = vld [vmem:[%s11247_s3 + $0xf0] sm:$0xff]  }
 0x2f1   :  { %v8567_v9 = vld [vmem:[%s11247_s3 + $0x30] sm:$0xff]  }
 0x2f2   :  { %v8568_v54 = vld [vmem:[%s11247_s3 + $0xb0] sm:$0xff]  }
 0x2f3   :  { %5421 = vmatpush1.bf16.msra.mxu0 %v8493_v60  ;;  %5954 = vmatpush1.bf16.msra.mxu1 %v8496_v11  ;;  %v8569_v60 = vld [vmem:[%s11247_s3 + $0x78] sm:$0xff]  }
 0x2f4   :  { %5422 = vmatprep.subr.bf16.mxu0 %v8501_v12  ;;  %5955 = vmatprep.subr.bf16.mxu1 %v8504_v14  ;;  %v8570_v11 = vld [vmem:[%s11247_s3 + $0xf8] sm:$0xff]  }
 0x2f5   :  { %v8571_v12 = vld [vmem:[%s11247_s3 + $0x38] sm:$0xff]  }
 0x2f6   :  { %v8572_v14 = vld [vmem:[%s11247_s3 + $0xb8] sm:$0xff]  }
 0x2f7   :  { %5423 = vmatpush1.bf16.msra.mxu0 %v8499_v4  ;;  %5956 = vmatpush1.bf16.msra.mxu1 %v8502_v52  ;;  %v814_v4 = vsub.s32 0, %v8751_v42  ;;  %v822_v52 = vsub.s32 2, %v8751_v42 }
 0x2f8   :  { %5424 = vmatprep.subr.bf16.mxu0 %v8507_v16  ;;  %5957 = vmatprep.subr.bf16.mxu1 %v8510_v17  ;;  %v810_v16 = vld [vmem:[%s11246_s2] sm:$0xf]  ;;  %v818_v17 = vsub.s32 1, %v8751_v42 }
 0x2fb   :  { %5425 = vmatpush1.bf16.msra.mxu0 %v8505_v18  ;;  %5958 = vmatpush1.bf16.msra.mxu1 %v8508_v7  ;;  %v826_v18 = vsub.s32 3, %v8751_v42  ;;  %v815_v7 = vrot.slane %v810_v16, %v814_v4 }
 0x2fc   :  { %5426 = vmatprep.subr.bf16.mxu0 %v8513_v20  ;;  %5959 = vmatprep.subr.bf16.mxu1 %v8516_v22  ;;  %v823_v20 = vrot.slane %v810_v16, %v822_v52  ;;  %v819_v22 = vrot.slane %v810_v16, %v818_v17 }
 0x2ff   :  { %5427 = vmatpush1.bf16.msra.mxu0 %v8511_v23  ;;  %5960 = vmatpush1.bf16.msra.mxu1 %v8514_v25  ;;  %v827_v23 = vrot.slane %v810_v16, %v826_v18 }
 0x300   :  { %5437 = vmatprep.subr.bf16.mxu0 %v8519_v10  ;;  %5970 = vmatprep.subr.bf16.mxu1 %v8522_v13 }
 0x302   :  { %5429 = vmatmul.mubr.bf16.vlgmr.msra.gmra.mrb[0].mxu0 %v980_v27  ;;  %5962 = vmatmul.mubr.bf16.vlgmr.msra.gmra.mrb[0].mxu1 %v980_v27 }
 0x303   :  { %5438 = vmatpush1.bf16.msra.mxu0 %v8517_v29  ;;  %5971 = vmatpush1.bf16.msra.mxu1 %v8520_v19 }
 0x304   :  { %5439 = vmatprep.subr.bf16.mxu0 %v8525_v30  ;;  %5972 = vmatprep.subr.bf16.mxu1 %v8528_v21 }
 0x305   :  { %5469 = vmatprep.mubr.bf16.mxu0 %v8600_v26  ;;  %6002 = vmatprep.mubr.bf16.mxu1 %v8600_v26 }
 0x307   :  { %5440 = vmatpush1.bf16.msra.mxu0 %v8523_v31  ;;  %5973 = vmatpush1.bf16.msra.mxu1 %v8526_v15 }
 0x308   :  { %5441 = vmatprep.subr.bf16.mxu0 %v8531_v32  ;;  %5974 = vmatprep.subr.bf16.mxu1 %v8534_v33 }
 0x30b   :  { %5442 = vmatpush1.bf16.msra.mxu0 %v8529_v34  ;;  %5975 = vmatpush1.bf16.msra.mxu1 %v8532_v35 }
 0x30c   :  { %5443 = vmatprep.subr.bf16.mxu0 %v8537_v37  ;;  %5976 = vmatprep.subr.bf16.mxu1 %v8540_v28 }
 0x30f   :  { %5444 = vmatpush1.bf16.msra.mxu0 %v8535_v39  ;;  %5977 = vmatpush1.bf16.msra.mxu1 %v8538_v41 }
 0x310   :  { %7213 = vmatprep.subr.bf16.mxu0 %v8541_v44  ;;  %7235 = vmatprep.subr.bf16.mxu1 %v8542_v45 }
 0x312   :  { %7178 = vmatmul.mubr.msk.bf16.vlgmr.msra.gmra.mrb[0].mxu0 %vm4941_vm0, %v996_v46  ;;  %7179 = vmatmul.mubr.msk.bf16.vlgmr.msra.gmra.mrb[0].mxu1 %vm4941_vm0, %v996_v46  ;;  %v7180_v46 = vld [vmem:[%s11248_s4] ss:$0 sm:$0xff]  ;;  %s8602_s4 = smov [#allocation2]  }
 0x313   :  { %7214 = vmatpush3.bf16.msra.mxu0 %v8543_v47  ;;  %7236 = vmatpush3.bf16.msra.mxu1 %v8544_v38  ;;  %s6385_s6 = sshll.u32 %s8602_s4, 4  ;;  %s6386_s6 = int_to_ptr.vmem [resolvable:$true] %s6385_s6 }
 0x314   :  { %7215 = vmatprep.subr.bf16.mxu0 %v8545_v48  ;;  %7237 = vmatprep.subr.bf16.mxu1 %v8546_v49  ;;  %v6363_v48 = vand.u32 127, %v812_v36  ;;  %s8575_s7 = scalar_lea.vmem %s6386_s6, 32  ;;  %p8580_p1 = scmp.lt.s32.totalorder %s6386_s6, %s6386_s6 }
 0x315   :  { %p8576_p0 = scmp.ne.s32.totalorder %s6386_s6, %s8575_s7  ;;  %p8581_p2 = scmp.lt.s32.totalorder %s8575_s7, %s8575_s7 }
 0x316   :  { %vm6364_vm1 = vcmp.lt.s32.totalorder %v6363_v48, 17 }
 0x317   :  { %7216 = vmatpush3.bf16.msra.mxu0 %v8547_v50  ;;  %7238 = vmatpush3.bf16.msra.mxu1 %v8548_v51  ;;  %p8582_p3 = por %p8581_p2, %p8580_p1 }
 0x318   :  { %7217 = vmatprep.subr.bf16.mxu0 %v8549_v53  ;;  %7239 = vmatprep.subr.bf16.mxu1 %v8550_v40 }
 0x319   :  { %p8583_p4 = pnand %p8582_p3, %p8576_p0 }
 0x31b   :  { %7218 = vmatpush3.bf16.msra.mxu0 %v8551_v56  ;;  %7240 = vmatpush3.bf16.msra.mxu1 %v8552_v58 }
 0x31c   :  { %7219 = vmatprep.subr.bf16.mxu0 %v8553_v59  ;;  %7241 = vmatprep.subr.bf16.mxu1 %v8554_v24 }
 0x31f   :  { %7220 = vmatpush3.bf16.msra.mxu0 %v8555_v61  ;;  %7242 = vmatpush3.bf16.msra.mxu1 %v8556_v62 }
 0x320   :  { %7221 = vmatprep.subr.bf16.mxu0 %v8557_v63  ;;  %7243 = vmatprep.subr.bf16.mxu1 %v8558_v55 }
 0x323   :  { %7222 = vmatpush3.bf16.msra.mxu0 %v8559_v0  ;;  %7244 = vmatpush3.bf16.msra.mxu1 %v8560_v1 }
 0x324   :  { %7223 = vmatprep.subr.bf16.mxu0 %v8561_v2  ;;  %7245 = vmatprep.subr.bf16.mxu1 %v8562_v3 }
 0x327   :  { %7224 = vmatpush3.bf16.msra.mxu0 %v8563_v57  ;;  %7246 = vmatpush3.bf16.msra.mxu1 %v8564_v5 }
 0x328   :  { %7225 = vmatprep.subr.bf16.mxu0 %v8565_v6  ;;  %7247 = vmatprep.subr.bf16.mxu1 %v8566_v8 }
 0x32b   :  { %7226 = vmatpush3.bf16.msra.mxu0 %v8567_v9  ;;  %7248 = vmatpush3.bf16.msra.mxu1 %v8568_v54 }
 0x32c   :  { %7227 = vmatprep.subr.bf16.mxu0 %v8569_v60  ;;  %7249 = vmatprep.subr.bf16.mxu1 %v8570_v11 }
 0x32f   :  { %7228 = vmatpush3.bf16.msra.mxu0 %v8571_v12  ;;  %7250 = vmatpush3.bf16.msra.mxu1 %v8572_v14 }
 0x3e5   :  { %v5471_v25 = vpop.f32.mrb[0].mxu0  ;;  %v6004_v10 = vpop.f32.mrb[0].mxu1 }
 0x3e6   :  { %v7257_v13 = vadd.f32 %v5471_v25, %v815_v7  ;;  %v7259_v27 = vadd.f32 %v6004_v10, %v823_v20  ;;  %v5473_v29 = vpop.f32.mrb[1].mxu0  ;;  %v6006_v19 = vpop.f32.mrb[1].mxu1 }
 0x3e7   :  { %v7258_v30 = vadd.f32 %v5473_v29, %v819_v22  ;;  %v7260_v21 = vadd.f32 %v6006_v19, %v827_v23  ;;  %v5475_v31 = vpop.f32.mrb[2].mxu0  ;;  %v6008_v15 = vpop.f32.mrb[2].mxu1 }
 0x3e8   :  { %v6011_v32 = vmax.f32 %v7257_v13, 0.0  ;;  %v6013_v33 = vmax.f32 %v7259_v27, 0.0  ;;  %v5476_v26 = vpop.f32.mrb[3].mxu0  ;;  %v6009_v34 = vpop.f32.mrb[3].mxu1 }
 0x3e9   :  { %v6012_v35 = vmax.f32 %v7258_v30, 0.0  ;;  %v6014_v42 = vmax.f32 %v7260_v21, 0.0 }
 0x3ea   :  { %v6015_v39 = vpack.c.bf16 %v6011_v32, %v6011_v32  ;;  %v6017_v41 = vpack.c.bf16 %v6013_v33, %v6013_v33 }
 0x3eb   :  { %v6016_v37 = vpack.c.bf16 %v6012_v35, %v6012_v35  ;;  %v6018_v28 = vpack.c.bf16 %v6014_v42, %v6014_v42 }
 0x3ed   :  { %6314 = vmatprep.mubr.bf16.mxu0 %v6016_v37  ;;  %6354 = vmatprep.mubr.bf16.mxu1 %v6018_v28 }
 0x3ee   :  { %6315 = vmatmul.mubr.bf16.vlgmr.msra.gmra.mrb[4].mxu0 %v6015_v39  ;;  %6355 = vmatmul.mubr.bf16.vlgmr.msra.gmra.mrb[4].mxu1 %v6017_v41 }
 0x4c1   :  { %v7229_v44 = vpop.f32.mrb[4].mxu0  ;;  %v7251_v45 = vpop.f32.mrb[4].mxu1 }
 0x4c2   :  { %v7230_v47 = vpop.f32.mrb[5].mxu0  ;;  %v7252_v38 = vpop.f32.mrb[5].mxu1 }
 0x4c3   :  { %v7231_v49 = vadd.f32 %v7230_v47, %v7229_v44  ;;  %v7253_v50 = vadd.f32 %v7252_v38, %v7251_v45  ;;  %v7232_v51 = vpop.f32.mrb[6].mxu0  ;;  %v7254_v53 = vpop.f32.mrb[6].mxu1 }
 0x4c4   :  { %v7233_v40 = vpop.f32.mrb[7].mxu0  ;;  %v7255_v56 = vpop.f32.mrb[7].mxu1 }
 0x4c5   :  { %v6317_v58 = vadd.f32 %v7231_v49, %v7180_v46 }
 0x4c7   :  { %v6357_v59 = vadd.f32 %v7253_v50, %v6317_v58 }
 0x4c9   :  { %v6365_v24 = vsel %vm6364_vm1, %v6357_v59, 0.0 }
 0x4ca   :  { %v6367_v61 = vsel %vm6366_vm2, %v6365_v24, 0.0 }
 0x4cb   :  { %6368 = vadd.xlane.f32.xlu0 %v6367_v61 }
 0x4e1   :  { %6372 = vperm.xlu0 %7361, %v6357_v59  }
 0x558   :  { %v6369_v62 = vpop.xlane.xlu0 %6368 }
 0x559   :  { %v6376_v55 = vmul.f32 0.05882353, %v6369_v62 }
 0x560   :  { %v6373_v63 = vpop.permute.xlu0 %6372 }
 0x561   :  { %v6375_v36 = vadd.f32 %v6373_v63, %v6357_v59 }
 0x563   :  { %v6377_v0 = vsub.f32 %v6375_v36, %v6376_v55 }
 0x565   :  { %6378 = vst [vmem:[#allocation2] sm:$0x3] %v6377_v0 }
 0x566   :  { %8586 = shalt.err (!%p8583_p4)
}
 0x567   :  { %s8587_s10 = scalar_lea.hbm %s11249_s5, 32 }
 0x568   :  { %p8588_p5 = scmp.ne.s32.totalorder %s11249_s5, %s8587_s10  ;;  %p8591_p6 = scmp.lt.u32.totalorder %s8587_s10, %s11249_s5 }
 0x56a   :  { %p8593_p7 = pnand %p8591_p6, %p8588_p5 }
 0x56c   :  { %8596 = shalt.err (!%p8593_p7)
}
 0x56d   :  { %6388 = dma.vmem_to_hbm [thread:$0]  %s6386_s6, 32, %s11249_s5, [#allocation3]  }
 0x56e   :  { %8597 = dma.done.wait [#allocation3], 32  }
 0x56f   :  { %8598 = vsyncadd [#allocation3], 4294967264 }
 0x570   :  { %6392 = vsyncpa [#allocation3], 1 }

</bundles_post_ra>
